<compile_context>
chip_gen: v7x
topology: tpu7x:2x2x1
jax: 0.10.0
libtpu: 0.0.40
codegen_flags: <defaults>
</compile_context>

<pallas_src>
import jax
import jax.numpy as jnp
import numpy as np
from jax.experimental import pallas as pl
from jax.experimental.pallas import tpu as pltpu

W = 64
LD = 36
N_FEATURES = 2 * 16          # 32
NUM_HIDCOLORDIM = 15
DIR_DIM = LD + 3             # 39
OUT_DIM = 4                  # color(3) + dense(1)


def _nerf_kernel(emb_ref, dir_ref,
                 w_in_ref, b_in_ref,
                 w_m0_ref, b_m0_ref,
                 w_clx_ref, w_cld_ref, b_ci_ref,
                 w_m1a_ref, b_m1a_ref,
                 w_m1b_ref, b_m1b_ref,
                 w_out_ref, b_out_ref,
                 out_ref):
    relu = lambda v: jnp.maximum(v, 0.0)
    cd = w_in_ref.dtype            # matmul input dtype (bf16 default, f32 optional)

    def mm(x, w_ref):
        return jnp.dot(x, w_ref[...], preferred_element_type=jnp.float32)

    emb = emb_ref[...].astype(cd)                                   # (TM, 32)
    dirv = dir_ref[...].astype(cd)                                  # (TM, 39)

    # x0 = relu(MLPinput(emb)); x0 = MLPmid0(x0)
    x0 = relu(mm(emb, w_in_ref) + b_in_ref[...]).astype(cd)         # (TM, 64)
    x0 = relu(mm(x0, w_m0_ref) + b_m0_ref[...]).astype(cd)          # (TM, 64)

    # h = relu(colorlayerin(concat([Denseout(x0)[:,1:], enc_dir])))
    #   = relu(x0 @ (w_do[:,1:] @ w_cl_h) + dir @ w_cl_dir + fused bias)
    h = relu(mm(x0, w_clx_ref) + mm(dirv, w_cld_ref) + b_ci_ref[...]).astype(cd)
    # h = MLPmid1(h)
    h = relu(mm(h, w_m1a_ref) + b_m1a_ref[...]).astype(cd)
    h = relu(mm(h, w_m1b_ref) + b_m1b_ref[...]).astype(cd)

    # Fused output head: out[:, :3] = colorout(h), out[:, 3] = Denseout(x0)[:, 0]
    # via one (TM,128) @ (128,4) matmul over the lane-concat [h | x0].
    cat = jnp.concatenate([h, x0], axis=-1)                         # (TM, 128)
    out_ref[...] = (mm(cat, w_out_ref) + b_out_ref[...]).astype(out_ref.dtype)


def _prepare_fused_params(p, compute_dtype):
    """Build the fused weights consumed by the kernel (fusions done in f32)."""
    f32 = jnp.float32
    w_do_dense = p["w_do"][:, :1]            # (64, 1)  Denseout density column
    b_do_dense = p["b_do"][:, :1]            # (1, 1)
    w_do_h = p["w_do"][:, 1:]                # (64, 15)
    b_do_h = p["b_do"][:, 1:]                # (1, 15)
    w_clh = p["w_cl"][:NUM_HIDCOLORDIM, :]   # (15, 64)  colorlayerin (hidden part)
    w_cld = p["w_cl"][NUM_HIDCOLORDIM:, :]   # (39, 64)  colorlayerin (dir part)

    # Denseout hidden part folded into colorlayerin (exact linear algebra).
    w_clx = w_do_h @ w_clh                   # (64, 64)
    b_ci = p["b_cl"] + b_do_h @ w_clh        # (1, 64)

    # Fused output head over concat([h, x0]) -> 128 input lanes, 4 output lanes.
    w_out = jnp.zeros((2 * W, OUT_DIM), f32)
    w_out = w_out.at[:W, :3].set(p["w_co"])
    w_out = w_out.at[W:, 3:4].set(w_do_dense)
    b_out = (jnp.zeros((1, OUT_DIM), f32)
             .at[:, :3].set(p["b_co"])
             .at[:, 3:4].set(b_do_dense))

    cd = compute_dtype
    return [
        p["w_in"].astype(cd), p["b_in"],
        p["w_m0"].astype(cd), p["b_m0"],
        w_clx.astype(cd), w_cld.astype(cd), b_ci,
        p["w_m1a"].astype(cd), p["b_m1a"],
        p["w_m1b"].astype(cd), p["b_m1b"],
        w_out.astype(cd), b_out,
    ]


def _round_up(x, m):
    return ((x + m - 1) // m) * m


def _chip_tiling():
    """(default tile_m, vmem_limit_bytes, prefer_even_grid) per TPU generation."""
    mib = 1024 * 1024
    try:
        vmem_cap = int(pltpu.get_tpu_info().vmem_capacity_bytes)
    except Exception:
        vmem_cap = 64 * mib           # conservative fallback
    if vmem_cap >= 100 * mib:         # v5e / v6e class: 128 MiB VMEM, 1 TC
        return 8192, min(96 * mib, int(0.75 * vmem_cap)), False
    # v7x class: 64 MiB VMEM per TensorCore, 2 TCs share parallel grid axes.
    return 2048, min(40 * mib, int(0.625 * vmem_cap)), True


def nerf_tiny_forward(emb_points, enc_dir, params, *, tile_m=None,
                      vmem_limit_bytes=None, compute_dtype=jnp.bfloat16,
                      out_dtype=jnp.float32):
    n = emb_points.shape[0]
    if n == 0:
        return jnp.zeros((0, OUT_DIM), out_dtype)

    d_tile, d_vmem, prefer_even = _chip_tiling()
    if tile_m is None:
        tile_m = d_tile
    if vmem_limit_bytes is None:
        vmem_limit_bytes = d_vmem

    # Row tile: multiple of 256, capped by (rounded-up) N.  No explicit padding;
    # Pallas handles the ragged last block (rows are independent, OOB rows are
    # read as garbage but never written back).
    tile = max(256, min(_round_up(tile_m, 256), _round_up(n, 256)))
    if prefer_even and pl.cdiv(n, tile) == 1 and n > 512:
        # v7x: split into (at least) 2 parallel steps so both TCs get work.
        tile = max(256, _round_up(pl.cdiv(n, 2), 256))
    grid = pl.cdiv(n, tile)

    param_list = _prepare_fused_params(params, compute_dtype)

    row_spec = lambda feat: pl.BlockSpec((tile, feat), lambda i: (i, 0))
    full_spec = lambda arr: pl.BlockSpec(arr.shape, lambda i: (0, 0))
    in_specs = ([row_spec(N_FEATURES), row_spec(DIR_DIM)]
                + [full_spec(p) for p in param_list])

    # Advisory cost estimate.
    flops_per_row = 2 * (N_FEATURES * W + W * W + W * W + DIR_DIM * W
                         + W * W + W * W + 2 * W * OUT_DIM)
    param_bytes = sum(int(p.size) * p.dtype.itemsize for p in param_list)
    row_bytes = (N_FEATURES * emb_points.dtype.itemsize
                 + DIR_DIM * enc_dir.dtype.itemsize
                 + OUT_DIM * np.dtype(out_dtype).itemsize)
    cost = pl.CostEstimate(flops=int(n) * flops_per_row, transcendentals=0,
                           bytes_accessed=int(n) * row_bytes + param_bytes)

    out = pl.pallas_call(
        _nerf_kernel,
        out_shape=jax.ShapeDtypeStruct((n, OUT_DIM), out_dtype),
        grid_spec=pltpu.PrefetchScalarGridSpec(
            num_scalar_prefetch=0,
            grid=(grid,),
            in_specs=in_specs,
            out_specs=row_spec(OUT_DIM),
        ),
        compiler_params=pltpu.CompilerParams(
            dimension_semantics=("parallel",),
            vmem_limit_bytes=int(vmem_limit_bytes),
        ),
        cost_estimate=cost,
    )(emb_points, enc_dir, *param_list)

    return out


def init_params(key):
    """Deterministic synthetic parameters in natural layout, weights as (in, out)."""
    ks = jax.random.split(key, 7)

    def lin(k, fan_in, fan_out):
        kw, kb = jax.random.split(k)
        bound = 1.0 / jnp.sqrt(fan_in)
        w = jax.random.uniform(kw, (fan_in, fan_out), jnp.float32, -bound, bound)
        b = jax.random.uniform(kb, (1, fan_out), jnp.float32, -bound, bound)
        return w, b

    w_in, b_in = lin(ks[0], N_FEATURES, W)
    w_m0, b_m0 = lin(ks[1], W, W)
    w_do, b_do = lin(ks[2], W, 1 + NUM_HIDCOLORDIM)
    w_cl, b_cl = lin(ks[3], NUM_HIDCOLORDIM + DIR_DIM, W)   # (54, 64)
    w_m1a, b_m1a = lin(ks[4], W, W)
    w_m1b, b_m1b = lin(ks[5], W, W)
    w_co, b_co = lin(ks[6], W, 3)

    return {
        "w_in": w_in, "b_in": b_in,
        "w_m0": w_m0, "b_m0": b_m0,
        "w_do": w_do, "b_do": b_do,
        "w_cl": w_cl, "b_cl": b_cl,
        "w_m1a": w_m1a, "b_m1a": b_m1a,
        "w_m1b": w_m1b, "b_m1b": b_m1b,
        "w_co": w_co, "b_co": b_co,
    }


def reference_forward(emb_points, enc_dir, p):
    """Pure-JAX f32 reference matching the PyTorch module exactly."""
    relu = lambda v: jnp.maximum(v, 0.0)
    x0 = relu(emb_points @ p["w_in"] + p["b_in"])
    x0 = relu(x0 @ p["w_m0"] + p["b_m0"])
    x0 = x0 @ p["w_do"] + p["b_do"]
    dense = x0[..., :1]
    h = x0[..., 1:]
    h = relu(jnp.concatenate([h, enc_dir], -1) @ p["w_cl"] + p["b_cl"])
    h = relu(h @ p["w_m1a"] + p["b_m1a"])
    h = relu(h @ p["w_m1b"] + p["b_m1b"])
    color = h @ p["w_co"] + p["b_co"]
    return jnp.concatenate([color, dense], axis=-1)


if __name__ == "__main__":
    key = jax.random.PRNGKey(0)
    kp, ke, kd = jax.random.split(key, 3)

    # N not a multiple of any tile -> exercises the ragged (un-padded) last block.
    N = 3000
    params = init_params(kp)
    emb_points = jax.random.normal(ke, (N, N_FEATURES), jnp.float32)
    enc_dir = jax.random.normal(kd, (N, DIR_DIM), jnp.float32)

    ref = reference_forward(emb_points, enc_dir, params)

    # 1) f32 path with a small tile: multi-step grid + ragged tail block (tight check).
    out_f32 = nerf_tiny_forward(emb_points, enc_dir, params,
                                tile_m=1024, compute_dtype=jnp.float32)
    out_f32 = jax.block_until_ready(out_f32)
    assert out_f32.shape == (N, OUT_DIM)
    assert jnp.allclose(out_f32, ref, atol=1e-3, rtol=1e-3), "f32 mismatch vs reference"

    # 2) Default path: bf16 row inputs (cast where produced), bf16 matmul inputs
    #    with f32 accumulation, per-chip default tiling, single ragged block.
    out_bf16 = nerf_tiny_forward(emb_points.astype(jnp.bfloat16),
                                 enc_dir.astype(jnp.bfloat16), params)
    out_bf16 = jax.block_until_ready(out_bf16)
    assert out_bf16.shape == (N, OUT_DIM)
    assert float(jnp.max(jnp.abs(out_bf16 - ref))) < 0.25, "bf16 mismatch too large"

    print("KERNEL_OK")
</pallas_src>

<mosaic_0001>
module attributes {stable_mosaic.version = 11 : i64} {
  func.func @_nerf_kernel(%arg0: i32, %arg1: memref<1024x32xf32, #tpu.memory_space<vmem>>, %arg2: memref<1024x39xf32, #tpu.memory_space<vmem>>, %arg3: memref<32x64xf32, #tpu.memory_space<vmem>>, %arg4: memref<1x64xf32, #tpu.memory_space<vmem>>, %arg5: memref<64x64xf32, #tpu.memory_space<vmem>>, %arg6: memref<1x64xf32, #tpu.memory_space<vmem>>, %arg7: memref<64x64xf32, #tpu.memory_space<vmem>>, %arg8: memref<39x64xf32, #tpu.memory_space<vmem>>, %arg9: memref<1x64xf32, #tpu.memory_space<vmem>>, %arg10: memref<64x64xf32, #tpu.memory_space<vmem>>, %arg11: memref<1x64xf32, #tpu.memory_space<vmem>>, %arg12: memref<64x64xf32, #tpu.memory_space<vmem>>, %arg13: memref<1x64xf32, #tpu.memory_space<vmem>>, %arg14: memref<128x4xf32, #tpu.memory_space<vmem>>, %arg15: memref<1x4xf32, #tpu.memory_space<vmem>>, %arg16: memref<1024x4xf32, #tpu.memory_space<vmem>>) attributes {dimension_semantics = [#tpu.dimension_semantics<parallel>], iteration_bounds = array<i64: 3>, scalar_prefetch = 0 : i64, scratch_operands = 0 : i64, tpu.core_type = #tpu.core_type<tc>, window_params = [{transform_indices = @transform_0, window_bounds = array<i64: 1024, 32>}, {transform_indices = @transform_1, window_bounds = array<i64: 1024, 39>}, {pipeline_mode = #tpu.pipeline_mode<synchronous>, transform_indices = @transform_2, window_bounds = array<i64: 32, 64>}, {pipeline_mode = #tpu.pipeline_mode<synchronous>, transform_indices = @transform_3, window_bounds = array<i64: 1, 64>}, {pipeline_mode = #tpu.pipeline_mode<synchronous>, transform_indices = @transform_4, window_bounds = array<i64: 64, 64>}, {pipeline_mode = #tpu.pipeline_mode<synchronous>, transform_indices = @transform_5, window_bounds = array<i64: 1, 64>}, {pipeline_mode = #tpu.pipeline_mode<synchronous>, transform_indices = @transform_6, window_bounds = array<i64: 64, 64>}, {pipeline_mode = #tpu.pipeline_mode<synchronous>, transform_indices = @transform_7, window_bounds = array<i64: 39, 64>}, {pipeline_mode = #tpu.pipeline_mode<synchronous>, transform_indices = @transform_8, window_bounds = array<i64: 1, 64>}, {pipeline_mode = #tpu.pipeline_mode<synchronous>, transform_indices = @transform_9, window_bounds = array<i64: 64, 64>}, {pipeline_mode = #tpu.pipeline_mode<synchronous>, transform_indices = @transform_10, window_bounds = array<i64: 1, 64>}, {pipeline_mode = #tpu.pipeline_mode<synchronous>, transform_indices = @transform_11, window_bounds = array<i64: 64, 64>}, {pipeline_mode = #tpu.pipeline_mode<synchronous>, transform_indices = @transform_12, window_bounds = array<i64: 1, 64>}, {pipeline_mode = #tpu.pipeline_mode<synchronous>, transform_indices = @transform_13, window_bounds = array<i64: 128, 4>}, {pipeline_mode = #tpu.pipeline_mode<synchronous>, transform_indices = @transform_14, window_bounds = array<i64: 1, 4>}, {transform_indices = @transform_15, window_bounds = array<i64: 1024, 4>}]} {
    %c0 = arith.constant 0 : index
    %c0_0 = arith.constant 0 : index
    %0 = vector.load %arg1[%c0, %c0_0] : memref<1024x32xf32, #tpu.memory_space<vmem>>, vector<1024x32xf32>
    %c0_1 = arith.constant 0 : index
    %c0_2 = arith.constant 0 : index
    %1 = vector.load %arg2[%c0_1, %c0_2] : memref<1024x39xf32, #tpu.memory_space<vmem>>, vector<1024x39xf32>
    %c0_3 = arith.constant 0 : index
    %c0_4 = arith.constant 0 : index
    %2 = vector.load %arg3[%c0_3, %c0_4] : memref<32x64xf32, #tpu.memory_space<vmem>>, vector<32x64xf32>
    %cst = arith.constant dense<0.000000e+00> : vector<1024x64xf32>
    %3 = tpu.matmul %0, %2, %cst {dimension_numbers = #tpu.dot_dimension_numbers<[1], [0], [0], [1], [0, 0, 1, 1], [], []>} : vector<1024x32xf32>, vector<32x64xf32>, vector<1024x64xf32> -> vector<1024x64xf32>
    %c0_5 = arith.constant 0 : index
    %c0_6 = arith.constant 0 : index
    %4 = vector.load %arg4[%c0_5, %c0_6] : memref<1x64xf32, #tpu.memory_space<vmem>>, vector<1x64xf32>
    %5 = vector.broadcast %4 : vector<1x64xf32> to vector<1024x64xf32>
    %6 = arith.addf %3, %5 : vector<1024x64xf32>
    %cst_7 = arith.constant 0.000000e+00 : f32
    %7 = vector.broadcast %cst_7 : f32 to vector<1024x64xf32>
    %8 = arith.maximumf %6, %7 : vector<1024x64xf32>
    %c0_8 = arith.constant 0 : index
    %c0_9 = arith.constant 0 : index
    %9 = vector.load %arg5[%c0_8, %c0_9] : memref<64x64xf32, #tpu.memory_space<vmem>>, vector<64x64xf32>
    %cst_10 = arith.constant dense<0.000000e+00> : vector<1024x64xf32>
    %10 = tpu.matmul %8, %9, %cst_10 {dimension_numbers = #tpu.dot_dimension_numbers<[1], [0], [0], [1], [0, 0, 1, 1], [], []>} : vector<1024x64xf32>, vector<64x64xf32>, vector<1024x64xf32> -> vector<1024x64xf32>
    %c0_11 = arith.constant 0 : index
    %c0_12 = arith.constant 0 : index
    %11 = vector.load %arg6[%c0_11, %c0_12] : memref<1x64xf32, #tpu.memory_space<vmem>>, vector<1x64xf32>
    %12 = vector.broadcast %11 : vector<1x64xf32> to vector<1024x64xf32>
    %13 = arith.addf %10, %12 : vector<1024x64xf32>
    %cst_13 = arith.constant 0.000000e+00 : f32
    %14 = vector.broadcast %cst_13 : f32 to vector<1024x64xf32>
    %15 = arith.maximumf %13, %14 : vector<1024x64xf32>
    %c0_14 = arith.constant 0 : index
    %c0_15 = arith.constant 0 : index
    %16 = vector.load %arg7[%c0_14, %c0_15] : memref<64x64xf32, #tpu.memory_space<vmem>>, vector<64x64xf32>
    %cst_16 = arith.constant dense<0.000000e+00> : vector<1024x64xf32>
    %17 = tpu.matmul %15, %16, %cst_16 {dimension_numbers = #tpu.dot_dimension_numbers<[1], [0], [0], [1], [0, 0, 1, 1], [], []>} : vector<1024x64xf32>, vector<64x64xf32>, vector<1024x64xf32> -> vector<1024x64xf32>
    %c0_17 = arith.constant 0 : index
    %c0_18 = arith.constant 0 : index
    %18 = vector.load %arg8[%c0_17, %c0_18] : memref<39x64xf32, #tpu.memory_space<vmem>>, vector<39x64xf32>
    %cst_19 = arith.constant dense<0.000000e+00> : vector<1024x64xf32>
    %19 = tpu.matmul %1, %18, %cst_19 {dimension_numbers = #tpu.dot_dimension_numbers<[1], [0], [0], [1], [0, 0, 1, 1], [], []>} : vector<1024x39xf32>, vector<39x64xf32>, vector<1024x64xf32> -> vector<1024x64xf32>
    %20 = arith.addf %17, %19 : vector<1024x64xf32>
    %c0_20 = arith.constant 0 : index
    %c0_21 = arith.constant 0 : index
    %21 = vector.load %arg9[%c0_20, %c0_21] : memref<1x64xf32, #tpu.memory_space<vmem>>, vector<1x64xf32>
    %22 = vector.broadcast %21 : vector<1x64xf32> to vector<1024x64xf32>
    %23 = arith.addf %20, %22 : vector<1024x64xf32>
    %cst_22 = arith.constant 0.000000e+00 : f32
    %24 = vector.broadcast %cst_22 : f32 to vector<1024x64xf32>
    %25 = arith.maximumf %23, %24 : vector<1024x64xf32>
    %c0_23 = arith.constant 0 : index
    %c0_24 = arith.constant 0 : index
    %26 = vector.load %arg10[%c0_23, %c0_24] : memref<64x64xf32, #tpu.memory_space<vmem>>, vector<64x64xf32>
    %cst_25 = arith.constant dense<0.000000e+00> : vector<1024x64xf32>
    %27 = tpu.matmul %25, %26, %cst_25 {dimension_numbers = #tpu.dot_dimension_numbers<[1], [0], [0], [1], [0, 0, 1, 1], [], []>} : vector<1024x64xf32>, vector<64x64xf32>, vector<1024x64xf32> -> vector<1024x64xf32>
    %c0_26 = arith.constant 0 : index
    %c0_27 = arith.constant 0 : index
    %28 = vector.load %arg11[%c0_26, %c0_27] : memref<1x64xf32, #tpu.memory_space<vmem>>, vector<1x64xf32>
    %29 = vector.broadcast %28 : vector<1x64xf32> to vector<1024x64xf32>
    %30 = arith.addf %27, %29 : vector<1024x64xf32>
    %cst_28 = arith.constant 0.000000e+00 : f32
    %31 = vector.broadcast %cst_28 : f32 to vector<1024x64xf32>
    %32 = arith.maximumf %30, %31 : vector<1024x64xf32>
    %c0_29 = arith.constant 0 : index
    %c0_30 = arith.constant 0 : index
    %33 = vector.load %arg12[%c0_29, %c0_30] : memref<64x64xf32, #tpu.memory_space<vmem>>, vector<64x64xf32>
    %cst_31 = arith.constant dense<0.000000e+00> : vector<1024x64xf32>
    %34 = tpu.matmul %32, %33, %cst_31 {dimension_numbers = #tpu.dot_dimension_numbers<[1], [0], [0], [1], [0, 0, 1, 1], [], []>} : vector<1024x64xf32>, vector<64x64xf32>, vector<1024x64xf32> -> vector<1024x64xf32>
    %c0_32 = arith.constant 0 : index
    %c0_33 = arith.constant 0 : index
    %35 = vector.load %arg13[%c0_32, %c0_33] : memref<1x64xf32, #tpu.memory_space<vmem>>, vector<1x64xf32>
    %36 = vector.broadcast %35 : vector<1x64xf32> to vector<1024x64xf32>
    %37 = arith.addf %34, %36 : vector<1024x64xf32>
    %cst_34 = arith.constant 0.000000e+00 : f32
    %38 = vector.broadcast %cst_34 : f32 to vector<1024x64xf32>
    %39 = arith.maximumf %37, %38 : vector<1024x64xf32>
    %40 = tpu.concatenate %39, %15 in 1 : vector<1024x64xf32>, vector<1024x64xf32> -> vector<1024x128xf32>
    %c0_35 = arith.constant 0 : index
    %c0_36 = arith.constant 0 : index
    %41 = vector.load %arg14[%c0_35, %c0_36] : memref<128x4xf32, #tpu.memory_space<vmem>>, vector<128x4xf32>
    %cst_37 = arith.constant dense<0.000000e+00> : vector<1024x4xf32>
    %42 = tpu.matmul %40, %41, %cst_37 {dimension_numbers = #tpu.dot_dimension_numbers<[1], [0], [0], [1], [0, 0, 1, 1], [], []>} : vector<1024x128xf32>, vector<128x4xf32>, vector<1024x4xf32> -> vector<1024x4xf32>
    %c0_38 = arith.constant 0 : index
    %c0_39 = arith.constant 0 : index
    %43 = vector.load %arg15[%c0_38, %c0_39] : memref<1x4xf32, #tpu.memory_space<vmem>>, vector<1x4xf32>
    %44 = vector.broadcast %43 : vector<1x4xf32> to vector<1024x4xf32>
    %45 = arith.addf %42, %44 : vector<1024x4xf32>
    %c0_40 = arith.constant 0 : index
    %c0_41 = arith.constant 0 : index
    %46 = vector.load %arg16[%c0_40, %c0_41] : memref<1024x4xf32, #tpu.memory_space<vmem>>, vector<1024x4xf32>
    tpu.vector_store %arg16[%c0_40, %c0_41], %45 {strides = array<i32>} : memref<1024x4xf32, #tpu.memory_space<vmem>>, vector<1024x4xf32>,
    return
  }
  func.func @transform_0(%arg0: i32) -> (i32, i32) {
    %c0_i32 = arith.constant 0 : i32
    %c0_i32_0 = arith.constant 0 : i32
    return %arg0, %c0_i32 : i32, i32
  }
  func.func @transform_1(%arg0: i32) -> (i32, i32) {
    %c0_i32 = arith.constant 0 : i32
    %c0_i32_0 = arith.constant 0 : i32
    return %arg0, %c0_i32 : i32, i32
  }
  func.func @transform_2(%arg0: i32) -> (i32, i32) {
    %c0_i32 = arith.constant 0 : i32
    %c0_i32_0 = arith.constant 0 : i32
    %c0_i32_1 = arith.constant 0 : i32
    return %c0_i32, %c0_i32_0 : i32, i32
  }
  func.func @transform_3(%arg0: i32) -> (i32, i32) {
    %c0_i32 = arith.constant 0 : i32
    %c0_i32_0 = arith.constant 0 : i32
    %c0_i32_1 = arith.constant 0 : i32
    return %c0_i32, %c0_i32_0 : i32, i32
  }
  func.func @transform_4(%arg0: i32) -> (i32, i32) {
    %c0_i32 = arith.constant 0 : i32
    %c0_i32_0 = arith.constant 0 : i32
    %c0_i32_1 = arith.constant 0 : i32
    return %c0_i32, %c0_i32_0 : i32, i32
  }
  func.func @transform_5(%arg0: i32) -> (i32, i32) {
    %c0_i32 = arith.constant 0 : i32
    %c0_i32_0 = arith.constant 0 : i32
    %c0_i32_1 = arith.constant 0 : i32
    return %c0_i32, %c0_i32_0 : i32, i32
  }
  func.func @transform_6(%arg0: i32) -> (i32, i32) {
    %c0_i32 = arith.constant 0 : i32
    %c0_i32_0 = arith.constant 0 : i32
    %c0_i32_1 = arith.constant 0 : i32
    return %c0_i32, %c0_i32_0 : i32, i32
  }
  func.func @transform_7(%arg0: i32) -> (i32, i32) {
    %c0_i32 = arith.constant 0 : i32
    %c0_i32_0 = arith.constant 0 : i32
    %c0_i32_1 = arith.constant 0 : i32
    return %c0_i32, %c0_i32_0 : i32, i32
  }
  func.func @transform_8(%arg0: i32) -> (i32, i32) {
    %c0_i32 = arith.constant 0 : i32
    %c0_i32_0 = arith.constant 0 : i32
    %c0_i32_1 = arith.constant 0 : i32
    return %c0_i32, %c0_i32_0 : i32, i32
  }
  func.func @transform_9(%arg0: i32) -> (i32, i32) {
    %c0_i32 = arith.constant 0 : i32
    %c0_i32_0 = arith.constant 0 : i32
    %c0_i32_1 = arith.constant 0 : i32
    return %c0_i32, %c0_i32_0 : i32, i32
  }
  func.func @transform_10(%arg0: i32) -> (i32, i32) {
    %c0_i32 = arith.constant 0 : i32
    %c0_i32_0 = arith.constant 0 : i32
    %c0_i32_1 = arith.constant 0 : i32
    return %c0_i32, %c0_i32_0 : i32, i32
  }
  func.func @transform_11(%arg0: i32) -> (i32, i32) {
    %c0_i32 = arith.constant 0 : i32
    %c0_i32_0 = arith.constant 0 : i32
    %c0_i32_1 = arith.constant 0 : i32
    return %c0_i32, %c0_i32_0 : i32, i32
  }
  func.func @transform_12(%arg0: i32) -> (i32, i32) {
    %c0_i32 = arith.constant 0 : i32
    %c0_i32_0 = arith.constant 0 : i32
    %c0_i32_1 = arith.constant 0 : i32
    return %c0_i32, %c0_i32_0 : i32, i32
  }
  func.func @transform_13(%arg0: i32) -> (i32, i32) {
    %c0_i32 = arith.constant 0 : i32
    %c0_i32_0 = arith.constant 0 : i32
    %c0_i32_1 = arith.constant 0 : i32
    return %c0_i32, %c0_i32_0 : i32, i32
  }
  func.func @transform_14(%arg0: i32) -> (i32, i32) {
    %c0_i32 = arith.constant 0 : i32
    %c0_i32_0 = arith.constant 0 : i32
    %c0_i32_1 = arith.constant 0 : i32
    return %c0_i32, %c0_i32_0 : i32, i32
  }
  func.func @transform_15(%arg0: i32) -> (i32, i32) {
    %c0_i32 = arith.constant 0 : i32
    %c0_i32_0 = arith.constant 0 : i32
    return %arg0, %c0_i32 : i32, i32
  }
}

</mosaic_0001>

<bundles_post_ra>
// kernel: tpu_custom_call.1
= control target key start
LH: loop header
LB: loop body
LE: loop exit
PB: predicated region body
PF: predicated region fallthrough
CT: control target
= control target key end

     0   :  { %s17403_s0 = inlined_call_operand.vmem [shape: f32[3000,32], index: 0, kind: input, shape index: {}]   ;;  %s17404_s1 = inlined_call_operand.vmem [shape: f32[3000,39], index: 1, kind: input, shape index: {}]   ;;  %s17405_s2 = inlined_call_operand.vmem [shape: f32[32,64], index: 2, kind: input, shape index: {}]   ;;  %s17406_s3 = inlined_call_operand.vmem [shape: f32[1,64], index: 3, kind: input, shape index: {}]   ;;  %s17407_s4 = inlined_call_operand.vmem [shape: f32[64,64], index: 4, kind: input, shape index: {}]   ;;  %s17408_s5 = inlined_call_operand.vmem [shape: f32[1,64], index: 5, kind: input, shape index: {}]   ;;  %s17409_s6 = inlined_call_operand.vmem [shape: f32[64,64], index: 6, kind: input, shape index: {}]   ;;  %s17410_s7 = inlined_call_operand.vmem [shape: f32[39,64], index: 7, kind: input, shape index: {}]   ;;  %s17411_s8 = inlined_call_operand.vmem [shape: f32[1,64], index: 8, kind: input, shape index: {}]   ;;  %s17412_s9 = inlined_call_operand.vmem [shape: f32[64,64], index: 9, kind: input, shape index: {}]   ;;  %s17413_s10 = inlined_call_operand.vmem [shape: f32[1,64], index: 10, kind: input, shape index: {}]   ;;  %s17414_s11 = inlined_call_operand.vmem [shape: f32[64,64], index: 11, kind: input, shape index: {}]   ;;  %s17415_s12 = inlined_call_operand.vmem [shape: f32[1,64], index: 12, kind: input, shape index: {}]   ;;  %s17416_s13 = inlined_call_operand.vmem [shape: f32[128,4], index: 13, kind: input, shape index: {}]   ;;  %s17417_s14 = inlined_call_operand.vmem [shape: f32[1,4], index: 14, kind: input, shape index: {}]   ;;  %s17418_s15 = inlined_call_operand.vmem [shape: f32[3000,4], index: 15, kind: output, shape index: {}]  }
   0x1   :  { %17419 = sst [smem:[#allocation13_spill]] %s17403_s0 }
   0x2   :  { %17420 = sst [smem:[#allocation14_spill]] %s17404_s1 }
   0x3   :  { %17421 = sst [smem:[#allocation15_spill]] %s17405_s2 }
   0x4   :  { %s14090_s18 = smov 0   ;;  %s14092_s19 = smov 0  }
   0x5   :  { %s14094_s20 = smov 0  }
   0x6 LB: > { %s14103_s21 = sadd.s32 4294967295, %s13975_s20   ;;  %s14105_s22 = sadd.s32 1, %s13975_s20   ;;  %s13975_s20 = sphi %s14094_s20, %s17453_s20   ;;  %s13971_s19 = sphi %s14092_s19, %s17452_s19   ;;  %s13967_s18 = sphi %s14090_s18, %s17451_s18  }
   0x7   : > { %s354_s23 = ssub.s32 %s13975_s20, %s14105_s22  ;;  %s357_s24 = sadd.s32 1, %s13971_s19 }
   0x8   : > { %p355_p0 = scmp.eq.s32.totalorder %s354_s23, 0  ;;  %p367_p1 = scmp.ne.s32.totalorder %s13971_s19, %s13967_s18 }
   0x9   : > { %p368_p2 = scmp.eq.s32.totalorder %s14103_s21, 2  ;;  %p10050_p3 = scmp.ge.s32.totalorder %s13975_s20, 1 }
   0xa   : > { %s14113_s25 = scalar_select %p355_p0, %s13971_s19, %s357_s24  }
   0xb   : > { %p14115_p4 = por %p368_p2, %p367_p1  ;;  %p465_p5 = scmp.lt.s32.totalorder %s13975_s20, 4 }
   0xc   : > { %17422 = sst [smem:[#allocation3_spill]] %s14113_s25 }
   0xd   : > { %p466_p6 = pnand %p10050_p3, %p465_p5 }
   0xf   : > { %469 = sbr.rel (%p466_p6) target bundleno = 1708 (0x6ac), region = 80 }
  0x16   : > { %s17424_s2 = sld [smem:[#allocation15_spill]]  ;;  %s14129_s23 = sshll.u32 %s14103_s21, 7  ;;  %v3284_v6 = vld [vmem:[%s17410_s7] sm:$0xff]  ;;  %v3285_v7 = vld [vmem:[%s17410_s7 + $0x8] sm:$0xff]  ;;  %vm825_vm0 = vcmask 261120   ;;  %v3286_v12 = vld [vmem:[%s17410_s7 + $0x10] sm:$0xff] }
  0x17   : > { %p530_p7 = scmp.lt.s32.totalorder %s14129_s23, 374  ;;  %v2043_v8 = vld [vmem:[%s17407_s4] sm:$0xff]  ;;  %v2044_v9 = vld [vmem:[%s17407_s4 + $0x8] sm:$0xff]  ;;  %v13286_v10 = vpack.c.bf16 %v3285_v7, %v3284_v6  ;;  %s17425_s0 = sld [smem:[#allocation13_spill]]  ;;  %v3287_v13 = vld [vmem:[%s17410_s7 + $0x18] sm:$0xff]  ;;  %vm3674_vm1 = vcmask 1046528  }
  0x18   : > { %v13270_v11 = vpack.c.bf16 %v2044_v9, %v2043_v8  ;;  %v13290_v17 = vpack.c.bf16 %v3287_v13, %v3286_v12  ;;  %v2045_v22 = vld [vmem:[%s17407_s4 + $0x10] sm:$0xff]  ;;  %v2046_v23 = vld [vmem:[%s17407_s4 + $0x18] sm:$0xff]  ;;  %v3288_v45 = vld [vmem:[%s17410_s7 + $0x20] sm:$0x7f]  ;;  %s17426_s1 = sld [smem:[#allocation14_spill]]  ;;  %vm3289_vm2 = vcmask 318464  }
  0x19   : > { %s14142_s16 = scalar_select %p530_p7, %s14129_s23, 374  ;;  %v13274_v28 = vpack.c.bf16 %v2046_v23, %v2045_v22  ;;  %v2047_v48 = vld [vmem:[%s17407_s4 + $0x20] sm:$0xff]  ;;  %v2048_v49 = vld [vmem:[%s17407_s4 + $0x28] sm:$0xff]  ;;  %v2049_v62 = vld [vmem:[%s17407_s4 + $0x30] sm:$0xff]  ;;  %vm2058_vm3 = vcmask 523264   ;;  %vm9439_vm4 = vcmask 31744  }
  0x1a   : > { %v13278_v52 = vpack.c.bf16 %v2048_v49, %v2047_v48  ;;  %v3276_v57 = vld [vmem:[%s17409_s6] sm:$0xff]  ;;  %v3277_v58 = vld [vmem:[%s17409_s6 + $0x8] sm:$0xff]  ;;  %v2050_v63 = vld [vmem:[%s17407_s4 + $0x38] sm:$0xff]  ;;  %s14009_s24 = smov 64  }
  0x1b   : > { %s10053_s27 = sshll.u32 %s14142_s16, 3  ;;  %v14255_v60 = vpack.c.bf16 %v3277_v58, %v3276_v57  ;;  %s10848_s16 = sshll.u32 (%p14115_p4), %s14103_s21, 10 }
  0x1c   : > { %v814_v0 = vld [vmem:[%s17424_s2] sm:$0xff]  ;;  %v815_v1 = vld [vmem:[%s17424_s2 + $0x8] sm:$0xff]  ;;  %v816_v2 = vld [vmem:[%s17424_s2 + $0x10] sm:$0xff] }
  0x1d   : > { %v13262_v3 = vpack.c.bf16 %v815_v1, %v814_v0  ;;  %v817_v4 = vld [vmem:[%s17424_s2 + $0x18] sm:$0xff]  ;;  %s14156_s30 = scalar_lea.vmem %s17425_s0, %s10053_s27 }
  0x1e   : > { %v13266_v5 = vpack.c.bf16 %v817_v4, %v816_v2  ;;  %v558_v14 = vld [vmem:[%s14156_s30] sm:$0xff]  ;;  %v559_v15 = vld [vmem:[%s14156_s30 + $0x8] sm:$0xff]  ;;  %v560_v16 = vld [vmem:[%s14156_s30 + $0x10] sm:$0xff]  ;;  %v13282_v2 = vpack.c.bf16 %v2050_v63, %v2049_v62  ;;  %s14436_s25 = scalar_lea.vmem %s17426_s1, %s10053_s27  ;;  %s522_s27 = sand.u32 1, %s13967_s18  }
  0x1f   : > { %13263 = vmatprep.subr.bf16.mxu0 %v13262_v3  ;;  %13374 = vmatprep.subr.bf16.mxu1 %v13262_v3  ;;  %v561_v18 = vld [vmem:[%s14156_s30 + $0x18] sm:$0xff]  ;;  %v562_v19 = vld [vmem:[%s14156_s30 + $0x20] sm:$0xff]  ;;  %v563_v20 = vld [vmem:[%s14156_s30 + $0x28] sm:$0xff]  ;;  %s10051_s17 = sshll.u32 %s522_s27, 10 }
  0x20   : > { %13265 = vmatpush3.bf16.msra.mxu0 %v13262_v3  ;;  %13376 = vmatpush3.bf16.msra.mxu1 %v13262_v3  ;;  %v564_v21 = vld [vmem:[%s14156_s30 + $0x30] sm:$0xff]  ;;  %v565_v24 = vld [vmem:[%s14156_s30 + $0x38] sm:$0xff]  ;;  %v566_v25 = vld [vmem:[%s14156_s30 + $0x40] sm:$0xff] }
  0x21   : > { %13267 = vmatprep.subr.bf16.mxu0 %v13266_v5  ;;  %13375 = vmatprep.subr.bf16.mxu1 %v13266_v5  ;;  %v622_v26 = vld [vmem:[%s14156_s30 + $0x200] sm:$0xff]  ;;  %v623_v27 = vld [vmem:[%s14156_s30 + $0x208] sm:$0xff]  ;;  %v624_v29 = vld [vmem:[%s14156_s30 + $0x210] sm:$0xff] }
  0x22   : > { %11812 = vmatprep.mubr.msk.f32.mxu0 %vm825_vm0, %v558_v14  ;;  %11908 = vmatprep.mubr.msk.f32.mxu1 %vm825_vm0, %v622_v26  ;;  %v567_v30 = vld [vmem:[%s14156_s30 + $0x48] sm:$0xff]  ;;  %v568_v31 = vld [vmem:[%s14156_s30 + $0x50] sm:$0xff]  ;;  %v625_v32 = vld [vmem:[%s14156_s30 + $0x218] sm:$0xff] }
  0x23   : > { %v626_v33 = vld [vmem:[%s14156_s30 + $0x220] sm:$0xff]  ;;  %v569_v34 = vld [vmem:[%s14156_s30 + $0x58] sm:$0xff]  ;;  %v627_v36 = vld [vmem:[%s14156_s30 + $0x228] sm:$0xff] }
  0x24   : > { %13269 = vmatpush3.bf16.msra.mxu0 %v13266_v5  ;;  %13377 = vmatpush3.bf16.msra.mxu1 %v13266_v5  ;;  %v570_v35 = vld [vmem:[%s14156_s30 + $0x60] sm:$0xff]  ;;  %v628_v37 = vld [vmem:[%s14156_s30 + $0x230] sm:$0xff]  ;;  %v571_v38 = vld [vmem:[%s14156_s30 + $0x68] sm:$0xff] }
  0x25   : > { %13287 = vmatprep.subr.bf16.mxu0 %v13286_v10  ;;  %13271 = vmatprep.subr.bf16.mxu1 %v13270_v11  ;;  %v572_v39 = vld [vmem:[%s14156_s30 + $0x70] sm:$0xff]  ;;  %v629_v40 = vld [vmem:[%s14156_s30 + $0x238] sm:$0xff]  ;;  %v630_v41 = vld [vmem:[%s14156_s30 + $0x240] sm:$0xff] }
  0x26   : > { %v573_v42 = vld [vmem:[%s14156_s30 + $0x78] sm:$0xff]  ;;  %v574_v43 = vld [vmem:[%s14156_s30 + $0x80] sm:$0xff]  ;;  %v631_v44 = vld [vmem:[%s14156_s30 + $0x248] sm:$0xff] }
  0x27   : > { %11813 = vmatmul.mubr.msk.f32.vlgmr.msra.gmra.mrb[0].mxu0 %vm825_vm0, %v559_v15  ;;  %11909 = vmatmul.mubr.msk.f32.vlgmr.msra.gmra.mrb[0].mxu1 %vm825_vm0, %v623_v27  ;;  %v632_v46 = vld [vmem:[%s14156_s30 + $0x250] sm:$0xff]  ;;  %v575_v47 = vld [vmem:[%s14156_s30 + $0x88] sm:$0xff]  ;;  %v633_v51 = vld [vmem:[%s14156_s30 + $0x258] sm:$0xff] }
  0x28   : > { %11815 = vmatprep.mubr.msk.f32.mxu0 %vm825_vm0, %v560_v16  ;;  %13289 = vmatpush3.bf16.msra.mxu0 %v13286_v10  ;;  %v576_v50 = vld [vmem:[%s14156_s30 + $0x90] sm:$0xff]  ;;  %v634_v53 = vld [vmem:[%s14156_s30 + $0x260] sm:$0xff]  ;;  %v577_v54 = vld [vmem:[%s14156_s30 + $0x98] sm:$0xff] }
  0x29   : > { %13291 = vmatprep.subr.bf16.mxu0 %v13290_v17  ;;  %13273 = vmatpush3.bf16.msra.mxu1 %v13270_v11  ;;  %v578_v55 = vld [vmem:[%s14156_s30 + $0xa0] sm:$0xff]  ;;  %v635_v56 = vld [vmem:[%s14156_s30 + $0x268] sm:$0xff]  ;;  %v636_v59 = vld [vmem:[%s14156_s30 + $0x270] sm:$0xff] }
  0x2a   : > { %11911 = vmatprep.mubr.msk.f32.mxu1 %vm825_vm0, %v624_v29  ;;  %13275 = vmatprep.subr.bf16.mxu1 %v13274_v28  ;;  %v579_v61 = vld [vmem:[%s14156_s30 + $0xa8] sm:$0xff]  ;;  %v580_v0 = vld [vmem:[%s14156_s30 + $0xb0] sm:$0xff]  ;;  %v637_v1 = vld [vmem:[%s14156_s30 + $0x278] sm:$0xff] }
  0x2b   : > { %11816 = vmatmul.mubr.msk.f32.gmra.mrb[2].mxu0 %vm825_vm0, %v561_v18  ;;  %11912 = vmatmul.mubr.msk.f32.gmra.mrb[2].mxu1 %vm825_vm0, %v625_v32  ;;  %v638_v3 = vld [vmem:[%s14156_s30 + $0x280] sm:$0xff]  ;;  %v581_v4 = vld [vmem:[%s14156_s30 + $0xb8] sm:$0xff]  ;;  %v639_v6 = vld [vmem:[%s14156_s30 + $0x288] sm:$0xff] }
  0x2c   : > { %11818 = vmatprep.mubr.msk.f32.mxu0 %vm825_vm0, %v562_v19  ;;  %13293 = vmatpush3.bf16.msra.mxu0 %v13290_v17  ;;  %v582_v5 = vld [vmem:[%s14156_s30 + $0xc0] sm:$0xff]  ;;  %v640_v7 = vld [vmem:[%s14156_s30 + $0x290] sm:$0xff]  ;;  %v583_v8 = vld [vmem:[%s14156_s30 + $0xc8] sm:$0xff] }
  0x2d   : > { %11914 = vmatprep.mubr.msk.f32.mxu1 %vm825_vm0, %v626_v33  ;;  %13277 = vmatpush3.bf16.msra.mxu1 %v13274_v28  ;;  %v584_v9 = vld [vmem:[%s14156_s30 + $0xd0] sm:$0xff]  ;;  %v641_v10 = vld [vmem:[%s14156_s30 + $0x298] sm:$0xff]  ;;  %v642_v11 = vld [vmem:[%s14156_s30 + $0x2a0] sm:$0xff] }
  0x2e   : > { %12220 = vmatprep.subr.msk.mxu0 %vm3674_vm1, %v3288_v45  ;;  %13279 = vmatprep.subr.bf16.mxu1 %v13278_v52  ;;  %v585_v12 = vld [vmem:[%s14156_s30 + $0xd8] sm:$0xff]  ;;  %v586_v13 = vld [vmem:[%s14156_s30 + $0xe0] sm:$0xff]  ;;  %v643_v14 = vld [vmem:[%s14156_s30 + $0x2a8] sm:$0xff] }
  0x2f   : > { %11819 = vmatmul.mubr.msk.f32.gmra.mrb[4].mxu0 %vm825_vm0, %v563_v20  ;;  %11915 = vmatmul.mubr.msk.f32.gmra.mrb[4].mxu1 %vm825_vm0, %v627_v36  ;;  %v644_v15 = vld [vmem:[%s14156_s30 + $0x2b0] sm:$0xff]  ;;  %v587_v16 = vld [vmem:[%s14156_s30 + $0xe8] sm:$0xff]  ;;  %v645_v18 = vld [vmem:[%s14156_s30 + $0x2b8] sm:$0xff] }
  0x30   : > { %11821 = vmatprep.mubr.msk.f32.mxu0 %vm825_vm0, %v564_v21  ;;  %11917 = vmatprep.mubr.msk.f32.mxu1 %vm825_vm0, %v628_v37  ;;  %v588_v17 = vld [vmem:[%s14156_s30 + $0xf0] sm:$0xff]  ;;  %v646_v19 = vld [vmem:[%s14156_s30 + $0x2c0] sm:$0xff]  ;;  %v589_v20 = vld [vmem:[%s14156_s30 + $0xf8] sm:$0xff] }
  0x31   : > { %12221 = vmatpush3.msk.msra.mxu0 %vm3674_vm1, %v3288_v45  ;;  %13281 = vmatpush3.bf16.msra.mxu1 %v13278_v52  ;;  %v590_v21 = vld [vmem:[%s14156_s30 + $0x100] sm:$0xff]  ;;  %v647_v22 = vld [vmem:[%s14156_s30 + $0x2c8] sm:$0xff]  ;;  %v648_v23 = vld [vmem:[%s14156_s30 + $0x2d0] sm:$0xff] }
  0x32   : > { %13295 = vmatprep.subr.bf16.mxu0 %v14255_v60  ;;  %13283 = vmatprep.subr.bf16.mxu1 %v13282_v2  ;;  %v649_v26 = vld [vmem:[%s14156_s30 + $0x2d8] sm:$0xff]  ;;  %v650_v27 = vld [vmem:[%s14156_s30 + $0x2e0] sm:$0xff]  ;;  %v595_v32 = vld [vmem:[%s14156_s30 + $0x128] sm:$0xff] }
  0x33   : > { %11822 = vmatmul.mubr.msk.f32.gmra.mrb[6].mxu0 %vm825_vm0, %v565_v24  ;;  %11918 = vmatmul.mubr.msk.f32.gmra.mrb[6].mxu1 %vm825_vm0, %v629_v40  ;;  %v591_v24 = vld [vmem:[%s14156_s30 + $0x108] sm:$0xff]  ;;  %v593_v28 = vld [vmem:[%s14156_s30 + $0x118] sm:$0xff]  ;;  %v594_v29 = vld [vmem:[%s14156_s30 + $0x120] sm:$0xff] }
  0x34   : > { %11824 = vmatprep.mubr.msk.f32.mxu0 %vm825_vm0, %v566_v25  ;;  %11920 = vmatprep.mubr.msk.f32.mxu1 %vm825_vm0, %v630_v41  ;;  %v592_v25 = vld [vmem:[%s14156_s30 + $0x110] sm:$0xff]  ;;  %v597_v36 = vld [vmem:[%s14156_s30 + $0x138] sm:$0xff]  ;;  %v598_v37 = vld [vmem:[%s14156_s30 + $0x140] sm:$0xff] }
  0x35   : > { %13285 = vmatpush3.bf16.msra.mxu1 %v13282_v2  ;;  %v596_v33 = vld [vmem:[%s14156_s30 + $0x130] sm:$0xff]  ;;  %v599_v40 = vld [vmem:[%s14156_s30 + $0x148] sm:$0xff]  ;;  %v602_v45 = vld [vmem:[%s14156_s30 + $0x160] sm:$0xff] }
  0x36   : > { %v600_v41 = vld [vmem:[%s14156_s30 + $0x150] sm:$0xff]  ;;  %v603_v48 = vld [vmem:[%s14156_s30 + $0x168] sm:$0xff]  ;;  %v605_v52 = vld [vmem:[%s14156_s30 + $0x178] sm:$0xff] }
  0x37   : > { %11825 = vmatmul.mubr.msk.f32.gmra.mrb[8].mxu0 %vm825_vm0, %v567_v30  ;;  %11921 = vmatmul.mubr.msk.f32.gmra.mrb[8].mxu1 %vm825_vm0, %v631_v44  ;;  %v651_v30 = vld [vmem:[%s14156_s30 + $0x2e8] sm:$0xff]  ;;  %v601_v44 = vld [vmem:[%s14156_s30 + $0x158] sm:$0xff]  ;;  %v604_v49 = vld [vmem:[%s14156_s30 + $0x170] sm:$0xff] }
  0x38   : > { %11827 = vmatprep.mubr.msk.f32.mxu0 %vm825_vm0, %v568_v31  ;;  %11923 = vmatprep.mubr.msk.f32.mxu1 %vm825_vm0, %v632_v46  ;;  %v652_v31 = vld [vmem:[%s14156_s30 + $0x2f0] sm:$0xff]  ;;  %v659_v46 = vld [vmem:[%s14156_s30 + $0x328] sm:$0xff]  ;;  %v665_v58 = vld [vmem:[%s14156_s30 + $0x358] sm:$0xff] }
  0x39   : > { %v608_v57 = vld [vmem:[%s14156_s30 + $0x190] sm:$0xff]  ;;  %v610_v62 = vld [vmem:[%s14156_s30 + $0x1a0] sm:$0xff]  ;;  %v667_v63 = vld [vmem:[%s14156_s30 + $0x368] sm:$0xff] }
  0x3a   : > { %v612_v2 = vld [vmem:[%s14156_s30 + $0x1b0] sm:$0xff] }
  0x3b   : > { %11828 = vmatmul.mubr.msk.f32.gmra.mrb[10].mxu0 %vm825_vm0, %v569_v34  ;;  %11924 = vmatmul.mubr.msk.f32.gmra.mrb[10].mxu1 %vm825_vm0, %v633_v51  ;;  %v653_v34 = vld [vmem:[%s14156_s30 + $0x2f8] sm:$0xff]  ;;  %v662_v51 = vld [vmem:[%s14156_s30 + $0x340] sm:$0xff] }
  0x3c   : > { %11830 = vmatprep.mubr.msk.f32.mxu0 %vm825_vm0, %v570_v35  ;;  %11926 = vmatprep.mubr.msk.f32.mxu1 %vm825_vm0, %v634_v53  ;;  %v654_v35 = vld [vmem:[%s14156_s30 + $0x300] sm:$0xff] }
  0x3d   : > { %v606_v53 = vld [vmem:[%s14156_s30 + $0x180] sm:$0xff] }
  0x3f   : > { %11831 = vmatmul.mubr.msk.f32.gmra.mrb[12].mxu0 %vm825_vm0, %v571_v38  ;;  %11927 = vmatmul.mubr.msk.f32.gmra.mrb[12].mxu1 %vm825_vm0, %v635_v56  ;;  %v655_v38 = vld [vmem:[%s14156_s30 + $0x308] sm:$0xff] }
  0x40   : > { %11833 = vmatprep.mubr.msk.f32.mxu0 %vm825_vm0, %v572_v39  ;;  %11929 = vmatprep.mubr.msk.f32.mxu1 %vm825_vm0, %v636_v59  ;;  %v656_v39 = vld [vmem:[%s14156_s30 + $0x310] sm:$0xff]  ;;  %v607_v56 = vld [vmem:[%s14156_s30 + $0x188] sm:$0xff]  ;;  %v666_v59 = vld [vmem:[%s14156_s30 + $0x360] sm:$0xff] }
  0x43   : > { %11834 = vmatmul.mubr.msk.f32.gmra.mrb[14].mxu0 %vm825_vm0, %v573_v42  ;;  %11930 = vmatmul.mubr.msk.f32.gmra.mrb[14].mxu1 %vm825_vm0, %v637_v1  ;;  %v657_v42 = vld [vmem:[%s14156_s30 + $0x318] sm:$0xff]  ;;  %v611_v1 = vld [vmem:[%s14156_s30 + $0x1a8] sm:$0xff] }
  0x44   : > { %11836 = vmatprep.mubr.msk.f32.mxu0 %vm825_vm0, %v574_v43  ;;  %11932 = vmatprep.mubr.msk.f32.mxu1 %vm825_vm0, %v638_v3  ;;  %v658_v43 = vld [vmem:[%s14156_s30 + $0x320] sm:$0xff]  ;;  %v669_v3 = vld [vmem:[%s14156_s30 + $0x378] sm:$0xff] }
  0x47   : > { %11837 = vmatmul.mubr.msk.f32.gmra.mrb[16].mxu0 %vm825_vm0, %v575_v47  ;;  %11933 = vmatmul.mubr.msk.f32.gmra.mrb[16].mxu1 %vm825_vm0, %v639_v6  ;;  %v660_v47 = vld [vmem:[%s14156_s30 + $0x330] sm:$0xff]  ;;  %v614_v6 = vld [vmem:[%s14156_s30 + $0x1c0] sm:$0xff] }
  0x48   : > { %11839 = vmatprep.mubr.msk.f32.mxu0 %vm825_vm0, %v576_v50  ;;  %11935 = vmatprep.mubr.msk.f32.mxu1 %vm825_vm0, %v640_v7  ;;  %v661_v50 = vld [vmem:[%s14156_s30 + $0x338] sm:$0xff]  ;;  %v671_v7 = vld [vmem:[%s14156_s30 + $0x388] sm:$0xff] }
  0x4b   : > { %11840 = vmatmul.mubr.msk.f32.gmra.mrb[18].mxu0 %vm825_vm0, %v577_v54  ;;  %11936 = vmatmul.mubr.msk.f32.gmra.mrb[18].mxu1 %vm825_vm0, %v641_v10  ;;  %v663_v54 = vld [vmem:[%s14156_s30 + $0x348] sm:$0xff]  ;;  %v616_v10 = vld [vmem:[%s14156_s30 + $0x1d0] sm:$0xff] }
  0x4c   : > { %11842 = vmatprep.mubr.msk.f32.mxu0 %vm825_vm0, %v578_v55  ;;  %11938 = vmatprep.mubr.msk.f32.mxu1 %vm825_vm0, %v642_v11  ;;  %v664_v55 = vld [vmem:[%s14156_s30 + $0x350] sm:$0xff]  ;;  %v673_v11 = vld [vmem:[%s14156_s30 + $0x398] sm:$0xff] }
  0x4f   : > { %11843 = vmatmul.mubr.msk.f32.gmra.mrb[20].mxu0 %vm825_vm0, %v579_v61  ;;  %11939 = vmatmul.mubr.msk.f32.gmra.mrb[20].mxu1 %vm825_vm0, %v643_v14  ;;  %v609_v61 = vld [vmem:[%s14156_s30 + $0x198] sm:$0xff]  ;;  %v618_v14 = vld [vmem:[%s14156_s30 + $0x1e0] sm:$0xff] }
  0x50   : > { %11845 = vmatprep.mubr.msk.f32.mxu0 %vm825_vm0, %v580_v0  ;;  %11941 = vmatprep.mubr.msk.f32.mxu1 %vm825_vm0, %v644_v15  ;;  %v668_v0 = vld [vmem:[%s14156_s30 + $0x370] sm:$0xff]  ;;  %v675_v15 = vld [vmem:[%s14156_s30 + $0x3a8] sm:$0xff] }
  0x53   : > { %11846 = vmatmul.mubr.msk.f32.gmra.mrb[22].mxu0 %vm825_vm0, %v581_v4  ;;  %11942 = vmatmul.mubr.msk.f32.gmra.mrb[22].mxu1 %vm825_vm0, %v645_v18  ;;  %v670_v4 = vld [vmem:[%s14156_s30 + $0x380] sm:$0xff]  ;;  %v620_v18 = vld [vmem:[%s14156_s30 + $0x1f0] sm:$0xff] }
  0x54   : > { %11848 = vmatprep.mubr.msk.f32.mxu0 %vm825_vm0, %v582_v5  ;;  %11944 = vmatprep.mubr.msk.f32.mxu1 %vm825_vm0, %v646_v19  ;;  %v613_v5 = vld [vmem:[%s14156_s30 + $0x1b8] sm:$0xff] }
  0x55   : > { %v677_v19 = vld [vmem:[%s14156_s30 + $0x3b8] sm:$0xff] }
  0x57   : > { %11849 = vmatmul.mubr.msk.f32.gmra.mrb[24].mxu0 %vm825_vm0, %v583_v8  ;;  %11945 = vmatmul.mubr.msk.f32.gmra.mrb[24].mxu1 %vm825_vm0, %v647_v22  ;;  %v672_v8 = vld [vmem:[%s14156_s30 + $0x390] sm:$0xff]  ;;  %v686_v22 = vld [vmem:[%s14436_s25] sm:$0xff] }
  0x58   : > { %11851 = vmatprep.mubr.msk.f32.mxu0 %vm825_vm0, %v584_v9  ;;  %11947 = vmatprep.mubr.msk.f32.mxu1 %vm825_vm0, %v648_v23  ;;  %v615_v9 = vld [vmem:[%s14156_s30 + $0x1c8] sm:$0xff] }
  0x59   : > { %v679_v23 = vld [vmem:[%s14156_s30 + $0x3c8] sm:$0xff] }
  0x5b   : > { %11852 = vmatmul.mubr.msk.f32.gmra.mrb[26].mxu0 %vm825_vm0, %v585_v12  ;;  %11948 = vmatmul.mubr.msk.f32.gmra.mrb[26].mxu1 %vm825_vm0, %v649_v26  ;;  %v674_v12 = vld [vmem:[%s14156_s30 + $0x3a0] sm:$0xff]  ;;  %v3279_v26 = vld [vmem:[%s17409_s6 + $0x18] sm:$0xff] }
  0x5c   : > { %11854 = vmatprep.mubr.msk.f32.mxu0 %vm825_vm0, %v586_v13  ;;  %11950 = vmatprep.mubr.msk.f32.mxu1 %vm825_vm0, %v650_v27  ;;  %v617_v13 = vld [vmem:[%s14156_s30 + $0x1d8] sm:$0xff]  ;;  %v687_v27 = vld [vmem:[%s14436_s25 + $0x8] sm:$0xff] }
  0x5f   : > { %11855 = vmatmul.mubr.msk.f32.gmra.mrb[28].mxu0 %vm825_vm0, %v587_v16  ;;  %11951 = vmatmul.mubr.msk.f32.gmra.mrb[28].mxu1 %vm825_vm0, %v651_v30  ;;  %v676_v16 = vld [vmem:[%s14156_s30 + $0x3b0] sm:$0xff]  ;;  %v681_v30 = vld [vmem:[%s14156_s30 + $0x3d8] sm:$0xff] }
  0x60   : > { %11857 = vmatprep.mubr.msk.f32.mxu0 %vm825_vm0, %v588_v17  ;;  %11953 = vmatprep.mubr.msk.f32.mxu1 %vm825_vm0, %v652_v31  ;;  %v619_v17 = vld [vmem:[%s14156_s30 + $0x1e8] sm:$0xff]  ;;  %v682_v31 = vld [vmem:[%s14156_s30 + $0x3e0] sm:$0xff] }
  0x63   : > { %11858 = vmatmul.mubr.msk.f32.gmra.mrb[30].mxu0 %vm825_vm0, %v589_v20  ;;  %11954 = vmatmul.mubr.msk.f32.gmra.mrb[30].mxu1 %vm825_vm0, %v653_v34  ;;  %v678_v20 = vld [vmem:[%s14156_s30 + $0x3c0] sm:$0xff]  ;;  %v683_v34 = vld [vmem:[%s14156_s30 + $0x3e8] sm:$0xff] }
  0x64   : > { %11860 = vmatprep.mubr.msk.f32.mxu0 %vm825_vm0, %v590_v21  ;;  %11956 = vmatprep.mubr.msk.f32.mxu1 %vm825_vm0, %v654_v35  ;;  %v621_v21 = vld [vmem:[%s14156_s30 + $0x1f8] sm:$0xff]  ;;  %v684_v35 = vld [vmem:[%s14156_s30 + $0x3f0] sm:$0xff] }
  0x67   : > { %11861 = vmatmul.mubr.msk.f32.gmra.mrb[32].mxu0 %vm825_vm0, %v591_v24  ;;  %11957 = vmatmul.mubr.msk.f32.gmra.mrb[32].mxu1 %vm825_vm0, %v655_v38  ;;  %v680_v24 = vld [vmem:[%s14156_s30 + $0x3d0] sm:$0xff]  ;;  %v693_v38 = vld [vmem:[%s14436_s25 + $0x38] sm:$0xff] }
  0x68   : > { %11863 = vmatprep.mubr.msk.f32.mxu0 %vm825_vm0, %v592_v25  ;;  %11959 = vmatprep.mubr.msk.f32.mxu1 %vm825_vm0, %v656_v39  ;;  %v3278_v25 = vld [vmem:[%s17409_s6 + $0x10] sm:$0xff]  ;;  %v694_v39 = vld [vmem:[%s14436_s25 + $0x40] sm:$0xff] }
  0x6b   : > { %11864 = vmatmul.mubr.msk.f32.gmra.mrb[34].mxu0 %vm825_vm0, %v593_v28  ;;  %11960 = vmatmul.mubr.msk.f32.gmra.mrb[34].mxu1 %vm825_vm0, %v657_v42  ;;  %v688_v28 = vld [vmem:[%s14436_s25 + $0x10] sm:$0xff]  ;;  %v697_v42 = vld [vmem:[%s14436_s25 + $0x58] sm:$0xff] }
  0x6c   : > { %11866 = vmatprep.mubr.msk.f32.mxu0 %vm825_vm0, %v594_v29  ;;  %11962 = vmatprep.mubr.msk.f32.mxu1 %vm825_vm0, %v658_v43  ;;  %v13298_v29 = vpack.c.bf16 %v3279_v26, %v3278_v25  ;;  %v698_v43 = vld [vmem:[%s14436_s25 + $0x60] sm:$0xff] }
  0x6f   : > { %11867 = vmatmul.mubr.msk.f32.gmra.mrb[36].mxu0 %vm825_vm0, %v595_v32  ;;  %11963 = vmatmul.mubr.msk.f32.gmra.mrb[36].mxu1 %vm825_vm0, %v659_v46  ;;  %v689_v32 = vld [vmem:[%s14436_s25 + $0x18] sm:$0xff] }
  0x70   : > { %11869 = vmatprep.mubr.msk.f32.mxu0 %vm825_vm0, %v596_v33  ;;  %11965 = vmatprep.mubr.msk.f32.mxu1 %vm825_vm0, %v660_v47  ;;  %v690_v33 = vld [vmem:[%s14436_s25 + $0x20] sm:$0xff]  ;;  %v701_v46 = vld [vmem:[%s14436_s25 + $0x78] sm:$0xff] }
  0x71   : > { %v702_v47 = vld [vmem:[%s14436_s25 + $0x80] sm:$0xff] }
  0x73   : > { %11870 = vmatmul.mubr.msk.f32.gmra.mrb[38].mxu0 %vm825_vm0, %v597_v36  ;;  %11966 = vmatmul.mubr.msk.f32.gmra.mrb[38].mxu1 %vm825_vm0, %v661_v50  ;;  %v692_v36 = vld [vmem:[%s14436_s25 + $0x30] sm:$0xff]  ;;  %v705_v50 = vld [vmem:[%s14436_s25 + $0x98] sm:$0xff] }
  0x74   : > { %11872 = vmatprep.mubr.msk.f32.mxu0 %vm825_vm0, %v598_v37  ;;  %11968 = vmatprep.mubr.msk.f32.mxu1 %vm825_vm0, %v662_v51  ;;  %v685_v37 = vld [vmem:[%s14156_s30 + $0x3f8] sm:$0xff]  ;;  %v706_v51 = vld [vmem:[%s14436_s25 + $0xa0] sm:$0xff]  ;;  %s16775_s30 = scalar_lea.vmem [#allocation2], %s10051_s17   ;;  %s17204_s17 = scalar_lea.vmem (%p14115_p4), %s17418_s15, %s10848_s16  }
  0x77   : > { %11873 = vmatmul.mubr.msk.f32.gmra.mrb[40].mxu0 %vm825_vm0, %v599_v40  ;;  %11969 = vmatmul.mubr.msk.f32.gmra.mrb[40].mxu1 %vm825_vm0, %v663_v54  ;;  %v695_v40 = vld [vmem:[%s14436_s25 + $0x48] sm:$0xff]  ;;  %v709_v54 = vld [vmem:[%s14436_s25 + $0xb8] sm:$0xff] }
  0x78   : > { %11875 = vmatprep.mubr.msk.f32.mxu0 %vm825_vm0, %v600_v41  ;;  %11971 = vmatprep.mubr.msk.f32.mxu1 %vm825_vm0, %v664_v55  ;;  %v696_v41 = vld [vmem:[%s14436_s25 + $0x50] sm:$0xff]  ;;  %v710_v55 = vld [vmem:[%s14436_s25 + $0xc0] sm:$0xff] }
  0x7b   : > { %11876 = vmatmul.mubr.msk.f32.gmra.mrb[42].mxu0 %vm825_vm0, %v601_v44  ;;  %11972 = vmatmul.mubr.msk.f32.gmra.mrb[42].mxu1 %vm825_vm0, %v665_v58  ;;  %v699_v44 = vld [vmem:[%s14436_s25 + $0x68] sm:$0xff]  ;;  %v713_v58 = vld [vmem:[%s14436_s25 + $0xd8] sm:$0xff] }
  0x7c   : > { %11878 = vmatprep.mubr.msk.f32.mxu0 %vm825_vm0, %v602_v45  ;;  %11974 = vmatprep.mubr.msk.f32.mxu1 %vm825_vm0, %v666_v59  ;;  %v700_v45 = vld [vmem:[%s14436_s25 + $0x70] sm:$0xff]  ;;  %v714_v59 = vld [vmem:[%s14436_s25 + $0xe0] sm:$0xff] }
  0x7f   : > { %11879 = vmatmul.mubr.msk.f32.gmra.mrb[44].mxu0 %vm825_vm0, %v603_v48  ;;  %11975 = vmatmul.mubr.msk.f32.gmra.mrb[44].mxu1 %vm825_vm0, %v667_v63  ;;  %v703_v48 = vld [vmem:[%s14436_s25 + $0x88] sm:$0xff]  ;;  %v3280_v63 = vld [vmem:[%s17409_s6 + $0x20] sm:$0xff] }
  0x80   : > { %11881 = vmatprep.mubr.msk.f32.mxu0 %vm825_vm0, %v604_v49  ;;  %11977 = vmatprep.mubr.msk.f32.mxu1 %vm825_vm0, %v668_v0  ;;  %v704_v49 = vld [vmem:[%s14436_s25 + $0x90] sm:$0xff]  ;;  %v3281_v0 = vld [vmem:[%s17409_s6 + $0x28] sm:$0xff] }
  0x83   : > { %11882 = vmatmul.mubr.msk.f32.gmra.mrb[46].mxu0 %vm825_vm0, %v605_v52  ;;  %11978 = vmatmul.mubr.msk.f32.gmra.mrb[46].mxu1 %vm825_vm0, %v669_v3  ;;  %v707_v52 = vld [vmem:[%s14436_s25 + $0xa8] sm:$0xff]  ;;  %v718_v3 = vld [vmem:[%s14436_s25 + $0x100] sm:$0xff] }
  0x84   : > { %11884 = vmatprep.mubr.msk.f32.mxu0 %vm825_vm0, %v606_v53  ;;  %11980 = vmatprep.mubr.msk.f32.mxu1 %vm825_vm0, %v670_v4  ;;  %v708_v53 = vld [vmem:[%s14436_s25 + $0xb0] sm:$0xff]  ;;  %v719_v4 = vld [vmem:[%s14436_s25 + $0x108] sm:$0xff] }
  0x87   : > { %11885 = vmatmul.mubr.msk.f32.gmra.mrb[48].mxu0 %vm825_vm0, %v607_v56  ;;  %11981 = vmatmul.mubr.msk.f32.gmra.mrb[48].mxu1 %vm825_vm0, %v671_v7  ;;  %v711_v56 = vld [vmem:[%s14436_s25 + $0xc8] sm:$0xff]  ;;  %v722_v7 = vld [vmem:[%s14436_s25 + $0x120] sm:$0xff] }
  0x88   : > { %11887 = vmatprep.mubr.msk.f32.mxu0 %vm825_vm0, %v608_v57  ;;  %11983 = vmatprep.mubr.msk.f32.mxu1 %vm825_vm0, %v672_v8  ;;  %v712_v57 = vld [vmem:[%s14436_s25 + $0xd0] sm:$0xff]  ;;  %v723_v8 = vld [vmem:[%s14436_s25 + $0x128] sm:$0xff] }
  0x8b   : > { %11888 = vmatmul.mubr.msk.f32.gmra.mrb[50].mxu0 %vm825_vm0, %v609_v61  ;;  %11984 = vmatmul.mubr.msk.f32.gmra.mrb[50].mxu1 %vm825_vm0, %v673_v11  ;;  %v715_v61 = vld [vmem:[%s14436_s25 + $0xe8] sm:$0xff]  ;;  %v726_v11 = vld [vmem:[%s14436_s25 + $0x140] sm:$0xff] }
  0x8c   : > { %11890 = vmatprep.mubr.msk.f32.mxu0 %vm825_vm0, %v610_v62  ;;  %11986 = vmatprep.mubr.msk.f32.mxu1 %vm825_vm0, %v674_v12  ;;  %v716_v62 = vld [vmem:[%s14436_s25 + $0xf0] sm:$0xff]  ;;  %v727_v12 = vld [vmem:[%s14436_s25 + $0x148] sm:$0xff] }
  0x8f   : > { %11891 = vmatmul.mubr.msk.f32.gmra.mrb[52].mxu0 %vm825_vm0, %v611_v1  ;;  %11987 = vmatmul.mubr.msk.f32.gmra.mrb[52].mxu1 %vm825_vm0, %v675_v15  ;;  %v13302_v1 = vpack.c.bf16 %v3281_v0, %v3280_v63  ;;  %v729_v15 = vld [vmem:[%s14436_s25 + $0x158] sm:$0xff] }
  0x90   : > { %11893 = vmatprep.mubr.msk.f32.mxu0 %vm825_vm0, %v612_v2  ;;  %11989 = vmatprep.mubr.msk.f32.mxu1 %vm825_vm0, %v676_v16  ;;  %v717_v2 = vld [vmem:[%s14436_s25 + $0xf8] sm:$0xff]  ;;  %v730_v16 = vld [vmem:[%s14436_s25 + $0x160] sm:$0xff] }
  0x93   : > { %11894 = vmatmul.mubr.msk.f32.gmra.mrb[54].mxu0 %vm825_vm0, %v613_v5  ;;  %11990 = vmatmul.mubr.msk.f32.gmra.mrb[54].mxu1 %vm825_vm0, %v677_v19  ;;  %v720_v5 = vld [vmem:[%s14436_s25 + $0x110] sm:$0xff] }
  0x94   : > { %11896 = vmatprep.mubr.msk.f32.mxu0 %vm825_vm0, %v614_v6  ;;  %11992 = vmatprep.mubr.msk.f32.mxu1 %vm825_vm0, %v678_v20  ;;  %v721_v6 = vld [vmem:[%s14436_s25 + $0x118] sm:$0xff] }
  0x97   : > { %11897 = vmatmul.mubr.msk.f32.gmra.mrb[56].mxu0 %vm825_vm0, %v615_v9  ;;  %11993 = vmatmul.mubr.msk.f32.gmra.mrb[56].mxu1 %vm825_vm0, %v679_v23  ;;  %v724_v9 = vld [vmem:[%s14436_s25 + $0x130] sm:$0xff] }
  0x98   : > { %11899 = vmatprep.mubr.msk.f32.mxu0 %vm825_vm0, %v616_v10  ;;  %11995 = vmatprep.mubr.msk.f32.mxu1 %vm825_vm0, %v680_v24  ;;  %v725_v10 = vld [vmem:[%s14436_s25 + $0x138] sm:$0xff] }
  0x9b   : > { %11900 = vmatmul.mubr.msk.f32.gmra.mrb[58].mxu0 %vm825_vm0, %v617_v13  ;;  %11996 = vmatmul.mubr.msk.f32.gmra.mrb[58].mxu1 %vm825_vm0, %v681_v30  ;;  %v728_v13 = vld [vmem:[%s14436_s25 + $0x150] sm:$0xff]  ;;  %v734_v30 = vld [vmem:[%s14436_s25 + $0x180] sm:$0xff] }
  0x9c   : > { %11902 = vmatprep.mubr.msk.f32.mxu0 %vm825_vm0, %v618_v14  ;;  %11998 = vmatprep.mubr.msk.f32.mxu1 %vm825_vm0, %v682_v31  ;;  %v14560_v14 = vld [vmem:[%s17406_s3] ss:$0 sm:$0xff] }
  0x9f   : > { %11903 = vmatmul.mubr.msk.f32.gmra.mrb[60].mxu0 %vm825_vm0, %v619_v17  ;;  %11999 = vmatmul.mubr.msk.f32.gmra.mrb[60].mxu1 %vm825_vm0, %v683_v34 }
  0xa0   : > { %11905 = vmatprep.mubr.msk.f32.mxu0 %vm825_vm0, %v620_v18  ;;  %12001 = vmatprep.mubr.msk.f32.mxu1 %vm825_vm0, %v684_v35 }
  0xa3   : > { %11906 = vmatmul.mubr.msk.f32.gmra.mrb[62].mxu0 %vm825_vm0, %v621_v21  ;;  %12002 = vmatmul.mubr.msk.f32.gmra.mrb[62].mxu1 %vm825_vm0, %v685_v37  ;;  %v731_v21 = vld [vmem:[%s14436_s25 + $0x168] sm:$0xff]  ;;  %v736_v37 = vld [vmem:[%s14436_s25 + $0x190] sm:$0xff] }
  0xa4   : > { %12222 = vmatprep.mubr.msk.f32.mxu0 %vm3289_vm2, %v686_v22  ;;  %v732_v22 = vld [vmem:[%s14436_s25 + $0x170] sm:$0xff] }
  0xa7   : > { %12223 = vmatmul.mubr.msk.f32.vlgmr.msra.gmra.mrb[64].mxu0 %vm3289_vm2, %v687_v27 }
  0xa8   : > { %13297 = vmatpush3.bf16.msra.mxu0 %v14255_v60  ;;  %12225 = vmatprep.mubr.msk.f32.mxu0 %vm3289_vm2, %v688_v28  ;;  %v691_v60 = vld [vmem:[%s14436_s25 + $0x28] sm:$0xff] }
  0xa9   : > { %13299 = vmatprep.subr.bf16.mxu0 %v13298_v29 }
  0xab   : > { %12226 = vmatmul.mubr.msk.f32.gmra.mrb[66].mxu0 %vm3289_vm2, %v689_v32 }
  0xac   : > { %12228 = vmatprep.mubr.msk.f32.mxu0 %vm3289_vm2, %v690_v33  ;;  %13301 = vmatpush3.bf16.msra.mxu0 %v13298_v29  ;;  %v733_v29 = vld [vmem:[%s14436_s25 + $0x178] sm:$0xff] }
  0xad   : > { %13303 = vmatprep.subr.bf16.mxu0 %v13302_v1 }
  0xaf   : > { %12229 = vmatmul.mubr.msk.f32.gmra.mrb[68].mxu0 %vm3289_vm2, %v691_v60 }
  0xb0   : > { %12231 = vmatprep.mubr.msk.f32.mxu0 %vm3289_vm2, %v692_v36  ;;  %13305 = vmatpush3.bf16.msra.mxu0 %v13302_v1  ;;  %v735_v36 = vld [vmem:[%s14436_s25 + $0x188] sm:$0xff] }
  0xb3   : > { %12232 = vmatmul.mubr.msk.f32.gmra.mrb[70].mxu0 %vm3289_vm2, %v693_v38 }
  0xb4   : > { %12234 = vmatprep.mubr.msk.f32.mxu0 %vm3289_vm2, %v694_v39 }
  0xb7   : > { %12235 = vmatmul.mubr.msk.f32.gmra.mrb[72].mxu0 %vm3289_vm2, %v695_v40 }
  0xb8   : > { %12237 = vmatprep.mubr.msk.f32.mxu0 %vm3289_vm2, %v696_v41 }
  0xbb   : > { %12238 = vmatmul.mubr.msk.f32.gmra.mrb[74].mxu0 %vm3289_vm2, %v697_v42 }
  0xbc   : > { %12240 = vmatprep.mubr.msk.f32.mxu0 %vm3289_vm2, %v698_v43 }
  0xbf   : > { %12241 = vmatmul.mubr.msk.f32.gmra.mrb[76].mxu0 %vm3289_vm2, %v699_v44 }
  0xc0   : > { %12243 = vmatprep.mubr.msk.f32.mxu0 %vm3289_vm2, %v700_v45  ;;  %v737_v45 = vld [vmem:[%s14436_s25 + $0x198] sm:$0xff] }
  0xc3   : > { %12244 = vmatmul.mubr.msk.f32.gmra.mrb[78].mxu0 %vm3289_vm2, %v701_v46 }
  0xc4   : > { %12246 = vmatprep.mubr.msk.f32.mxu0 %vm3289_vm2, %v702_v47  ;;  %v738_v47 = vld [vmem:[%s14436_s25 + $0x1a0] sm:$0xff] }
  0xc7   : > { %12247 = vmatmul.mubr.msk.f32.gmra.mrb[80].mxu0 %vm3289_vm2, %v703_v48 }
  0xc8   : > { %12249 = vmatprep.mubr.msk.f32.mxu0 %vm3289_vm2, %v704_v49 }
  0xcb   : > { %12250 = vmatmul.mubr.msk.f32.gmra.mrb[82].mxu0 %vm3289_vm2, %v705_v50 }
  0xcc   : > { %12252 = vmatprep.mubr.msk.f32.mxu0 %vm3289_vm2, %v706_v51 }
  0xcf   : > { %12253 = vmatmul.mubr.msk.f32.gmra.mrb[84].mxu0 %vm3289_vm2, %v707_v52 }
  0xd0   : > { %12255 = vmatprep.mubr.msk.f32.mxu0 %vm3289_vm2, %v708_v53 }
  0xd3   : > { %12256 = vmatmul.mubr.msk.f32.gmra.mrb[86].mxu0 %vm3289_vm2, %v709_v54 }
  0xd4   : > { %12258 = vmatprep.mubr.msk.f32.mxu0 %vm3289_vm2, %v710_v55  ;;  %v739_v55 = vld [vmem:[%s14436_s25 + $0x1a8] sm:$0xff] }
  0xd7   : > { %12259 = vmatmul.mubr.msk.f32.gmra.mrb[88].mxu0 %vm3289_vm2, %v711_v56 }
  0xd8   : > { %12261 = vmatprep.mubr.msk.f32.mxu0 %vm3289_vm2, %v712_v57  ;;  %v740_v57 = vld [vmem:[%s14436_s25 + $0x1b0] sm:$0xff] }
  0xdb   : > { %12262 = vmatmul.mubr.msk.f32.gmra.mrb[90].mxu0 %vm3289_vm2, %v713_v58 }
  0xdc   : > { %12264 = vmatprep.mubr.msk.f32.mxu0 %vm3289_vm2, %v714_v59 }
  0xdf   : > { %12265 = vmatmul.mubr.msk.f32.gmra.mrb[92].mxu0 %vm3289_vm2, %v715_v61 }
  0xe0   : > { %12267 = vmatprep.mubr.msk.f32.mxu0 %vm3289_vm2, %v716_v62 }
  0xe3   : > { %12268 = vmatmul.mubr.msk.f32.gmra.mrb[94].mxu0 %vm3289_vm2, %v717_v2  ;;  %v741_v2 = vld [vmem:[%s14436_s25 + $0x1b8] sm:$0xff] }
  0xe4   : > { %12270 = vmatprep.mubr.msk.f32.mxu0 %vm3289_vm2, %v718_v3 }
  0xe7   : > { %12271 = vmatmul.mubr.msk.f32.gmra.mrb[96].mxu0 %vm3289_vm2, %v719_v4  ;;  %v742_v4 = vld [vmem:[%s14436_s25 + $0x1c0] sm:$0xff] }
  0xe8   : > { %12273 = vmatprep.mubr.msk.f32.mxu0 %vm3289_vm2, %v720_v5 }
  0xeb   : > { %12274 = vmatmul.mubr.msk.f32.gmra.mrb[98].mxu0 %vm3289_vm2, %v721_v6 }
  0xec   : > { %12276 = vmatprep.mubr.msk.f32.mxu0 %vm3289_vm2, %v722_v7 }
  0xef   : > { %12277 = vmatmul.mubr.msk.f32.gmra.mrb[100].mxu0 %vm3289_vm2, %v723_v8 }
  0xf0   : > { %12279 = vmatprep.mubr.msk.f32.mxu0 %vm3289_vm2, %v724_v9 }
  0xf3   : > { %12280 = vmatmul.mubr.msk.f32.gmra.mrb[102].mxu0 %vm3289_vm2, %v725_v10 }
  0xf4   : > { %12282 = vmatprep.mubr.msk.f32.mxu0 %vm3289_vm2, %v726_v11 }
  0xf7   : > { %12283 = vmatmul.mubr.msk.f32.gmra.mrb[104].mxu0 %vm3289_vm2, %v727_v12  ;;  %v743_v12 = vld [vmem:[%s14436_s25 + $0x1c8] sm:$0xff] }
  0xf8   : > { %12285 = vmatprep.mubr.msk.f32.mxu0 %vm3289_vm2, %v728_v13 }
  0xfa   : > { %v11814_v17 = vpop.f32.mrb[0].mxu0  ;;  %v14589_v43 = vpop.f32.mrb[0].mxu1 }
  0xfb   : > { %v1282_v18 = vadd.f32 %v11814_v17, %v14560_v14  ;;  %v1276_v19 = vpop.f32.mrb[1].mxu0  ;;  %12286 = vmatmul.mubr.msk.f32.gmra.mrb[106].mxu0 %vm3289_vm2, %v729_v15  ;;  %v14595_v46 = vpop.f32.mrb[1].mxu1  ;;  %v744_v15 = vld [vmem:[%s14436_s25 + $0x1d0] sm:$0xff] }
  0xfc   : > { %v1277_v20 = vadd.f32 %v14560_v14, %v1276_v19  ;;  %12288 = vmatprep.mubr.msk.f32.mxu0 %vm3289_vm2, %v730_v16 }
  0xfd   : > { %v1916_v25 = vmax.f32 %v1282_v18, 0.0 }
  0xfe   : > { %v1915_v23 = vmax.f32 %v1277_v20, 0.0  ;;  %v11817_v24 = vpop.f32.mrb[2].mxu0  ;;  %v14601_v53 = vpop.f32.mrb[2].mxu1 }
  0xff   : > { %v1292_v26 = vadd.f32 %v11817_v24, %v14560_v14  ;;  %v1286_v27 = vpop.f32.mrb[3].mxu0  ;;  %12289 = vmatmul.mubr.msk.f32.gmra.mrb[108].mxu0 %vm3289_vm2, %v731_v21  ;;  %v14607_v56 = vpop.f32.mrb[3].mxu1 }
 0x100   : > { %v1287_v28 = vadd.f32 %v14560_v14, %v1286_v27  ;;  %12020 = vmatprep.mubr.msk.f32.mxu1 %vm2058_vm3, %v1915_v23  ;;  %12291 = vmatprep.mubr.msk.f32.mxu0 %vm3289_vm2, %v732_v22  ;;  %v745_v23 = vld [vmem:[%s14436_s25 + $0x1d8] sm:$0xff] }
 0x101   : > { %12021 = vmatmul.mubr.msk.f32.vlgmr.msra.gmra.mrb[64].mxu1 %vm2058_vm3, %v1916_v25  ;;  %v1918_v33 = vmax.f32 %v1292_v26, 0.0  ;;  %v746_v25 = vld [vmem:[%s14436_s25 + $0x1e0] sm:$0xff] }
 0x102   : > { %v1917_v31 = vmax.f32 %v1287_v28, 0.0  ;;  %v11820_v32 = vpop.f32.mrb[4].mxu0  ;;  %v14613_v0 = vpop.f32.mrb[4].mxu1  ;;  %v3282_v28 = vld [vmem:[%s17409_s6 + $0x30] sm:$0xff] }
 0x103   : > { %v1302_v34 = vadd.f32 %v11820_v32, %v14560_v14  ;;  %v1296_v35 = vpop.f32.mrb[5].mxu0  ;;  %12292 = vmatmul.mubr.msk.f32.gmra.mrb[110].mxu0 %vm3289_vm2, %v733_v29  ;;  %v14619_v3 = vpop.f32.mrb[5].mxu1  ;;  %v3283_v29 = vld [vmem:[%s17409_s6 + $0x38] sm:$0xff] }
 0x104   : > { %v1297_v60 = vadd.f32 %v14560_v14, %v1296_v35  ;;  %12023 = vmatprep.mubr.msk.f32.mxu1 %vm2058_vm3, %v1917_v31  ;;  %12294 = vmatprep.mubr.msk.f32.mxu0 %vm3289_vm2, %v734_v30 }
 0x105   : > { %12024 = vmatmul.mubr.msk.f32.gmra.mrb[66].mxu1 %vm2058_vm3, %v1918_v33  ;;  %v1920_v40 = vmax.f32 %v1302_v34, 0.0  ;;  %v13306_v34 = vpack.c.bf16 %v3283_v29, %v3282_v28 }
 0x106   : > { %v1919_v38 = vmax.f32 %v1297_v60, 0.0  ;;  %v11823_v39 = vpop.f32.mrb[6].mxu0  ;;  %v14625_v10 = vpop.f32.mrb[6].mxu1  ;;  %v747_v60 = vld [vmem:[%s14436_s25 + $0x1e8] sm:$0xff] }
 0x107   : > { %v1312_v41 = vadd.f32 %v11823_v39, %v14560_v14  ;;  %v1306_v42 = vpop.f32.mrb[7].mxu0  ;;  %12295 = vmatmul.mubr.msk.f32.gmra.mrb[112].mxu0 %vm3289_vm2, %v735_v36  ;;  %v14631_v13 = vpop.f32.mrb[7].mxu1  ;;  %13307 = vmatprep.subr.bf16.mxu0 %v13306_v34 }
 0x108   : > { %v1307_v44 = vadd.f32 %v14560_v14, %v1306_v42  ;;  %12026 = vmatprep.mubr.msk.f32.mxu1 %vm2058_vm3, %v1919_v38  ;;  %12297 = vmatprep.mubr.msk.f32.mxu0 %vm3289_vm2, %v736_v37  ;;  %v748_v37 = vld [vmem:[%s14436_s25 + $0x1f0] sm:$0xff] }
 0x109   : > { %12027 = vmatmul.mubr.msk.f32.gmra.mrb[68].mxu1 %vm2058_vm3, %v1920_v40  ;;  %v1922_v50 = vmax.f32 %v1312_v41, 0.0  ;;  %13309 = vmatpush3.bf16.msra.mxu0 %v13306_v34  ;;  %v757_v34 = vld [vmem:[%s14436_s25 + $0x238] sm:$0xff] }
 0x10a   : > { %v1921_v48 = vmax.f32 %v1307_v44, 0.0  ;;  %v11826_v49 = vpop.f32.mrb[8].mxu0  ;;  %v14637_v21 = vpop.f32.mrb[8].mxu1 }
 0x10b   : > { %v1322_v51 = vadd.f32 %v11826_v49, %v14560_v14  ;;  %v1316_v52 = vpop.f32.mrb[9].mxu0  ;;  %12298 = vmatmul.mubr.msk.f32.gmra.mrb[114].mxu0 %vm3289_vm2, %v737_v45  ;;  %v14643_v24 = vpop.f32.mrb[9].mxu1  ;;  %v750_v49 = vld [vmem:[%s14436_s25 + $0x200] sm:$0xff] }
 0x10c   : > { %v1317_v54 = vadd.f32 %v14560_v14, %v1316_v52  ;;  %12029 = vmatprep.mubr.msk.f32.mxu1 %vm2058_vm3, %v1921_v48  ;;  %12300 = vmatprep.mubr.msk.f32.mxu0 %vm3289_vm2, %v738_v47  ;;  %v749_v47 = vld [vmem:[%s14436_s25 + $0x1f8] sm:$0xff] }
 0x10d   : > { %12030 = vmatmul.mubr.msk.f32.gmra.mrb[70].mxu1 %vm2058_vm3, %v1922_v50  ;;  %v1924_v61 = vmax.f32 %v1322_v51, 0.0 }
 0x10e   : > { %v1923_v58 = vmax.f32 %v1317_v54, 0.0  ;;  %v11829_v59 = vpop.f32.mrb[10].mxu0  ;;  %v14655_v33 = vpop.f32.mrb[10].mxu1 }
 0x10f   : > { %v1332_v62 = vadd.f32 %v11829_v59, %v14560_v14  ;;  %v1326_v63 = vpop.f32.mrb[11].mxu0  ;;  %12301 = vmatmul.mubr.msk.f32.gmra.mrb[116].mxu0 %vm3289_vm2, %v739_v55  ;;  %v14661_v36 = vpop.f32.mrb[11].mxu1  ;;  %v751_v59 = vld [vmem:[%s14436_s25 + $0x208] sm:$0xff] }
 0x110   : > { %v1327_v1 = vadd.f32 %v14560_v14, %v1326_v63  ;;  %12032 = vmatprep.mubr.msk.f32.mxu1 %vm2058_vm3, %v1923_v58  ;;  %12303 = vmatprep.mubr.msk.f32.mxu0 %vm3289_vm2, %v740_v57 }
 0x111   : > { %12033 = vmatmul.mubr.msk.f32.gmra.mrb[72].mxu1 %vm2058_vm3, %v1924_v61  ;;  %v1926_v7 = vmax.f32 %v1332_v62, 0.0  ;;  %v752_v62 = vld [vmem:[%s14436_s25 + $0x210] sm:$0xff] }
 0x112   : > { %v1925_v5 = vmax.f32 %v1327_v1, 0.0  ;;  %v11832_v6 = vpop.f32.mrb[12].mxu0  ;;  %v14667_v44 = vpop.f32.mrb[12].mxu1 }
 0x113   : > { %v1342_v8 = vadd.f32 %v11832_v6, %v14560_v14  ;;  %v1336_v9 = vpop.f32.mrb[13].mxu0  ;;  %12304 = vmatmul.mubr.msk.f32.gmra.mrb[118].mxu0 %vm3289_vm2, %v741_v2  ;;  %v14673_v48 = vpop.f32.mrb[13].mxu1 }
 0x114   : > { %v1337_v11 = vadd.f32 %v14560_v14, %v1336_v9  ;;  %12035 = vmatprep.mubr.msk.f32.mxu1 %vm2058_vm3, %v1925_v5  ;;  %12306 = vmatprep.mubr.msk.f32.mxu0 %vm3289_vm2, %v742_v4 }
 0x115   : > { %12036 = vmatmul.mubr.msk.f32.gmra.mrb[74].mxu1 %vm2058_vm3, %v1926_v7  ;;  %v1928_v18 = vmax.f32 %v1342_v8, 0.0  ;;  %v753_v8 = vld [vmem:[%s14436_s25 + $0x218] sm:$0xff] }
 0x116   : > { %v1927_v16 = vmax.f32 %v1337_v11, 0.0  ;;  %v11835_v17 = vpop.f32.mrb[14].mxu0  ;;  %v14679_v57 = vpop.f32.mrb[14].mxu1  ;;  %v754_v11 = vld [vmem:[%s14436_s25 + $0x220] sm:$0xff] }
 0x117   : > { %v1352_v19 = vadd.f32 %v11835_v17, %v14560_v14  ;;  %v1346_v20 = vpop.f32.mrb[15].mxu0  ;;  %12307 = vmatmul.mubr.msk.f32.gmra.mrb[120].mxu0 %vm3289_vm2, %v743_v12  ;;  %v14685_v61 = vpop.f32.mrb[15].mxu1 }
 0x118   : > { %v1347_v22 = vadd.f32 %v14560_v14, %v1346_v20  ;;  %12038 = vmatprep.mubr.msk.f32.mxu1 %vm2058_vm3, %v1927_v16  ;;  %12309 = vmatprep.mubr.msk.f32.mxu0 %vm3289_vm2, %v744_v15 }
 0x119   : > { %12039 = vmatmul.mubr.msk.f32.gmra.mrb[76].mxu1 %vm2058_vm3, %v1928_v18  ;;  %v1930_v30 = vmax.f32 %v1352_v19, 0.0 }
 0x11a   : > { %v1929_v26 = vmax.f32 %v1347_v22, 0.0  ;;  %v11838_v27 = vpop.f32.mrb[16].mxu0  ;;  %v14691_v6 = vpop.f32.mrb[16].mxu1  ;;  %v755_v22 = vld [vmem:[%s14436_s25 + $0x228] sm:$0xff] }
 0x11b   : > { %v1362_v31 = vadd.f32 %v11838_v27, %v14560_v14  ;;  %v1356_v32 = vpop.f32.mrb[17].mxu0  ;;  %12310 = vmatmul.mubr.msk.f32.gmra.mrb[122].mxu0 %vm3289_vm2, %v745_v23  ;;  %v14697_v9 = vpop.f32.mrb[17].mxu1 }
 0x11c   : > { %v1357_v35 = vadd.f32 %v14560_v14, %v1356_v32  ;;  %12041 = vmatprep.mubr.msk.f32.mxu1 %vm2058_vm3, %v1929_v26  ;;  %12312 = vmatprep.mubr.msk.f32.mxu0 %vm3289_vm2, %v746_v25  ;;  %v756_v25 = vld [vmem:[%s14436_s25 + $0x230] sm:$0xff] }
 0x11d   : > { %12042 = vmatmul.mubr.msk.f32.gmra.mrb[78].mxu1 %vm2058_vm3, %v1930_v30  ;;  %v1932_v40 = vmax.f32 %v1362_v31, 0.0 }
 0x11e   : > { %v1931_v38 = vmax.f32 %v1357_v35, 0.0  ;;  %v11841_v39 = vpop.f32.mrb[18].mxu0  ;;  %v14703_v19 = vpop.f32.mrb[18].mxu1 }
 0x11f   : > { %v1372_v41 = vadd.f32 %v11841_v39, %v14560_v14  ;;  %v1366_v42 = vpop.f32.mrb[19].mxu0  ;;  %12313 = vmatmul.mubr.msk.f32.gmra.mrb[124].mxu0 %vm3289_vm2, %v747_v60  ;;  %v14709_v23 = vpop.f32.mrb[19].mxu1  ;;  %v758_v60 = vld [vmem:[%s14436_s25 + $0x240] sm:$0xff] }
 0x120   : > { %v1367_v45 = vadd.f32 %v14560_v14, %v1366_v42  ;;  %12044 = vmatprep.mubr.msk.f32.mxu1 %vm2058_vm3, %v1931_v38  ;;  %12315 = vmatprep.mubr.msk.f32.mxu0 %vm3289_vm2, %v748_v37  ;;  %v5735_v39 = vld [vmem:[%s17412_s9] sm:$0xff] }
 0x121   : > { %12045 = vmatmul.mubr.msk.f32.gmra.mrb[80].mxu1 %vm2058_vm3, %v1932_v40  ;;  %v1934_v52 = vmax.f32 %v1372_v41, 0.0  ;;  %v5736_v40 = vld [vmem:[%s17412_s9 + $0x8] sm:$0xff] }
 0x122   : > { %v1933_v50 = vmax.f32 %v1367_v45, 0.0  ;;  %v11844_v51 = vpop.f32.mrb[20].mxu0  ;;  %v14715_v31 = vpop.f32.mrb[20].mxu1 }
 0x123   : > { %v1382_v54 = vadd.f32 %v11844_v51, %v14560_v14  ;;  %v1376_v55 = vpop.f32.mrb[21].mxu0  ;;  %12316 = vmatmul.mubr.msk.f32.gmra.mrb[126].mxu0 %vm3289_vm2, %v749_v47  ;;  %v14721_v35 = vpop.f32.mrb[21].mxu1  ;;  %v759_v51 = vld [vmem:[%s14436_s25 + $0x248] sm:$0xff] }
 0x124   : > { %v1377_v58 = vadd.f32 %v14560_v14, %v1376_v55  ;;  %12047 = vmatprep.mubr.msk.f32.mxu1 %vm2058_vm3, %v1933_v50  ;;  %12318 = vmatprep.mubr.msk.f32.mxu0 %vm3289_vm2, %v750_v49  ;;  %v13310_v49 = vpack.c.bf16 %v5736_v40, %v5735_v39 }
 0x125   : > { %12048 = vmatmul.mubr.msk.f32.gmra.mrb[82].mxu1 %vm2058_vm3, %v1934_v52  ;;  %v1936_v2 = vmax.f32 %v1382_v54, 0.0  ;;  %v760_v54 = vld [vmem:[%s14436_s25 + $0x250] sm:$0xff] }
 0x126   : > { %v1935_v63 = vmax.f32 %v1377_v58, 0.0  ;;  %v11847_v1 = vpop.f32.mrb[22].mxu0  ;;  %v14733_v47 = vpop.f32.mrb[22].mxu1  ;;  %13311 = vmatprep.subr.bf16.mxu1 %v13310_v49 }
 0x127   : > { %v1392_v4 = vadd.f32 %v11847_v1, %v14560_v14  ;;  %v1386_v5 = vpop.f32.mrb[23].mxu0  ;;  %12319 = vmatmul.mubr.msk.f32.gmra.mrb[128].mxu0 %vm3289_vm2, %v751_v59  ;;  %v14739_v52 = vpop.f32.mrb[23].mxu1  ;;  %13313 = vmatpush3.bf16.msra.mxu1 %v13310_v49 }
 0x128   : > { %v1387_v7 = vadd.f32 %v14560_v14, %v1386_v5  ;;  %12050 = vmatprep.mubr.msk.f32.mxu1 %vm2058_vm3, %v1935_v63  ;;  %12321 = vmatprep.mubr.msk.f32.mxu0 %vm3289_vm2, %v752_v62 }
 0x129   : > { %12051 = vmatmul.mubr.msk.f32.gmra.mrb[84].mxu1 %vm2058_vm3, %v1936_v2  ;;  %v1938_v16 = vmax.f32 %v1392_v4, 0.0  ;;  %v761_v4 = vld [vmem:[%s14436_s25 + $0x258] sm:$0xff] }
 0x12a   : > { %v1937_v12 = vmax.f32 %v1387_v7, 0.0  ;;  %v11850_v15 = vpop.f32.mrb[24].mxu0  ;;  %v14745_v1 = vpop.f32.mrb[24].mxu1  ;;  %v762_v7 = vld [vmem:[%s14436_s25 + $0x260] sm:$0xff] }
 0x12b   : > { %v1402_v17 = vadd.f32 %v11850_v15, %v14560_v14  ;;  %v1396_v18 = vpop.f32.mrb[25].mxu0  ;;  %12322 = vmatmul.mubr.msk.f32.gmra.mrb[130].mxu0 %vm3289_vm2, %v753_v8  ;;  %v14751_v5 = vpop.f32.mrb[25].mxu1 }
 0x12c   : > { %v1397_v20 = vadd.f32 %v14560_v14, %v1396_v18  ;;  %12053 = vmatprep.mubr.msk.f32.mxu1 %vm2058_vm3, %v1937_v12  ;;  %12324 = vmatprep.mubr.msk.f32.mxu0 %vm3289_vm2, %v754_v11 }
 0x12d   : > { %12054 = vmatmul.mubr.msk.f32.gmra.mrb[86].mxu1 %vm2058_vm3, %v1938_v16  ;;  %v1940_v28 = vmax.f32 %v1402_v17, 0.0 }
 0x12e   : > { %v1939_v26 = vmax.f32 %v1397_v20, 0.0  ;;  %v11853_v27 = vpop.f32.mrb[26].mxu0  ;;  %v14757_v17 = vpop.f32.mrb[26].mxu1  ;;  %v763_v20 = vld [vmem:[%s14436_s25 + $0x268] sm:$0xff] }
 0x12f   : > { %v1412_v29 = vadd.f32 %v11853_v27, %v14560_v14  ;;  %v1406_v30 = vpop.f32.mrb[27].mxu0  ;;  %12325 = vmatmul.mubr.msk.f32.gmra.mrb[132].mxu0 %vm3289_vm2, %v755_v22  ;;  %v14763_v22 = vpop.f32.mrb[27].mxu1 }
 0x130   : > { %v1407_v32 = vadd.f32 %v14560_v14, %v1406_v30  ;;  %12056 = vmatprep.mubr.msk.f32.mxu1 %vm2058_vm3, %v1939_v26  ;;  %12327 = vmatprep.mubr.msk.f32.mxu0 %vm3289_vm2, %v756_v25  ;;  %v764_v25 = vld [vmem:[%s14436_s25 + $0x270] sm:$0xff] }
 0x131   : > { %12057 = vmatmul.mubr.msk.f32.gmra.mrb[88].mxu1 %vm2058_vm3, %v1940_v28  ;;  %v1942_v41 = vmax.f32 %v1412_v29, 0.0 }
 0x132   : > { %v1941_v37 = vmax.f32 %v1407_v32, 0.0  ;;  %v11856_v38 = vpop.f32.mrb[28].mxu0  ;;  %v14769_v32 = vpop.f32.mrb[28].mxu1 }
 0x133   : > { %v1422_v42 = vadd.f32 %v11856_v38, %v14560_v14  ;;  %v1416_v45 = vpop.f32.mrb[29].mxu0  ;;  %12328 = vmatmul.mubr.msk.f32.gmra.mrb[134].mxu0 %vm3289_vm2, %v757_v34  ;;  %v766_v38 = vld [vmem:[%s14436_s25 + $0x280] sm:$0xff] }
 0x134   : > { %v1417_v50 = vadd.f32 %v14560_v14, %v1416_v45  ;;  %12059 = vmatprep.mubr.msk.f32.mxu1 %vm2058_vm3, %v1941_v37  ;;  %12330 = vmatprep.mubr.msk.f32.mxu0 %vm3289_vm2, %v758_v60  ;;  %v765_v60 = vld [vmem:[%s14436_s25 + $0x278] sm:$0xff]  ;;  %v14775_v37 = vpop.f32.mrb[29].mxu1 }
 0x135   : > { %12060 = vmatmul.mubr.msk.f32.gmra.mrb[90].mxu1 %vm2058_vm3, %v1942_v41  ;;  %v1944_v59 = vmax.f32 %v1422_v42, 0.0 }
 0x136   : > { %v1943_v55 = vmax.f32 %v1417_v50, 0.0  ;;  %v11859_v58 = vpop.f32.mrb[30].mxu0  ;;  %v14781_v49 = vpop.f32.mrb[30].mxu1 }
 0x137   : > { %v1432_v62 = vadd.f32 %v11859_v58, %v14560_v14  ;;  %v1426_v63 = vpop.f32.mrb[31].mxu0  ;;  %12331 = vmatmul.mubr.msk.f32.gmra.mrb[136].mxu0 %vm3289_vm2, %v759_v51  ;;  %v767_v51 = vld [vmem:[%s14436_s25 + $0x288] sm:$0xff] }
 0x138   : > { %v1427_v2 = vadd.f32 %v14560_v14, %v1426_v63  ;;  %12062 = vmatprep.mubr.msk.f32.mxu1 %vm2058_vm3, %v1943_v55  ;;  %12333 = vmatprep.mubr.msk.f32.mxu0 %vm3289_vm2, %v760_v54  ;;  %v14787_v54 = vpop.f32.mrb[31].mxu1  ;;  %v768_v55 = vld [vmem:[%s14436_s25 + $0x290] sm:$0xff] }
 0x139   : > { %12063 = vmatmul.mubr.msk.f32.gmra.mrb[92].mxu1 %vm2058_vm3, %v1944_v59  ;;  %v1946_v12 = vmax.f32 %v1432_v62, 0.0 }
 0x13a   : > { %v1945_v8 = vmax.f32 %v1427_v2, 0.0  ;;  %v11862_v11 = vpop.f32.mrb[32].mxu0 }
 0x13b   : > { %v1442_v15 = vadd.f32 %v11862_v11, %v14560_v14  ;;  %v1436_v16 = vpop.f32.mrb[33].mxu0  ;;  %12334 = vmatmul.mubr.msk.f32.gmra.mrb[138].mxu0 %vm3289_vm2, %v761_v4  ;;  %v14793_v4 = vpop.f32.mrb[32].mxu1 }
 0x13c   : > { %v1437_v18 = vadd.f32 %v14560_v14, %v1436_v16  ;;  %12065 = vmatprep.mubr.msk.f32.mxu1 %vm2058_vm3, %v1945_v8  ;;  %12336 = vmatprep.mubr.msk.f32.mxu0 %vm3289_vm2, %v762_v7  ;;  %v769_v8 = vld [vmem:[%s14436_s25 + $0x298] sm:$0xff]  ;;  %v14799_v11 = vpop.f32.mrb[33].mxu1 }
 0x13d   : > { %12066 = vmatmul.mubr.msk.f32.gmra.mrb[94].mxu1 %vm2058_vm3, %v1946_v12  ;;  %v1948_v28 = vmax.f32 %v1442_v15, 0.0  ;;  %v770_v12 = vld [vmem:[%s14436_s25 + $0x2a0] sm:$0xff] }
 0x13e   : > { %v1947_v26 = vmax.f32 %v1437_v18, 0.0  ;;  %v11865_v27 = vpop.f32.mrb[34].mxu0 }
 0x13f   : > { %v1452_v29 = vadd.f32 %v11865_v27, %v14560_v14  ;;  %v1446_v30 = vpop.f32.mrb[35].mxu0  ;;  %12337 = vmatmul.mubr.msk.f32.gmra.mrb[140].mxu0 %vm3289_vm2, %v763_v20 }
 0x140   : > { %v1447_v34 = vadd.f32 %v14560_v14, %v1446_v30  ;;  %12068 = vmatprep.mubr.msk.f32.mxu1 %vm2058_vm3, %v1947_v26  ;;  %12339 = vmatprep.mubr.msk.f32.mxu0 %vm3289_vm2, %v764_v25  ;;  %v14805_v26 = vpop.f32.mrb[34].mxu1  ;;  %v772_v30 = vld [vmem:[%s14436_s25 + $0x2b0] sm:$0xff] }
 0x141   : > { %12069 = vmatmul.mubr.msk.f32.gmra.mrb[96].mxu1 %vm2058_vm3, %v1948_v28  ;;  %v1950_v41 = vmax.f32 %v1452_v29, 0.0  ;;  %v771_v28 = vld [vmem:[%s14436_s25 + $0x2a8] sm:$0xff]  ;;  %v14811_v29 = vpop.f32.mrb[35].mxu1 }
 0x142   : > { %v1949_v39 = vmax.f32 %v1447_v34, 0.0  ;;  %v11868_v40 = vpop.f32.mrb[36].mxu0 }
 0x143   : > { %v1462_v42 = vadd.f32 %v11868_v40, %v14560_v14  ;;  %v1456_v45 = vpop.f32.mrb[37].mxu0  ;;  %12340 = vmatmul.mubr.msk.f32.gmra.mrb[142].mxu0 %vm3289_vm2, %v765_v60 }
 0x144   : > { %v1457_v50 = vadd.f32 %v14560_v14, %v1456_v45  ;;  %12071 = vmatprep.mubr.msk.f32.mxu1 %vm2058_vm3, %v1949_v39  ;;  %12342 = vmatprep.mubr.msk.f32.mxu0 %vm3289_vm2, %v766_v38  ;;  %v773_v45 = vld [vmem:[%s14436_s25 + $0x2b8] sm:$0xff] }
 0x145   : > { %12072 = vmatmul.mubr.msk.f32.gmra.mrb[98].mxu1 %vm2058_vm3, %v1950_v41  ;;  %v1952_v62 = vmax.f32 %v1462_v42, 0.0  ;;  %v14817_v41 = vpop.f32.mrb[36].mxu1 }
 0x146   : > { %v1951_v58 = vmax.f32 %v1457_v50, 0.0  ;;  %v11871_v59 = vpop.f32.mrb[38].mxu0  ;;  %v14823_v50 = vpop.f32.mrb[37].mxu1 }
 0x147   : > { %v1472_v63 = vadd.f32 %v11871_v59, %v14560_v14  ;;  %v1466_v2 = vpop.f32.mrb[39].mxu0  ;;  %12343 = vmatmul.mubr.msk.f32.gmra.mrb[144].mxu0 %vm3289_vm2, %v767_v51  ;;  %v774_v51 = vld [vmem:[%s14436_s25 + $0x2c0] sm:$0xff] }
 0x148   : > { %v1467_v7 = vadd.f32 %v14560_v14, %v1466_v2  ;;  %12074 = vmatprep.mubr.msk.f32.mxu1 %vm2058_vm3, %v1951_v58  ;;  %12345 = vmatprep.mubr.msk.f32.mxu0 %vm3289_vm2, %v768_v55  ;;  %v14829_v2 = vpop.f32.mrb[38].mxu1 }
 0x149   : > { %12075 = vmatmul.mubr.msk.f32.gmra.mrb[100].mxu1 %vm2058_vm3, %v1952_v62  ;;  %v1954_v18 = vmax.f32 %v1472_v63, 0.0 }
 0x14a   : > { %v1953_v15 = vmax.f32 %v1467_v7, 0.0  ;;  %v11874_v16 = vpop.f32.mrb[40].mxu0 }
 0x14b   : > { %v1482_v20 = vadd.f32 %v11874_v16, %v14560_v14  ;;  %v1476_v25 = vpop.f32.mrb[41].mxu0  ;;  %12346 = vmatmul.mubr.msk.f32.gmra.mrb[146].mxu0 %vm3289_vm2, %v769_v8  ;;  %v775_v8 = vld [vmem:[%s14436_s25 + $0x2c8] sm:$0xff] }
 0x14c   : > { %v1477_v27 = vadd.f32 %v14560_v14, %v1476_v25  ;;  %12077 = vmatprep.mubr.msk.f32.mxu1 %vm2058_vm3, %v1953_v15  ;;  %12348 = vmatprep.mubr.msk.f32.mxu0 %vm3289_vm2, %v770_v12  ;;  %v14835_v12 = vpop.f32.mrb[39].mxu1  ;;  %v776_v15 = vld [vmem:[%s14436_s25 + $0x2d0] sm:$0xff] }
 0x14d   : > { %12078 = vmatmul.mubr.msk.f32.gmra.mrb[102].mxu1 %vm2058_vm3, %v1954_v18  ;;  %v1956_v38 = vmax.f32 %v1482_v20, 0.0 }
 0x14e   : > { %v1955_v34 = vmax.f32 %v1477_v27, 0.0  ;;  %v11877_v60 = vpop.f32.mrb[42].mxu0 }
 0x14f   : > { %v1492_v39 = vadd.f32 %v11877_v60, %v14560_v14  ;;  %v1486_v40 = vpop.f32.mrb[43].mxu0  ;;  %12349 = vmatmul.mubr.msk.f32.gmra.mrb[148].mxu0 %vm3289_vm2, %v771_v28  ;;  %v14841_v28 = vpop.f32.mrb[40].mxu1 }
 0x150   : > { %v1487_v42 = vadd.f32 %v14560_v14, %v1486_v40  ;;  %12080 = vmatprep.mubr.msk.f32.mxu1 %vm2058_vm3, %v1955_v34  ;;  %12351 = vmatprep.mubr.msk.f32.mxu0 %vm3289_vm2, %v772_v30  ;;  %v777_v34 = vld [vmem:[%s14436_s25 + $0x2d8] sm:$0xff]  ;;  %v14847_v60 = vpop.f32.mrb[41].mxu1 }
 0x151   : > { %12081 = vmatmul.mubr.msk.f32.gmra.mrb[104].mxu1 %vm2058_vm3, %v1956_v38  ;;  %v1958_v59 = vmax.f32 %v1492_v39, 0.0  ;;  %v778_v38 = vld [vmem:[%s14436_s25 + $0x2e0] sm:$0xff] }
 0x152   : > { %v1957_v55 = vmax.f32 %v1487_v42, 0.0  ;;  %v11880_v58 = vpop.f32.mrb[44].mxu0 }
 0x153   : > { %v1502_v62 = vadd.f32 %v11880_v58, %v14560_v14  ;;  %v1496_v63 = vpop.f32.mrb[45].mxu0  ;;  %12352 = vmatmul.mubr.msk.f32.gmra.mrb[150].mxu0 %vm3289_vm2, %v773_v45 }
 0x154   : > { %v1497_v7 = vadd.f32 %v14560_v14, %v1496_v63  ;;  %12083 = vmatprep.mubr.msk.f32.mxu1 %vm2058_vm3, %v1957_v55  ;;  %12354 = vmatprep.mubr.msk.f32.mxu0 %vm3289_vm2, %v774_v51  ;;  %v14853_v55 = vpop.f32.mrb[42].mxu1  ;;  %v780_v63 = vld [vmem:[%s14436_s25 + $0x2f0] sm:$0xff] }
 0x155   : > { %12084 = vmatmul.mubr.msk.f32.gmra.mrb[106].mxu1 %vm2058_vm3, %v1958_v59  ;;  %v1960_v20 = vmax.f32 %v1502_v62, 0.0  ;;  %v779_v59 = vld [vmem:[%s14436_s25 + $0x2e8] sm:$0xff]  ;;  %v14859_v62 = vpop.f32.mrb[43].mxu1 }
 0x156   : > { %v1959_v16 = vmax.f32 %v1497_v7, 0.0  ;;  %v11883_v18 = vpop.f32.mrb[46].mxu0 }
 0x157   : > { %v1512_v25 = vadd.f32 %v11883_v18, %v14560_v14  ;;  %v1506_v27 = vpop.f32.mrb[47].mxu0  ;;  %12355 = vmatmul.mubr.msk.f32.gmra.mrb[152].mxu0 %vm3289_vm2, %v775_v8 }
 0x158   : > { %v1507_v30 = vadd.f32 %v14560_v14, %v1506_v27  ;;  %12086 = vmatprep.mubr.msk.f32.mxu1 %vm2058_vm3, %v1959_v16  ;;  %12357 = vmatprep.mubr.msk.f32.mxu0 %vm3289_vm2, %v776_v15  ;;  %v781_v27 = vld [vmem:[%s14436_s25 + $0x2f8] sm:$0xff] }
 0x159   : > { %12087 = vmatmul.mubr.msk.f32.gmra.mrb[108].mxu1 %vm2058_vm3, %v1960_v20  ;;  %v1962_v42 = vmax.f32 %v1512_v25, 0.0  ;;  %v14865_v20 = vpop.f32.mrb[44].mxu1 }
 0x15a   : > { %v1961_v39 = vmax.f32 %v1507_v30, 0.0  ;;  %v11886_v40 = vpop.f32.mrb[48].mxu0  ;;  %v14871_v30 = vpop.f32.mrb[45].mxu1 }
 0x15b   : > { %v1522_v45 = vadd.f32 %v11886_v40, %v14560_v14  ;;  %v1516_v51 = vpop.f32.mrb[49].mxu0  ;;  %12358 = vmatmul.mubr.msk.f32.gmra.mrb[154].mxu0 %vm3289_vm2, %v777_v34  ;;  %v782_v34 = vld [vmem:[%s14436_s25 + $0x300] sm:$0xff] }
 0x15c   : > { %v1517_v58 = vadd.f32 %v14560_v14, %v1516_v51  ;;  %12089 = vmatprep.mubr.msk.f32.mxu1 %vm2058_vm3, %v1961_v39  ;;  %12360 = vmatprep.mubr.msk.f32.mxu0 %vm3289_vm2, %v778_v38  ;;  %v14877_v51 = vpop.f32.mrb[46].mxu1 }
 0x15d   : > { %12090 = vmatmul.mubr.msk.f32.gmra.mrb[110].mxu1 %vm2058_vm3, %v1962_v42  ;;  %v1964_v15 = vmax.f32 %v1522_v45, 0.0 }
 0x15e   : > { %v1963_v7 = vmax.f32 %v1517_v58, 0.0  ;;  %v11889_v8 = vpop.f32.mrb[50].mxu0 }
 0x15f   : > { %v1532_v16 = vadd.f32 %v11889_v8, %v14560_v14  ;;  %v1526_v18 = vpop.f32.mrb[51].mxu0  ;;  %12361 = vmatmul.mubr.msk.f32.gmra.mrb[156].mxu0 %vm3289_vm2, %v779_v59  ;;  %v783_v59 = vld [vmem:[%s14436_s25 + $0x308] sm:$0xff] }
 0x160   : > { %v1527_v25 = vadd.f32 %v14560_v14, %v1526_v18  ;;  %12092 = vmatprep.mubr.msk.f32.mxu1 %vm2058_vm3, %v1963_v7  ;;  %12363 = vmatprep.mubr.msk.f32.mxu0 %vm3289_vm2, %v780_v63  ;;  %v14883_v63 = vpop.f32.mrb[47].mxu1  ;;  %v784_v7 = vld [vmem:[%s14436_s25 + $0x310] sm:$0xff] }
 0x161   : > { %12093 = vmatmul.mubr.msk.f32.gmra.mrb[112].mxu1 %vm2058_vm3, %v1964_v15  ;;  %v1966_v40 = vmax.f32 %v1532_v16, 0.0 }
 0x162   : > { %v1965_v38 = vmax.f32 %v1527_v25, 0.0  ;;  %v11892_v39 = vpop.f32.mrb[52].mxu0 }
 0x163   : > { %v1542_v42 = vadd.f32 %v11892_v39, %v14560_v14  ;;  %v1536_v45 = vpop.f32.mrb[53].mxu0  ;;  %12364 = vmatmul.mubr.msk.f32.gmra.mrb[158].mxu0 %vm3289_vm2, %v781_v27  ;;  %v14889_v27 = vpop.f32.mrb[48].mxu1 }
 0x164   : > { %v1537_v58 = vadd.f32 %v14560_v14, %v1536_v45  ;;  %12095 = vmatprep.mubr.msk.f32.mxu1 %vm2058_vm3, %v1965_v38  ;;  %12366 = vmatprep.mubr.msk.f32.mxu0 %vm3289_vm2, %v782_v34  ;;  %17427 = vst [vmem:[#allocation4_spill] sm:$0xff] %v14889_v27  ;;  %v785_v34 = vld [vmem:[%s14436_s25 + $0x318] sm:$0xff]  ;;  %v14895_v39 = vpop.f32.mrb[49].mxu1 }
 0x165   : > { %12096 = vmatmul.mubr.msk.f32.gmra.mrb[114].mxu1 %vm2058_vm3, %v1966_v40  ;;  %v1968_v16 = vmax.f32 %v1542_v42, 0.0  ;;  %17428 = vst [vmem:[#allocation5_spill] sm:$0xff] %v14895_v39  ;;  %v786_v40 = vld [vmem:[%s14436_s25 + $0x320] sm:$0xff] }
 0x166   : > { %v1967_v8 = vmax.f32 %v1537_v58, 0.0  ;;  %v11895_v15 = vpop.f32.mrb[54].mxu0 }
 0x167   : > { %v1552_v18 = vadd.f32 %v11895_v15, %v14560_v14  ;;  %v1546_v25 = vpop.f32.mrb[55].mxu0  ;;  %12367 = vmatmul.mubr.msk.f32.gmra.mrb[160].mxu0 %vm3289_vm2, %v783_v59 }
 0x168   : > { %v1547_v38 = vadd.f32 %v14560_v14, %v1546_v25  ;;  %12098 = vmatprep.mubr.msk.f32.mxu1 %vm2058_vm3, %v1967_v8  ;;  %12369 = vmatprep.mubr.msk.f32.mxu0 %vm3289_vm2, %v784_v7  ;;  %v14901_v25 = vpop.f32.mrb[50].mxu1  ;;  %v787_v7 = vld [vmem:[%s14436_s25 + $0x328] sm:$0xff] }
 0x169   : > { %12099 = vmatmul.mubr.msk.f32.gmra.mrb[116].mxu1 %vm2058_vm3, %v1968_v16  ;;  %v1970_v58 = vmax.f32 %v1552_v18, 0.0  ;;  %17429 = vst [vmem:[#allocation6_spill] sm:$0xff] %v14901_v25  ;;  %v14907_v16 = vpop.f32.mrb[51].mxu1  ;;  %v788_v18 = vld [vmem:[%s14436_s25 + $0x330] sm:$0xff] }
 0x16a   : > { %v1969_v42 = vmax.f32 %v1547_v38, 0.0  ;;  %v11898_v45 = vpop.f32.mrb[56].mxu0  ;;  %17430 = vst [vmem:[#allocation7_spill] sm:$0xff] %v14907_v16 }
 0x16b   : > { %v1562_v59 = vadd.f32 %v11898_v45, %v14560_v14  ;;  %v1556_v15 = vpop.f32.mrb[57].mxu0  ;;  %12370 = vmatmul.mubr.msk.f32.gmra.mrb[162].mxu0 %vm3289_vm2, %v785_v34 }
 0x16c   : > { %v1557_v8 = vadd.f32 %v14560_v14, %v1556_v15  ;;  %12101 = vmatprep.mubr.msk.f32.mxu1 %vm2058_vm3, %v1969_v42  ;;  %12372 = vmatprep.mubr.msk.f32.mxu0 %vm3289_vm2, %v786_v40  ;;  %v14913_v15 = vpop.f32.mrb[52].mxu1  ;;  %v789_v40 = vld [vmem:[%s14436_s25 + $0x338] sm:$0xff] }
 0x16d   : > { %12102 = vmatmul.mubr.msk.f32.gmra.mrb[118].mxu1 %vm2058_vm3, %v1970_v58  ;;  %v1972_v27 = vmax.f32 %v1562_v59, 0.0  ;;  %17431 = vst [vmem:[#allocation8_spill] sm:$0xff] %v14913_v15  ;;  %v14919_v58 = vpop.f32.mrb[53].mxu1  ;;  %v790_v59 = vld [vmem:[%s14436_s25 + $0x340] sm:$0xff] }
 0x16e   : > { %v1971_v38 = vmax.f32 %v1557_v8, 0.0  ;;  %v11901_v45 = vpop.f32.mrb[58].mxu0  ;;  %17432 = vst [vmem:[#allocation9_spill] sm:$0xff] %v14919_v58 }
 0x16f   : > { %v1572_v34 = vadd.f32 %v11901_v45, %v14560_v14  ;;  %v1566_v25 = vpop.f32.mrb[59].mxu0  ;;  %12373 = vmatmul.mubr.msk.f32.gmra.mrb[164].mxu0 %vm3289_vm2, %v787_v7 }
 0x170   : > { %v1567_v42 = vadd.f32 %v14560_v14, %v1566_v25  ;;  %12104 = vmatprep.mubr.msk.f32.mxu1 %vm2058_vm3, %v1971_v38  ;;  %12375 = vmatprep.mubr.msk.f32.mxu0 %vm3289_vm2, %v788_v18  ;;  %v14925_v25 = vpop.f32.mrb[54].mxu1  ;;  %v791_v18 = vld [vmem:[%s14436_s25 + $0x348] sm:$0xff] }
 0x171   : > { %12105 = vmatmul.mubr.msk.f32.gmra.mrb[120].mxu1 %vm2058_vm3, %v1972_v27  ;;  %v1974_v16 = vmax.f32 %v1572_v34, 0.0  ;;  %17433 = vst [vmem:[#allocation10_spill] sm:$0xff] %v14925_v25  ;;  %v14931_v58 = vpop.f32.mrb[55].mxu1  ;;  %v792_v27 = vld [vmem:[%s14436_s25 + $0x350] sm:$0xff] }
 0x172   : > { %v1973_v8 = vmax.f32 %v1567_v42, 0.0  ;;  %v11904_v45 = vpop.f32.mrb[60].mxu0  ;;  %17434 = vst [vmem:[#allocation11_spill] sm:$0xff] %v14931_v58 }
 0x173   : > { %v1582_v7 = vadd.f32 %v11904_v45, %v14560_v14  ;;  %v1576_v15 = vpop.f32.mrb[61].mxu0  ;;  %12376 = vmatmul.mubr.msk.f32.gmra.mrb[166].mxu0 %vm3289_vm2, %v789_v40 }
 0x174   : > { %v1577_v38 = vadd.f32 %v14560_v14, %v1576_v15  ;;  %12107 = vmatprep.mubr.msk.f32.mxu1 %vm2058_vm3, %v1973_v8  ;;  %12378 = vmatprep.mubr.msk.f32.mxu0 %vm3289_vm2, %v790_v59  ;;  %v14937_v15 = vpop.f32.mrb[56].mxu1  ;;  %v5737_v59 = vld [vmem:[%s17412_s9 + $0x10] sm:$0xff]  ;;  %v1597_v8 = vadd.f32 %v14560_v14, %v14595_v46  ;;  %v1602_v46 = vadd.f32 %v14589_v43, %v14560_v14 }
 0x175   : > { %12108 = vmatmul.mubr.msk.f32.gmra.mrb[122].mxu1 %vm2058_vm3, %v1974_v16  ;;  %v1976_v45 = vmax.f32 %v1582_v7, 0.0  ;;  %17435 = vst [vmem:[#allocation12_spill] sm:$0xff] %v14937_v15  ;;  %v5738_v16 = vld [vmem:[%s17412_s9 + $0x18] sm:$0xff]  ;;  %v794_v15 = vld [vmem:[%s14436_s25 + $0x360] sm:$0xff]  ;;  %v796_v43 = vld [vmem:[%s14436_s25 + $0x370] sm:$0xff] }
 0x176   : > { %v1975_v34 = vmax.f32 %v1577_v38, 0.0  ;;  %v11907_v42 = vpop.f32.mrb[62].mxu0  ;;  %v793_v38 = vld [vmem:[%s14436_s25 + $0x358] sm:$0xff] }
 0x177   : > { %v1592_v40 = vadd.f32 %v11907_v42, %v14560_v14  ;;  %v1586_v25 = vpop.f32.mrb[63].mxu0  ;;  %12379 = vmatmul.mubr.msk.f32.gmra.mrb[168].mxu0 %vm3289_vm2, %v791_v18  ;;  %v14951_v18 = vpop.f32.mrb[57].mxu1  ;;  %v13314_v42 = vpack.c.bf16 %v5738_v16, %v5737_v59  ;;  %v1980_v59 = vmax.f32 %v1602_v46, 0.0  ;;  %v1612_v16 = vadd.f32 %v14601_v53, %v14560_v14  ;;  %v799_v46 = vld [vmem:[%s14436_s25 + $0x388] sm:$0xff] }
 0x178   : > { %v1587_v7 = vadd.f32 %v14560_v14, %v1586_v25  ;;  %12110 = vmatprep.mubr.msk.f32.mxu1 %vm2058_vm3, %v1975_v34  ;;  %12381 = vmatprep.mubr.msk.f32.mxu0 %vm3289_vm2, %v792_v27  ;;  %v1979_v25 = vmax.f32 %v1597_v8, 0.0  ;;  %v1607_v27 = vadd.f32 %v14560_v14, %v14607_v56  ;;  %v795_v34 = vld [vmem:[%s14436_s25 + $0x368] sm:$0xff]  ;;  %v798_v8 = vld [vmem:[%s14436_s25 + $0x380] sm:$0xff] }
 0x179   : > { %12111 = vmatmul.mubr.msk.f32.gmra.mrb[124].mxu1 %vm2058_vm3, %v1976_v45  ;;  %13315 = vmatprep.subr.bf16.mxu1 %v13314_v42  ;;  %v1978_v39 = vmax.f32 %v1592_v40, 0.0  ;;  %v14963_v45 = vpop.f32.mrb[58].mxu1  ;;  %v1982_v53 = vmax.f32 %v1612_v16, 0.0  ;;  %v801_v16 = vld [vmem:[%s14436_s25 + $0x398] sm:$0xff] }
 0x17a   : > { %v1977_v58 = vmax.f32 %v1587_v7, 0.0  ;;  %13317 = vmatpush3.bf16.msra.mxu1 %v13314_v42  ;;  %v14967_v40 = vpop.f32.mrb[59].mxu1  ;;  %v1981_v56 = vmax.f32 %v1607_v27, 0.0  ;;  %v1627_v42 = vadd.f32 %v14560_v14, %v14631_v13  ;;  %v800_v27 = vld [vmem:[%s14436_s25 + $0x390] sm:$0xff] }
 0x17b   : > { %12382 = vmatmul.mubr.msk.f32.gmra.mrb[170].mxu0 %vm3289_vm2, %v793_v38  ;;  %v1622_v38 = vadd.f32 %v14613_v0, %v14560_v14 }
 0x17c   : > { %12113 = vmatprep.mubr.msk.f32.mxu1 %vm2058_vm3, %v1977_v58  ;;  %12384 = vmatprep.mubr.msk.f32.mxu0 %vm3289_vm2, %v794_v15  ;;  %v1617_v58 = vadd.f32 %v14560_v14, %v14619_v3  ;;  %v14977_v15 = vpop.f32.mrb[60].mxu1  ;;  %v1985_v13 = vmax.f32 %v1627_v42, 0.0  ;;  %v805_v42 = vld [vmem:[%s14436_s25 + $0x3b8] sm:$0xff] }
 0x17d   : > { %12114 = vmatmul.mubr.msk.f32.gmra.mrb[126].mxu1 %vm2058_vm3, %v1978_v39  ;;  %v797_v39 = vld [vmem:[%s14436_s25 + $0x378] sm:$0xff]  ;;  %v14981_v7 = vpop.f32.mrb[61].mxu1  ;;  %v1984_v0 = vmax.f32 %v1622_v38, 0.0 }
 0x17e   : > { %12116 = vmatprep.mubr.msk.f32.mxu1 %vm2058_vm3, %v1979_v25  ;;  %v1983_v3 = vmax.f32 %v1617_v58, 0.0  ;;  %v14991_v25 = vpop.f32.mrb[62].mxu1 }
 0x17f   : > { %12385 = vmatmul.mubr.msk.f32.gmra.mrb[172].mxu0 %vm3289_vm2, %v795_v34  ;;  %v14995_v34 = vpop.f32.mrb[63].mxu1 }
 0x180   : > { %12387 = vmatprep.mubr.msk.f32.mxu0 %vm3289_vm2, %v796_v43  ;;  %v1632_v43 = vadd.f32 %v14625_v10, %v14560_v14 }
 0x181   : > { %12117 = vmatmul.mubr.msk.f32.gmra.mrb[128].mxu1 %vm2058_vm3, %v1980_v59  ;;  %v1637_v59 = vadd.f32 %v14560_v14, %v14643_v24  ;;  %v1647_v24 = vadd.f32 %v14560_v14, %v14661_v36 }
 0x182   : > { %12119 = vmatprep.mubr.msk.f32.mxu1 %vm2058_vm3, %v1981_v56  ;;  %v802_v56 = vld [vmem:[%s14436_s25 + $0x3a0] sm:$0xff]  ;;  %v1986_v58 = vmax.f32 %v1632_v43, 0.0  ;;  %v807_v43 = vld [vmem:[%s14436_s25 + $0x3c8] sm:$0xff] }
 0x183   : > { %12388 = vmatmul.mubr.msk.f32.gmra.mrb[174].mxu0 %vm3289_vm2, %v797_v39  ;;  %v1642_v39 = vadd.f32 %v14637_v21, %v14560_v14  ;;  %v1987_v10 = vmax.f32 %v1637_v59, 0.0  ;;  %v15021_v21 = vld [vmem:[%s17406_s3] ss:$0 sm:$0xff]  ;;  %v1989_v14 = vmax.f32 %v1647_v24, 0.0 }
 0x184   : > { %12390 = vmatprep.mubr.msk.f32.mxu0 %vm3289_vm2, %v798_v8  ;;  %v803_v8 = vld [vmem:[%s14436_s25 + $0x3a8] sm:$0xff]  ;;  %v1657_v36 = vadd.f32 %v15021_v21, %v14673_v48  ;;  %v1667_v48 = vadd.f32 %v15021_v21, %v14685_v61  ;;  %v1677_v61 = vadd.f32 %v15021_v21, %v14697_v9  ;;  %v1687_v24 = vadd.f32 %v15021_v21, %v14709_v23  ;;  %v813_v23 = vld [vmem:[%s14436_s25 + $0x3f8] sm:$0xff] }
 0x185   : > { %12120 = vmatmul.mubr.msk.f32.gmra.mrb[130].mxu1 %vm2058_vm3, %v1982_v53  ;;  %v804_v53 = vld [vmem:[%s14436_s25 + $0x3b0] sm:$0xff]  ;;  %v1988_v38 = vmax.f32 %v1642_v39, 0.0  ;;  %v811_v9 = vld [vmem:[%s14436_s25 + $0x3e8] sm:$0xff] }
 0x186   : > { %12122 = vmatprep.mubr.msk.f32.mxu1 %vm2058_vm3, %v1983_v3  ;;  %v1652_v3 = vadd.f32 %v15021_v21, %v14655_v33  ;;  %v1662_v33 = vadd.f32 %v15021_v21, %v14667_v44  ;;  %v1672_v44 = vadd.f32 %v15021_v21, %v14679_v57  ;;  %v1682_v57 = vadd.f32 %v15021_v21, %v14691_v6 }
 0x187   : > { %12391 = vmatmul.mubr.msk.f32.gmra.mrb[176].mxu0 %vm3289_vm2, %v799_v46  ;;  %v806_v46 = vld [vmem:[%s14436_s25 + $0x3c0] sm:$0xff]  ;;  %v1997_v6 = vmax.f32 %v1687_v24, 0.0 }
 0x188   : > { %12393 = vmatprep.mubr.msk.f32.mxu0 %vm3289_vm2, %v800_v27  ;;  %v1990_v27 = vmax.f32 %v1652_v3, 0.0  ;;  %v1992_v59 = vmax.f32 %v1662_v33, 0.0  ;;  %v1994_v39 = vmax.f32 %v1672_v44, 0.0  ;;  %v1697_v3 = vadd.f32 %v15021_v21, %v14721_v35 }
 0x189   : > { %12123 = vmatmul.mubr.msk.f32.gmra.mrb[132].mxu1 %vm2058_vm3, %v1984_v0  ;;  %v1991_v0 = vmax.f32 %v1657_v36, 0.0  ;;  %v1702_v36 = vadd.f32 %v15021_v21, %v14715_v31  ;;  %v1717_v33 = vadd.f32 %v15021_v21, %v14751_v5  ;;  %v1732_v5 = vadd.f32 %v15021_v21, %v14757_v17 }
 0x18a   : > { %12125 = vmatprep.mubr.msk.f32.mxu1 %vm2058_vm3, %v1985_v13  ;;  %v808_v13 = vld [vmem:[%s14436_s25 + $0x3d0] sm:$0xff]  ;;  %v1747_v44 = vadd.f32 %v15021_v21, %v14787_v54  ;;  %v1757_v54 = vadd.f32 %v15021_v21, %v14799_v11 }
 0x18b   : > { %12394 = vmatmul.mubr.msk.f32.gmra.mrb[178].mxu0 %vm3289_vm2, %v801_v16  ;;  %v1993_v16 = vmax.f32 %v1667_v48, 0.0  ;;  %v2000_v35 = vmax.f32 %v1702_v36, 0.0  ;;  %v1727_v48 = vadd.f32 %v15021_v21, %v14763_v22  ;;  %v1742_v22 = vadd.f32 %v15021_v21, %v14769_v32  ;;  %v5740_v32 = vld [vmem:[%s17412_s9 + $0x28] sm:$0xff] }
 0x18c   : > { %12396 = vmatprep.mubr.msk.f32.mxu0 %vm3289_vm2, %v802_v56  ;;  %v809_v56 = vld [vmem:[%s14436_s25 + $0x3d8] sm:$0xff]  ;;  %v1817_v36 = vadd.f32 %v15021_v21, %v14871_v30 }
 0x18d   : > { %12126 = vmatmul.mubr.msk.f32.gmra.mrb[134].mxu1 %vm2058_vm3, %v1986_v58  ;;  %v810_v58 = vld [vmem:[%s14436_s25 + $0x3e0] sm:$0xff]  ;;  %v2008_v17 = vmax.f32 %v1742_v22, 0.0 }
 0x18e   : > { %12128 = vmatprep.mubr.msk.f32.mxu1 %vm2058_vm3, %v1987_v10  ;;  %v1995_v10 = vmax.f32 %v1677_v61, 0.0  ;;  %v2009_v61 = vmax.f32 %v1747_v44, 0.0  ;;  %v17437_v22 = vld [vmem:[#allocation4_spill] sm:$0xff] }
 0x18f   : > { %12397 = vmatmul.mubr.msk.f32.gmra.mrb[180].mxu0 %vm3289_vm2, %v803_v8  ;;  %v812_v8 = vld [vmem:[%s14436_s25 + $0x3f0] sm:$0xff]  ;;  %s9576_s25 = ssub.s32 (%p14115_p4), 375, %s14129_s23 }
 0x190   : > { %12399 = vmatprep.mubr.msk.f32.mxu0 %vm3289_vm2, %v804_v53  ;;  %v1996_v53 = vmax.f32 %v1682_v57, 0.0  ;;  %v1767_v57 = vadd.f32 %v15021_v21, %v14811_v29  ;;  %v1782_v29 = vadd.f32 %v15021_v21, %v14817_v41  ;;  %p9577_p8 = scmp.lt.s32.totalorder (%p14115_p4), %s9576_s25, 128 }
 0x191   : > { %12129 = vmatmul.mubr.msk.f32.gmra.mrb[136].mxu1 %vm2058_vm3, %v1988_v38  ;;  %v1692_v38 = vadd.f32 %v15021_v21, %v14703_v19  ;;  %v1999_v19 = vmax.f32 %v1697_v3, 0.0 }
 0x192   : > { %12131 = vmatprep.mubr.msk.f32.mxu1 %vm2058_vm3, %v1989_v14  ;;  %v2013_v24 = vmax.f32 %v1767_v57, 0.0  ;;  %v17439_v57 = vld [vmem:[#allocation6_spill] sm:$0xff] }
 0x193   : > { %12400 = vmatmul.mubr.msk.f32.gmra.mrb[182].mxu0 %vm3289_vm2, %v805_v42  ;;  %v1998_v14 = vmax.f32 %v1692_v38, 0.0  ;;  %v1707_v42 = vadd.f32 %v15021_v21, %v14739_v52  ;;  %v1722_v52 = vadd.f32 %v15021_v21, %v14745_v1  ;;  %v2006_v1 = vmax.f32 %v1732_v5, 0.0 }
 0x194   : > { %12402 = vmatprep.mubr.msk.f32.mxu0 %vm3289_vm2, %v806_v46  ;;  %v1712_v46 = vadd.f32 %v15021_v21, %v14733_v47 }
 0x195   : > { %12132 = vmatmul.mubr.msk.f32.gmra.mrb[138].mxu1 %vm2058_vm3, %v1990_v27  ;;  %v2001_v27 = vmax.f32 %v1707_v42, 0.0  ;;  %v2004_v47 = vmax.f32 %v1722_v52, 0.0  ;;  %v2023_v42 = vmax.f32 %v1817_v36, 0.0 }
 0x196   : > { %12134 = vmatprep.mubr.msk.f32.mxu1 %vm2058_vm3, %v1991_v0  ;;  %v2002_v31 = vmax.f32 %v1712_v46, 0.0  ;;  %v2003_v0 = vmax.f32 %v1717_v33, 0.0 }
 0x197   : > { %12403 = vmatmul.mubr.msk.f32.gmra.mrb[184].mxu0 %vm3289_vm2, %v807_v43  ;;  %v2005_v43 = vmax.f32 %v1727_v48, 0.0 }
 0x198   : > { %12405 = vmatprep.mubr.msk.f32.mxu0 %vm3289_vm2, %v808_v13  ;;  %v1737_v13 = vadd.f32 %v15021_v21, %v14775_v37  ;;  %v1752_v37 = vadd.f32 %v15021_v21, %v14781_v49  ;;  %v1762_v49 = vadd.f32 %v15021_v21, %v14793_v4 }
 0x199   : > { %12135 = vmatmul.mubr.msk.f32.gmra.mrb[140].mxu1 %vm2058_vm3, %v1992_v59 }
 0x19a   : > { %12137 = vmatprep.mubr.msk.f32.mxu1 %vm2058_vm3, %v1993_v16  ;;  %v2007_v59 = vmax.f32 %v1737_v13, 0.0  ;;  %v5739_v16 = vld [vmem:[%s17412_s9 + $0x20] sm:$0xff]  ;;  %v2012_v11 = vmax.f32 %v1762_v49, 0.0 }
 0x19b   : > { %12406 = vmatmul.mubr.msk.f32.gmra.mrb[186].mxu0 %vm3289_vm2, %v809_v56  ;;  %v13318_v56 = vpack.c.bf16 %v5740_v32, %v5739_v16 }
 0x19c   : > { %12408 = vmatprep.mubr.msk.f32.mxu0 %vm3289_vm2, %v810_v58  ;;  %v2010_v58 = vmax.f32 %v1752_v37, 0.0  ;;  %v17438_v37 = vld [vmem:[#allocation7_spill] sm:$0xff] }
 0x19d   : > { %12138 = vmatmul.mubr.msk.f32.gmra.mrb[142].mxu1 %vm2058_vm3, %v1994_v39  ;;  %13319 = vmatprep.subr.bf16.mxu1 %v13318_v56  ;;  %v2011_v39 = vmax.f32 %v1757_v54, 0.0  ;;  %v1847_v16 = vadd.f32 %v15021_v21, %v17438_v37 }
 0x19e   : > { %12140 = vmatprep.mubr.msk.f32.mxu1 %vm2058_vm3, %v1995_v10  ;;  %13321 = vmatpush3.bf16.msra.mxu1 %v13318_v56  ;;  %v1772_v10 = vadd.f32 %v15021_v21, %v14805_v26  ;;  %v2016_v26 = vmax.f32 %v1782_v29, 0.0 }
 0x19f   : > { %12409 = vmatmul.mubr.msk.f32.gmra.mrb[188].mxu0 %vm3289_vm2, %v811_v9  ;;  %v1777_v9 = vadd.f32 %v15021_v21, %v14823_v50  ;;  %v1792_v50 = vadd.f32 %v15021_v21, %v14829_v2 }
 0x1a0   : > { %12411 = vmatprep.mubr.msk.f32.mxu0 %vm3289_vm2, %v812_v8  ;;  %v2014_v4 = vmax.f32 %v1772_v10, 0.0 }
 0x1a1   : > { %12141 = vmatmul.mubr.msk.f32.gmra.mrb[144].mxu1 %vm2058_vm3, %v1996_v53  ;;  %v2015_v8 = vmax.f32 %v1777_v9, 0.0  ;;  %v1787_v53 = vadd.f32 %v15021_v21, %v14835_v12  ;;  %v2018_v41 = vmax.f32 %v1792_v50, 0.0  ;;  %v1802_v12 = vadd.f32 %v15021_v21, %v14841_v28  ;;  %v15154_v28 = vld [vmem:[%s17408_s5] ss:$0 sm:$0xff]  ;;  %v17440_v9 = vld [vmem:[#allocation9_spill] sm:$0xff] }
 0x1a2   : > { %12143 = vmatprep.mubr.msk.f32.mxu1 %vm2058_vm3, %v1997_v6  ;;  %v1797_v6 = vadd.f32 %v15021_v21, %v14847_v60  ;;  %v1812_v60 = vadd.f32 %v15021_v21, %v14853_v55  ;;  %v1827_v55 = vadd.f32 %v15021_v21, %v14883_v63 }
 0x1a3   : > { %12412 = vmatmul.mubr.msk.f32.gmra.mrb[190].mxu0 %vm3289_vm2, %v813_v23  ;;  %v2017_v38 = vmax.f32 %v1787_v53, 0.0  ;;  %v1807_v23 = vadd.f32 %v15021_v21, %v14859_v62  ;;  %v2020_v2 = vmax.f32 %v1802_v12, 0.0 }
 0x1a4   : > { %v2019_v3 = vmax.f32 %v1797_v6, 0.0  ;;  %v2022_v62 = vmax.f32 %v1812_v60, 0.0 }
 0x1a5   : > { %12144 = vmatmul.mubr.msk.f32.gmra.mrb[146].mxu1 %vm2058_vm3, %v1998_v14  ;;  %v2021_v14 = vmax.f32 %v1807_v23, 0.0 }
 0x1a6   : > { %12146 = vmatprep.mubr.msk.f32.mxu1 %vm2058_vm3, %v1999_v19  ;;  %v1822_v19 = vadd.f32 %v15021_v21, %v14865_v20  ;;  %v2025_v20 = vmax.f32 %v1827_v55, 0.0 }
 0x1a8   : > { %v2024_v33 = vmax.f32 %v1822_v19, 0.0 }
 0x1a9   : > { %12147 = vmatmul.mubr.msk.f32.gmra.mrb[148].mxu1 %vm2058_vm3, %v2000_v35 }
 0x1aa   : > { %12149 = vmatprep.mubr.msk.f32.mxu1 %vm2058_vm3, %v2001_v27 }
 0x1ad   : > { %12150 = vmatmul.mubr.msk.f32.gmra.mrb[150].mxu1 %vm2058_vm3, %v2002_v31  ;;  %v1832_v31 = vadd.f32 %v15021_v21, %v14877_v51 }
 0x1ae   : > { %12152 = vmatprep.mubr.msk.f32.mxu1 %vm2058_vm3, %v2003_v0  ;;  %v17436_v0 = vld [vmem:[#allocation5_spill] sm:$0xff] }
 0x1af   : > { %v1837_v48 = vadd.f32 %v15021_v21, %v17436_v0  ;;  %v2026_v51 = vmax.f32 %v1832_v31, 0.0  ;;  %v1877_v31 = vadd.f32 %v15021_v21, %v14951_v18 }
 0x1b1   : > { %12153 = vmatmul.mubr.msk.f32.gmra.mrb[152].mxu1 %vm2058_vm3, %v2004_v47 }
 0x1b2   : > { %12155 = vmatprep.mubr.msk.f32.mxu1 %vm2058_vm3, %v2005_v43 }
 0x1b5   : > { %12156 = vmatmul.mubr.msk.f32.gmra.mrb[154].mxu1 %vm2058_vm3, %v2006_v1 }
 0x1b6   : > { %12158 = vmatprep.mubr.msk.f32.mxu1 %vm2058_vm3, %v2007_v59  ;;  %v1842_v59 = vadd.f32 %v15021_v21, %v17437_v22 }
 0x1b9   : > { %12159 = vmatmul.mubr.msk.f32.gmra.mrb[156].mxu1 %vm2058_vm3, %v2008_v17  ;;  %v2027_v17 = vmax.f32 %v1837_v48, 0.0 }
 0x1ba   : > { %12161 = vmatprep.mubr.msk.f32.mxu1 %vm2058_vm3, %v2009_v61 }
 0x1bd   : > { %12162 = vmatmul.mubr.msk.f32.gmra.mrb[158].mxu1 %vm2058_vm3, %v2010_v58 }
 0x1be   : > { %12164 = vmatprep.mubr.msk.f32.mxu1 %vm2058_vm3, %v2011_v39  ;;  %v2028_v39 = vmax.f32 %v1842_v59, 0.0 }
 0x1c1   : > { %12165 = vmatmul.mubr.msk.f32.gmra.mrb[160].mxu1 %vm2058_vm3, %v2012_v11  ;;  %v1852_v11 = vadd.f32 %v15021_v21, %v17439_v57 }
 0x1c2   : > { %12167 = vmatprep.mubr.msk.f32.mxu1 %vm2058_vm3, %v2013_v24  ;;  %v2029_v24 = vmax.f32 %v1847_v16, 0.0 }
 0x1c3   : > { %v2030_v6 = vmax.f32 %v1852_v11, 0.0 }
 0x1c5   : > { %12168 = vmatmul.mubr.msk.f32.gmra.mrb[162].mxu1 %vm2058_vm3, %v2014_v4  ;;  %v1857_v4 = vadd.f32 %v15021_v21, %v17440_v9 }
 0x1c6   : > { %12170 = vmatprep.mubr.msk.f32.mxu1 %vm2058_vm3, %v2015_v8 }
 0x1c7   : > { %v2031_v23 = vmax.f32 %v1857_v4, 0.0  ;;  %v1907_v4 = vadd.f32 %v15021_v21, %v14995_v34  ;;  %v1912_v34 = vadd.f32 %v15021_v21, %v14991_v25 }
 0x1c9   : > { %12171 = vmatmul.mubr.msk.f32.gmra.mrb[164].mxu1 %vm2058_vm3, %v2016_v26 }
 0x1ca   : > { %12173 = vmatprep.mubr.msk.f32.mxu1 %vm2058_vm3, %v2017_v38 }
 0x1cd   : > { %12174 = vmatmul.mubr.msk.f32.gmra.mrb[166].mxu1 %vm2058_vm3, %v2018_v41  ;;  %v17441_v41 = vld [vmem:[#allocation8_spill] sm:$0xff] }
 0x1ce   : > { %12176 = vmatprep.mubr.msk.f32.mxu1 %vm2058_vm3, %v2019_v3  ;;  %v1862_v12 = vadd.f32 %v15021_v21, %v17441_v41  ;;  %v5741_v41 = vld [vmem:[%s17412_s9 + $0x30] sm:$0xff] }
 0x1d1   : > { %12177 = vmatmul.mubr.msk.f32.gmra.mrb[168].mxu1 %vm2058_vm3, %v2020_v2  ;;  %v17442_v2 = vld [vmem:[#allocation11_spill] sm:$0xff] }
 0x1d2   : > { %12179 = vmatprep.mubr.msk.f32.mxu1 %vm2058_vm3, %v2021_v14  ;;  %v1867_v60 = vadd.f32 %v15021_v21, %v17442_v2 }
 0x1d4   : > { %v12022_v35 = vpop.f32.mrb[64].mxu1 }
 0x1d5   : > { %v2515_v30 = vadd.f32 %v12022_v35, %v15154_v28  ;;  %v2509_v46 = vpop.f32.mrb[65].mxu1  ;;  %12180 = vmatmul.mubr.msk.f32.gmra.mrb[170].mxu1 %vm2058_vm3, %v2022_v62  ;;  %v2032_v35 = vmax.f32 %v1862_v12, 0.0  ;;  %v5742_v12 = vld [vmem:[%s17412_s9 + $0x38] sm:$0xff] }
 0x1d6   : > { %v2510_v27 = vadd.f32 %v15154_v28, %v2509_v46  ;;  %12182 = vmatprep.mubr.msk.f32.mxu1 %vm2058_vm3, %v2023_v42 }
 0x1d7   : > { %v3149_v52 = vmax.f32 %v2515_v30, 0.0  ;;  %v17443_v30 = vld [vmem:[#allocation10_spill] sm:$0xff] }
 0x1d8   : > { %v3148_v63 = vmax.f32 %v2510_v27, 0.0  ;;  %v12025_v47 = vpop.f32.mrb[66].mxu1  ;;  %v1872_v46 = vadd.f32 %v15021_v21, %v17443_v30 }
 0x1d9   : > { %v2525_v5 = vadd.f32 %v12025_v47, %v15154_v28  ;;  %v2519_v43 = vpop.f32.mrb[67].mxu1  ;;  %12183 = vmatmul.mubr.msk.f32.gmra.mrb[172].mxu1 %vm2058_vm3, %v2024_v33  ;;  %v2033_v33 = vmax.f32 %v1867_v60, 0.0  ;;  %v13322_v60 = vpack.c.bf16 %v5742_v12, %v5741_v41 }
 0x1da   : > { %v2520_v13 = vadd.f32 %v15154_v28, %v2519_v43  ;;  %12185 = vmatprep.mubr.msk.f32.mxu1 %vm2058_vm3, %v2025_v20  ;;  %12430 = vmatprep.mubr.msk.f32.mxu0 %vm2058_vm3, %v3148_v63  ;;  %v13595_v1 = vpack.i.bf16 %v3149_v52, %v3148_v63  ;;  %v17444_v43 = vld [vmem:[#allocation12_spill] sm:$0xff] }
 0x1db   : > { %v3151_v44 = vmax.f32 %v2525_v5, 0.0  ;;  %12431 = vmatmul.mubr.msk.f32.vlgmr.msra.gmra.mrb[64].mxu0 %vm2058_vm3, %v3149_v52  ;;  %v2034_v5 = vmax.f32 %v1872_v46, 0.0  ;;  %v1882_v18 = vadd.f32 %v15021_v21, %v17444_v43  ;;  %13323 = vmatprep.subr.bf16.mxu1 %v13322_v60 }
 0x1dc   : > { %v3150_v32 = vmax.f32 %v2520_v13, 0.0  ;;  %v12028_v61 = vpop.f32.mrb[68].mxu1  ;;  %13596 = vrot.lane.b32.xlu0 %v13595_v1, %s14009_s24  ;;  %v2035_v1 = vmax.f32 %v1877_v31, 0.0  ;;  %13325 = vmatpush3.bf16.msra.mxu1 %v13322_v60 }
 0x1dd   : > { %v2535_v54 = vadd.f32 %v12028_v61, %v15154_v28  ;;  %v2529_v56 = vpop.f32.mrb[69].mxu1  ;;  %12186 = vmatmul.mubr.msk.f32.gmra.mrb[174].mxu1 %vm2058_vm3, %v2026_v51  ;;  %v1887_v51 = vadd.f32 %v15021_v21, %v14967_v40  ;;  %v1892_v40 = vadd.f32 %v15021_v21, %v14963_v45 }
 0x1de   : > { %v2530_v58 = vadd.f32 %v15154_v28, %v2529_v56  ;;  %12188 = vmatprep.mubr.msk.f32.mxu1 %vm2058_vm3, %v2027_v17  ;;  %12433 = vmatprep.mubr.msk.f32.mxu0 %vm2058_vm3, %v3150_v32  ;;  %v13600_v49 = vpack.i.bf16 %v3151_v44, %v3150_v32  ;;  %v2036_v32 = vmax.f32 %v1882_v18, 0.0  ;;  %v1897_v56 = vadd.f32 %v15021_v21, %v14981_v7 }
 0x1df   : > { %v3153_v10 = vmax.f32 %v2535_v54, 0.0  ;;  %12434 = vmatmul.mubr.msk.f32.gmra.mrb[66].mxu0 %vm2058_vm3, %v3151_v44  ;;  %v2037_v54 = vmax.f32 %v1887_v51, 0.0  ;;  %v1902_v7 = vadd.f32 %v15021_v21, %v14977_v15 }
 0x1e0   : > { %v3152_v29 = vmax.f32 %v2530_v58, 0.0  ;;  %v12031_v8 = vpop.f32.mrb[70].mxu1  ;;  %13601 = vrot.lane.b32.xlu0 %v13600_v49, %s14009_s24  ;;  %v2039_v9 = vmax.f32 %v1897_v56, 0.0 }
 0x1e1   : > { %v2545_v53 = vadd.f32 %v12031_v8, %v15154_v28  ;;  %v2539_v26 = vpop.f32.mrb[71].mxu1  ;;  %12189 = vmatmul.mubr.msk.f32.gmra.mrb[176].mxu1 %vm2058_vm3, %v2028_v39 }
 0x1e2   : > { %v2540_v50 = vadd.f32 %v15154_v28, %v2539_v26  ;;  %12191 = vmatprep.mubr.msk.f32.mxu1 %vm2058_vm3, %v2029_v24  ;;  %12436 = vmatprep.mubr.msk.f32.mxu0 %vm2058_vm3, %v3152_v29  ;;  %v13605_v38 = vpack.i.bf16 %v3153_v10, %v3152_v29 }
 0x1e3   : > { %v3155_v3 = vmax.f32 %v2545_v53, 0.0  ;;  %12437 = vmatmul.mubr.msk.f32.gmra.mrb[68].mxu0 %vm2058_vm3, %v3153_v10  ;;  %v2038_v10 = vmax.f32 %v1892_v40, 0.0 }
 0x1e4   : > { %v3154_v14 = vmax.f32 %v2540_v50, 0.0  ;;  %v12034_v36 = vpop.f32.mrb[72].mxu1  ;;  %13606 = vrot.lane.b32.xlu1 %v13605_v38, %s14009_s24  ;;  %v2040_v38 = vmax.f32 %v1902_v7, 0.0 }
 0x1e5   : > { %v2555_v62 = vadd.f32 %v12034_v36, %v15154_v28  ;;  %v2549_v19 = vpop.f32.mrb[73].mxu1  ;;  %12192 = vmatmul.mubr.msk.f32.gmra.mrb[178].mxu1 %vm2058_vm3, %v2030_v6 }
 0x1e6   : > { %v2550_v42 = vadd.f32 %v15154_v28, %v2549_v19  ;;  %12194 = vmatprep.mubr.msk.f32.mxu1 %vm2058_vm3, %v2031_v23  ;;  %12439 = vmatprep.mubr.msk.f32.mxu0 %vm2058_vm3, %v3154_v14  ;;  %v13610_v55 = vpack.i.bf16 %v3155_v3, %v3154_v14 }
 0x1e7   : > { %v3157_v27 = vmax.f32 %v2555_v62, 0.0  ;;  %12440 = vmatmul.mubr.msk.f32.gmra.mrb[70].mxu0 %vm2058_vm3, %v3155_v3  ;;  %v2041_v3 = vmax.f32 %v1907_v4, 0.0  ;;  %v2042_v62 = vmax.f32 %v1912_v34, 0.0 }
 0x1e8   : > { %v3156_v52 = vmax.f32 %v2550_v42, 0.0  ;;  %v12037_v20 = vpop.f32.mrb[74].mxu1  ;;  %13611 = vrot.lane.b32.xlu1 %v13610_v55, %s14009_s24 }
 0x1e9   : > { %v2565_v0 = vadd.f32 %v12037_v20, %v15154_v28  ;;  %v2559_v48 = vpop.f32.mrb[75].mxu1  ;;  %12195 = vmatmul.mubr.msk.f32.gmra.mrb[180].mxu1 %vm2058_vm3, %v2032_v35 }
 0x1ea   : > { %v2560_v63 = vadd.f32 %v15154_v28, %v2559_v48  ;;  %12197 = vmatprep.mubr.msk.f32.mxu1 %vm2058_vm3, %v2033_v33  ;;  %12442 = vmatprep.mubr.msk.f32.mxu0 %vm2058_vm3, %v3156_v52  ;;  %v13615_v47 = vpack.i.bf16 %v3157_v27, %v3156_v52 }
 0x1eb   : > { %v3159_v13 = vmax.f32 %v2565_v0, 0.0  ;;  %12443 = vmatmul.mubr.msk.f32.gmra.mrb[72].mxu0 %vm2058_vm3, %v3157_v27 }
 0x1ec   : > { %v3158_v22 = vmax.f32 %v2560_v63, 0.0  ;;  %v12040_v59 = vpop.f32.mrb[76].mxu1  ;;  %13616 = vrot.lane.b32.xlu0 %v13615_v47, %s14009_s24 }
 0x1ed   : > { %v2575_v44 = vadd.f32 %v12040_v59, %v15154_v28  ;;  %v2569_v17 = vpop.f32.mrb[77].mxu1  ;;  %12198 = vmatmul.mubr.msk.f32.gmra.mrb[182].mxu1 %vm2058_vm3, %v2034_v5 }
 0x1ee   : > { %v2570_v37 = vadd.f32 %v15154_v28, %v2569_v17  ;;  %12200 = vmatprep.mubr.msk.f32.mxu1 %vm2058_vm3, %v2035_v1  ;;  %12445 = vmatprep.mubr.msk.f32.mxu0 %vm2058_vm3, %v3158_v22  ;;  %v13620_v16 = vpack.i.bf16 %v3159_v13, %v3158_v22 }
 0x1ef   : > { %v3161_v61 = vmax.f32 %v2575_v44, 0.0  ;;  %12446 = vmatmul.mubr.msk.f32.gmra.mrb[74].mxu0 %vm2058_vm3, %v3159_v13 }
 0x1f0   : > { %v3160_v58 = vmax.f32 %v2570_v37, 0.0  ;;  %v12043_v49 = vpop.f32.mrb[78].mxu1  ;;  %13621 = vrot.lane.b32.xlu1 %v13620_v16, %s14009_s24 }
 0x1f1   : > { %v2585_v39 = vadd.f32 %v12043_v49, %v15154_v28  ;;  %v2579_v57 = vpop.f32.mrb[79].mxu1  ;;  %12201 = vmatmul.mubr.msk.f32.gmra.mrb[184].mxu1 %vm2058_vm3, %v2036_v32 }
 0x1f2   : > { %v2580_v11 = vadd.f32 %v15154_v28, %v2579_v57  ;;  %12203 = vmatprep.mubr.msk.f32.mxu1 %vm2058_vm3, %v2037_v54  ;;  %12448 = vmatprep.mubr.msk.f32.mxu0 %vm2058_vm3, %v3160_v58  ;;  %v13625_v45 = vpack.i.bf16 %v3161_v61, %v3160_v58 }
 0x1f3   : > { %v3163_v24 = vmax.f32 %v2585_v39, 0.0  ;;  %12449 = vmatmul.mubr.msk.f32.gmra.mrb[76].mxu0 %vm2058_vm3, %v3161_v61 }
 0x1f4   : > { %v3162_v29 = vmax.f32 %v2580_v11, 0.0  ;;  %v12046_v8 = vpop.f32.mrb[80].mxu1  ;;  %13626 = vrot.lane.b32.xlu0 %v13625_v45, %s14009_s24 }
 0x1f5   : > { %v2595_v53 = vadd.f32 %v12046_v8, %v15154_v28  ;;  %v2589_v26 = vpop.f32.mrb[81].mxu1  ;;  %12204 = vmatmul.mubr.msk.f32.gmra.mrb[186].mxu1 %vm2058_vm3, %v2038_v10 }
 0x1f6   : > { %v2590_v50 = vadd.f32 %v15154_v28, %v2589_v26  ;;  %12206 = vmatprep.mubr.msk.f32.mxu1 %vm2058_vm3, %v2039_v9  ;;  %12451 = vmatprep.mubr.msk.f32.mxu0 %vm2058_vm3, %v3162_v29  ;;  %v13630_v15 = vpack.i.bf16 %v3163_v24, %v3162_v29 }
 0x1f7   : > { %v3165_v6 = vmax.f32 %v2595_v53, 0.0  ;;  %12452 = vmatmul.mubr.msk.f32.gmra.mrb[78].mxu0 %vm2058_vm3, %v3163_v24 }
 0x1f8   : > { %v3164_v23 = vmax.f32 %v2590_v50, 0.0  ;;  %v12049_v2 = vpop.f32.mrb[82].mxu1  ;;  %13631 = vrot.lane.b32.xlu1 %v13630_v15, %s14009_s24 }
 0x1f9   : > { %v2605_v14 = vadd.f32 %v12049_v2, %v15154_v28  ;;  %v2599_v25 = vpop.f32.mrb[83].mxu1  ;;  %12207 = vmatmul.mubr.msk.f32.gmra.mrb[188].mxu1 %vm2058_vm3, %v2040_v38 }
 0x1fa   : > { %v2600_v21 = vadd.f32 %v15154_v28, %v2599_v25  ;;  %12209 = vmatprep.mubr.msk.f32.mxu1 %vm2058_vm3, %v2041_v3  ;;  %12454 = vmatprep.mubr.msk.f32.mxu0 %vm2058_vm3, %v3164_v23  ;;  %v13635_v36 = vpack.i.bf16 %v3165_v6, %v3164_v23 }
 0x1fb   : > { %v3167_v19 = vmax.f32 %v2605_v14, 0.0  ;;  %12455 = vmatmul.mubr.msk.f32.gmra.mrb[80].mxu0 %vm2058_vm3, %v3165_v6 }
 0x1fc   : > { %v3166_v42 = vmax.f32 %v2600_v21, 0.0  ;;  %v12052_v55 = vpop.f32.mrb[84].mxu1  ;;  %13636 = vrot.lane.b32.xlu0 %v13635_v36, %s14009_s24 }
 0x1fd   : > { %v2615_v35 = vadd.f32 %v12052_v55, %v15154_v28  ;;  %v2609_v30 = vpop.f32.mrb[85].mxu1  ;;  %12210 = vmatmul.mubr.msk.f32.gmra.mrb[190].mxu1 %vm2058_vm3, %v2042_v62 }
 0x1fe   : > { %v2610_v46 = vadd.f32 %v15154_v28, %v2609_v30  ;;  %12457 = vmatprep.mubr.msk.f32.mxu0 %vm2058_vm3, %v3166_v42  ;;  %v13640_v27 = vpack.i.bf16 %v3167_v19, %v3166_v42 }
 0x1ff   : > { %v3169_v33 = vmax.f32 %v2615_v35, 0.0  ;;  %12458 = vmatmul.mubr.msk.f32.gmra.mrb[82].mxu0 %vm2058_vm3, %v3167_v19 }
 0x200   : > { %v3168_v31 = vmax.f32 %v2610_v46, 0.0  ;;  %v12055_v52 = vpop.f32.mrb[86].mxu1  ;;  %13641 = vrot.lane.b32.xlu1 %v13640_v27, %s14009_s24 }
 0x201   : > { %v2625_v20 = vadd.f32 %v12055_v52, %v15154_v28  ;;  %v2619_v0 = vpop.f32.mrb[87].mxu1 }
 0x202   : > { %v2620_v48 = vadd.f32 %v15154_v28, %v2619_v0  ;;  %12460 = vmatprep.mubr.msk.f32.mxu0 %vm2058_vm3, %v3168_v31  ;;  %v13645_v63 = vpack.i.bf16 %v3169_v33, %v3168_v31 }
 0x203   : > { %v3171_v47 = vmax.f32 %v2625_v20, 0.0  ;;  %12461 = vmatmul.mubr.msk.f32.gmra.mrb[84].mxu0 %vm2058_vm3, %v3169_v33 }
 0x204   : > { %v3170_v5 = vmax.f32 %v2620_v48, 0.0  ;;  %v12058_v43 = vpop.f32.mrb[88].mxu1  ;;  %13646 = vrot.lane.b32.xlu0 %v13645_v63, %s14009_s24 }
 0x205   : > { %v2635_v18 = vadd.f32 %v12058_v43, %v15154_v28  ;;  %v2629_v13 = vpop.f32.mrb[89].mxu1 }
 0x206   : > { %v2630_v1 = vadd.f32 %v15154_v28, %v2629_v13  ;;  %12463 = vmatprep.mubr.msk.f32.mxu0 %vm2058_vm3, %v3170_v5  ;;  %v13650_v51 = vpack.i.bf16 %v3171_v47, %v3170_v5 }
 0x207   : > { %v3173_v22 = vmax.f32 %v2635_v18, 0.0  ;;  %12464 = vmatmul.mubr.msk.f32.gmra.mrb[86].mxu0 %vm2058_vm3, %v3171_v47 }
 0x208   : > { %v3172_v59 = vmax.f32 %v2630_v1, 0.0  ;;  %v12061_v44 = vpop.f32.mrb[90].mxu1  ;;  %13651 = vrot.lane.b32.xlu1 %v13650_v51, %s14009_s24 }
 0x209   : > { %v2645_v17 = vadd.f32 %v12061_v44, %v15154_v28  ;;  %v2639_v37 = vpop.f32.mrb[91].mxu1 }
 0x20a   : > { %v2640_v16 = vadd.f32 %v15154_v28, %v2639_v37  ;;  %12466 = vmatprep.mubr.msk.f32.mxu0 %vm2058_vm3, %v3172_v59  ;;  %v13655_v32 = vpack.i.bf16 %v3173_v22, %v3172_v59 }
 0x20b   : > { %v3175_v40 = vmax.f32 %v2645_v17, 0.0  ;;  %12467 = vmatmul.mubr.msk.f32.gmra.mrb[88].mxu0 %vm2058_vm3, %v3173_v22 }
 0x20c   : > { %v3174_v61 = vmax.f32 %v2640_v16, 0.0  ;;  %v12064_v54 = vpop.f32.mrb[92].mxu1  ;;  %13656 = vrot.lane.b32.xlu0 %v13655_v32, %s14009_s24 }
 0x20d   : > { %v2655_v56 = vadd.f32 %v12064_v54, %v15154_v28  ;;  %v2649_v58 = vpop.f32.mrb[93].mxu1 }
 0x20e   : > { %v2650_v49 = vadd.f32 %v15154_v28, %v2649_v58  ;;  %12469 = vmatprep.mubr.msk.f32.mxu0 %vm2058_vm3, %v3174_v61  ;;  %v13660_v39 = vpack.i.bf16 %v3175_v40, %v3174_v61 }
 0x20f   : > { %v3177_v57 = vmax.f32 %v2655_v56, 0.0  ;;  %12470 = vmatmul.mubr.msk.f32.gmra.mrb[90].mxu0 %vm2058_vm3, %v3175_v40 }
 0x210   : > { %v3176_v11 = vmax.f32 %v2650_v49, 0.0  ;;  %v12067_v45 = vpop.f32.mrb[94].mxu1  ;;  %13661 = vrot.lane.b32.xlu1 %v13660_v39, %s14009_s24 }
 0x211   : > { %v2665_v10 = vadd.f32 %v12067_v45, %v15154_v28  ;;  %v2659_v7 = vpop.f32.mrb[95].mxu1 }
 0x212   : > { %v2660_v24 = vadd.f32 %v15154_v28, %v2659_v7  ;;  %12472 = vmatprep.mubr.msk.f32.mxu0 %vm2058_vm3, %v3176_v11  ;;  %v13665_v9 = vpack.i.bf16 %v3177_v57, %v3176_v11 }
 0x213   : > { %v3179_v4 = vmax.f32 %v2665_v10, 0.0  ;;  %12473 = vmatmul.mubr.msk.f32.gmra.mrb[92].mxu0 %vm2058_vm3, %v3177_v57 }
 0x214   : > { %v3178_v29 = vmax.f32 %v2660_v24, 0.0  ;;  %v12070_v8 = vpop.f32.mrb[96].mxu1  ;;  %13666 = vrot.lane.b32.xlu0 %v13665_v9, %s14009_s24 }
 0x215   : > { %v2675_v53 = vadd.f32 %v12070_v8, %v15154_v28  ;;  %v2669_v26 = vpop.f32.mrb[97].mxu1  ;;  %v6968_v8 = vld [vmem:[%s17414_s11 + $0x8] sm:$0xff] }
 0x216   : > { %v2670_v50 = vadd.f32 %v15154_v28, %v2669_v26  ;;  %12475 = vmatprep.mubr.msk.f32.mxu0 %vm2058_vm3, %v3178_v29  ;;  %v13670_v15 = vpack.i.bf16 %v3179_v4, %v3178_v29  ;;  %v6967_v29 = vld [vmem:[%s17414_s11] sm:$0xff] }
 0x217   : > { %v3181_v38 = vmax.f32 %v2675_v53, 0.0  ;;  %12476 = vmatmul.mubr.msk.f32.gmra.mrb[94].mxu0 %vm2058_vm3, %v3179_v4 }
 0x218   : > { %v3180_v34 = vmax.f32 %v2670_v50, 0.0  ;;  %v12073_v6 = vpop.f32.mrb[98].mxu1  ;;  %13671 = vrot.lane.b32.xlu1 %v13670_v15, %s14009_s24  ;;  %v15349_v50 = vpack.c.bf16 %v6968_v8, %v6967_v29 }
 0x219   : > { %v2685_v41 = vadd.f32 %v12073_v6, %v15154_v28  ;;  %v2679_v12 = vpop.f32.mrb[99].mxu1 }
 0x21a   : > { %v2680_v3 = vadd.f32 %v15154_v28, %v2679_v12  ;;  %12478 = vmatprep.mubr.msk.f32.mxu0 %vm2058_vm3, %v3180_v34  ;;  %v13675_v23 = vpack.i.bf16 %v3181_v38, %v3180_v34  ;;  %13327 = vmatprep.subr.bf16.mxu1 %v15349_v50 }
 0x21b   : > { %v3183_v2 = vmax.f32 %v2685_v41, 0.0  ;;  %12479 = vmatmul.mubr.msk.f32.gmra.mrb[96].mxu0 %vm2058_vm3, %v3181_v38 }
 0x21c   : > { %v3182_v60 = vmax.f32 %v2680_v3, 0.0  ;;  %v12076_v14 = vpop.f32.mrb[100].mxu1  ;;  %13676 = vrot.lane.b32.xlu0 %v13675_v23, %s14009_s24 }
 0x21d   : > { %v2695_v25 = vadd.f32 %v12076_v14, %v15154_v28  ;;  %v2689_v21 = vpop.f32.mrb[101].mxu1 }
 0x21e   : > { %v2690_v36 = vadd.f32 %v15154_v28, %v2689_v21  ;;  %12481 = vmatprep.mubr.msk.f32.mxu0 %vm2058_vm3, %v3182_v60  ;;  %v13680_v62 = vpack.i.bf16 %v3183_v2, %v3182_v60 }
 0x21f   : > { %v3185_v19 = vmax.f32 %v2695_v25, 0.0  ;;  %12482 = vmatmul.mubr.msk.f32.gmra.mrb[98].mxu0 %vm2058_vm3, %v3183_v2 }
 0x220   : > { %v3184_v42 = vmax.f32 %v2690_v36, 0.0  ;;  %v12079_v55 = vpop.f32.mrb[102].mxu1  ;;  %13681 = vrot.lane.b32.xlu1 %v13680_v62, %s14009_s24 }
 0x221   : > { %v2705_v35 = vadd.f32 %v12079_v55, %v15154_v28  ;;  %v2699_v30 = vpop.f32.mrb[103].mxu1 }
 0x222   : > { %v2700_v46 = vadd.f32 %v15154_v28, %v2699_v30  ;;  %12484 = vmatprep.mubr.msk.f32.mxu0 %vm2058_vm3, %v3184_v42  ;;  %v13685_v27 = vpack.i.bf16 %v3185_v19, %v3184_v42 }
 0x223   : > { %v3187_v33 = vmax.f32 %v2705_v35, 0.0  ;;  %12485 = vmatmul.mubr.msk.f32.gmra.mrb[100].mxu0 %vm2058_vm3, %v3185_v19 }
 0x224   : > { %v3186_v31 = vmax.f32 %v2700_v46, 0.0  ;;  %v12082_v52 = vpop.f32.mrb[104].mxu1  ;;  %13686 = vrot.lane.b32.xlu0 %v13685_v27, %s14009_s24 }
 0x225   : > { %v2715_v20 = vadd.f32 %v12082_v52, %v15154_v28  ;;  %v2709_v0 = vpop.f32.mrb[105].mxu1 }
 0x226   : > { %v2710_v48 = vadd.f32 %v15154_v28, %v2709_v0  ;;  %12487 = vmatprep.mubr.msk.f32.mxu0 %vm2058_vm3, %v3186_v31  ;;  %v13690_v63 = vpack.i.bf16 %v3187_v33, %v3186_v31 }
 0x227   : > { %v3189_v47 = vmax.f32 %v2715_v20, 0.0  ;;  %12488 = vmatmul.mubr.msk.f32.gmra.mrb[102].mxu0 %vm2058_vm3, %v3187_v33 }
 0x228   : > { %v3188_v5 = vmax.f32 %v2710_v48, 0.0  ;;  %v12085_v43 = vpop.f32.mrb[106].mxu1  ;;  %13691 = vrot.lane.b32.xlu1 %v13690_v63, %s14009_s24 }
 0x229   : > { %v2725_v18 = vadd.f32 %v12085_v43, %v15154_v28  ;;  %v2719_v13 = vpop.f32.mrb[107].mxu1 }
 0x22a   : > { %v2720_v1 = vadd.f32 %v15154_v28, %v2719_v13  ;;  %12490 = vmatprep.mubr.msk.f32.mxu0 %vm2058_vm3, %v3188_v5  ;;  %v13695_v51 = vpack.i.bf16 %v3189_v47, %v3188_v5 }
 0x22b   : > { %v3191_v22 = vmax.f32 %v2725_v18, 0.0  ;;  %12491 = vmatmul.mubr.msk.f32.gmra.mrb[104].mxu0 %vm2058_vm3, %v3189_v47 }
 0x22c   : > { %v3190_v59 = vmax.f32 %v2720_v1, 0.0  ;;  %v12088_v44 = vpop.f32.mrb[108].mxu1  ;;  %13696 = vrot.lane.b32.xlu0 %v13695_v51, %s14009_s24 }
 0x22d   : > { %v2735_v17 = vadd.f32 %v12088_v44, %v15154_v28  ;;  %v2729_v37 = vpop.f32.mrb[109].mxu1 }
 0x22e   : > { %v2730_v16 = vadd.f32 %v15154_v28, %v2729_v37  ;;  %12493 = vmatprep.mubr.msk.f32.mxu0 %vm2058_vm3, %v3190_v59  ;;  %v13700_v32 = vpack.i.bf16 %v3191_v22, %v3190_v59 }
 0x22f   : > { %v3193_v40 = vmax.f32 %v2735_v17, 0.0  ;;  %12494 = vmatmul.mubr.msk.f32.gmra.mrb[106].mxu0 %vm2058_vm3, %v3191_v22 }
 0x230   : > { %v3192_v61 = vmax.f32 %v2730_v16, 0.0  ;;  %v12091_v54 = vpop.f32.mrb[110].mxu1  ;;  %13701 = vrot.lane.b32.xlu1 %v13700_v32, %s14009_s24 }
 0x231   : > { %v2745_v56 = vadd.f32 %v12091_v54, %v15154_v28  ;;  %v2739_v58 = vpop.f32.mrb[111].mxu1 }
 0x232   : > { %v2740_v49 = vadd.f32 %v15154_v28, %v2739_v58  ;;  %12496 = vmatprep.mubr.msk.f32.mxu0 %vm2058_vm3, %v3192_v61  ;;  %v13705_v39 = vpack.i.bf16 %v3193_v40, %v3192_v61 }
 0x233   : > { %v3195_v57 = vmax.f32 %v2745_v56, 0.0  ;;  %12497 = vmatmul.mubr.msk.f32.gmra.mrb[108].mxu0 %vm2058_vm3, %v3193_v40 }
 0x234   : > { %v3194_v11 = vmax.f32 %v2740_v49, 0.0  ;;  %v12094_v45 = vpop.f32.mrb[112].mxu1  ;;  %13706 = vrot.lane.b32.xlu0 %v13705_v39, %s14009_s24 }
 0x235   : > { %v2755_v10 = vadd.f32 %v12094_v45, %v15154_v28  ;;  %v2749_v7 = vpop.f32.mrb[113].mxu1 }
 0x236   : > { %v2750_v24 = vadd.f32 %v15154_v28, %v2749_v7  ;;  %12499 = vmatprep.mubr.msk.f32.mxu0 %vm2058_vm3, %v3194_v11  ;;  %v13710_v9 = vpack.i.bf16 %v3195_v57, %v3194_v11 }
 0x237   : > { %v3197_v4 = vmax.f32 %v2755_v10, 0.0  ;;  %12500 = vmatmul.mubr.msk.f32.gmra.mrb[110].mxu0 %vm2058_vm3, %v3195_v57 }
 0x238   : > { %v3196_v53 = vmax.f32 %v2750_v24, 0.0  ;;  %v12097_v26 = vpop.f32.mrb[114].mxu1  ;;  %13711 = vrot.lane.b32.xlu1 %v13710_v9, %s14009_s24 }
 0x239   : > { %v2765_v15 = vadd.f32 %v12097_v26, %v15154_v28  ;;  %v2759_v38 = vpop.f32.mrb[115].mxu1 }
 0x23a   : > { %v2760_v34 = vadd.f32 %v15154_v28, %v2759_v38  ;;  %12502 = vmatprep.mubr.msk.f32.mxu0 %vm2058_vm3, %v3196_v53  ;;  %v13715_v6 = vpack.i.bf16 %v3197_v4, %v3196_v53 }
 0x23b   : > { %v3199_v41 = vmax.f32 %v2765_v15, 0.0  ;;  %12503 = vmatmul.mubr.msk.f32.gmra.mrb[112].mxu0 %vm2058_vm3, %v3197_v4 }
 0x23c   : > { %v3198_v12 = vmax.f32 %v2760_v34, 0.0  ;;  %v12100_v3 = vpop.f32.mrb[116].mxu1  ;;  %13716 = vrot.lane.b32.xlu0 %v13715_v6, %s14009_s24 }
 0x23d   : > { %v2775_v23 = vadd.f32 %v12100_v3, %v15154_v28  ;;  %v2769_v2 = vpop.f32.mrb[117].mxu1 }
 0x23e   : > { %v2770_v60 = vadd.f32 %v15154_v28, %v2769_v2  ;;  %12505 = vmatprep.mubr.msk.f32.mxu0 %vm2058_vm3, %v3198_v12  ;;  %v13720_v14 = vpack.i.bf16 %v3199_v41, %v3198_v12 }
 0x23f   : > { %v3201_v25 = vmax.f32 %v2775_v23, 0.0  ;;  %12506 = vmatmul.mubr.msk.f32.gmra.mrb[114].mxu0 %vm2058_vm3, %v3199_v41 }
 0x240   : > { %v3200_v21 = vmax.f32 %v2770_v60, 0.0  ;;  %v12103_v36 = vpop.f32.mrb[118].mxu1  ;;  %13721 = vrot.lane.b32.xlu1 %v13720_v14, %s14009_s24 }
 0x241   : > { %v2785_v62 = vadd.f32 %v12103_v36, %v15154_v28  ;;  %v2779_v19 = vpop.f32.mrb[119].mxu1 }
 0x242   : > { %v2780_v42 = vadd.f32 %v15154_v28, %v2779_v19  ;;  %12508 = vmatprep.mubr.msk.f32.mxu0 %vm2058_vm3, %v3200_v21  ;;  %v13725_v55 = vpack.i.bf16 %v3201_v25, %v3200_v21 }
 0x243   : > { %v3203_v35 = vmax.f32 %v2785_v62, 0.0  ;;  %12509 = vmatmul.mubr.msk.f32.gmra.mrb[116].mxu0 %vm2058_vm3, %v3201_v25 }
 0x244   : > { %v3202_v30 = vmax.f32 %v2780_v42, 0.0  ;;  %v12106_v46 = vpop.f32.mrb[120].mxu1  ;;  %13726 = vrot.lane.b32.xlu0 %v13725_v55, %s14009_s24 }
 0x245   : > { %v2795_v27 = vadd.f32 %v12106_v46, %v15154_v28  ;;  %v2789_v33 = vpop.f32.mrb[121].mxu1 }
 0x246   : > { %v2790_v31 = vadd.f32 %v15154_v28, %v2789_v33  ;;  %12511 = vmatprep.mubr.msk.f32.mxu0 %vm2058_vm3, %v3202_v30  ;;  %v13730_v52 = vpack.i.bf16 %v3203_v35, %v3202_v30 }
 0x247   : > { %v3205_v20 = vmax.f32 %v2795_v27, 0.0  ;;  %12512 = vmatmul.mubr.msk.f32.gmra.mrb[118].mxu0 %vm2058_vm3, %v3203_v35 }
 0x248   : > { %v3204_v0 = vmax.f32 %v2790_v31, 0.0  ;;  %v12109_v48 = vpop.f32.mrb[122].mxu1  ;;  %13731 = vrot.lane.b32.xlu1 %v13730_v52, %s14009_s24 }
 0x249   : > { %v2805_v63 = vadd.f32 %v12109_v48, %v15154_v28  ;;  %v2799_v47 = vpop.f32.mrb[123].mxu1 }
 0x24a   : > { %v2800_v5 = vadd.f32 %v15154_v28, %v2799_v47  ;;  %12514 = vmatprep.mubr.msk.f32.mxu0 %vm2058_vm3, %v3204_v0  ;;  %v13735_v43 = vpack.i.bf16 %v3205_v20, %v3204_v0 }
 0x24b   : > { %v3207_v18 = vmax.f32 %v2805_v63, 0.0  ;;  %12515 = vmatmul.mubr.msk.f32.gmra.mrb[120].mxu0 %vm2058_vm3, %v3205_v20 }
 0x24c   : > { %v3206_v13 = vmax.f32 %v2800_v5, 0.0  ;;  %v12112_v1 = vpop.f32.mrb[124].mxu1  ;;  %13736 = vrot.lane.b32.xlu0 %v13735_v43, %s14009_s24 }
 0x24d   : > { %v2815_v51 = vadd.f32 %v12112_v1, %v15154_v28  ;;  %v2809_v22 = vpop.f32.mrb[125].mxu1 }
 0x24e   : > { %v2810_v59 = vadd.f32 %v15154_v28, %v2809_v22  ;;  %12517 = vmatprep.mubr.msk.f32.mxu0 %vm2058_vm3, %v3206_v13  ;;  %v13740_v44 = vpack.i.bf16 %v3207_v18, %v3206_v13 }
 0x24f   : > { %v3209_v17 = vmax.f32 %v2815_v51, 0.0  ;;  %12518 = vmatmul.mubr.msk.f32.gmra.mrb[122].mxu0 %vm2058_vm3, %v3207_v18 }
 0x250   : > { %v3208_v37 = vmax.f32 %v2810_v59, 0.0  ;;  %v12115_v16 = vpop.f32.mrb[126].mxu1  ;;  %13741 = vrot.lane.b32.xlu1 %v13740_v44, %s14009_s24 }
 0x251   : > { %v2825_v32 = vadd.f32 %v12115_v16, %v15154_v28  ;;  %v2819_v40 = vpop.f32.mrb[127].mxu1 }
 0x252   : > { %v2820_v61 = vadd.f32 %v15154_v28, %v2819_v40  ;;  %12520 = vmatprep.mubr.msk.f32.mxu0 %vm2058_vm3, %v3208_v37  ;;  %v13745_v54 = vpack.i.bf16 %v3209_v17, %v3208_v37 }
 0x253   : > { %v3211_v56 = vmax.f32 %v2825_v32, 0.0  ;;  %12521 = vmatmul.mubr.msk.f32.gmra.mrb[124].mxu0 %vm2058_vm3, %v3209_v17 }
 0x254   : > { %v3210_v58 = vmax.f32 %v2820_v61, 0.0  ;;  %v12118_v49 = vpop.f32.mrb[128].mxu1  ;;  %13746 = vrot.lane.b32.xlu0 %v13745_v54, %s14009_s24 }
 0x255   : > { %v2835_v39 = vadd.f32 %v12118_v49, %v15154_v28  ;;  %v2829_v57 = vpop.f32.mrb[129].mxu1 }
 0x256   : > { %v2830_v11 = vadd.f32 %v15154_v28, %v2829_v57  ;;  %12523 = vmatprep.mubr.msk.f32.mxu0 %vm2058_vm3, %v3210_v58  ;;  %v13750_v45 = vpack.i.bf16 %v3211_v56, %v3210_v58 }
 0x257   : > { %v3213_v10 = vmax.f32 %v2835_v39, 0.0  ;;  %12524 = vmatmul.mubr.msk.f32.gmra.mrb[126].mxu0 %vm2058_vm3, %v3211_v56 }
 0x258   : > { %v3212_v7 = vmax.f32 %v2830_v11, 0.0  ;;  %v12121_v24 = vpop.f32.mrb[130].mxu1  ;;  %13751 = vrot.lane.b32.xlu1 %v13750_v45, %s14009_s24 }
 0x259   : > { %v2845_v9 = vadd.f32 %v12121_v24, %v15154_v28  ;;  %v2839_v4 = vpop.f32.mrb[131].mxu1 }
 0x25a   : > { %v2840_v29 = vadd.f32 %v15154_v28, %v2839_v4  ;;  %12526 = vmatprep.mubr.msk.f32.mxu0 %vm2058_vm3, %v3212_v7  ;;  %v13755_v8 = vpack.i.bf16 %v3213_v10, %v3212_v7 }
 0x25b   : > { %v3215_v53 = vmax.f32 %v2845_v9, 0.0  ;;  %12527 = vmatmul.mubr.msk.f32.gmra.mrb[128].mxu0 %vm2058_vm3, %v3213_v10 }
 0x25c   : > { %v3214_v26 = vmax.f32 %v2840_v29, 0.0  ;;  %v12124_v15 = vpop.f32.mrb[132].mxu1  ;;  %13756 = vrot.lane.b32.xlu0 %v13755_v8, %s14009_s24 }
 0x25d   : > { %v2855_v38 = vadd.f32 %v12124_v15, %v15154_v28  ;;  %v2849_v34 = vpop.f32.mrb[133].mxu1 }
 0x25e   : > { %v2850_v6 = vadd.f32 %v15154_v28, %v2849_v34  ;;  %12529 = vmatprep.mubr.msk.f32.mxu0 %vm2058_vm3, %v3214_v26  ;;  %v13760_v41 = vpack.i.bf16 %v3215_v53, %v3214_v26 }
 0x25f   : > { %v3217_v12 = vmax.f32 %v2855_v38, 0.0  ;;  %12530 = vmatmul.mubr.msk.f32.gmra.mrb[130].mxu0 %vm2058_vm3, %v3215_v53 }
 0x260   : > { %v3216_v3 = vmax.f32 %v2850_v6, 0.0  ;;  %v12127_v23 = vpop.f32.mrb[134].mxu1  ;;  %13761 = vrot.lane.b32.xlu1 %v13760_v41, %s14009_s24 }
 0x261   : > { %v2865_v2 = vadd.f32 %v12127_v23, %v15154_v28  ;;  %v2859_v60 = vpop.f32.mrb[135].mxu1 }
 0x262   : > { %v2860_v14 = vadd.f32 %v15154_v28, %v2859_v60  ;;  %12532 = vmatprep.mubr.msk.f32.mxu0 %vm2058_vm3, %v3216_v3  ;;  %v13765_v25 = vpack.i.bf16 %v3217_v12, %v3216_v3 }
 0x263   : > { %v3219_v21 = vmax.f32 %v2865_v2, 0.0  ;;  %12533 = vmatmul.mubr.msk.f32.gmra.mrb[132].mxu0 %vm2058_vm3, %v3217_v12 }
 0x264   : > { %v3218_v36 = vmax.f32 %v2860_v14, 0.0  ;;  %v12130_v62 = vpop.f32.mrb[136].mxu1  ;;  %13766 = vrot.lane.b32.xlu0 %v13765_v25, %s14009_s24 }
 0x265   : > { %v2875_v19 = vadd.f32 %v12130_v62, %v15154_v28  ;;  %v2869_v42 = vpop.f32.mrb[137].mxu1 }
 0x266   : > { %v2870_v55 = vadd.f32 %v15154_v28, %v2869_v42  ;;  %12535 = vmatprep.mubr.msk.f32.mxu0 %vm2058_vm3, %v3218_v36  ;;  %v13770_v35 = vpack.i.bf16 %v3219_v21, %v3218_v36  ;;  %v15455_v42 = vld [vmem:[%s17408_s5] ss:$0 sm:$0xff] }
 0x267   : > { %v3221_v30 = vmax.f32 %v2875_v19, 0.0  ;;  %12536 = vmatmul.mubr.msk.f32.gmra.mrb[134].mxu0 %vm2058_vm3, %v3219_v21 }
 0x268   : > { %v3220_v46 = vmax.f32 %v2870_v55, 0.0  ;;  %v12133_v27 = vpop.f32.mrb[138].mxu1  ;;  %13771 = vrot.lane.b32.xlu1 %v13770_v35, %s14009_s24 }
 0x269   : > { %v2885_v33 = vadd.f32 %v12133_v27, %v15154_v28  ;;  %v2879_v31 = vpop.f32.mrb[139].mxu1 }
 0x26a   : > { %v2880_v52 = vadd.f32 %v15154_v28, %v2879_v31  ;;  %12538 = vmatprep.mubr.msk.f32.mxu0 %vm2058_vm3, %v3220_v46  ;;  %v13775_v20 = vpack.i.bf16 %v3221_v30, %v3220_v46 }
 0x26b   : > { %v3223_v0 = vmax.f32 %v2885_v33, 0.0  ;;  %12539 = vmatmul.mubr.msk.f32.gmra.mrb[136].mxu0 %vm2058_vm3, %v3221_v30 }
 0x26c   : > { %v3222_v48 = vmax.f32 %v2880_v52, 0.0  ;;  %v12136_v63 = vpop.f32.mrb[140].mxu1  ;;  %13776 = vrot.lane.b32.xlu0 %v13775_v20, %s14009_s24 }
 0x26d   : > { %v2895_v47 = vadd.f32 %v12136_v63, %v15154_v28  ;;  %v2889_v5 = vpop.f32.mrb[141].mxu1 }
 0x26e   : > { %v2890_v43 = vadd.f32 %v15154_v28, %v2889_v5  ;;  %12541 = vmatprep.mubr.msk.f32.mxu0 %vm2058_vm3, %v3222_v48  ;;  %v13780_v18 = vpack.i.bf16 %v3223_v0, %v3222_v48 }
 0x26f   : > { %v3225_v13 = vmax.f32 %v2895_v47, 0.0  ;;  %12542 = vmatmul.mubr.msk.f32.gmra.mrb[138].mxu0 %vm2058_vm3, %v3223_v0 }
 0x270   : > { %v3224_v1 = vmax.f32 %v2890_v43, 0.0  ;;  %v12139_v51 = vpop.f32.mrb[142].mxu1  ;;  %13781 = vrot.lane.b32.xlu1 %v13780_v18, %s14009_s24 }
 0x271   : > { %v2905_v22 = vadd.f32 %v12139_v51, %v15154_v28  ;;  %v2899_v59 = vpop.f32.mrb[143].mxu1 }
 0x272   : > { %v2900_v44 = vadd.f32 %v15154_v28, %v2899_v59  ;;  %12544 = vmatprep.mubr.msk.f32.mxu0 %vm2058_vm3, %v3224_v1  ;;  %v13785_v17 = vpack.i.bf16 %v3225_v13, %v3224_v1 }
 0x273   : > { %v3227_v37 = vmax.f32 %v2905_v22, 0.0  ;;  %12545 = vmatmul.mubr.msk.f32.gmra.mrb[140].mxu0 %vm2058_vm3, %v3225_v13 }
 0x274   : > { %v3226_v16 = vmax.f32 %v2900_v44, 0.0  ;;  %v12142_v32 = vpop.f32.mrb[144].mxu1  ;;  %13786 = vrot.lane.b32.xlu0 %v13785_v17, %s14009_s24 }
 0x275   : > { %v2915_v40 = vadd.f32 %v12142_v32, %v15154_v28  ;;  %v2909_v61 = vpop.f32.mrb[145].mxu1 }
 0x276   : > { %v2910_v54 = vadd.f32 %v15154_v28, %v2909_v61  ;;  %12547 = vmatprep.mubr.msk.f32.mxu0 %vm2058_vm3, %v3226_v16  ;;  %v13790_v56 = vpack.i.bf16 %v3227_v37, %v3226_v16 }
 0x277   : > { %v3229_v58 = vmax.f32 %v2915_v40, 0.0  ;;  %12548 = vmatmul.mubr.msk.f32.gmra.mrb[142].mxu0 %vm2058_vm3, %v3227_v37 }
 0x278   : > { %v3228_v49 = vmax.f32 %v2910_v54, 0.0  ;;  %v12145_v39 = vpop.f32.mrb[146].mxu1  ;;  %13791 = vrot.lane.b32.xlu1 %v13790_v56, %s14009_s24 }
 0x279   : > { %v2925_v57 = vadd.f32 %v12145_v39, %v15154_v28  ;;  %v2919_v11 = vpop.f32.mrb[147].mxu1 }
 0x27a   : > { %v2920_v45 = vadd.f32 %v15154_v28, %v2919_v11  ;;  %12550 = vmatprep.mubr.msk.f32.mxu0 %vm2058_vm3, %v3228_v49  ;;  %v13795_v10 = vpack.i.bf16 %v3229_v58, %v3228_v49 }
 0x27b   : > { %v3231_v7 = vmax.f32 %v2925_v57, 0.0  ;;  %12551 = vmatmul.mubr.msk.f32.gmra.mrb[144].mxu0 %vm2058_vm3, %v3229_v58 }
 0x27c   : > { %v3230_v24 = vmax.f32 %v2920_v45, 0.0  ;;  %v12148_v9 = vpop.f32.mrb[148].mxu1  ;;  %13796 = vrot.lane.b32.xlu0 %v13795_v10, %s14009_s24 }
 0x27d   : > { %v2935_v4 = vadd.f32 %v12148_v9, %v15154_v28  ;;  %v2929_v29 = vpop.f32.mrb[149].mxu1 }
 0x27e   : > { %v2930_v8 = vadd.f32 %v15154_v28, %v2929_v29  ;;  %12553 = vmatprep.mubr.msk.f32.mxu0 %vm2058_vm3, %v3230_v24  ;;  %v13800_v53 = vpack.i.bf16 %v3231_v7, %v3230_v24 }
 0x27f   : > { %v3233_v26 = vmax.f32 %v2935_v4, 0.0  ;;  %12554 = vmatmul.mubr.msk.f32.gmra.mrb[146].mxu0 %vm2058_vm3, %v3231_v7 }
 0x280   : > { %v3232_v15 = vmax.f32 %v2930_v8, 0.0  ;;  %v12151_v38 = vpop.f32.mrb[150].mxu1  ;;  %13801 = vrot.lane.b32.xlu1 %v13800_v53, %s14009_s24 }
 0x281   : > { %v2945_v34 = vadd.f32 %v12151_v38, %v15154_v28  ;;  %v2939_v6 = vpop.f32.mrb[151].mxu1 }
 0x282   : > { %v2940_v41 = vadd.f32 %v15154_v28, %v2939_v6  ;;  %12556 = vmatprep.mubr.msk.f32.mxu0 %vm2058_vm3, %v3232_v15  ;;  %v13805_v12 = vpack.i.bf16 %v3233_v26, %v3232_v15 }
 0x283   : > { %v3235_v3 = vmax.f32 %v2945_v34, 0.0  ;;  %12557 = vmatmul.mubr.msk.f32.gmra.mrb[148].mxu0 %vm2058_vm3, %v3233_v26 }
 0x284   : > { %v3234_v23 = vmax.f32 %v2940_v41, 0.0  ;;  %v12154_v2 = vpop.f32.mrb[152].mxu1  ;;  %13806 = vrot.lane.b32.xlu0 %v13805_v12, %s14009_s24 }
 0x285   : > { %v2955_v60 = vadd.f32 %v12154_v2, %v15154_v28  ;;  %v2949_v14 = vpop.f32.mrb[153].mxu1 }
 0x286   : > { %v2950_v25 = vadd.f32 %v15154_v28, %v2949_v14  ;;  %12559 = vmatprep.mubr.msk.f32.mxu0 %vm2058_vm3, %v3234_v23  ;;  %v13810_v21 = vpack.i.bf16 %v3235_v3, %v3234_v23 }
 0x287   : > { %v3237_v36 = vmax.f32 %v2955_v60, 0.0  ;;  %12560 = vmatmul.mubr.msk.f32.gmra.mrb[150].mxu0 %vm2058_vm3, %v3235_v3 }
 0x288   : > { %v3236_v62 = vmax.f32 %v2950_v25, 0.0  ;;  %v12157_v19 = vpop.f32.mrb[154].mxu1  ;;  %13811 = vrot.lane.b32.xlu1 %v13810_v21, %s14009_s24 }
 0x289   : > { %v2965_v55 = vadd.f32 %v15455_v42, %v12157_v19  ;;  %v2959_v35 = vpop.f32.mrb[155].mxu1 }
 0x28a   : > { %v2960_v28 = vadd.f32 %v15455_v42, %v2959_v35  ;;  %12562 = vmatprep.mubr.msk.f32.mxu0 %vm2058_vm3, %v3236_v62  ;;  %v13815_v30 = vpack.i.bf16 %v3237_v36, %v3236_v62  ;;  %v15505_v35 = vld [vmem:[%s17411_s8] ss:$0 sm:$0xff] }
 0x28b   : > { %v3239_v46 = vmax.f32 %v2965_v55, 0.0  ;;  %12563 = vmatmul.mubr.msk.f32.gmra.mrb[152].mxu0 %vm2058_vm3, %v3237_v36 }
 0x28c   : > { %v3238_v27 = vmax.f32 %v2960_v28, 0.0  ;;  %v12160_v33 = vpop.f32.mrb[156].mxu1  ;;  %13816 = vrot.lane.b32.xlu0 %v13815_v30, %s14009_s24 }
 0x28d   : > { %v2975_v31 = vadd.f32 %v15455_v42, %v12160_v33  ;;  %v2969_v52 = vpop.f32.mrb[157].mxu1 }
 0x28e   : > { %v2970_v20 = vadd.f32 %v15455_v42, %v2969_v52  ;;  %12565 = vmatprep.mubr.msk.f32.mxu0 %vm2058_vm3, %v3238_v27  ;;  %v13820_v0 = vpack.i.bf16 %v3239_v46, %v3238_v27 }
 0x28f   : > { %v3241_v48 = vmax.f32 %v2975_v31, 0.0  ;;  %12566 = vmatmul.mubr.msk.f32.gmra.mrb[154].mxu0 %vm2058_vm3, %v3239_v46 }
 0x290   : > { %v3240_v63 = vmax.f32 %v2970_v20, 0.0  ;;  %v12163_v47 = vpop.f32.mrb[158].mxu1  ;;  %13821 = vrot.lane.b32.xlu1 %v13820_v0, %s14009_s24 }
 0x291   : > { %v2985_v5 = vadd.f32 %v15455_v42, %v12163_v47  ;;  %v2979_v43 = vpop.f32.mrb[159].mxu1  ;;  %v6969_v47 = vld [vmem:[%s17414_s11 + $0x10] sm:$0xff] }
 0x292   : > { %v2980_v18 = vadd.f32 %v15455_v42, %v2979_v43  ;;  %12568 = vmatprep.mubr.msk.f32.mxu0 %vm2058_vm3, %v3240_v63  ;;  %v13825_v13 = vpack.i.bf16 %v3241_v48, %v3240_v63 }
 0x293   : > { %v3243_v1 = vmax.f32 %v2985_v5, 0.0  ;;  %12569 = vmatmul.mubr.msk.f32.gmra.mrb[156].mxu0 %vm2058_vm3, %v3241_v48  ;;  %v6970_v5 = vld [vmem:[%s17414_s11 + $0x18] sm:$0xff] }
 0x294   : > { %v3242_v51 = vmax.f32 %v2980_v18, 0.0  ;;  %v12166_v22 = vpop.f32.mrb[160].mxu1  ;;  %13826 = vrot.lane.b32.xlu0 %v13825_v13, %s14009_s24 }
 0x295   : > { %v2995_v59 = vadd.f32 %v15455_v42, %v12166_v22  ;;  %v2989_v44 = vpop.f32.mrb[161].mxu1 }
 0x296   : > { %v2990_v17 = vadd.f32 %v15455_v42, %v2989_v44  ;;  %12571 = vmatprep.mubr.msk.f32.mxu0 %vm2058_vm3, %v3242_v51  ;;  %v13830_v37 = vpack.i.bf16 %v3243_v1, %v3242_v51 }
 0x297   : > { %v3245_v16 = vmax.f32 %v2995_v59, 0.0  ;;  %12572 = vmatmul.mubr.msk.f32.gmra.mrb[158].mxu0 %vm2058_vm3, %v3243_v1 }
 0x298   : > { %v3244_v32 = vmax.f32 %v2990_v17, 0.0  ;;  %v12169_v40 = vpop.f32.mrb[162].mxu1  ;;  %13831 = vrot.lane.b32.xlu1 %v13830_v37, %s14009_s24 }
 0x299   : > { %v3005_v61 = vadd.f32 %v15455_v42, %v12169_v40  ;;  %v2999_v54 = vpop.f32.mrb[163].mxu1 }
 0x29a   : > { %v3000_v56 = vadd.f32 %v15455_v42, %v2999_v54  ;;  %12574 = vmatprep.mubr.msk.f32.mxu0 %vm2058_vm3, %v3244_v32  ;;  %v13835_v58 = vpack.i.bf16 %v3245_v16, %v3244_v32 }
 0x29b   : > { %v3247_v49 = vmax.f32 %v3005_v61, 0.0  ;;  %12575 = vmatmul.mubr.msk.f32.gmra.mrb[160].mxu0 %vm2058_vm3, %v3245_v16  ;;  %v13330_v16 = vpack.c.bf16 %v6970_v5, %v6969_v47 }
 0x29c   : > { %v3246_v39 = vmax.f32 %v3000_v56, 0.0  ;;  %v12172_v57 = vpop.f32.mrb[164].mxu1  ;;  %13836 = vrot.lane.b32.xlu0 %v13835_v58, %s14009_s24 }
 0x29d   : > { %v3015_v11 = vadd.f32 %v15455_v42, %v12172_v57  ;;  %v3009_v45 = vpop.f32.mrb[165].mxu1 }
 0x29e   : > { %v3010_v10 = vadd.f32 %v15455_v42, %v3009_v45  ;;  %12577 = vmatprep.mubr.msk.f32.mxu0 %vm2058_vm3, %v3246_v39  ;;  %v13840_v7 = vpack.i.bf16 %v3247_v49, %v3246_v39  ;;  %v6972_v45 = vld [vmem:[%s17414_s11 + $0x28] sm:$0xff] }
 0x29f   : > { %v3249_v24 = vmax.f32 %v3015_v11, 0.0  ;;  %12578 = vmatmul.mubr.msk.f32.gmra.mrb[162].mxu0 %vm2058_vm3, %v3247_v49  ;;  %v6971_v11 = vld [vmem:[%s17414_s11 + $0x20] sm:$0xff] }
 0x2a0   : > { %v3248_v9 = vmax.f32 %v3010_v10, 0.0  ;;  %v12175_v4 = vpop.f32.mrb[166].mxu1  ;;  %13841 = vrot.lane.b32.xlu1 %v13840_v7, %s14009_s24 }
 0x2a1   : > { %v3025_v29 = vadd.f32 %v15455_v42, %v12175_v4  ;;  %v3019_v8 = vpop.f32.mrb[167].mxu1 }
 0x2a2   : > { %v3020_v53 = vadd.f32 %v15455_v42, %v3019_v8  ;;  %12580 = vmatprep.mubr.msk.f32.mxu0 %vm2058_vm3, %v3248_v9  ;;  %v13845_v26 = vpack.i.bf16 %v3249_v24, %v3248_v9  ;;  %v13334_v8 = vpack.c.bf16 %v6972_v45, %v6971_v11 }
 0x2a3   : > { %v3251_v15 = vmax.f32 %v3025_v29, 0.0  ;;  %12581 = vmatmul.mubr.msk.f32.gmra.mrb[164].mxu0 %vm2058_vm3, %v3249_v24 }
 0x2a4   : > { %v3250_v38 = vmax.f32 %v3020_v53, 0.0  ;;  %v12178_v34 = vpop.f32.mrb[168].mxu1  ;;  %13846 = vrot.lane.b32.xlu0 %v13845_v26, %s14009_s24 }
 0x2a5   : > { %v3035_v6 = vadd.f32 %v15455_v42, %v12178_v34  ;;  %v3029_v41 = vpop.f32.mrb[169].mxu1 }
 0x2a6   : > { %v3030_v12 = vadd.f32 %v15455_v42, %v3029_v41  ;;  %12583 = vmatprep.mubr.msk.f32.mxu0 %vm2058_vm3, %v3250_v38  ;;  %v13850_v3 = vpack.i.bf16 %v3251_v15, %v3250_v38 }
 0x2a7   : > { %v3253_v23 = vmax.f32 %v3035_v6, 0.0  ;;  %12584 = vmatmul.mubr.msk.f32.gmra.mrb[166].mxu0 %vm2058_vm3, %v3251_v15 }
 0x2a8   : > { %v3252_v2 = vmax.f32 %v3030_v12, 0.0  ;;  %v12181_v60 = vpop.f32.mrb[170].mxu1  ;;  %13851 = vrot.lane.b32.xlu1 %v13850_v3, %s14009_s24 }
 0x2a9   : > { %v3045_v14 = vadd.f32 %v15455_v42, %v12181_v60  ;;  %v3039_v25 = vpop.f32.mrb[171].mxu1 }
 0x2aa   : > { %v3040_v21 = vadd.f32 %v15455_v42, %v3039_v25  ;;  %12586 = vmatprep.mubr.msk.f32.mxu0 %vm2058_vm3, %v3252_v2  ;;  %v13855_v36 = vpack.i.bf16 %v3253_v23, %v3252_v2 }
 0x2ab   : > { %v3255_v62 = vmax.f32 %v3045_v14, 0.0  ;;  %12587 = vmatmul.mubr.msk.f32.gmra.mrb[168].mxu0 %vm2058_vm3, %v3253_v23 }
 0x2ac   : > { %v3254_v19 = vmax.f32 %v3040_v21, 0.0  ;;  %v12184_v55 = vpop.f32.mrb[172].mxu1  ;;  %13856 = vrot.lane.b32.xlu0 %v13855_v36, %s14009_s24 }
 0x2ad   : > { %v3055_v28 = vadd.f32 %v15455_v42, %v12184_v55  ;;  %v3049_v30 = vpop.f32.mrb[173].mxu1 }
 0x2ae   : > { %v3050_v46 = vadd.f32 %v15455_v42, %v3049_v30  ;;  %v12432_v27 = vpop.f32.mrb[64].mxu0  ;;  %12589 = vmatprep.mubr.msk.f32.mxu0 %vm2058_vm3, %v3254_v19  ;;  %v13860_v33 = vpack.i.bf16 %v3255_v62, %v3254_v19 }
 0x2af   : > { %v3257_v31 = vmax.f32 %v3055_v28, 0.0  ;;  %v5480_v52 = vadd.f32 %v12432_v27, %v15505_v35  ;;  %v4833_v20 = vpop.f32.mrb[65].mxu0  ;;  %12590 = vmatmul.mubr.msk.f32.gmra.mrb[170].mxu0 %vm2058_vm3, %v3255_v62 }
 0x2b0   : > { %v3256_v0 = vmax.f32 %v3050_v46, 0.0  ;;  %v5479_v48 = vadd.f32 %v15505_v35, %v4833_v20  ;;  %v12187_v63 = vpop.f32.mrb[174].mxu1  ;;  %13861 = vrot.lane.b32.xlu1 %v13860_v33, %s14009_s24 }
 0x2b1   : > { %v3065_v43 = vadd.f32 %v15455_v42, %v12187_v63  ;;  %v3059_v18 = vpop.f32.mrb[175].mxu1  ;;  %v5608_v59 = vmax.f32 %v5480_v52, 0.0 }
 0x2b2   : > { %v5607_v13 = vmax.f32 %v5479_v48, 0.0  ;;  %v3060_v1 = vadd.f32 %v15455_v42, %v3059_v18  ;;  %v12435_v51 = vpop.f32.mrb[66].mxu0  ;;  %12592 = vmatprep.mubr.msk.f32.mxu0 %vm2058_vm3, %v3256_v0  ;;  %v13865_v22 = vpack.i.bf16 %v3257_v31, %v3256_v0 }
 0x2b3   : > { %v3259_v44 = vmax.f32 %v3065_v43, 0.0  ;;  %v5482_v17 = vadd.f32 %v12435_v51, %v15505_v35  ;;  %v4843_v37 = vpop.f32.mrb[67].mxu0  ;;  %12593 = vmatmul.mubr.msk.f32.gmra.mrb[172].mxu0 %vm2058_vm3, %v3257_v31 }
 0x2b4   : > { %v3258_v32 = vmax.f32 %v3060_v1, 0.0  ;;  %v5481_v40 = vadd.f32 %v15505_v35, %v4843_v37  ;;  %v12190_v61 = vpop.f32.mrb[176].mxu1  ;;  %13866 = vrot.lane.b32.xlu0 %v13865_v22, %s14009_s24  ;;  %12638 = vmatprep.mubr.msk.f32.mxu1 %vm2058_vm3, %v5607_v13 }
 0x2b5   : > { %v3075_v54 = vadd.f32 %v15455_v42, %v12190_v61  ;;  %v3069_v56 = vpop.f32.mrb[177].mxu1  ;;  %12639 = vmatmul.mubr.msk.f32.vlgmr.msra.gmra.mrb[192].mxu1 %vm2058_vm3, %v5608_v59  ;;  %v5610_v10 = vmax.f32 %v5482_v17, 0.0 }
 0x2b6   : > { %v5609_v58 = vmax.f32 %v5481_v40, 0.0  ;;  %v3070_v49 = vadd.f32 %v15455_v42, %v3069_v56  ;;  %13329 = vmatpush3.bf16.msra.mxu1 %v15349_v50  ;;  %v12438_v39 = vpop.f32.mrb[68].mxu0  ;;  %12595 = vmatprep.mubr.msk.f32.mxu0 %vm2058_vm3, %v3258_v32  ;;  %v13870_v57 = vpack.i.bf16 %v3259_v44, %v3258_v32 }
 0x2b7   : > { %v3261_v7 = vmax.f32 %v3075_v54, 0.0  ;;  %v5484_v24 = vadd.f32 %v12438_v39, %v15505_v35  ;;  %v4853_v9 = vpop.f32.mrb[69].mxu0  ;;  %12596 = vmatmul.mubr.msk.f32.gmra.mrb[174].mxu0 %vm2058_vm3, %v3259_v44  ;;  %13331 = vmatprep.subr.bf16.mxu1 %v13330_v16 }
 0x2b8   : > { %v3260_v50 = vmax.f32 %v3070_v49, 0.0  ;;  %v5483_v4 = vadd.f32 %v15505_v35, %v4853_v9  ;;  %v12193_v29 = vpop.f32.mrb[178].mxu1  ;;  %13871 = vrot.lane.b32.xlu1 %v13870_v57, %s14009_s24  ;;  %12641 = vmatprep.mubr.msk.f32.mxu1 %vm2058_vm3, %v5609_v58 }
 0x2b9   : > { %v3085_v53 = vadd.f32 %v15455_v42, %v12193_v29  ;;  %v3079_v26 = vpop.f32.mrb[179].mxu1  ;;  %12642 = vmatmul.mubr.msk.f32.gmra.mrb[194].mxu1 %vm2058_vm3, %v5610_v10  ;;  %v5612_v41 = vmax.f32 %v5484_v24, 0.0 }
 0x2ba   : > { %v5611_v15 = vmax.f32 %v5483_v4, 0.0  ;;  %v3080_v38 = vadd.f32 %v15455_v42, %v3079_v26  ;;  %v12441_v34 = vpop.f32.mrb[70].mxu0  ;;  %12598 = vmatprep.mubr.msk.f32.mxu0 %vm2058_vm3, %v3260_v50  ;;  %v13875_v6 = vpack.i.bf16 %v3261_v7, %v3260_v50  ;;  %13333 = vmatpush3.bf16.msra.mxu1 %v13330_v16 }
 0x2bb   : > { %v3263_v12 = vmax.f32 %v3085_v53, 0.0  ;;  %v5486_v3 = vadd.f32 %v12441_v34, %v15505_v35  ;;  %v4863_v23 = vpop.f32.mrb[71].mxu0  ;;  %12599 = vmatmul.mubr.msk.f32.gmra.mrb[176].mxu0 %vm2058_vm3, %v3261_v7  ;;  %13335 = vmatprep.subr.bf16.mxu1 %v13334_v8 }
 0x2bc   : > { %v3262_v2 = vmax.f32 %v3080_v38, 0.0  ;;  %v5485_v60 = vadd.f32 %v15505_v35, %v4863_v23  ;;  %v12196_v14 = vpop.f32.mrb[180].mxu1  ;;  %13876 = vrot.lane.b32.xlu0 %v13875_v6, %s14009_s24  ;;  %12644 = vmatprep.mubr.msk.f32.mxu1 %vm2058_vm3, %v5611_v15 }
 0x2bd   : > { %v3095_v25 = vadd.f32 %v15455_v42, %v12196_v14  ;;  %v3089_v21 = vpop.f32.mrb[181].mxu1  ;;  %12645 = vmatmul.mubr.msk.f32.gmra.mrb[196].mxu1 %vm2058_vm3, %v5612_v41  ;;  %v5614_v28 = vmax.f32 %v5486_v3, 0.0 }
 0x2be   : > { %v5613_v36 = vmax.f32 %v5485_v60, 0.0  ;;  %v3090_v62 = vadd.f32 %v15455_v42, %v3089_v21  ;;  %v12444_v19 = vpop.f32.mrb[72].mxu0  ;;  %12601 = vmatprep.mubr.msk.f32.mxu0 %vm2058_vm3, %v3262_v2  ;;  %v13880_v55 = vpack.i.bf16 %v3263_v12, %v3262_v2  ;;  %13337 = vmatpush3.bf16.msra.mxu1 %v13334_v8 }
 0x2bf   : > { %v3265_v30 = vmax.f32 %v3095_v25, 0.0  ;;  %v5488_v46 = vadd.f32 %v12444_v19, %v15505_v35  ;;  %v4873_v27 = vpop.f32.mrb[73].mxu0  ;;  %12602 = vmatmul.mubr.msk.f32.gmra.mrb[178].mxu0 %vm2058_vm3, %v3263_v12 }
 0x2c0   : > { %v3264_v33 = vmax.f32 %v3090_v62, 0.0  ;;  %v5487_v31 = vadd.f32 %v15505_v35, %v4873_v27  ;;  %v12199_v52 = vpop.f32.mrb[182].mxu1  ;;  %13881 = vrot.lane.b32.xlu1 %v13880_v55, %s14009_s24  ;;  %12647 = vmatprep.mubr.msk.f32.mxu1 %vm2058_vm3, %v5613_v36 }
 0x2c1   : > { %v3105_v20 = vadd.f32 %v15455_v42, %v12199_v52  ;;  %v3099_v0 = vpop.f32.mrb[183].mxu1  ;;  %12648 = vmatmul.mubr.msk.f32.gmra.mrb[198].mxu1 %vm2058_vm3, %v5614_v28  ;;  %v5616_v43 = vmax.f32 %v5488_v46, 0.0 }
 0x2c2   : > { %v5615_v48 = vmax.f32 %v5487_v31, 0.0  ;;  %v3100_v63 = vadd.f32 %v15455_v42, %v3099_v0  ;;  %v12447_v47 = vpop.f32.mrb[74].mxu0  ;;  %12604 = vmatprep.mubr.msk.f32.mxu0 %vm2058_vm3, %v3264_v33  ;;  %v13885_v5 = vpack.i.bf16 %v3265_v30, %v3264_v33 }
 0x2c3   : > { %v3267_v18 = vmax.f32 %v3105_v20, 0.0  ;;  %v5490_v13 = vadd.f32 %v12447_v47, %v15505_v35  ;;  %v4883_v1 = vpop.f32.mrb[75].mxu0  ;;  %12605 = vmatmul.mubr.msk.f32.gmra.mrb[180].mxu0 %vm2058_vm3, %v3265_v30 }
 0x2c4   : > { %v3266_v51 = vmax.f32 %v3100_v63, 0.0  ;;  %v5489_v22 = vadd.f32 %v15505_v35, %v4883_v1  ;;  %v12202_v59 = vpop.f32.mrb[184].mxu1  ;;  %13886 = vrot.lane.b32.xlu0 %v13885_v5, %s14009_s24  ;;  %12650 = vmatprep.mubr.msk.f32.mxu1 %vm2058_vm3, %v5615_v48 }
 0x2c5   : > { %v3115_v44 = vadd.f32 %v15455_v42, %v12202_v59  ;;  %v3109_v17 = vpop.f32.mrb[185].mxu1  ;;  %12651 = vmatmul.mubr.msk.f32.gmra.mrb[200].mxu1 %vm2058_vm3, %v5616_v43  ;;  %v5618_v61 = vmax.f32 %v5490_v13, 0.0 }
 0x2c6   : > { %v5617_v37 = vmax.f32 %v5489_v22, 0.0  ;;  %v3110_v16 = vadd.f32 %v15455_v42, %v3109_v17  ;;  %v12450_v32 = vpop.f32.mrb[76].mxu0  ;;  %12607 = vmatprep.mubr.msk.f32.mxu0 %vm2058_vm3, %v3266_v51  ;;  %v13890_v40 = vpack.i.bf16 %v3267_v18, %v3266_v51 }
 0x2c7   : > { %v3269_v54 = vmax.f32 %v3115_v44, 0.0  ;;  %v5492_v56 = vadd.f32 %v12450_v32, %v15505_v35  ;;  %v4893_v58 = vpop.f32.mrb[77].mxu0  ;;  %12608 = vmatmul.mubr.msk.f32.gmra.mrb[182].mxu0 %vm2058_vm3, %v3267_v18 }
 0x2c8   : > { %v3268_v49 = vmax.f32 %v3110_v16, 0.0  ;;  %v5491_v39 = vadd.f32 %v15505_v35, %v4893_v58  ;;  %v12205_v57 = vpop.f32.mrb[186].mxu1  ;;  %13891 = vrot.lane.b32.xlu1 %v13890_v40, %s14009_s24  ;;  %12653 = vmatprep.mubr.msk.f32.mxu1 %vm2058_vm3, %v5617_v37 }
 0x2c9   : > { %v3125_v11 = vadd.f32 %v15455_v42, %v12205_v57  ;;  %v3119_v45 = vpop.f32.mrb[187].mxu1  ;;  %12654 = vmatmul.mubr.msk.f32.gmra.mrb[202].mxu1 %vm2058_vm3, %v5618_v61  ;;  %v5620_v50 = vmax.f32 %v5492_v56, 0.0 }
 0x2ca   : > { %v5619_v10 = vmax.f32 %v5491_v39, 0.0  ;;  %v3120_v7 = vadd.f32 %v15455_v42, %v3119_v45  ;;  %v12453_v24 = vpop.f32.mrb[78].mxu0  ;;  %12610 = vmatprep.mubr.msk.f32.mxu0 %vm2058_vm3, %v3268_v49  ;;  %v13895_v9 = vpack.i.bf16 %v3269_v54, %v3268_v49 }
 0x2cb   : > { %v3271_v4 = vmax.f32 %v3125_v11, 0.0  ;;  %v5494_v29 = vadd.f32 %v12453_v24, %v15505_v35  ;;  %v4903_v8 = vpop.f32.mrb[79].mxu0  ;;  %12611 = vmatmul.mubr.msk.f32.gmra.mrb[184].mxu0 %vm2058_vm3, %v3269_v54 }
 0x2cc   : > { %v3270_v53 = vmax.f32 %v3120_v7, 0.0  ;;  %v5493_v26 = vadd.f32 %v15505_v35, %v4903_v8  ;;  %v12208_v15 = vpop.f32.mrb[188].mxu1  ;;  %13896 = vrot.lane.b32.xlu0 %v13895_v9, %s14009_s24  ;;  %12656 = vmatprep.mubr.msk.f32.mxu1 %vm2058_vm3, %v5619_v10 }
 0x2cd   : > { %v3135_v38 = vadd.f32 %v15455_v42, %v12208_v15  ;;  %v3129_v34 = vpop.f32.mrb[189].mxu1  ;;  %12657 = vmatmul.mubr.msk.f32.gmra.mrb[204].mxu1 %vm2058_vm3, %v5620_v50  ;;  %v5622_v23 = vmax.f32 %v5494_v29, 0.0 }
 0x2ce   : > { %v5621_v6 = vmax.f32 %v5493_v26, 0.0  ;;  %v3130_v41 = vadd.f32 %v15455_v42, %v3129_v34  ;;  %v12456_v12 = vpop.f32.mrb[80].mxu0  ;;  %12613 = vmatprep.mubr.msk.f32.mxu0 %vm2058_vm3, %v3270_v53  ;;  %v13900_v3 = vpack.i.bf16 %v3271_v4, %v3270_v53 }
 0x2cf   : > { %v3273_v2 = vmax.f32 %v3135_v38, 0.0  ;;  %v5496_v60 = vadd.f32 %v12456_v12, %v15505_v35  ;;  %v4913_v14 = vpop.f32.mrb[81].mxu0  ;;  %12614 = vmatmul.mubr.msk.f32.gmra.mrb[186].mxu0 %vm2058_vm3, %v3271_v4 }
 0x2d0   : > { %v3272_v25 = vmax.f32 %v3130_v41, 0.0  ;;  %v5495_v21 = vadd.f32 %v15505_v35, %v4913_v14  ;;  %v12211_v36 = vpop.f32.mrb[190].mxu1  ;;  %13901 = vrot.lane.b32.xlu1 %v13900_v3, %s14009_s24  ;;  %12659 = vmatprep.mubr.msk.f32.mxu1 %vm2058_vm3, %v5621_v6 }
 0x2d1   : > { %v3145_v62 = vadd.f32 %v15455_v42, %v12211_v36  ;;  %v3139_v19 = vpop.f32.mrb[191].mxu1  ;;  %12660 = vmatmul.mubr.msk.f32.gmra.mrb[206].mxu1 %vm2058_vm3, %v5622_v23  ;;  %v5624_v27 = vmax.f32 %v5496_v60, 0.0 }
 0x2d2   : > { %v5623_v55 = vmax.f32 %v5495_v21, 0.0  ;;  %v3140_v28 = vadd.f32 %v15455_v42, %v3139_v19  ;;  %v12459_v30 = vpop.f32.mrb[82].mxu0  ;;  %12616 = vmatprep.mubr.msk.f32.mxu0 %vm2058_vm3, %v3272_v25  ;;  %v13905_v46 = vpack.i.bf16 %v3273_v2, %v3272_v25  ;;  %v6974_v19 = vld [vmem:[%s17414_s11 + $0x38] sm:$0xff] }
 0x2d3   : > { %v3275_v33 = vmax.f32 %v3145_v62, 0.0  ;;  %v5498_v31 = vadd.f32 %v12459_v30, %v15505_v35  ;;  %v4923_v52 = vpop.f32.mrb[83].mxu0  ;;  %12617 = vmatmul.mubr.msk.f32.gmra.mrb[188].mxu0 %vm2058_vm3, %v3273_v2  ;;  %v6973_v62 = vld [vmem:[%s17414_s11 + $0x30] sm:$0xff] }
 0x2d4   : > { %v3274_v20 = vmax.f32 %v3140_v28, 0.0  ;;  %v5497_v0 = vadd.f32 %v15505_v35, %v4923_v52  ;;  %13906 = vrot.lane.b32.xlu0 %v13905_v46, %s14009_s24  ;;  %12662 = vmatprep.mubr.msk.f32.mxu1 %vm2058_vm3, %v5623_v55  ;;  %v13338_v46 = vpack.c.bf16 %v6974_v19, %v6973_v62 }
 0x2d5   : > { %12663 = vmatmul.mubr.msk.f32.gmra.mrb[208].mxu1 %vm2058_vm3, %v5624_v27  ;;  %v5626_v47 = vmax.f32 %v5498_v31, 0.0 }
 0x2d6   : > { %v5625_v42 = vmax.f32 %v5497_v0, 0.0  ;;  %v12462_v48 = vpop.f32.mrb[84].mxu0  ;;  %12619 = vmatprep.mubr.msk.f32.mxu0 %vm2058_vm3, %v3274_v20  ;;  %v13910_v63 = vpack.i.bf16 %v3275_v33, %v3274_v20  ;;  %13339 = vmatprep.subr.bf16.mxu1 %v13338_v46 }
 0x2d7   : > { %v5500_v5 = vadd.f32 %v12462_v48, %v15505_v35  ;;  %v4933_v43 = vpop.f32.mrb[85].mxu0  ;;  %12620 = vmatmul.mubr.msk.f32.gmra.mrb[190].mxu0 %vm2058_vm3, %v3275_v33  ;;  %13341 = vmatpush3.bf16.msra.mxu1 %v13338_v46 }
 0x2d8   : > { %v5499_v18 = vadd.f32 %v15505_v35, %v4933_v43  ;;  %13911 = vrot.lane.b32.xlu1 %v13910_v63, %s14009_s24  ;;  %12665 = vmatprep.mubr.msk.f32.mxu1 %vm2058_vm3, %v5625_v42 }
 0x2d9   : > { %12666 = vmatmul.mubr.msk.f32.gmra.mrb[210].mxu1 %vm2058_vm3, %v5626_v47  ;;  %v5628_v51 = vmax.f32 %v5500_v5, 0.0 }
 0x2da   : > { %v5627_v13 = vmax.f32 %v5499_v18, 0.0  ;;  %v12465_v1 = vpop.f32.mrb[86].mxu0 }
 0x2db   : > { %v5502_v22 = vadd.f32 %v12465_v1, %v15505_v35  ;;  %v4943_v59 = vpop.f32.mrb[87].mxu0 }
 0x2dc   : > { %v5501_v44 = vadd.f32 %v15505_v35, %v4943_v59  ;;  %12668 = vmatprep.mubr.msk.f32.mxu1 %vm2058_vm3, %v5627_v13 }
 0x2dd   : > { %12669 = vmatmul.mubr.msk.f32.gmra.mrb[212].mxu1 %vm2058_vm3, %v5628_v51  ;;  %v5630_v16 = vmax.f32 %v5502_v22, 0.0 }
 0x2de   : > { %v5629_v17 = vmax.f32 %v5501_v44, 0.0  ;;  %v12468_v37 = vpop.f32.mrb[88].mxu0 }
 0x2df   : > { %v5504_v32 = vadd.f32 %v12468_v37, %v15505_v35  ;;  %v4953_v40 = vpop.f32.mrb[89].mxu0 }
 0x2e0   : > { %v5503_v61 = vadd.f32 %v15505_v35, %v4953_v40  ;;  %12671 = vmatprep.mubr.msk.f32.mxu1 %vm2058_vm3, %v5629_v17 }
 0x2e1   : > { %12672 = vmatmul.mubr.msk.f32.gmra.mrb[214].mxu1 %vm2058_vm3, %v5630_v16  ;;  %v5632_v58 = vmax.f32 %v5504_v32, 0.0 }
 0x2e2   : > { %v5631_v54 = vmax.f32 %v5503_v61, 0.0  ;;  %v12471_v56 = vpop.f32.mrb[90].mxu0 }
 0x2e3   : > { %v5506_v49 = vadd.f32 %v12471_v56, %v15505_v35  ;;  %v4963_v39 = vpop.f32.mrb[91].mxu0 }
 0x2e4   : > { %v5505_v57 = vadd.f32 %v15505_v35, %v4963_v39  ;;  %12674 = vmatprep.mubr.msk.f32.mxu1 %vm2058_vm3, %v5631_v54 }
 0x2e5   : > { %12675 = vmatmul.mubr.msk.f32.gmra.mrb[216].mxu1 %vm2058_vm3, %v5632_v58  ;;  %v5634_v10 = vmax.f32 %v5506_v49, 0.0 }
 0x2e6   : > { %v5633_v11 = vmax.f32 %v5505_v57, 0.0  ;;  %v12474_v45 = vpop.f32.mrb[92].mxu0 }
 0x2e7   : > { %v5508_v7 = vadd.f32 %v12474_v45, %v15505_v35  ;;  %v4973_v24 = vpop.f32.mrb[93].mxu0 }
 0x2e8   : > { %v5507_v9 = vadd.f32 %v15505_v35, %v4973_v24  ;;  %12677 = vmatprep.mubr.msk.f32.mxu1 %vm2058_vm3, %v5633_v11 }
 0x2e9   : > { %12678 = vmatmul.mubr.msk.f32.gmra.mrb[218].mxu1 %vm2058_vm3, %v5634_v10  ;;  %v5636_v29 = vmax.f32 %v5508_v7, 0.0 }
 0x2ea   : > { %v5635_v50 = vmax.f32 %v5507_v9, 0.0  ;;  %v12477_v4 = vpop.f32.mrb[94].mxu0 }
 0x2eb   : > { %v5510_v8 = vadd.f32 %v12477_v4, %v15505_v35  ;;  %v4983_v53 = vpop.f32.mrb[95].mxu0 }
 0x2ec   : > { %v5509_v26 = vadd.f32 %v15505_v35, %v4983_v53  ;;  %12680 = vmatprep.mubr.msk.f32.mxu1 %vm2058_vm3, %v5635_v50 }
 0x2ed   : > { %12681 = vmatmul.mubr.msk.f32.gmra.mrb[220].mxu1 %vm2058_vm3, %v5636_v29  ;;  %v5638_v34 = vmax.f32 %v5510_v8, 0.0  ;;  %v8711_v29 = vld [vmem:[%s17416_s13] sm:$0xff]  ;;  %v8712_v8 = vld [vmem:[%s17416_s13 + $0x8] sm:$0xff] }
 0x2ee   : > { %v5637_v15 = vmax.f32 %v5509_v26, 0.0  ;;  %v12480_v38 = vpop.f32.mrb[96].mxu0 }
 0x2ef   : > { %v5512_v6 = vadd.f32 %v12480_v38, %v15505_v35  ;;  %v4993_v41 = vpop.f32.mrb[97].mxu0  ;;  %v13342_v38 = vpack.c.bf16 %v8712_v8, %v8711_v29 }
 0x2f0   : > { %v5511_v12 = vadd.f32 %v15505_v35, %v4993_v41  ;;  %12683 = vmatprep.mubr.msk.f32.mxu1 %vm2058_vm3, %v5637_v15 }
 0x2f1   : > { %12684 = vmatmul.mubr.msk.f32.gmra.mrb[222].mxu1 %vm2058_vm3, %v5638_v34  ;;  %v5640_v2 = vmax.f32 %v5512_v6, 0.0  ;;  %13343 = vmatprep.subr.bf16.mxu0 %v13342_v38 }
 0x2f2   : > { %v5639_v3 = vmax.f32 %v5511_v12, 0.0  ;;  %v12483_v23 = vpop.f32.mrb[98].mxu0  ;;  %13345 = vmatpush3.bf16.msra.mxu0 %v13342_v38 }
 0x2f3   : > { %v5514_v60 = vadd.f32 %v12483_v23, %v15505_v35  ;;  %v5003_v14 = vpop.f32.mrb[99].mxu0 }
 0x2f4   : > { %v5513_v25 = vadd.f32 %v15505_v35, %v5003_v14  ;;  %12686 = vmatprep.mubr.msk.f32.mxu1 %vm2058_vm3, %v5639_v3 }
 0x2f5   : > { %12687 = vmatmul.mubr.msk.f32.gmra.mrb[224].mxu1 %vm2058_vm3, %v5640_v2  ;;  %v5642_v55 = vmax.f32 %v5514_v60, 0.0 }
 0x2f6   : > { %v5641_v21 = vmax.f32 %v5513_v25, 0.0  ;;  %v12486_v36 = vpop.f32.mrb[100].mxu0 }
 0x2f7   : > { %v5516_v28 = vadd.f32 %v12486_v36, %v15505_v35  ;;  %v5013_v30 = vpop.f32.mrb[101].mxu0 }
 0x2f8   : > { %v5515_v27 = vadd.f32 %v15505_v35, %v5013_v30  ;;  %12689 = vmatprep.mubr.msk.f32.mxu1 %vm2058_vm3, %v5641_v21 }
 0x2f9   : > { %12690 = vmatmul.mubr.msk.f32.gmra.mrb[226].mxu1 %vm2058_vm3, %v5642_v55  ;;  %v5644_v52 = vmax.f32 %v5516_v28, 0.0 }
 0x2fa   : > { %v5643_v33 = vmax.f32 %v5515_v27, 0.0  ;;  %v12489_v31 = vpop.f32.mrb[102].mxu0 }
 0x2fb   : > { %v5518_v20 = vadd.f32 %v12489_v31, %v15505_v35  ;;  %v5023_v0 = vpop.f32.mrb[103].mxu0 }
 0x2fc   : > { %v5517_v42 = vadd.f32 %v15505_v35, %v5023_v0  ;;  %12692 = vmatprep.mubr.msk.f32.mxu1 %vm2058_vm3, %v5643_v33 }
 0x2fd   : > { %12693 = vmatmul.mubr.msk.f32.gmra.mrb[228].mxu1 %vm2058_vm3, %v5644_v52  ;;  %v5646_v47 = vmax.f32 %v5518_v20, 0.0 }
 0x2fe   : > { %v5645_v48 = vmax.f32 %v5517_v42, 0.0  ;;  %v12492_v63 = vpop.f32.mrb[104].mxu0 }
 0x2ff   : > { %v5520_v5 = vadd.f32 %v12492_v63, %v15505_v35  ;;  %v5033_v43 = vpop.f32.mrb[105].mxu0 }
 0x300   : > { %v5519_v18 = vadd.f32 %v15505_v35, %v5033_v43  ;;  %12695 = vmatprep.mubr.msk.f32.mxu1 %vm2058_vm3, %v5645_v48 }
 0x301   : > { %12696 = vmatmul.mubr.msk.f32.gmra.mrb[230].mxu1 %vm2058_vm3, %v5646_v47  ;;  %v5648_v51 = vmax.f32 %v5520_v5, 0.0 }
 0x302   : > { %v5647_v13 = vmax.f32 %v5519_v18, 0.0  ;;  %v12495_v1 = vpop.f32.mrb[106].mxu0 }
 0x303   : > { %v5522_v22 = vadd.f32 %v12495_v1, %v15505_v35  ;;  %v5043_v59 = vpop.f32.mrb[107].mxu0 }
 0x304   : > { %v5521_v44 = vadd.f32 %v15505_v35, %v5043_v59  ;;  %12698 = vmatprep.mubr.msk.f32.mxu1 %vm2058_vm3, %v5647_v13 }
 0x305   : > { %12699 = vmatmul.mubr.msk.f32.gmra.mrb[232].mxu1 %vm2058_vm3, %v5648_v51  ;;  %v5650_v16 = vmax.f32 %v5522_v22, 0.0 }
 0x306   : > { %v5649_v17 = vmax.f32 %v5521_v44, 0.0  ;;  %v12498_v37 = vpop.f32.mrb[108].mxu0 }
 0x307   : > { %v5524_v32 = vadd.f32 %v12498_v37, %v15505_v35  ;;  %v5053_v40 = vpop.f32.mrb[109].mxu0 }
 0x308   : > { %v5523_v61 = vadd.f32 %v15505_v35, %v5053_v40  ;;  %12701 = vmatprep.mubr.msk.f32.mxu1 %vm2058_vm3, %v5649_v17 }
 0x309   : > { %12702 = vmatmul.mubr.msk.f32.gmra.mrb[234].mxu1 %vm2058_vm3, %v5650_v16  ;;  %v5652_v58 = vmax.f32 %v5524_v32, 0.0 }
 0x30a   : > { %v5651_v54 = vmax.f32 %v5523_v61, 0.0  ;;  %v12501_v56 = vpop.f32.mrb[110].mxu0 }
 0x30b   : > { %v5526_v49 = vadd.f32 %v12501_v56, %v15505_v35  ;;  %v5063_v39 = vpop.f32.mrb[111].mxu0  ;;  %v8714_v56 = vld [vmem:[%s17416_s13 + $0x18] sm:$0xff] }
 0x30c   : > { %v5525_v57 = vadd.f32 %v15505_v35, %v5063_v39  ;;  %12704 = vmatprep.mubr.msk.f32.mxu1 %vm2058_vm3, %v5651_v54  ;;  %v8713_v54 = vld [vmem:[%s17416_s13 + $0x10] sm:$0xff] }
 0x30d   : > { %12705 = vmatmul.mubr.msk.f32.gmra.mrb[236].mxu1 %vm2058_vm3, %v5652_v58  ;;  %v5654_v10 = vmax.f32 %v5526_v49, 0.0  ;;  %v13346_v58 = vpack.c.bf16 %v8714_v56, %v8713_v54 }
 0x30e   : > { %v5653_v11 = vmax.f32 %v5525_v57, 0.0  ;;  %v12504_v45 = vpop.f32.mrb[112].mxu0 }
 0x30f   : > { %v5528_v7 = vadd.f32 %v12504_v45, %v15505_v35  ;;  %v5073_v24 = vpop.f32.mrb[113].mxu0  ;;  %13347 = vmatprep.subr.bf16.mxu0 %v13346_v58 }
 0x310   : > { %v5527_v9 = vadd.f32 %v15505_v35, %v5073_v24  ;;  %12707 = vmatprep.mubr.msk.f32.mxu1 %vm2058_vm3, %v5653_v11  ;;  %13349 = vmatpush3.bf16.msra.mxu0 %v13346_v58 }
 0x311   : > { %12708 = vmatmul.mubr.msk.f32.gmra.mrb[238].mxu1 %vm2058_vm3, %v5654_v10  ;;  %v5656_v53 = vmax.f32 %v5528_v7, 0.0 }
 0x312   : > { %v5655_v50 = vmax.f32 %v5527_v9, 0.0  ;;  %v12507_v4 = vpop.f32.mrb[114].mxu0 }
 0x313   : > { %v5530_v26 = vadd.f32 %v12507_v4, %v15505_v35  ;;  %v5083_v15 = vpop.f32.mrb[115].mxu0 }
 0x314   : > { %v5529_v34 = vadd.f32 %v15505_v35, %v5083_v15  ;;  %12710 = vmatprep.mubr.msk.f32.mxu1 %vm2058_vm3, %v5655_v50 }
 0x315   : > { %12711 = vmatmul.mubr.msk.f32.gmra.mrb[240].mxu1 %vm2058_vm3, %v5656_v53  ;;  %v5658_v12 = vmax.f32 %v5530_v26, 0.0 }
 0x316   : > { %v5657_v6 = vmax.f32 %v5529_v34, 0.0  ;;  %v12510_v41 = vpop.f32.mrb[116].mxu0 }
 0x317   : > { %v5532_v3 = vadd.f32 %v12510_v41, %v15505_v35  ;;  %v5093_v23 = vpop.f32.mrb[117].mxu0 }
 0x318   : > { %v5531_v2 = vadd.f32 %v15505_v35, %v5093_v23  ;;  %12713 = vmatprep.mubr.msk.f32.mxu1 %vm2058_vm3, %v5657_v6 }
 0x319   : > { %12714 = vmatmul.mubr.msk.f32.gmra.mrb[242].mxu1 %vm2058_vm3, %v5658_v12  ;;  %v5660_v25 = vmax.f32 %v5532_v3, 0.0 }
 0x31a   : > { %v5659_v60 = vmax.f32 %v5531_v2, 0.0  ;;  %v12513_v14 = vpop.f32.mrb[118].mxu0 }
 0x31b   : > { %v5534_v21 = vadd.f32 %v12513_v14, %v15505_v35  ;;  %v5103_v36 = vpop.f32.mrb[119].mxu0 }
 0x31c   : > { %v5533_v62 = vadd.f32 %v15505_v35, %v5103_v36  ;;  %12716 = vmatprep.mubr.msk.f32.mxu1 %vm2058_vm3, %v5659_v60 }
 0x31d   : > { %12717 = vmatmul.mubr.msk.f32.gmra.mrb[244].mxu1 %vm2058_vm3, %v5660_v25  ;;  %v5662_v28 = vmax.f32 %v5534_v21, 0.0 }
 0x31e   : > { %v5661_v19 = vmax.f32 %v5533_v62, 0.0  ;;  %v12516_v55 = vpop.f32.mrb[120].mxu0 }
 0x31f   : > { %v5536_v30 = vadd.f32 %v12516_v55, %v15505_v35  ;;  %v5113_v46 = vpop.f32.mrb[121].mxu0 }
 0x320   : > { %v5535_v27 = vadd.f32 %v15505_v35, %v5113_v46  ;;  %12719 = vmatprep.mubr.msk.f32.mxu1 %vm2058_vm3, %v5661_v19 }
 0x321   : > { %12720 = vmatmul.mubr.msk.f32.gmra.mrb[246].mxu1 %vm2058_vm3, %v5662_v28  ;;  %v5664_v52 = vmax.f32 %v5536_v30, 0.0 }
 0x322   : > { %v5663_v33 = vmax.f32 %v5535_v27, 0.0  ;;  %v12519_v31 = vpop.f32.mrb[122].mxu0 }
 0x323   : > { %v5538_v20 = vadd.f32 %v12519_v31, %v15505_v35  ;;  %v5123_v0 = vpop.f32.mrb[123].mxu0 }
 0x324   : > { %v5537_v42 = vadd.f32 %v15505_v35, %v5123_v0  ;;  %12722 = vmatprep.mubr.msk.f32.mxu1 %vm2058_vm3, %v5663_v33 }
 0x325   : > { %12723 = vmatmul.mubr.msk.f32.gmra.mrb[248].mxu1 %vm2058_vm3, %v5664_v52  ;;  %v5666_v47 = vmax.f32 %v5538_v20, 0.0 }
 0x326   : > { %v5665_v48 = vmax.f32 %v5537_v42, 0.0  ;;  %v12522_v63 = vpop.f32.mrb[124].mxu0 }
 0x327   : > { %v5540_v5 = vadd.f32 %v12522_v63, %v15505_v35  ;;  %v5133_v43 = vpop.f32.mrb[125].mxu0 }
 0x328   : > { %v5539_v18 = vadd.f32 %v15505_v35, %v5133_v43  ;;  %12725 = vmatprep.mubr.msk.f32.mxu1 %vm2058_vm3, %v5665_v48 }
 0x329   : > { %12726 = vmatmul.mubr.msk.f32.gmra.mrb[250].mxu1 %vm2058_vm3, %v5666_v47  ;;  %v5668_v51 = vmax.f32 %v5540_v5, 0.0 }
 0x32a   : > { %v5667_v13 = vmax.f32 %v5539_v18, 0.0  ;;  %v12525_v1 = vpop.f32.mrb[126].mxu0 }
 0x32b   : > { %v5542_v22 = vadd.f32 %v12525_v1, %v15505_v35  ;;  %v5143_v59 = vpop.f32.mrb[127].mxu0  ;;  %v8716_v1 = vld [vmem:[%s17416_s13 + $0x28] sm:$0xff] }
 0x32c   : > { %v5541_v44 = vadd.f32 %v15505_v35, %v5143_v59  ;;  %12728 = vmatprep.mubr.msk.f32.mxu1 %vm2058_vm3, %v5667_v13  ;;  %v8715_v13 = vld [vmem:[%s17416_s13 + $0x20] sm:$0xff] }
 0x32d   : > { %12729 = vmatmul.mubr.msk.f32.gmra.mrb[252].mxu1 %vm2058_vm3, %v5668_v51  ;;  %v5670_v16 = vmax.f32 %v5542_v22, 0.0  ;;  %v13350_v51 = vpack.c.bf16 %v8716_v1, %v8715_v13 }
 0x32e   : > { %v5669_v17 = vmax.f32 %v5541_v44, 0.0  ;;  %v12528_v37 = vpop.f32.mrb[128].mxu0 }
 0x32f   : > { %v5544_v32 = vadd.f32 %v12528_v37, %v15505_v35  ;;  %v5153_v40 = vpop.f32.mrb[129].mxu0  ;;  %13351 = vmatprep.subr.bf16.mxu0 %v13350_v51 }
 0x330   : > { %v5543_v61 = vadd.f32 %v15505_v35, %v5153_v40  ;;  %12731 = vmatprep.mubr.msk.f32.mxu1 %vm2058_vm3, %v5669_v17  ;;  %13353 = vmatpush3.bf16.msra.mxu0 %v13350_v51 }
 0x331   : > { %12732 = vmatmul.mubr.msk.f32.gmra.mrb[254].mxu1 %vm2058_vm3, %v5670_v16  ;;  %v5672_v57 = vmax.f32 %v5544_v32, 0.0 }
 0x332   : > { %v5671_v49 = vmax.f32 %v5543_v61, 0.0  ;;  %v12531_v39 = vpop.f32.mrb[130].mxu0 }
 0x333   : > { %v5546_v11 = vadd.f32 %v12531_v39, %v15505_v35  ;;  %v5163_v45 = vpop.f32.mrb[131].mxu0 }
 0x334   : > { %v5545_v10 = vadd.f32 %v15505_v35, %v5163_v45  ;;  %12734 = vmatprep.mubr.msk.f32.mxu1 %vm2058_vm3, %v5671_v49 }
 0x335   : > { %12735 = vmatmul.mubr.msk.f32.gmra.mrb[0].mxu1 %vm2058_vm3, %v5672_v57  ;;  %v5674_v9 = vmax.f32 %v5546_v11, 0.0 }
 0x336   : > { %v5673_v7 = vmax.f32 %v5545_v10, 0.0  ;;  %v12534_v24 = vpop.f32.mrb[132].mxu0 }
 0x337   : > { %v5548_v50 = vadd.f32 %v12534_v24, %v15505_v35  ;;  %v5173_v4 = vpop.f32.mrb[133].mxu0 }
 0x338   : > { %v5547_v29 = vadd.f32 %v15505_v35, %v5173_v4  ;;  %12737 = vmatprep.mubr.msk.f32.mxu1 %vm2058_vm3, %v5673_v7 }
 0x339   : > { %12738 = vmatmul.mubr.msk.f32.gmra.mrb[2].mxu1 %vm2058_vm3, %v5674_v9  ;;  %v5676_v26 = vmax.f32 %v5548_v50, 0.0 }
 0x33a   : > { %v5675_v8 = vmax.f32 %v5547_v29, 0.0  ;;  %v12537_v53 = vpop.f32.mrb[134].mxu0 }
 0x33b   : > { %v5550_v15 = vadd.f32 %v12537_v53, %v15505_v35  ;;  %v5183_v38 = vpop.f32.mrb[135].mxu0 }
 0x33c   : > { %v5549_v34 = vadd.f32 %v15505_v35, %v5183_v38  ;;  %12740 = vmatprep.mubr.msk.f32.mxu1 %vm2058_vm3, %v5675_v8 }
 0x33d   : > { %12741 = vmatmul.mubr.msk.f32.gmra.mrb[4].mxu1 %vm2058_vm3, %v5676_v26  ;;  %v5678_v12 = vmax.f32 %v5550_v15, 0.0 }
 0x33e   : > { %v5677_v6 = vmax.f32 %v5549_v34, 0.0  ;;  %v12540_v41 = vpop.f32.mrb[136].mxu0 }
 0x33f   : > { %v5552_v3 = vadd.f32 %v12540_v41, %v15505_v35  ;;  %v5193_v23 = vpop.f32.mrb[137].mxu0 }
 0x340   : > { %v5551_v2 = vadd.f32 %v15505_v35, %v5193_v23  ;;  %12743 = vmatprep.mubr.msk.f32.mxu1 %vm2058_vm3, %v5677_v6 }
 0x341   : > { %12744 = vmatmul.mubr.msk.f32.gmra.mrb[6].mxu1 %vm2058_vm3, %v5678_v12  ;;  %v5680_v25 = vmax.f32 %v5552_v3, 0.0 }
 0x342   : > { %v5679_v60 = vmax.f32 %v5551_v2, 0.0  ;;  %v12543_v14 = vpop.f32.mrb[138].mxu0 }
 0x343   : > { %v5554_v21 = vadd.f32 %v12543_v14, %v15505_v35  ;;  %v5203_v36 = vpop.f32.mrb[139].mxu0 }
 0x344   : > { %v5553_v62 = vadd.f32 %v15505_v35, %v5203_v36  ;;  %12746 = vmatprep.mubr.msk.f32.mxu1 %vm2058_vm3, %v5679_v60 }
 0x345   : > { %12747 = vmatmul.mubr.msk.f32.gmra.mrb[8].mxu1 %vm2058_vm3, %v5680_v25  ;;  %v5682_v28 = vmax.f32 %v5554_v21, 0.0 }
 0x346   : > { %v5681_v19 = vmax.f32 %v5553_v62, 0.0  ;;  %v12546_v55 = vpop.f32.mrb[140].mxu0  ;;  %v15787_v62 = vld [vmem:[%s17411_s8] ss:$0 sm:$0xff] }
 0x347   : > { %v5556_v30 = vadd.f32 %v12546_v55, %v15505_v35  ;;  %v5213_v46 = vpop.f32.mrb[141].mxu0 }
 0x348   : > { %v5555_v27 = vadd.f32 %v15505_v35, %v5213_v46  ;;  %12749 = vmatprep.mubr.msk.f32.mxu1 %vm2058_vm3, %v5681_v19 }
 0x349   : > { %12750 = vmatmul.mubr.msk.f32.gmra.mrb[10].mxu1 %vm2058_vm3, %v5682_v28  ;;  %v5684_v52 = vmax.f32 %v5556_v30, 0.0 }
 0x34a   : > { %v5683_v33 = vmax.f32 %v5555_v27, 0.0  ;;  %v12549_v31 = vpop.f32.mrb[142].mxu0 }
 0x34b   : > { %v5558_v20 = vadd.f32 %v12549_v31, %v15505_v35  ;;  %v5223_v0 = vpop.f32.mrb[143].mxu0  ;;  %v8718_v31 = vld [vmem:[%s17416_s13 + $0x38] sm:$0xff] }
 0x34c   : > { %v5557_v42 = vadd.f32 %v15505_v35, %v5223_v0  ;;  %12752 = vmatprep.mubr.msk.f32.mxu1 %vm2058_vm3, %v5683_v33  ;;  %v8717_v33 = vld [vmem:[%s17416_s13 + $0x30] sm:$0xff] }
 0x34d   : > { %12753 = vmatmul.mubr.msk.f32.gmra.mrb[12].mxu1 %vm2058_vm3, %v5684_v52  ;;  %v5686_v47 = vmax.f32 %v5558_v20, 0.0  ;;  %v13354_v52 = vpack.c.bf16 %v8718_v31, %v8717_v33 }
 0x34e   : > { %v5685_v48 = vmax.f32 %v5557_v42, 0.0  ;;  %v12552_v63 = vpop.f32.mrb[144].mxu0 }
 0x34f   : > { %v5560_v5 = vadd.f32 %v12552_v63, %v15505_v35  ;;  %v5233_v43 = vpop.f32.mrb[145].mxu0  ;;  %13355 = vmatprep.subr.bf16.mxu0 %v13354_v52 }
 0x350   : > { %v5559_v18 = vadd.f32 %v15505_v35, %v5233_v43  ;;  %12755 = vmatprep.mubr.msk.f32.mxu1 %vm2058_vm3, %v5685_v48  ;;  %13357 = vmatpush3.bf16.msra.mxu0 %v13354_v52 }
 0x351   : > { %12756 = vmatmul.mubr.msk.f32.gmra.mrb[14].mxu1 %vm2058_vm3, %v5686_v47  ;;  %v5688_v44 = vmax.f32 %v5560_v5, 0.0 }
 0x352   : > { %v5687_v22 = vmax.f32 %v5559_v18, 0.0  ;;  %v12555_v59 = vpop.f32.mrb[146].mxu0 }
 0x353   : > { %v5562_v17 = vadd.f32 %v12555_v59, %v15505_v35  ;;  %v5243_v37 = vpop.f32.mrb[147].mxu0 }
 0x354   : > { %v5561_v16 = vadd.f32 %v15505_v35, %v5243_v37  ;;  %12758 = vmatprep.mubr.msk.f32.mxu1 %vm2058_vm3, %v5687_v22 }
 0x355   : > { %12759 = vmatmul.mubr.msk.f32.gmra.mrb[16].mxu1 %vm2058_vm3, %v5688_v44  ;;  %v5690_v61 = vmax.f32 %v5562_v17, 0.0 }
 0x356   : > { %v5689_v32 = vmax.f32 %v5561_v16, 0.0  ;;  %v12558_v40 = vpop.f32.mrb[148].mxu0 }
 0x357   : > { %v5564_v54 = vadd.f32 %v12558_v40, %v15505_v35  ;;  %v5253_v56 = vpop.f32.mrb[149].mxu0 }
 0x358   : > { %v5563_v58 = vadd.f32 %v15505_v35, %v5253_v56  ;;  %12761 = vmatprep.mubr.msk.f32.mxu1 %vm2058_vm3, %v5689_v32 }
 0x359   : > { %12762 = vmatmul.mubr.msk.f32.gmra.mrb[18].mxu1 %vm2058_vm3, %v5690_v61  ;;  %v5692_v57 = vmax.f32 %v5564_v54, 0.0 }
 0x35a   : > { %v5691_v49 = vmax.f32 %v5563_v58, 0.0  ;;  %v12561_v39 = vpop.f32.mrb[150].mxu0 }
 0x35b   : > { %v5566_v11 = vadd.f32 %v12561_v39, %v15505_v35  ;;  %v5263_v45 = vpop.f32.mrb[151].mxu0 }
 0x35c   : > { %v5565_v10 = vadd.f32 %v15505_v35, %v5263_v45  ;;  %12764 = vmatprep.mubr.msk.f32.mxu1 %vm2058_vm3, %v5691_v49 }
 0x35d   : > { %12765 = vmatmul.mubr.msk.f32.gmra.mrb[20].mxu1 %vm2058_vm3, %v5692_v57  ;;  %v5694_v9 = vmax.f32 %v5566_v11, 0.0 }
 0x35e   : > { %v5693_v7 = vmax.f32 %v5565_v10, 0.0  ;;  %v12564_v24 = vpop.f32.mrb[152].mxu0 }
 0x35f   : > { %v5568_v50 = vadd.f32 %v12564_v24, %v15505_v35  ;;  %v5273_v4 = vpop.f32.mrb[153].mxu0 }
 0x360   : > { %v5567_v29 = vadd.f32 %v15505_v35, %v5273_v4  ;;  %12767 = vmatprep.mubr.msk.f32.mxu1 %vm2058_vm3, %v5693_v7 }
 0x361   : > { %12768 = vmatmul.mubr.msk.f32.gmra.mrb[22].mxu1 %vm2058_vm3, %v5694_v9  ;;  %v5696_v26 = vmax.f32 %v5568_v50, 0.0 }
 0x362   : > { %v5695_v8 = vmax.f32 %v5567_v29, 0.0  ;;  %v12567_v53 = vpop.f32.mrb[154].mxu0 }
 0x363   : > { %v5570_v15 = vadd.f32 %v12567_v53, %v15505_v35  ;;  %v5283_v38 = vpop.f32.mrb[155].mxu0 }
 0x364   : > { %v5569_v34 = vadd.f32 %v15505_v35, %v5283_v38  ;;  %12770 = vmatprep.mubr.msk.f32.mxu1 %vm2058_vm3, %v5695_v8 }
 0x365   : > { %12771 = vmatmul.mubr.msk.f32.gmra.mrb[24].mxu1 %vm2058_vm3, %v5696_v26  ;;  %v5698_v12 = vmax.f32 %v5570_v15, 0.0 }
 0x366   : > { %v5697_v6 = vmax.f32 %v5569_v34, 0.0  ;;  %v12570_v41 = vpop.f32.mrb[156].mxu0 }
 0x367   : > { %v5572_v3 = vadd.f32 %v12570_v41, %v15505_v35  ;;  %v5293_v23 = vpop.f32.mrb[157].mxu0 }
 0x368   : > { %v5571_v2 = vadd.f32 %v15505_v35, %v5293_v23  ;;  %12773 = vmatprep.mubr.msk.f32.mxu1 %vm2058_vm3, %v5697_v6 }
 0x369   : > { %12774 = vmatmul.mubr.msk.f32.gmra.mrb[26].mxu1 %vm2058_vm3, %v5698_v12  ;;  %v5700_v25 = vmax.f32 %v5572_v3, 0.0 }
 0x36a   : > { %v5699_v60 = vmax.f32 %v5571_v2, 0.0  ;;  %v12573_v14 = vpop.f32.mrb[158].mxu0 }
 0x36b   : > { %v5574_v21 = vadd.f32 %v12573_v14, %v15505_v35  ;;  %v5303_v36 = vpop.f32.mrb[159].mxu0 }
 0x36c   : > { %v5573_v19 = vadd.f32 %v15787_v62, %v5303_v36  ;;  %12776 = vmatprep.mubr.msk.f32.mxu1 %vm2058_vm3, %v5699_v60 }
 0x36d   : > { %12777 = vmatmul.mubr.msk.f32.gmra.mrb[28].mxu1 %vm2058_vm3, %v5700_v25  ;;  %v5702_v30 = vmax.f32 %v5574_v21, 0.0 }
 0x36e   : > { %v5701_v55 = vmax.f32 %v5573_v19, 0.0  ;;  %v12576_v28 = vpop.f32.mrb[160].mxu0  ;;  %v8719_v19 = vld [vmem:[%s17416_s13 + $0x40] sm:$0xff] }
 0x36f   : > { %v5576_v46 = vadd.f32 %v15787_v62, %v12576_v28  ;;  %v5313_v27 = vpop.f32.mrb[161].mxu0 }
 0x370   : > { %v5575_v35 = vadd.f32 %v15787_v62, %v5313_v27  ;;  %12779 = vmatprep.mubr.msk.f32.mxu1 %vm2058_vm3, %v5701_v55  ;;  %v8720_v55 = vld [vmem:[%s17416_s13 + $0x48] sm:$0xff] }
 0x371   : > { %12780 = vmatmul.mubr.msk.f32.gmra.mrb[30].mxu1 %vm2058_vm3, %v5702_v30  ;;  %v5704_v42 = vmax.f32 %v5576_v46, 0.0  ;;  %v13358_v30 = vpack.c.bf16 %v8720_v55, %v8719_v19 }
 0x372   : > { %v5703_v20 = vmax.f32 %v5575_v35, 0.0  ;;  %v12579_v0 = vpop.f32.mrb[162].mxu0 }
 0x373   : > { %v5578_v48 = vadd.f32 %v15787_v62, %v12579_v0  ;;  %v5323_v63 = vpop.f32.mrb[163].mxu0  ;;  %13359 = vmatprep.subr.bf16.mxu0 %v13358_v30 }
 0x374   : > { %v5577_v47 = vadd.f32 %v15787_v62, %v5323_v63  ;;  %12782 = vmatprep.mubr.msk.f32.mxu1 %vm2058_vm3, %v5703_v20  ;;  %13361 = vmatpush3.bf16.msra.mxu0 %v13358_v30 }
 0x375   : > { %12783 = vmatmul.mubr.msk.f32.gmra.mrb[32].mxu1 %vm2058_vm3, %v5704_v42  ;;  %v5706_v18 = vmax.f32 %v5578_v48, 0.0 }
 0x376   : > { %v5705_v5 = vmax.f32 %v5577_v47, 0.0  ;;  %v12582_v43 = vpop.f32.mrb[164].mxu0 }
 0x377   : > { %v5580_v13 = vadd.f32 %v15787_v62, %v12582_v43  ;;  %v5333_v1 = vpop.f32.mrb[165].mxu0 }
 0x378   : > { %v5579_v51 = vadd.f32 %v15787_v62, %v5333_v1  ;;  %12785 = vmatprep.mubr.msk.f32.mxu1 %vm2058_vm3, %v5705_v5 }
 0x379   : > { %12786 = vmatmul.mubr.msk.f32.gmra.mrb[34].mxu1 %vm2058_vm3, %v5706_v18  ;;  %v5708_v44 = vmax.f32 %v5580_v13, 0.0 }
 0x37a   : > { %v5707_v22 = vmax.f32 %v5579_v51, 0.0  ;;  %v12585_v59 = vpop.f32.mrb[166].mxu0 }
 0x37b   : > { %v5582_v17 = vadd.f32 %v15787_v62, %v12585_v59  ;;  %v5343_v37 = vpop.f32.mrb[167].mxu0 }
 0x37c   : > { %v5581_v16 = vadd.f32 %v15787_v62, %v5343_v37  ;;  %12788 = vmatprep.mubr.msk.f32.mxu1 %vm2058_vm3, %v5707_v22 }
 0x37d   : > { %12789 = vmatmul.mubr.msk.f32.gmra.mrb[36].mxu1 %vm2058_vm3, %v5708_v44  ;;  %v5710_v61 = vmax.f32 %v5582_v17, 0.0 }
 0x37e   : > { %v5709_v32 = vmax.f32 %v5581_v16, 0.0  ;;  %v12588_v40 = vpop.f32.mrb[168].mxu0 }
 0x37f   : > { %v5584_v54 = vadd.f32 %v15787_v62, %v12588_v40  ;;  %v5353_v56 = vpop.f32.mrb[169].mxu0 }
 0x380   : > { %v5583_v58 = vadd.f32 %v15787_v62, %v5353_v56  ;;  %12791 = vmatprep.mubr.msk.f32.mxu1 %vm2058_vm3, %v5709_v32 }
 0x381   : > { %12792 = vmatmul.mubr.msk.f32.gmra.mrb[38].mxu1 %vm2058_vm3, %v5710_v61  ;;  %v5712_v57 = vmax.f32 %v5584_v54, 0.0 }
 0x382   : > { %v5711_v49 = vmax.f32 %v5583_v58, 0.0  ;;  %v12591_v39 = vpop.f32.mrb[170].mxu0 }
 0x383   : > { %v5586_v11 = vadd.f32 %v15787_v62, %v12591_v39  ;;  %v5363_v45 = vpop.f32.mrb[171].mxu0 }
 0x384   : > { %v5585_v10 = vadd.f32 %v15787_v62, %v5363_v45  ;;  %12794 = vmatprep.mubr.msk.f32.mxu1 %vm2058_vm3, %v5711_v49 }
 0x385   : > { %12795 = vmatmul.mubr.msk.f32.gmra.mrb[40].mxu1 %vm2058_vm3, %v5712_v57  ;;  %v5714_v9 = vmax.f32 %v5586_v11, 0.0 }
 0x386   : > { %v5713_v7 = vmax.f32 %v5585_v10, 0.0  ;;  %v12594_v24 = vpop.f32.mrb[172].mxu0 }
 0x387   : > { %v5588_v50 = vadd.f32 %v15787_v62, %v12594_v24  ;;  %v5373_v4 = vpop.f32.mrb[173].mxu0 }
 0x388   : > { %v5587_v29 = vadd.f32 %v15787_v62, %v5373_v4  ;;  %v15824_v8 = vpop.f32.mrb[192].mxu1  ;;  %12797 = vmatprep.mubr.msk.f32.mxu1 %vm2058_vm3, %v5713_v7 }
 0x389   : > { %v15827_v53 = vpop.f32.mrb[193].mxu1  ;;  %12798 = vmatmul.mubr.msk.f32.gmra.mrb[42].mxu1 %vm2058_vm3, %v5714_v9  ;;  %v5716_v38 = vmax.f32 %v5588_v50, 0.0 }
 0x38a   : > { %v5715_v26 = vmax.f32 %v5587_v29, 0.0  ;;  %v12597_v15 = vpop.f32.mrb[174].mxu0 }
 0x38b   : > { %v5590_v34 = vadd.f32 %v15787_v62, %v12597_v15  ;;  %v5383_v6 = vpop.f32.mrb[175].mxu0 }
 0x38c   : > { %v5589_v41 = vadd.f32 %v15787_v62, %v5383_v6  ;;  %v15832_v12 = vpop.f32.mrb[194].mxu1  ;;  %12800 = vmatprep.mubr.msk.f32.mxu1 %vm2058_vm3, %v5715_v26 }
 0x38d   : > { %v15835_v3 = vpop.f32.mrb[195].mxu1  ;;  %12801 = vmatmul.mubr.msk.f32.gmra.mrb[44].mxu1 %vm2058_vm3, %v5716_v38  ;;  %v5718_v60 = vmax.f32 %v5590_v34, 0.0 }
 0x38e   : > { %v5717_v23 = vmax.f32 %v5589_v41, 0.0  ;;  %v12600_v2 = vpop.f32.mrb[176].mxu0  ;;  %v15900_v41 = vld [vmem:[%s17413_s10] ss:$0 sm:$0xff] }
 0x38f   : > { %v5592_v14 = vadd.f32 %v15787_v62, %v12600_v2  ;;  %v5393_v25 = vpop.f32.mrb[177].mxu0  ;;  %v6201_v19 = vadd.f32 %v15900_v41, %v15827_v53 }
 0x390   : > { %v5591_v21 = vadd.f32 %v15787_v62, %v5393_v25  ;;  %v15840_v36 = vpop.f32.mrb[196].mxu1  ;;  %12803 = vmatprep.mubr.msk.f32.mxu1 %vm2058_vm3, %v5717_v23 }
 0x391   : > { %v15849_v28 = vpop.f32.mrb[197].mxu1  ;;  %12804 = vmatmul.mubr.msk.f32.gmra.mrb[46].mxu1 %vm2058_vm3, %v5718_v60  ;;  %v5720_v35 = vmax.f32 %v5592_v14, 0.0 }
 0x392   : > { %v5719_v46 = vmax.f32 %v5591_v21, 0.0  ;;  %v12603_v27 = vpop.f32.mrb[178].mxu0 }
 0x393   : > { %v5594_v33 = vadd.f32 %v15787_v62, %v12603_v27  ;;  %v5403_v31 = vpop.f32.mrb[179].mxu0 }
 0x394   : > { %v5593_v52 = vadd.f32 %v15787_v62, %v5403_v31  ;;  %v15854_v20 = vpop.f32.mrb[198].mxu1  ;;  %12806 = vmatprep.mubr.msk.f32.mxu1 %vm2058_vm3, %v5719_v46  ;;  %v6839_v31 = vmax.f32 %v6201_v19, 0.0  ;;  %v8724_v19 = vld [vmem:[%s17416_s13 + $0x68] sm:$0xff] }
 0x395   : > { %v15857_v0 = vpop.f32.mrb[199].mxu1  ;;  %12807 = vmatmul.mubr.msk.f32.gmra.mrb[48].mxu1 %vm2058_vm3, %v5720_v35  ;;  %v5722_v63 = vmax.f32 %v5594_v33, 0.0  ;;  %v6206_v35 = vadd.f32 %v15824_v8, %v15900_v41 }
 0x396   : > { %v5721_v42 = vmax.f32 %v5593_v52, 0.0  ;;  %v12606_v48 = vpop.f32.mrb[180].mxu0  ;;  %v6211_v52 = vadd.f32 %v15900_v41, %v15835_v3 }
 0x397   : > { %v5596_v47 = vadd.f32 %v15787_v62, %v12606_v48  ;;  %v5413_v5 = vpop.f32.mrb[181].mxu0  ;;  %v6840_v3 = vmax.f32 %v6206_v35, 0.0 }
 0x398   : > { %v5595_v43 = vadd.f32 %v15787_v62, %v5413_v5  ;;  %v15862_v18 = vpop.f32.mrb[200].mxu1  ;;  %12809 = vmatprep.mubr.msk.f32.mxu1 %vm2058_vm3, %v5721_v42  ;;  %v8722_v42 = vld [vmem:[%s17416_s13 + $0x58] sm:$0xff]  ;;  %v6221_v5 = vadd.f32 %v15900_v41, %v15849_v28 }
 0x399   : > { %v15865_v13 = vpop.f32.mrb[201].mxu1  ;;  %12810 = vmatmul.mubr.msk.f32.gmra.mrb[50].mxu1 %vm2058_vm3, %v5722_v63  ;;  %v5724_v22 = vmax.f32 %v5596_v47, 0.0  ;;  %v6216_v63 = vadd.f32 %v15832_v12, %v15900_v41  ;;  %v6841_v47 = vmax.f32 %v6211_v52, 0.0  ;;  %v6231_v12 = vadd.f32 %v15900_v41, %v15857_v0 }
 0x39a   : > { %v5723_v1 = vmax.f32 %v5595_v43, 0.0  ;;  %v12609_v51 = vpop.f32.mrb[182].mxu0 }
 0x39b   : > { %v5598_v59 = vadd.f32 %v15787_v62, %v12609_v51  ;;  %v5423_v44 = vpop.f32.mrb[183].mxu0  ;;  %v6842_v51 = vmax.f32 %v6216_v63, 0.0 }
 0x39c   : > { %v5597_v17 = vadd.f32 %v15787_v62, %v5423_v44  ;;  %v15870_v37 = vpop.f32.mrb[202].mxu1  ;;  %12812 = vmatprep.mubr.msk.f32.mxu1 %vm2058_vm3, %v5723_v1 }
 0x39d   : > { %v15873_v16 = vpop.f32.mrb[203].mxu1  ;;  %12813 = vmatmul.mubr.msk.f32.gmra.mrb[52].mxu1 %vm2058_vm3, %v5724_v22  ;;  %v5726_v61 = vmax.f32 %v5598_v59, 0.0  ;;  %v6226_v22 = vadd.f32 %v15840_v36, %v15900_v41  ;;  %v6843_v59 = vmax.f32 %v6221_v5, 0.0  ;;  %v6241_v36 = vadd.f32 %v15900_v41, %v15865_v13 }
 0x39e   : > { %v5725_v32 = vmax.f32 %v5597_v17, 0.0  ;;  %v12612_v40 = vpop.f32.mrb[184].mxu0 }
 0x39f   : > { %v5600_v54 = vadd.f32 %v15787_v62, %v12612_v40  ;;  %v5433_v56 = vpop.f32.mrb[185].mxu0  ;;  %v6844_v17 = vmax.f32 %v6226_v22, 0.0  ;;  %v6845_v40 = vmax.f32 %v6231_v12, 0.0 }
 0x3a0   : > { %v5599_v58 = vadd.f32 %v15787_v62, %v5433_v56  ;;  %v15878_v49 = vpop.f32.mrb[204].mxu1  ;;  %12815 = vmatprep.mubr.msk.f32.mxu1 %vm2058_vm3, %v5725_v32  ;;  %v6236_v32 = vadd.f32 %v15854_v20, %v15900_v41  ;;  %v6246_v56 = vadd.f32 %v15862_v18, %v15900_v41  ;;  %v6251_v20 = vadd.f32 %v15900_v41, %v15873_v16 }
 0x3a1   : > { %v15881_v39 = vpop.f32.mrb[205].mxu1  ;;  %12816 = vmatmul.mubr.msk.f32.gmra.mrb[54].mxu1 %vm2058_vm3, %v5726_v61  ;;  %v5728_v45 = vmax.f32 %v5600_v54, 0.0 }
 0x3a2   : > { %v5727_v57 = vmax.f32 %v5599_v58, 0.0  ;;  %v12615_v11 = vpop.f32.mrb[186].mxu0  ;;  %v6846_v0 = vmax.f32 %v6236_v32, 0.0  ;;  %v6847_v58 = vmax.f32 %v6241_v36, 0.0  ;;  %v6848_v13 = vmax.f32 %v6246_v56, 0.0 }
 0x3a3   : > { %v5602_v10 = vadd.f32 %v15787_v62, %v12615_v11  ;;  %v5443_v7 = vpop.f32.mrb[187].mxu0  ;;  %v6261_v18 = vadd.f32 %v15900_v41, %v15881_v39 }
 0x3a4   : > { %v5601_v24 = vadd.f32 %v15787_v62, %v5443_v7  ;;  %v15886_v9 = vpop.f32.mrb[206].mxu1  ;;  %12818 = vmatprep.mubr.msk.f32.mxu1 %vm2058_vm3, %v5727_v57 }
 0x3a5   : > { %v15889_v50 = vpop.f32.mrb[207].mxu1  ;;  %12819 = vmatmul.mubr.msk.f32.gmra.mrb[56].mxu1 %vm2058_vm3, %v5728_v45  ;;  %v5730_v26 = vmax.f32 %v5602_v10, 0.0  ;;  %v6256_v45 = vadd.f32 %v15870_v37, %v15900_v41  ;;  %v6849_v10 = vmax.f32 %v6251_v20, 0.0 }
 0x3a6   : > { %v5729_v4 = vmax.f32 %v5601_v24, 0.0  ;;  %v12618_v29 = vpop.f32.mrb[188].mxu0  ;;  %v6271_v37 = vadd.f32 %v15900_v41, %v15889_v50 }
 0x3a7   : > { %v5604_v15 = vadd.f32 %v15787_v62, %v12618_v29  ;;  %v5453_v38 = vpop.f32.mrb[189].mxu0  ;;  %v6850_v16 = vmax.f32 %v6256_v45, 0.0  ;;  %v6851_v29 = vmax.f32 %v6261_v18, 0.0 }
 0x3a8   : > { %v5603_v34 = vadd.f32 %v15787_v62, %v5453_v38  ;;  %v15894_v6 = vpop.f32.mrb[208].mxu1  ;;  %12821 = vmatprep.mubr.msk.f32.mxu1 %vm2058_vm3, %v5729_v4  ;;  %v6266_v4 = vadd.f32 %v15878_v49, %v15900_v41  ;;  %v6276_v38 = vadd.f32 %v15886_v9, %v15900_v41 }
 0x3a9   : > { %v15902_v23 = vpop.f32.mrb[209].mxu1  ;;  %12822 = vmatmul.mubr.msk.f32.gmra.mrb[58].mxu1 %vm2058_vm3, %v5730_v26  ;;  %v5732_v14 = vmax.f32 %v5604_v15, 0.0 }
 0x3aa   : > { %v5731_v2 = vmax.f32 %v5603_v34, 0.0  ;;  %v12621_v60 = vpop.f32.mrb[190].mxu0  ;;  %v6852_v39 = vmax.f32 %v6266_v4, 0.0  ;;  %v6853_v34 = vmax.f32 %v6271_v37, 0.0  ;;  %v6281_v49 = vadd.f32 %v15900_v41, %v15902_v23  ;;  %v8723_v23 = vld [vmem:[%s17416_s13 + $0x60] sm:$0xff] }
 0x3ab   : > { %v5606_v25 = vadd.f32 %v15787_v62, %v12621_v60  ;;  %v5463_v21 = vpop.f32.mrb[191].mxu0  ;;  %v6854_v50 = vmax.f32 %v6276_v38, 0.0  ;;  %v8726_v38 = vld [vmem:[%s17416_s13 + $0x78] sm:$0xff] }
 0x3ac   : > { %v5605_v55 = vadd.f32 %v15787_v62, %v5463_v21  ;;  %v15909_v30 = vpop.f32.mrb[210].mxu1  ;;  %12824 = vmatprep.mubr.msk.f32.mxu1 %vm2058_vm3, %v5731_v2  ;;  %v8721_v62 = vld [vmem:[%s17416_s13 + $0x50] sm:$0xff] }
 0x3ad   : > { %v15912_v46 = vpop.f32.mrb[211].mxu1  ;;  %12825 = vmatmul.mubr.msk.f32.gmra.mrb[60].mxu1 %vm2058_vm3, %v5732_v14  ;;  %v5734_v33 = vmax.f32 %v5606_v25, 0.0  ;;  %v13362_v8 = vpack.c.bf16 %v8722_v42, %v8721_v62  ;;  %v6286_v14 = vadd.f32 %v15894_v6, %v15900_v41  ;;  %v6855_v25 = vmax.f32 %v6281_v49, 0.0 }
 0x3ae   : > { %v5733_v27 = vmax.f32 %v5605_v55, 0.0  ;;  %v6291_v9 = vadd.f32 %v15900_v41, %v15912_v46  ;;  %v6296_v46 = vadd.f32 %v15909_v30, %v15900_v41 }
 0x3af   : > { %13363 = vmatprep.subr.bf16.mxu0 %v13362_v8  ;;  %v6856_v6 = vmax.f32 %v6286_v14, 0.0 }
 0x3b0   : > { %v15919_v53 = vpop.f32.mrb[212].mxu1  ;;  %12827 = vmatprep.mubr.msk.f32.mxu1 %vm2058_vm3, %v5733_v27  ;;  %13365 = vmatpush3.bf16.msra.mxu0 %v13362_v8  ;;  %v13366_v27 = vpack.c.bf16 %v8724_v19, %v8723_v23  ;;  %v6857_v35 = vmax.f32 %v6291_v9, 0.0  ;;  %v6858_v62 = vmax.f32 %v6296_v46, 0.0 }
 0x3b1   : > { %v15928_v48 = vpop.f32.mrb[213].mxu1  ;;  %12828 = vmatmul.mubr.msk.f32.gmra.mrb[62].mxu1 %vm2058_vm3, %v5734_v33  ;;  %v6306_v42 = vadd.f32 %v15919_v53, %v15900_v41 }
 0x3b2   : > { %12846 = vmatprep.mubr.msk.f32.mxu1 %vm2058_vm3, %v6839_v31  ;;  %13367 = vmatprep.subr.bf16.mxu0 %v13366_v27  ;;  %v6301_v33 = vadd.f32 %v15900_v41, %v15928_v48 }
 0x3b3   : > { %v6860_v63 = vmax.f32 %v6306_v42, 0.0 }
 0x3b4   : > { %v15936_v43 = vpop.f32.mrb[214].mxu1  ;;  %13369 = vmatpush3.bf16.msra.mxu0 %v13366_v27  ;;  %v6859_v8 = vmax.f32 %v6301_v33, 0.0 }
 0x3b5   : > { %v15938_v1 = vpop.f32.mrb[215].mxu1  ;;  %12847 = vmatmul.mubr.msk.f32.vlgmr.msra.gmra.mrb[64].mxu1 %vm2058_vm3, %v6840_v3 }
 0x3b6   : > { %12849 = vmatprep.mubr.msk.f32.mxu1 %vm2058_vm3, %v6841_v47  ;;  %v6311_v30 = vadd.f32 %v15900_v41, %v15938_v1  ;;  %v6316_v47 = vadd.f32 %v15936_v43, %v15900_v41 }
 0x3b8   : > { %v15946_v44 = vpop.f32.mrb[216].mxu1  ;;  %v6861_v5 = vmax.f32 %v6311_v30, 0.0  ;;  %v6862_v1 = vmax.f32 %v6316_v47, 0.0 }
 0x3b9   : > { %v15948_v28 = vpop.f32.mrb[217].mxu1  ;;  %12850 = vmatmul.mubr.msk.f32.gmra.mrb[66].mxu1 %vm2058_vm3, %v6842_v51 }
 0x3ba   : > { %12852 = vmatprep.mubr.msk.f32.mxu1 %vm2058_vm3, %v6843_v59  ;;  %v6321_v53 = vadd.f32 %v15900_v41, %v15948_v28  ;;  %v6326_v59 = vadd.f32 %v15946_v44, %v15900_v41 }
 0x3bc   : > { %v15956_v61 = vpop.f32.mrb[218].mxu1  ;;  %v6863_v12 = vmax.f32 %v6321_v53, 0.0  ;;  %v6864_v28 = vmax.f32 %v6326_v59, 0.0 }
 0x3bd   : > { %v15958_v54 = vpop.f32.mrb[219].mxu1  ;;  %12853 = vmatmul.mubr.msk.f32.gmra.mrb[68].mxu1 %vm2058_vm3, %v6844_v17 }
 0x3be   : > { %12855 = vmatprep.mubr.msk.f32.mxu1 %vm2058_vm3, %v6845_v40  ;;  %v6331_v43 = vadd.f32 %v15900_v41, %v15958_v54  ;;  %v6336_v40 = vadd.f32 %v15956_v61, %v15900_v41 }
 0x3c0   : > { %v15966_v57 = vpop.f32.mrb[220].mxu1  ;;  %v6865_v36 = vmax.f32 %v6331_v43, 0.0  ;;  %v6866_v54 = vmax.f32 %v6336_v40, 0.0 }
 0x3c1   : > { %v15968_v11 = vpop.f32.mrb[221].mxu1  ;;  %12856 = vmatmul.mubr.msk.f32.gmra.mrb[70].mxu1 %vm2058_vm3, %v6846_v0 }
 0x3c2   : > { %12858 = vmatprep.mubr.msk.f32.mxu1 %vm2058_vm3, %v6847_v58  ;;  %v6341_v44 = vadd.f32 %v15900_v41, %v15968_v11  ;;  %v6346_v58 = vadd.f32 %v15966_v57, %v15900_v41 }
 0x3c4   : > { %v15976_v7 = vpop.f32.mrb[222].mxu1  ;;  %v6867_v20 = vmax.f32 %v6341_v44, 0.0  ;;  %v6868_v11 = vmax.f32 %v6346_v58, 0.0 }
 0x3c5   : > { %v15978_v24 = vpop.f32.mrb[223].mxu1  ;;  %12859 = vmatmul.mubr.msk.f32.gmra.mrb[72].mxu1 %vm2058_vm3, %v6848_v13 }
 0x3c6   : > { %12861 = vmatprep.mubr.msk.f32.mxu1 %vm2058_vm3, %v6849_v10  ;;  %v6351_v61 = vadd.f32 %v15900_v41, %v15978_v24  ;;  %v6356_v10 = vadd.f32 %v15976_v7, %v15900_v41 }
 0x3c8   : > { %v15986_v26 = vpop.f32.mrb[224].mxu1  ;;  %v6869_v18 = vmax.f32 %v6351_v61, 0.0  ;;  %v6870_v24 = vmax.f32 %v6356_v10, 0.0 }
 0x3c9   : > { %v15988_v15 = vpop.f32.mrb[225].mxu1  ;;  %12862 = vmatmul.mubr.msk.f32.gmra.mrb[74].mxu1 %vm2058_vm3, %v6850_v16 }
 0x3ca   : > { %12864 = vmatprep.mubr.msk.f32.mxu1 %vm2058_vm3, %v6851_v29  ;;  %v6361_v57 = vadd.f32 %v15900_v41, %v15988_v15  ;;  %v6366_v29 = vadd.f32 %v15986_v26, %v15900_v41  ;;  %v8725_v15 = vld [vmem:[%s17416_s13 + $0x70] sm:$0xff] }
 0x3cb   : > { %v13370_v49 = vpack.c.bf16 %v8726_v38, %v8725_v15 }
 0x3cc   : > { %v15996_v2 = vpop.f32.mrb[226].mxu1  ;;  %v6871_v37 = vmax.f32 %v6361_v57, 0.0  ;;  %v6872_v26 = vmax.f32 %v6366_v29, 0.0 }
 0x3cd   : > { %v15998_v60 = vpop.f32.mrb[227].mxu1  ;;  %12865 = vmatmul.mubr.msk.f32.gmra.mrb[76].mxu1 %vm2058_vm3, %v6852_v39  ;;  %13371 = vmatprep.subr.bf16.mxu0 %v13370_v49 }
 0x3ce   : > { %12867 = vmatprep.mubr.msk.f32.mxu1 %vm2058_vm3, %v6853_v34  ;;  %v6371_v7 = vadd.f32 %v15900_v41, %v15998_v60  ;;  %v6376_v60 = vadd.f32 %v15996_v2, %v15900_v41  ;;  %13373 = vmatpush3.bf16.msra.mxu0 %v13370_v49 }
 0x3d0   : > { %v16006_v21 = vpop.f32.mrb[228].mxu1  ;;  %v6874_v23 = vmax.f32 %v6376_v60, 0.0 }
 0x3d1   : > { %v16014_v55 = vpop.f32.mrb[229].mxu1  ;;  %12868 = vmatmul.mubr.msk.f32.gmra.mrb[78].mxu1 %vm2058_vm3, %v6854_v50  ;;  %v6873_v50 = vmax.f32 %v6371_v7, 0.0  ;;  %v6386_v19 = vadd.f32 %v16006_v21, %v15900_v41 }
 0x3d2   : > { %12870 = vmatprep.mubr.msk.f32.mxu1 %vm2058_vm3, %v6855_v25  ;;  %v6381_v14 = vadd.f32 %v15900_v41, %v16014_v55 }
 0x3d3   : > { %v6876_v46 = vmax.f32 %v6386_v19, 0.0 }
 0x3d4   : > { %v16022_v31 = vpop.f32.mrb[230].mxu1  ;;  %v6875_v27 = vmax.f32 %v6381_v14, 0.0 }
 0x3d5   : > { %v16024_v52 = vpop.f32.mrb[231].mxu1  ;;  %12871 = vmatmul.mubr.msk.f32.gmra.mrb[80].mxu1 %vm2058_vm3, %v6856_v6 }
 0x3d6   : > { %12873 = vmatprep.mubr.msk.f32.mxu1 %vm2058_vm3, %v6857_v35  ;;  %v6391_v2 = vadd.f32 %v15900_v41, %v16024_v52  ;;  %v6396_v35 = vadd.f32 %v16022_v31, %v15900_v41 }
 0x3d8   : > { %v16032_v3 = vpop.f32.mrb[232].mxu1  ;;  %v6877_v33 = vmax.f32 %v6391_v2, 0.0  ;;  %v6878_v52 = vmax.f32 %v6396_v35, 0.0 }
 0x3d9   : > { %v16034_v48 = vpop.f32.mrb[233].mxu1  ;;  %12874 = vmatmul.mubr.msk.f32.gmra.mrb[82].mxu1 %vm2058_vm3, %v6858_v62 }
 0x3da   : > { %12876 = vmatprep.mubr.msk.f32.mxu1 %vm2058_vm3, %v6859_v8  ;;  %v6401_v21 = vadd.f32 %v15900_v41, %v16034_v48  ;;  %v6406_v8 = vadd.f32 %v16032_v3, %v15900_v41 }
 0x3dc   : > { %v16042_v51 = vpop.f32.mrb[234].mxu1  ;;  %v6879_v30 = vmax.f32 %v6401_v21, 0.0  ;;  %v6880_v48 = vmax.f32 %v6406_v8, 0.0 }
 0x3dd   : > { %v16044_v22 = vpop.f32.mrb[235].mxu1  ;;  %12877 = vmatmul.mubr.msk.f32.gmra.mrb[84].mxu1 %vm2058_vm3, %v6860_v63 }
 0x3de   : > { %12879 = vmatprep.mubr.msk.f32.mxu1 %vm2058_vm3, %v6861_v5  ;;  %v6411_v31 = vadd.f32 %v15900_v41, %v16044_v22  ;;  %v6416_v5 = vadd.f32 %v16042_v51, %v15900_v41 }
 0x3e0   : > { %v16052_v17 = vpop.f32.mrb[236].mxu1  ;;  %v6881_v53 = vmax.f32 %v6411_v31, 0.0  ;;  %v6882_v22 = vmax.f32 %v6416_v5, 0.0 }
 0x3e1   : > { %v16054_v32 = vpop.f32.mrb[237].mxu1  ;;  %12880 = vmatmul.mubr.msk.f32.gmra.mrb[86].mxu1 %vm2058_vm3, %v6862_v1 }
 0x3e2   : > { %12882 = vmatprep.mubr.msk.f32.mxu1 %vm2058_vm3, %v6863_v12  ;;  %v6421_v3 = vadd.f32 %v15900_v41, %v16054_v32  ;;  %v6426_v12 = vadd.f32 %v16052_v17, %v15900_v41 }
 0x3e4   : > { %v16062_v0 = vpop.f32.mrb[238].mxu1  ;;  %v6883_v43 = vmax.f32 %v6421_v3, 0.0  ;;  %v6884_v32 = vmax.f32 %v6426_v12, 0.0 }
 0x3e5   : > { %v16064_v56 = vpop.f32.mrb[239].mxu1  ;;  %12883 = vmatmul.mubr.msk.f32.gmra.mrb[88].mxu1 %vm2058_vm3, %v6864_v28 }
 0x3e6   : > { %12885 = vmatprep.mubr.msk.f32.mxu1 %vm2058_vm3, %v6865_v36  ;;  %v6431_v51 = vadd.f32 %v15900_v41, %v16064_v56  ;;  %v6436_v36 = vadd.f32 %v16062_v0, %v15900_v41 }
 0x3e8   : > { %v16072_v13 = vpop.f32.mrb[240].mxu1  ;;  %v6885_v44 = vmax.f32 %v6431_v51, 0.0  ;;  %v6886_v56 = vmax.f32 %v6436_v36, 0.0 }
 0x3e9   : > { %v16074_v45 = vpop.f32.mrb[241].mxu1  ;;  %12886 = vmatmul.mubr.msk.f32.gmra.mrb[90].mxu1 %vm2058_vm3, %v6866_v54 }
 0x3ea   : > { %12888 = vmatprep.mubr.msk.f32.mxu1 %vm2058_vm3, %v6867_v20  ;;  %v6441_v17 = vadd.f32 %v15900_v41, %v16074_v45  ;;  %v6446_v20 = vadd.f32 %v16072_v13, %v15900_v41 }
 0x3ec   : > { %v16082_v16 = vpop.f32.mrb[242].mxu1  ;;  %v6887_v61 = vmax.f32 %v6441_v17, 0.0  ;;  %v6888_v45 = vmax.f32 %v6446_v20, 0.0 }
 0x3ed   : > { %v16084_v4 = vpop.f32.mrb[243].mxu1  ;;  %12889 = vmatmul.mubr.msk.f32.gmra.mrb[92].mxu1 %vm2058_vm3, %v6868_v11 }
 0x3ee   : > { %12891 = vmatprep.mubr.msk.f32.mxu1 %vm2058_vm3, %v6869_v18  ;;  %v6451_v0 = vadd.f32 %v15900_v41, %v16084_v4  ;;  %v6456_v18 = vadd.f32 %v16082_v16, %v15900_v41 }
 0x3f0   : > { %v16092_v39 = vpop.f32.mrb[244].mxu1  ;;  %v6889_v57 = vmax.f32 %v6451_v0, 0.0  ;;  %v6890_v4 = vmax.f32 %v6456_v18, 0.0 }
 0x3f1   : > { %v16100_v34 = vpop.f32.mrb[245].mxu1  ;;  %12892 = vmatmul.mubr.msk.f32.gmra.mrb[94].mxu1 %vm2058_vm3, %v6870_v24 }
 0x3f2   : > { %12894 = vmatprep.mubr.msk.f32.mxu1 %vm2058_vm3, %v6871_v37  ;;  %v6461_v13 = vadd.f32 %v15900_v41, %v16100_v34  ;;  %v6466_v37 = vadd.f32 %v16092_v39, %v15900_v41 }
 0x3f4   : > { %v16108_v25 = vpop.f32.mrb[246].mxu1  ;;  %v6891_v7 = vmax.f32 %v6461_v13, 0.0  ;;  %v6892_v34 = vmax.f32 %v6466_v37, 0.0 }
 0x3f5   : > { %v16110_v9 = vpop.f32.mrb[247].mxu1  ;;  %12895 = vmatmul.mubr.msk.f32.gmra.mrb[96].mxu1 %vm2058_vm3, %v6872_v26  ;;  %v6476_v49 = vadd.f32 %v16108_v25, %v15900_v41 }
 0x3f6   : > { %12897 = vmatprep.mubr.msk.f32.mxu1 %vm2058_vm3, %v6873_v50  ;;  %v6471_v16 = vadd.f32 %v15900_v41, %v16110_v9 }
 0x3f7   : > { %v6894_v14 = vmax.f32 %v6476_v49, 0.0 }
 0x3f8   : > { %v16118_v6 = vpop.f32.mrb[248].mxu1  ;;  %v6893_v26 = vmax.f32 %v6471_v16, 0.0 }
 0x3f9   : > { %v16120_v55 = vpop.f32.mrb[249].mxu1  ;;  %12898 = vmatmul.mubr.msk.f32.gmra.mrb[98].mxu1 %vm2058_vm3, %v6874_v23  ;;  %v6486_v9 = vadd.f32 %v16118_v6, %v15900_v41 }
 0x3fa   : > { %12900 = vmatprep.mubr.msk.f32.mxu1 %vm2058_vm3, %v6875_v27  ;;  %v6481_v39 = vadd.f32 %v15900_v41, %v16120_v55 }
 0x3fb   : > { %v6896_v2 = vmax.f32 %v6486_v9, 0.0 }
 0x3fc   : > { %v16128_v62 = vpop.f32.mrb[250].mxu1  ;;  %v6895_v23 = vmax.f32 %v6481_v39, 0.0 }
 0x3fd   : > { %v16130_v42 = vpop.f32.mrb[251].mxu1  ;;  %12901 = vmatmul.mubr.msk.f32.gmra.mrb[100].mxu1 %vm2058_vm3, %v6876_v46  ;;  %v6496_v55 = vadd.f32 %v16128_v62, %v15900_v41 }
 0x3fe   : > { %12903 = vmatprep.mubr.msk.f32.mxu1 %vm2058_vm3, %v6877_v33  ;;  %v6491_v25 = vadd.f32 %v15900_v41, %v16130_v42 }
 0x3ff   : > { %v6898_v21 = vmax.f32 %v6496_v55, 0.0 }
 0x400   : > { %v16138_v63 = vpop.f32.mrb[252].mxu1  ;;  %v6897_v46 = vmax.f32 %v6491_v25, 0.0 }
 0x401   : > { %v16140_v47 = vpop.f32.mrb[253].mxu1  ;;  %12904 = vmatmul.mubr.msk.f32.gmra.mrb[102].mxu1 %vm2058_vm3, %v6878_v52  ;;  %v6506_v42 = vadd.f32 %v16138_v63, %v15900_v41 }
 0x402   : > { %12906 = vmatprep.mubr.msk.f32.mxu1 %vm2058_vm3, %v6879_v30  ;;  %v6501_v6 = vadd.f32 %v15900_v41, %v16140_v47 }
 0x403   : > { %v6900_v31 = vmax.f32 %v6506_v42, 0.0 }
 0x404   : > { %v16148_v1 = vpop.f32.mrb[254].mxu1  ;;  %v6899_v52 = vmax.f32 %v6501_v6, 0.0 }
 0x405   : > { %v16150_v59 = vpop.f32.mrb[255].mxu1  ;;  %12907 = vmatmul.mubr.msk.f32.gmra.mrb[104].mxu1 %vm2058_vm3, %v6880_v48  ;;  %v6516_v47 = vadd.f32 %v16148_v1, %v15900_v41 }
 0x406   : > { %12909 = vmatprep.mubr.msk.f32.mxu1 %vm2058_vm3, %v6881_v53  ;;  %v6511_v62 = vadd.f32 %v15900_v41, %v16150_v59 }
 0x407   : > { %v6902_v3 = vmax.f32 %v6516_v47, 0.0 }
 0x408   : > { %v16158_v28 = vpop.f32.mrb[0].mxu1  ;;  %v6901_v48 = vmax.f32 %v6511_v62, 0.0 }
 0x409   : > { %v16160_v40 = vpop.f32.mrb[1].mxu1  ;;  %12910 = vmatmul.mubr.msk.f32.gmra.mrb[106].mxu1 %vm2058_vm3, %v6882_v22  ;;  %v6526_v59 = vadd.f32 %v16158_v28, %v15900_v41 }
 0x40a   : > { %12912 = vmatprep.mubr.msk.f32.mxu1 %vm2058_vm3, %v6883_v43  ;;  %v6521_v63 = vadd.f32 %v15900_v41, %v16160_v40 }
 0x40b   : > { %v6904_v51 = vmax.f32 %v6526_v59, 0.0 }
 0x40c   : > { %v16168_v54 = vpop.f32.mrb[2].mxu1  ;;  %v6903_v22 = vmax.f32 %v6521_v63, 0.0 }
 0x40d   : > { %v16170_v58 = vpop.f32.mrb[3].mxu1  ;;  %12913 = vmatmul.mubr.msk.f32.gmra.mrb[108].mxu1 %vm2058_vm3, %v6884_v32  ;;  %v6536_v40 = vadd.f32 %v16168_v54, %v15900_v41 }
 0x40e   : > { %12915 = vmatprep.mubr.msk.f32.mxu1 %vm2058_vm3, %v6885_v44  ;;  %v6531_v1 = vadd.f32 %v15900_v41, %v16170_v58 }
 0x40f   : > { %v6906_v17 = vmax.f32 %v6536_v40, 0.0 }
 0x410   : > { %v16178_v11 = vpop.f32.mrb[4].mxu1  ;;  %v6905_v32 = vmax.f32 %v6531_v1, 0.0 }
 0x411   : > { %v16180_v10 = vpop.f32.mrb[5].mxu1  ;;  %12916 = vmatmul.mubr.msk.f32.gmra.mrb[110].mxu1 %vm2058_vm3, %v6886_v56  ;;  %v6546_v58 = vadd.f32 %v16178_v11, %v15900_v41 }
 0x412   : > { %12918 = vmatprep.mubr.msk.f32.mxu1 %vm2058_vm3, %v6887_v61  ;;  %v6541_v28 = vadd.f32 %v15900_v41, %v16180_v10 }
 0x413   : > { %v6908_v0 = vmax.f32 %v6546_v58, 0.0 }
 0x414   : > { %v16188_v24 = vpop.f32.mrb[6].mxu1  ;;  %v6907_v56 = vmax.f32 %v6541_v28, 0.0 }
 0x415   : > { %v16190_v29 = vpop.f32.mrb[7].mxu1  ;;  %12919 = vmatmul.mubr.msk.f32.gmra.mrb[112].mxu1 %vm2058_vm3, %v6888_v45  ;;  %v6556_v10 = vadd.f32 %v16188_v24, %v15900_v41 }
 0x416   : > { %12921 = vmatprep.mubr.msk.f32.mxu1 %vm2058_vm3, %v6889_v57  ;;  %v6551_v54 = vadd.f32 %v15900_v41, %v16190_v29 }
 0x417   : > { %v6910_v13 = vmax.f32 %v6556_v10, 0.0 }
 0x418   : > { %v16198_v15 = vpop.f32.mrb[8].mxu1  ;;  %v6909_v45 = vmax.f32 %v6551_v54, 0.0 }
 0x419   : > { %v16200_v38 = vpop.f32.mrb[9].mxu1  ;;  %12922 = vmatmul.mubr.msk.f32.gmra.mrb[114].mxu1 %vm2058_vm3, %v6890_v4  ;;  %v6566_v29 = vadd.f32 %v16198_v15, %v15900_v41 }
 0x41a   : > { %12924 = vmatprep.mubr.msk.f32.mxu1 %vm2058_vm3, %v6891_v7  ;;  %v6561_v11 = vadd.f32 %v15900_v41, %v16200_v38 }
 0x41b   : > { %v6912_v16 = vmax.f32 %v6566_v29, 0.0 }
 0x41c   : > { %v16208_v60 = vpop.f32.mrb[10].mxu1  ;;  %v6911_v4 = vmax.f32 %v6561_v11, 0.0 }
 0x41d   : > { %v16210_v50 = vpop.f32.mrb[11].mxu1  ;;  %12925 = vmatmul.mubr.msk.f32.gmra.mrb[116].mxu1 %vm2058_vm3, %v6892_v34  ;;  %v6576_v38 = vadd.f32 %v16208_v60, %v15900_v41 }
 0x41e   : > { %12927 = vmatprep.mubr.msk.f32.mxu1 %vm2058_vm3, %v6893_v26  ;;  %v6571_v24 = vadd.f32 %v15900_v41, %v16210_v50 }
 0x41f   : > { %v6914_v39 = vmax.f32 %v6576_v38, 0.0 }
 0x420   : > { %v16218_v19 = vpop.f32.mrb[12].mxu1  ;;  %v6913_v34 = vmax.f32 %v6571_v24, 0.0 }
 0x421   : > { %v16220_v27 = vpop.f32.mrb[13].mxu1  ;;  %12928 = vmatmul.mubr.msk.f32.gmra.mrb[118].mxu1 %vm2058_vm3, %v6894_v14  ;;  %v6586_v50 = vadd.f32 %v16218_v19, %v15900_v41 }
 0x422   : > { %12930 = vmatprep.mubr.msk.f32.mxu1 %vm2058_vm3, %v6895_v23  ;;  %v6581_v15 = vadd.f32 %v15900_v41, %v16220_v27 }
 0x423   : > { %v6916_v25 = vmax.f32 %v6586_v50, 0.0 }
 0x424   : > { %v16228_v35 = vpop.f32.mrb[14].mxu1  ;;  %v6915_v14 = vmax.f32 %v6581_v15, 0.0 }
 0x425   : > { %v16230_v33 = vpop.f32.mrb[15].mxu1  ;;  %12931 = vmatmul.mubr.msk.f32.gmra.mrb[120].mxu1 %vm2058_vm3, %v6896_v2  ;;  %v6596_v27 = vadd.f32 %v16228_v35, %v15900_v41 }
 0x426   : > { %12933 = vmatprep.mubr.msk.f32.mxu1 %vm2058_vm3, %v6897_v46  ;;  %v6591_v60 = vadd.f32 %v15900_v41, %v16230_v33 }
 0x427   : > { %v6918_v6 = vmax.f32 %v6596_v27, 0.0 }
 0x428   : > { %v16238_v8 = vpop.f32.mrb[16].mxu1  ;;  %v6917_v2 = vmax.f32 %v6591_v60, 0.0 }
 0x429   : > { %v16240_v30 = vpop.f32.mrb[17].mxu1  ;;  %12934 = vmatmul.mubr.msk.f32.gmra.mrb[122].mxu1 %vm2058_vm3, %v6898_v21  ;;  %v6606_v33 = vadd.f32 %v16238_v8, %v15900_v41 }
 0x42a   : > { %12936 = vmatprep.mubr.msk.f32.mxu1 %vm2058_vm3, %v6899_v52  ;;  %v6601_v19 = vadd.f32 %v15900_v41, %v16240_v30 }
 0x42b   : > { %v6920_v62 = vmax.f32 %v6606_v33, 0.0 }
 0x42c   : > { %v16248_v5 = vpop.f32.mrb[18].mxu1  ;;  %v6919_v21 = vmax.f32 %v6601_v19, 0.0 }
 0x42d   : > { %v16250_v53 = vpop.f32.mrb[19].mxu1  ;;  %12937 = vmatmul.mubr.msk.f32.gmra.mrb[124].mxu1 %vm2058_vm3, %v6900_v31  ;;  %v6616_v30 = vadd.f32 %v16248_v5, %v15900_v41 }
 0x42e   : > { %12939 = vmatprep.mubr.msk.f32.mxu1 %vm2058_vm3, %v6901_v48  ;;  %v6611_v35 = vadd.f32 %v15900_v41, %v16250_v53 }
 0x42f   : > { %v6922_v63 = vmax.f32 %v6616_v30, 0.0 }
 0x430   : > { %v16258_v12 = vpop.f32.mrb[20].mxu1  ;;  %v6921_v31 = vmax.f32 %v6611_v35, 0.0 }
 0x431   : > { %v16260_v43 = vpop.f32.mrb[21].mxu1  ;;  %12940 = vmatmul.mubr.msk.f32.gmra.mrb[126].mxu1 %vm2058_vm3, %v6902_v3  ;;  %v6626_v53 = vadd.f32 %v16258_v12, %v15900_v41 }
 0x432   : > { %12942 = vmatprep.mubr.msk.f32.mxu1 %vm2058_vm3, %v6903_v22  ;;  %v6621_v8 = vadd.f32 %v15900_v41, %v16260_v43 }
 0x433   : > { %v6924_v1 = vmax.f32 %v6626_v53, 0.0 }
 0x434   : > { %v16268_v36 = vpop.f32.mrb[22].mxu1  ;;  %v6923_v3 = vmax.f32 %v6621_v8, 0.0 }
 0x435   : > { %v16270_v44 = vpop.f32.mrb[23].mxu1  ;;  %12943 = vmatmul.mubr.msk.f32.gmra.mrb[128].mxu1 %vm2058_vm3, %v6904_v51  ;;  %v6636_v43 = vadd.f32 %v16268_v36, %v15900_v41 }
 0x436   : > { %12945 = vmatprep.mubr.msk.f32.mxu1 %vm2058_vm3, %v6905_v32  ;;  %v6631_v5 = vadd.f32 %v15900_v41, %v16270_v44 }
 0x437   : > { %v6926_v28 = vmax.f32 %v6636_v43, 0.0 }
 0x438   : > { %v16278_v20 = vpop.f32.mrb[24].mxu1  ;;  %v6925_v51 = vmax.f32 %v6631_v5, 0.0 }
 0x439   : > { %v16280_v61 = vpop.f32.mrb[25].mxu1  ;;  %12946 = vmatmul.mubr.msk.f32.gmra.mrb[130].mxu1 %vm2058_vm3, %v6906_v17  ;;  %v6646_v44 = vadd.f32 %v16278_v20, %v15900_v41 }
 0x43a   : > { %12948 = vmatprep.mubr.msk.f32.mxu1 %vm2058_vm3, %v6907_v56  ;;  %v6641_v12 = vadd.f32 %v15900_v41, %v16280_v61 }
 0x43b   : > { %v6928_v54 = vmax.f32 %v6646_v44, 0.0 }
 0x43c   : > { %v16288_v18 = vpop.f32.mrb[26].mxu1  ;;  %v6927_v17 = vmax.f32 %v6641_v12, 0.0  ;;  %v16477_v12 = vld [vmem:[%s17415_s12] ss:$0 sm:$0xff] }
 0x43d   : > { %v16290_v57 = vpop.f32.mrb[27].mxu1  ;;  %12949 = vmatmul.mubr.msk.f32.gmra.mrb[132].mxu1 %vm2058_vm3, %v6908_v0  ;;  %v6656_v61 = vadd.f32 %v16288_v18, %v15900_v41 }
 0x43e   : > { %12951 = vmatprep.mubr.msk.f32.mxu1 %vm2058_vm3, %v6909_v45  ;;  %v6651_v36 = vadd.f32 %v15900_v41, %v16290_v57 }
 0x43f   : > { %v6930_v11 = vmax.f32 %v6656_v61, 0.0 }
 0x440   : > { %v16298_v37 = vpop.f32.mrb[28].mxu1  ;;  %v6929_v0 = vmax.f32 %v6651_v36, 0.0 }
 0x441   : > { %v16300_v7 = vpop.f32.mrb[29].mxu1  ;;  %12952 = vmatmul.mubr.msk.f32.gmra.mrb[134].mxu1 %vm2058_vm3, %v6910_v13  ;;  %v6666_v57 = vadd.f32 %v16298_v37, %v15900_v41 }
 0x442   : > { %12954 = vmatprep.mubr.msk.f32.mxu1 %vm2058_vm3, %v6911_v4  ;;  %v6661_v20 = vadd.f32 %v15900_v41, %v16300_v7 }
 0x443   : > { %v6932_v24 = vmax.f32 %v6666_v57, 0.0 }
 0x444   : > { %v16308_v49 = vpop.f32.mrb[30].mxu1  ;;  %v6931_v13 = vmax.f32 %v6661_v20, 0.0 }
 0x445   : > { %v16310_v26 = vpop.f32.mrb[31].mxu1  ;;  %12955 = vmatmul.mubr.msk.f32.gmra.mrb[136].mxu1 %vm2058_vm3, %v6912_v16  ;;  %v6676_v7 = vadd.f32 %v16308_v49, %v15900_v41 }
 0x446   : > { %12957 = vmatprep.mubr.msk.f32.mxu1 %vm2058_vm3, %v6913_v34  ;;  %v6671_v18 = vadd.f32 %v15900_v41, %v16310_v26 }
 0x447   : > { %v6934_v15 = vmax.f32 %v6676_v7, 0.0 }
 0x448   : > { %v16318_v9 = vpop.f32.mrb[32].mxu1  ;;  %v6933_v16 = vmax.f32 %v6671_v18, 0.0 }
 0x449   : > { %v16320_v23 = vpop.f32.mrb[33].mxu1  ;;  %12958 = vmatmul.mubr.msk.f32.gmra.mrb[138].mxu1 %vm2058_vm3, %v6914_v39  ;;  %v6686_v26 = vadd.f32 %v16318_v9, %v15900_v41 }
 0x44a   : > { %12960 = vmatprep.mubr.msk.f32.mxu1 %vm2058_vm3, %v6915_v14  ;;  %v6681_v37 = vadd.f32 %v15900_v41, %v16320_v23 }
 0x44b   : > { %v6936_v60 = vmax.f32 %v6686_v26, 0.0  ;;  %v13607_v26 = vpop.permute.xlu1 %13606 }
 0x44c   : > { %v16328_v55 = vpop.f32.mrb[34].mxu1  ;;  %v6935_v39 = vmax.f32 %v6681_v37, 0.0 }
 0x44d   : > { %v16330_v46 = vpop.f32.mrb[35].mxu1  ;;  %12961 = vmatmul.mubr.msk.f32.gmra.mrb[140].mxu1 %vm2058_vm3, %v6916_v25  ;;  %v6696_v23 = vadd.f32 %v16328_v55, %v15900_v41 }
 0x44e   : > { %12963 = vmatprep.mubr.msk.f32.mxu1 %vm2058_vm3, %v6917_v2  ;;  %v6691_v49 = vadd.f32 %v15900_v41, %v16330_v46 }
 0x44f   : > { %v6938_v19 = vmax.f32 %v6696_v23, 0.0 }
 0x450   : > { %v16338_v42 = vpop.f32.mrb[36].mxu1  ;;  %v6937_v25 = vmax.f32 %v6691_v49, 0.0 }
 0x451   : > { %v16340_v52 = vpop.f32.mrb[37].mxu1  ;;  %12964 = vmatmul.mubr.msk.f32.gmra.mrb[142].mxu1 %vm2058_vm3, %v6918_v6  ;;  %v6706_v46 = vadd.f32 %v16338_v42, %v15900_v41 }
 0x452   : > { %12966 = vmatprep.mubr.msk.f32.mxu1 %vm2058_vm3, %v6919_v21  ;;  %v6701_v9 = vadd.f32 %v15900_v41, %v16340_v52 }
 0x453   : > { %v6940_v35 = vmax.f32 %v6706_v46, 0.0 }
 0x454   : > { %v16348_v47 = vpop.f32.mrb[38].mxu1  ;;  %v6939_v6 = vmax.f32 %v6701_v9, 0.0 }
 0x455   : > { %v16350_v48 = vpop.f32.mrb[39].mxu1  ;;  %12967 = vmatmul.mubr.msk.f32.gmra.mrb[144].mxu1 %vm2058_vm3, %v6920_v62  ;;  %v6716_v52 = vadd.f32 %v16348_v47, %v15900_v41 }
 0x456   : > { %12969 = vmatprep.mubr.msk.f32.mxu1 %vm2058_vm3, %v6921_v31  ;;  %v6711_v55 = vadd.f32 %v15900_v41, %v16350_v48 }
 0x457   : > { %v6942_v8 = vmax.f32 %v6716_v52, 0.0 }
 0x458   : > { %v16358_v59 = vpop.f32.mrb[40].mxu1  ;;  %v6941_v62 = vmax.f32 %v6711_v55, 0.0 }
 0x459   : > { %v16360_v22 = vpop.f32.mrb[41].mxu1  ;;  %12970 = vmatmul.mubr.msk.f32.gmra.mrb[146].mxu1 %vm2058_vm3, %v6922_v63  ;;  %v6726_v48 = vadd.f32 %v16358_v59, %v15900_v41 }
 0x45a   : > { %12972 = vmatprep.mubr.msk.f32.mxu1 %vm2058_vm3, %v6923_v3  ;;  %v6721_v42 = vadd.f32 %v15900_v41, %v16360_v22 }
 0x45b   : > { %v6944_v5 = vmax.f32 %v6726_v48, 0.0  ;;  %v13608_v48 = vunpack.i.l.bf16 %v13607_v26 }
 0x45c   : > { %v16368_v40 = vpop.f32.mrb[42].mxu1  ;;  %v6943_v63 = vmax.f32 %v6721_v42, 0.0 }
 0x45d   : > { %v16370_v32 = vpop.f32.mrb[43].mxu1  ;;  %12973 = vmatmul.mubr.msk.f32.gmra.mrb[148].mxu1 %vm2058_vm3, %v6924_v1  ;;  %v6736_v22 = vadd.f32 %v16368_v40, %v15900_v41 }
 0x45e   : > { %12975 = vmatprep.mubr.msk.f32.mxu1 %vm2058_vm3, %v6925_v51  ;;  %v6731_v47 = vadd.f32 %v15900_v41, %v16370_v32  ;;  %v13597_v32 = vpop.permute.xlu0 %13596 }
 0x460   : > { %v16378_v58 = vpop.f32.mrb[44].mxu1  ;;  %v6945_v1 = vmax.f32 %v6731_v47, 0.0  ;;  %v16512_v47 = vld [vmem:[%s17413_s10] ss:$0 sm:$0xff] }
 0x461   : > { %v16380_v56 = vpop.f32.mrb[45].mxu1  ;;  %12976 = vmatmul.mubr.msk.f32.gmra.mrb[150].mxu1 %vm2058_vm3, %v6926_v28  ;;  %v6946_v28 = vmax.f32 %v6736_v22, 0.0  ;;  %v6746_v40 = vadd.f32 %v16378_v58, %v15900_v41  ;;  %v13598_v58 = vunpack.i.l.bf16 %v13597_v32 }
 0x462   : > { %12978 = vmatprep.mubr.msk.f32.mxu1 %vm2058_vm3, %v6927_v17  ;;  %v6741_v59 = vadd.f32 %v15900_v41, %v16380_v56  ;;  %v13602_v7 = vpop.permute.xlu0 %13601 }
 0x463   : > { %v13603_v23 = vunpack.i.l.bf16 %v13602_v7 }
 0x464   : > { %v16388_v10 = vpop.f32.mrb[46].mxu1  ;;  %v6947_v44 = vmax.f32 %v6741_v59, 0.0  ;;  %v13609_v59 = vunpack.i.h.bf16 %v13607_v26 }
 0x465   : > { %v16390_v45 = vpop.f32.mrb[47].mxu1  ;;  %12979 = vmatmul.mubr.msk.f32.gmra.mrb[152].mxu1 %vm2058_vm3, %v6928_v54  ;;  %v6756_v20 = vadd.f32 %v16388_v10, %v15900_v41 }
 0x466   : > { %12981 = vmatprep.mubr.msk.f32.mxu1 %vm2058_vm3, %v6929_v0  ;;  %v6751_v17 = vadd.f32 %v15900_v41, %v16390_v45  ;;  %v6948_v0 = vmax.f32 %v6746_v40, 0.0 }
 0x468   : > { %v16398_v29 = vpop.f32.mrb[48].mxu1  ;;  %v6949_v57 = vmax.f32 %v6751_v17, 0.0 }
 0x469   : > { %v16400_v4 = vpop.f32.mrb[49].mxu1  ;;  %12982 = vmatmul.mubr.msk.f32.gmra.mrb[154].mxu1 %vm2058_vm3, %v6930_v11 }
 0x46a   : > { %12984 = vmatprep.mubr.msk.f32.mxu1 %vm2058_vm3, %v6931_v13  ;;  %v6761_v45 = vadd.f32 %v15900_v41, %v16400_v4  ;;  %v6766_v4 = vadd.f32 %v16398_v29, %v15900_v41 }
 0x46c   : > { %v16408_v38 = vpop.f32.mrb[50].mxu1 }
 0x46d   : > { %v16410_v34 = vpop.f32.mrb[51].mxu1  ;;  %12985 = vmatmul.mubr.msk.f32.gmra.mrb[156].mxu1 %vm2058_vm3, %v6932_v24  ;;  %v13599_v24 = vunpack.i.h.bf16 %v13597_v32  ;;  %v6776_v42 = vadd.f32 %v16408_v38, %v15900_v41  ;;  %v13612_v32 = vpop.permute.xlu1 %13611 }
 0x46e   : > { %12987 = vmatprep.mubr.msk.f32.mxu1 %vm2058_vm3, %v6933_v16  ;;  %v6771_v9 = vadd.f32 %v15900_v41, %v16410_v34 }
 0x470   : > { %v16418_v50 = vpop.f32.mrb[52].mxu1 }
 0x471   : > { %v16420_v14 = vpop.f32.mrb[53].mxu1  ;;  %12988 = vmatmul.mubr.msk.f32.gmra.mrb[158].mxu1 %vm2058_vm3, %v6934_v15 }
 0x472   : > { %12990 = vmatprep.mubr.msk.f32.mxu1 %vm2058_vm3, %v6935_v39  ;;  %v6950_v39 = vmax.f32 %v6756_v20, 0.0 }
 0x474   : > { %v16428_v27 = vpop.f32.mrb[54].mxu1 }
 0x475   : > { %v16430_v2 = vpop.f32.mrb[55].mxu1  ;;  %12991 = vmatmul.mubr.msk.f32.gmra.mrb[160].mxu1 %vm2058_vm3, %v6936_v60 }
 0x476   : > { %12993 = vmatprep.mubr.msk.f32.mxu1 %vm2058_vm3, %v6937_v25  ;;  %v6951_v25 = vmax.f32 %v6761_v45, 0.0 }
 0x478   : > { %v16438_v33 = vpop.f32.mrb[56].mxu1 }
 0x479   : > { %v16440_v21 = vpop.f32.mrb[57].mxu1  ;;  %12994 = vmatmul.mubr.msk.f32.gmra.mrb[162].mxu1 %vm2058_vm3, %v6938_v19 }
 0x47a   : > { %12996 = vmatprep.mubr.msk.f32.mxu1 %vm2058_vm3, %v6939_v6  ;;  %v13604_v6 = vunpack.i.h.bf16 %v13602_v7 }
 0x47c   : > { %v16448_v30 = vpop.f32.mrb[58].mxu1 }
 0x47d   : > { %v16450_v31 = vpop.f32.mrb[59].mxu1  ;;  %12997 = vmatmul.mubr.msk.f32.gmra.mrb[164].mxu1 %vm2058_vm3, %v6940_v35 }
 0x47e   : > { %12999 = vmatprep.mubr.msk.f32.mxu1 %vm2058_vm3, %v6941_v62  ;;  %v6952_v62 = vmax.f32 %v6766_v4, 0.0  ;;  %v13622_v4 = vpop.permute.xlu1 %13621 }
 0x480   : > { %v16458_v53 = vpop.f32.mrb[60].mxu1 }
 0x481   : > { %v16460_v3 = vpop.f32.mrb[61].mxu1  ;;  %13000 = vmatmul.mubr.msk.f32.gmra.mrb[166].mxu1 %vm2058_vm3, %v6942_v8 }
 0x482   : > { %13002 = vmatprep.mubr.msk.f32.mxu1 %vm2058_vm3, %v6943_v63  ;;  %v6953_v63 = vmax.f32 %v6771_v9, 0.0 }
 0x484   : > { %v16468_v43 = vpop.f32.mrb[62].mxu1 }
 0x485   : > { %v16470_v51 = vpop.f32.mrb[63].mxu1  ;;  %13003 = vmatmul.mubr.msk.f32.gmra.mrb[168].mxu1 %vm2058_vm3, %v6944_v5  ;;  %v6781_v5 = vadd.f32 %v16512_v47, %v16420_v14  ;;  %v6786_v14 = vadd.f32 %v16512_v47, %v16418_v50 }
 0x486   : > { %13005 = vmatprep.mubr.msk.f32.mxu1 %vm2058_vm3, %v6945_v1 }
 0x488   : > { %v12848_v36 = vpop.f32.mrb[64].mxu1 }
 0x489   : > { %v7438_v56 = vadd.f32 %v12848_v36, %v16477_v12  ;;  %v7432_v54 = vpop.f32.mrb[65].mxu1  ;;  %13006 = vmatmul.mubr.msk.f32.gmra.mrb[170].mxu1 %vm2058_vm3, %v6946_v28 }
 0x48a   : > { %v7433_v61 = vadd.f32 %v16477_v12, %v7432_v54  ;;  %13008 = vmatprep.mubr.msk.f32.mxu1 %vm2058_vm3, %v6947_v44  ;;  %v6954_v44 = vmax.f32 %v6776_v42, 0.0  ;;  %v6955_v54 = vmax.f32 %v6781_v5, 0.0 }
 0x48b   : > { %v8072_v11 = vmax.f32 %v7438_v56, 0.0  ;;  %v13613_v56 = vunpack.i.l.bf16 %v13612_v32 }
 0x48c   : > { %v8071_v13 = vmax.f32 %v7433_v61, 0.0  ;;  %v12851_v18 = vpop.f32.mrb[66].mxu1  ;;  %v6791_v61 = vadd.f32 %v16512_v47, %v16430_v2  ;;  %v6796_v2 = vadd.f32 %v16512_v47, %v16428_v27 }
 0x48d   : > { %v7448_v16 = vadd.f32 %v12851_v18, %v16477_v12  ;;  %v7442_v37 = vpop.f32.mrb[67].mxu1  ;;  %13009 = vmatmul.mubr.msk.f32.gmra.mrb[172].mxu1 %vm2058_vm3, %v6948_v0  ;;  %v8584_v49 = vsel %vm2058_vm3, %v8072_v11, %v13599_v24  ;;  %v13614_v11 = vunpack.i.h.bf16 %v13612_v32  ;;  %v6956_v18 = vmax.f32 %v6786_v14, 0.0 }
 0x48e   : > { %v7443_v15 = vadd.f32 %v16477_v12, %v7442_v37  ;;  %13011 = vmatprep.mubr.msk.f32.mxu1 %vm2058_vm3, %v6949_v57  ;;  %v8583_v10 = vsel %vm2058_vm3, %v8071_v13, %v13598_v58  ;;  %v13617_v58 = vpop.permute.xlu0 %13616  ;;  %v6957_v37 = vmax.f32 %v6791_v61, 0.0 }
 0x48f   : > { %v8074_v60 = vmax.f32 %v7448_v16, 0.0  ;;  %13070 = vmatprep.mubr.f32.mxu0 %v8583_v10  ;;  %v13618_v16 = vunpack.i.l.bf16 %v13617_v58 }
 0x490   : > { %v8073_v19 = vmax.f32 %v7443_v15, 0.0  ;;  %v12854_v46 = vpop.f32.mrb[68].mxu1  ;;  %13071 = vmatmul.mubr.f32.vlgmr.msra.gmra.mrb[192].mxu0 %v8584_v49  ;;  %v6801_v15 = vadd.f32 %v16512_v47, %v16440_v21  ;;  %v6806_v21 = vadd.f32 %v16512_v47, %v16438_v33 }
 0x491   : > { %v7458_v55 = vadd.f32 %v12854_v46, %v16477_v12  ;;  %v7452_v35 = vpop.f32.mrb[69].mxu1  ;;  %13012 = vmatmul.mubr.msk.f32.gmra.mrb[174].mxu1 %vm2058_vm3, %v6950_v39  ;;  %v8586_v8 = vsel %vm2058_vm3, %v8074_v60, %v13604_v6  ;;  %v13619_v39 = vunpack.i.h.bf16 %v13617_v58  ;;  %v13623_v46 = vunpack.i.l.bf16 %v13622_v4 }
 0x492   : > { %v7453_v29 = vadd.f32 %v16477_v12, %v7452_v35  ;;  %13014 = vmatprep.mubr.msk.f32.mxu1 %vm2058_vm3, %v6951_v25  ;;  %v8585_v52 = vsel %vm2058_vm3, %v8073_v19, %v13603_v23  ;;  %v6958_v25 = vmax.f32 %v6796_v2, 0.0  ;;  %v6959_v6 = vmax.f32 %v6801_v15, 0.0 }
 0x493   : > { %v8076_v34 = vmax.f32 %v7458_v55, 0.0  ;;  %13073 = vmatprep.mubr.f32.mxu0 %v8585_v52  ;;  %v6811_v55 = vadd.f32 %v16512_v47, %v16450_v31  ;;  %v13624_v52 = vunpack.i.h.bf16 %v13622_v4  ;;  %v6816_v31 = vadd.f32 %v16512_v47, %v16448_v30 }
 0x494   : > { %v8075_v22 = vmax.f32 %v7453_v29, 0.0  ;;  %v12857_v1 = vpop.f32.mrb[70].mxu1  ;;  %13074 = vmatmul.mubr.f32.gmra.mrb[194].mxu0 %v8586_v8 }
 0x495   : > { %v7468_v41 = vadd.f32 %v12857_v1, %v16477_v12  ;;  %v7462_v38 = vpop.f32.mrb[71].mxu1  ;;  %13015 = vmatmul.mubr.msk.f32.gmra.mrb[176].mxu1 %vm2058_vm3, %v6952_v62  ;;  %v8588_v36 = vsel %vm2058_vm3, %v8076_v34, %v13609_v59  ;;  %v13627_v62 = vpop.permute.xlu0 %13626  ;;  %v6961_v1 = vmax.f32 %v6811_v55, 0.0  ;;  %v6821_v59 = vadd.f32 %v16512_v47, %v16460_v3 }
 0x496   : > { %v7463_v28 = vadd.f32 %v16477_v12, %v7462_v38  ;;  %13017 = vmatprep.mubr.msk.f32.mxu1 %vm2058_vm3, %v6953_v63  ;;  %v8587_v40 = vsel %vm2058_vm3, %v8075_v22, %v13608_v48  ;;  %v6960_v48 = vmax.f32 %v6806_v21, 0.0  ;;  %v13628_v22 = vunpack.i.l.bf16 %v13627_v62 }
 0x497   : > { %v8078_v17 = vmax.f32 %v7468_v41, 0.0  ;;  %13076 = vmatprep.mubr.f32.mxu0 %v8587_v40  ;;  %v13629_v38 = vunpack.i.h.bf16 %v13627_v62  ;;  %v6826_v3 = vadd.f32 %v16512_v47, %v16458_v53  ;;  %v6963_v61 = vmax.f32 %v6821_v59, 0.0 }
 0x498   : > { %v8077_v0 = vmax.f32 %v7463_v28, 0.0  ;;  %v12860_v20 = vpop.f32.mrb[72].mxu1  ;;  %13077 = vmatmul.mubr.f32.gmra.mrb[196].mxu0 %v8588_v36  ;;  %v13632_v28 = vpop.permute.xlu1 %13631 }
 0x499   : > { %v7478_v57 = vadd.f32 %v12860_v20, %v16477_v12  ;;  %v7472_v45 = vpop.f32.mrb[73].mxu1  ;;  %13018 = vmatmul.mubr.msk.f32.gmra.mrb[178].mxu1 %vm2058_vm3, %v6954_v44  ;;  %v8590_v7 = vsel %vm2058_vm3, %v8078_v17, %v13614_v11  ;;  %v6962_v17 = vmax.f32 %v6816_v31, 0.0  ;;  %v13634_v58 = vunpack.i.h.bf16 %v13632_v28 }
 0x49a   : > { %v7473_v50 = vadd.f32 %v16477_v12, %v7472_v45  ;;  %13020 = vmatprep.mubr.msk.f32.mxu1 %vm2058_vm3, %v6955_v54  ;;  %v8589_v13 = vsel %vm2058_vm3, %v8077_v0, %v13613_v56  ;;  %v13633_v54 = vunpack.i.l.bf16 %v13632_v28  ;;  %v6831_v0 = vadd.f32 %v16512_v47, %v16470_v51 }
 0x49b   : > { %v8080_v24 = vmax.f32 %v7478_v57, 0.0  ;;  %13079 = vmatprep.mubr.f32.mxu0 %v8589_v13  ;;  %v13637_v57 = vpop.permute.xlu0 %13636  ;;  %v6836_v51 = vadd.f32 %v16512_v47, %v16468_v43 }
 0x49c   : > { %v8079_v10 = vmax.f32 %v7473_v50, 0.0  ;;  %v12863_v26 = vpop.f32.mrb[74].mxu1  ;;  %13080 = vmatmul.mubr.f32.gmra.mrb[198].mxu0 %v8590_v7  ;;  %v13638_v7 = vunpack.i.l.bf16 %v13637_v57 }
 0x49d   : > { %v7488_v49 = vadd.f32 %v12863_v26, %v16477_v12  ;;  %v7482_v60 = vpop.f32.mrb[75].mxu1  ;;  %13021 = vmatmul.mubr.msk.f32.gmra.mrb[180].mxu1 %vm2058_vm3, %v6956_v18  ;;  %v8592_v19 = vsel %vm2058_vm3, %v8080_v24, %v13619_v39  ;;  %v6964_v18 = vmax.f32 %v6826_v3, 0.0  ;;  %v13642_v26 = vpop.permute.xlu1 %13641  ;;  %v6966_v47 = vmax.f32 %v6836_v51, 0.0 }
 0x49e   : > { %v7483_v27 = vadd.f32 %v16477_v12, %v7482_v60  ;;  %13023 = vmatprep.mubr.msk.f32.mxu1 %vm2058_vm3, %v6957_v37  ;;  %v8591_v23 = vsel %vm2058_vm3, %v8079_v10, %v13618_v16  ;;  %v6965_v16 = vmax.f32 %v6831_v0, 0.0  ;;  %v13639_v10 = vunpack.i.h.bf16 %v13637_v57 }
 0x49f   : > { %v8082_v9 = vmax.f32 %v7488_v49, 0.0  ;;  %13082 = vmatprep.mubr.f32.mxu0 %v8591_v23  ;;  %v13643_v23 = vunpack.i.l.bf16 %v13642_v26 }
 0x4a0   : > { %v8081_v35 = vmax.f32 %v7483_v27, 0.0  ;;  %v12866_v29 = vpop.f32.mrb[76].mxu1  ;;  %13083 = vmatmul.mubr.f32.gmra.mrb[200].mxu0 %v8592_v19  ;;  %v13647_v19 = vpop.permute.xlu0 %13646 }
 0x4a1   : > { %v7498_v42 = vadd.f32 %v12866_v29, %v16477_v12  ;;  %v7492_v34 = vpop.f32.mrb[77].mxu1  ;;  %13024 = vmatmul.mubr.msk.f32.gmra.mrb[182].mxu1 %vm2058_vm3, %v6958_v25  ;;  %v8594_v5 = vsel %vm2058_vm3, %v8082_v9, %v13624_v52  ;;  %v13644_v9 = vunpack.i.h.bf16 %v13642_v26  ;;  %v13648_v62 = vunpack.i.l.bf16 %v13647_v19 }
 0x4a2   : > { %v7493_v33 = vadd.f32 %v16477_v12, %v7492_v34  ;;  %13026 = vmatprep.mubr.msk.f32.mxu1 %vm2058_vm3, %v6959_v6  ;;  %v8593_v8 = vsel %vm2058_vm3, %v8081_v35, %v13623_v46 }
 0x4a3   : > { %v8084_v63 = vmax.f32 %v7498_v42, 0.0  ;;  %13085 = vmatprep.mubr.f32.mxu0 %v8593_v8  ;;  %v13652_v8 = vpop.permute.xlu1 %13651 }
 0x4a4   : > { %v8083_v32 = vmax.f32 %v7493_v33, 0.0  ;;  %v12869_v41 = vpop.f32.mrb[78].mxu1  ;;  %13086 = vmatmul.mubr.f32.gmra.mrb[202].mxu0 %v8594_v5  ;;  %v13649_v33 = vunpack.i.h.bf16 %v13647_v19  ;;  %v13653_v59 = vunpack.i.l.bf16 %v13652_v8  ;;  %v13657_v28 = vpop.permute.xlu0 %13656 }
 0x4a5   : > { %v7508_v40 = vadd.f32 %v12869_v41, %v16477_v12  ;;  %v7502_v44 = vpop.f32.mrb[79].mxu1  ;;  %13027 = vmatmul.mubr.msk.f32.gmra.mrb[184].mxu1 %vm2058_vm3, %v6960_v48  ;;  %v8596_v56 = vsel %vm2058_vm3, %v8084_v63, %v13629_v38  ;;  %v13654_v38 = vunpack.i.h.bf16 %v13652_v8 }
 0x4a6   : > { %v7503_v30 = vadd.f32 %v16477_v12, %v7502_v44  ;;  %13029 = vmatprep.mubr.msk.f32.mxu1 %vm2058_vm3, %v6961_v1  ;;  %v8595_v14 = vsel %vm2058_vm3, %v8083_v32, %v13628_v22 }
 0x4a7   : > { %v8086_v36 = vmax.f32 %v7508_v40, 0.0  ;;  %13088 = vmatprep.mubr.f32.mxu0 %v8595_v14  ;;  %v13662_v0 = vpop.permute.xlu1 %13661 }
 0x4a8   : > { %v8085_v20 = vmax.f32 %v7503_v30, 0.0  ;;  %v12872_v11 = vpop.f32.mrb[80].mxu1  ;;  %13089 = vmatmul.mubr.f32.gmra.mrb[204].mxu0 %v8596_v56  ;;  %v13664_v51 = vunpack.i.h.bf16 %v13662_v0 }
 0x4a9   : > { %v7518_v45 = vadd.f32 %v12872_v11, %v16477_v12  ;;  %v7512_v50 = vpop.f32.mrb[81].mxu1  ;;  %13030 = vmatmul.mubr.msk.f32.gmra.mrb[186].mxu1 %vm2058_vm3, %v6962_v17  ;;  %v8598_v24 = vsel %vm2058_vm3, %v8086_v36, %v13634_v58  ;;  %v13658_v36 = vunpack.i.l.bf16 %v13657_v28 }
 0x4aa   : > { %v7513_v53 = vadd.f32 %v16477_v12, %v7512_v50  ;;  %13032 = vmatprep.mubr.msk.f32.mxu1 %vm2058_vm3, %v6963_v61  ;;  %v8597_v13 = vsel %vm2058_vm3, %v8085_v20, %v13633_v54  ;;  %v13659_v61 = vunpack.i.h.bf16 %v13657_v28 }
 0x4ab   : > { %v8088_v2 = vmax.f32 %v7518_v45, 0.0  ;;  %13091 = vmatprep.mubr.f32.mxu0 %v8597_v13 }
 0x4ac   : > { %v8087_v37 = vmax.f32 %v7513_v53, 0.0  ;;  %v12875_v15 = vpop.f32.mrb[82].mxu1  ;;  %13092 = vmatmul.mubr.f32.gmra.mrb[206].mxu0 %v8598_v24  ;;  %v13663_v53 = vunpack.i.l.bf16 %v13662_v0 }
 0x4ad   : > { %v7528_v39 = vadd.f32 %v12875_v15, %v16477_v12  ;;  %v7522_v4 = vpop.f32.mrb[83].mxu1  ;;  %13033 = vmatmul.mubr.msk.f32.gmra.mrb[188].mxu1 %vm2058_vm3, %v6964_v18  ;;  %v8600_v27 = vsel %vm2058_vm3, %v8088_v2, %v13639_v10  ;;  %v13667_v2 = vpop.permute.xlu0 %13666 }
 0x4ae   : > { %v7523_v49 = vadd.f32 %v16477_v12, %v7522_v4  ;;  %13035 = vmatprep.mubr.msk.f32.mxu1 %vm2058_vm3, %v6965_v16  ;;  %v8599_v43 = vsel %vm2058_vm3, %v8087_v37, %v13638_v7  ;;  %v13668_v26 = vunpack.i.l.bf16 %v13667_v2 }
 0x4af   : > { %v8090_v60 = vmax.f32 %v7528_v39, 0.0  ;;  %13094 = vmatprep.mubr.f32.mxu0 %v8599_v43  ;;  %v13672_v43 = vpop.permute.xlu1 %13671 }
 0x4b0   : > { %v8089_v25 = vmax.f32 %v7523_v49, 0.0  ;;  %v12878_v21 = vpop.f32.mrb[84].mxu1  ;;  %13095 = vmatmul.mubr.f32.gmra.mrb[208].mxu0 %v8600_v27  ;;  %v13669_v49 = vunpack.i.h.bf16 %v13667_v2 }
 0x4b1   : > { %v7538_v46 = vadd.f32 %v12878_v21, %v16477_v12  ;;  %v7532_v6 = vpop.f32.mrb[85].mxu1  ;;  %13036 = vmatmul.mubr.msk.f32.gmra.mrb[190].mxu1 %vm2058_vm3, %v6966_v47  ;;  %v8602_v52 = vsel %vm2058_vm3, %v8090_v60, %v13644_v9  ;;  %v13673_v9 = vunpack.i.l.bf16 %v13672_v43 }
 0x4b2   : > { %v7533_v55 = vadd.f32 %v16477_v12, %v7532_v6  ;;  %v8601_v35 = vsel %vm2058_vm3, %v8089_v25, %v13643_v23  ;;  %v13674_v6 = vunpack.i.h.bf16 %v13672_v43 }
 0x4b3   : > { %v8092_v29 = vmax.f32 %v7538_v46, 0.0  ;;  %13097 = vmatprep.mubr.f32.mxu0 %v8601_v35 }
 0x4b4   : > { %v8091_v42 = vmax.f32 %v7533_v55, 0.0  ;;  %v12881_v34 = vpop.f32.mrb[86].mxu1  ;;  %13098 = vmatmul.mubr.f32.gmra.mrb[210].mxu0 %v8602_v52  ;;  %v13677_v55 = vpop.permute.xlu0 %13676 }
 0x4b5   : > { %v7548_v48 = vadd.f32 %v12881_v34, %v16477_v12  ;;  %v7542_v31 = vpop.f32.mrb[87].mxu1  ;;  %v8604_v1 = vsel %vm2058_vm3, %v8092_v29, %v13649_v33  ;;  %v13678_v33 = vunpack.i.l.bf16 %v13677_v55 }
 0x4b6   : > { %v7543_v63 = vadd.f32 %v16477_v12, %v7542_v31  ;;  %v8603_v5 = vsel %vm2058_vm3, %v8091_v42, %v13648_v62  ;;  %v13679_v31 = vunpack.i.h.bf16 %v13677_v55 }
 0x4b7   : > { %v8094_v22 = vmax.f32 %v7548_v48, 0.0  ;;  %13100 = vmatprep.mubr.f32.mxu0 %v8603_v5 }
 0x4b8   : > { %v8093_v32 = vmax.f32 %v7543_v63, 0.0  ;;  %v12884_v41 = vpop.f32.mrb[88].mxu1  ;;  %13101 = vmatmul.mubr.f32.gmra.mrb[212].mxu0 %v8604_v1  ;;  %v13682_v63 = vpop.permute.xlu1 %13681 }
 0x4b9   : > { %v7558_v40 = vadd.f32 %v12884_v41, %v16477_v12  ;;  %v7552_v44 = vpop.f32.mrb[89].mxu1  ;;  %v8606_v3 = vsel %vm2058_vm3, %v8094_v22, %v13654_v38  ;;  %v13683_v38 = vunpack.i.l.bf16 %v13682_v63 }
 0x4ba   : > { %v7553_v30 = vadd.f32 %v16477_v12, %v7552_v44  ;;  %v8605_v14 = vsel %vm2058_vm3, %v8093_v32, %v13653_v59  ;;  %v13684_v44 = vunpack.i.h.bf16 %v13682_v63 }
 0x4bb   : > { %v8096_v17 = vmax.f32 %v7558_v40, 0.0  ;;  %13103 = vmatprep.mubr.f32.mxu0 %v8605_v14 }
 0x4bc   : > { %v8095_v56 = vmax.f32 %v7553_v30, 0.0  ;;  %v12887_v54 = vpop.f32.mrb[90].mxu1  ;;  %13104 = vmatmul.mubr.f32.gmra.mrb[214].mxu0 %v8606_v3  ;;  %v13687_v30 = vpop.permute.xlu0 %13686 }
 0x4bd   : > { %v7568_v20 = vadd.f32 %v12887_v54, %v16477_v12  ;;  %v7562_v11 = vpop.f32.mrb[91].mxu1  ;;  %v8608_v50 = vsel %vm2058_vm3, %v8096_v17, %v13659_v61  ;;  %v13688_v61 = vunpack.i.l.bf16 %v13687_v30 }
 0x4be   : > { %v7563_v58 = vadd.f32 %v16477_v12, %v7562_v11  ;;  %v8607_v57 = vsel %vm2058_vm3, %v8095_v56, %v13658_v36  ;;  %v13689_v11 = vunpack.i.h.bf16 %v13687_v30 }
 0x4bf   : > { %v8098_v45 = vmax.f32 %v7568_v20, 0.0  ;;  %13106 = vmatprep.mubr.f32.mxu0 %v8607_v57 }
 0x4c0   : > { %v8097_v13 = vmax.f32 %v7563_v58, 0.0  ;;  %v12890_v18 = vpop.f32.mrb[92].mxu1  ;;  %13107 = vmatmul.mubr.f32.gmra.mrb[216].mxu0 %v8608_v50  ;;  %v13692_v58 = vpop.permute.xlu1 %13691 }
 0x4c1   : > { %v7578_v24 = vadd.f32 %v12890_v18, %v16477_v12  ;;  %v7572_v7 = vpop.f32.mrb[93].mxu1  ;;  %v8610_v10 = vsel %vm2058_vm3, %v8098_v45, %v13664_v51  ;;  %v13693_v51 = vunpack.i.l.bf16 %v13692_v58 }
 0x4c2   : > { %v7573_v16 = vadd.f32 %v16477_v12, %v7572_v7  ;;  %v8609_v37 = vsel %vm2058_vm3, %v8097_v13, %v13663_v53  ;;  %v13694_v7 = vunpack.i.h.bf16 %v13692_v58 }
 0x4c3   : > { %v8100_v15 = vmax.f32 %v7578_v24, 0.0  ;;  %13109 = vmatprep.mubr.f32.mxu0 %v8609_v37 }
 0x4c4   : > { %v8099_v39 = vmax.f32 %v7573_v16, 0.0  ;;  %v12893_v4 = vpop.f32.mrb[94].mxu1  ;;  %13110 = vmatmul.mubr.f32.gmra.mrb[218].mxu0 %v8610_v10  ;;  %v13697_v16 = vpop.permute.xlu0 %13696 }
 0x4c5   : > { %v7588_v47 = vadd.f32 %v12893_v4, %v16477_v12  ;;  %v7582_v60 = vpop.f32.mrb[95].mxu1  ;;  %v8612_v21 = vsel %vm2058_vm3, %v8100_v15, %v13669_v49  ;;  %v13698_v49 = vunpack.i.l.bf16 %v13697_v16 }
 0x4c6   : > { %v7583_v27 = vadd.f32 %v16477_v12, %v7582_v60  ;;  %v8611_v23 = vsel %vm2058_vm3, %v8099_v39, %v13668_v26  ;;  %v13699_v60 = vunpack.i.h.bf16 %v13697_v16 }
 0x4c7   : > { %v8102_v25 = vmax.f32 %v7588_v47, 0.0  ;;  %13112 = vmatprep.mubr.f32.mxu0 %v8611_v23 }
 0x4c8   : > { %v8101_v19 = vmax.f32 %v7583_v27, 0.0  ;;  %v12896_v46 = vpop.f32.mrb[96].mxu1  ;;  %13113 = vmatmul.mubr.f32.gmra.mrb[220].mxu0 %v8612_v21  ;;  %v13702_v27 = vpop.permute.xlu1 %13701 }
 0x4c9   : > { %v7598_v35 = vadd.f32 %v12896_v46, %v16477_v12  ;;  %v7592_v29 = vpop.f32.mrb[97].mxu1  ;;  %v8614_v34 = vsel %vm2058_vm3, %v8102_v25, %v13674_v6  ;;  %v13703_v6 = vunpack.i.l.bf16 %v13702_v27 }
 0x4ca   : > { %v7593_v52 = vadd.f32 %v16477_v12, %v7592_v29  ;;  %v8613_v62 = vsel %vm2058_vm3, %v8101_v19, %v13673_v9  ;;  %v13704_v29 = vunpack.i.h.bf16 %v13702_v27 }
 0x4cb   : > { %v8104_v42 = vmax.f32 %v7598_v35, 0.0  ;;  %13115 = vmatprep.mubr.f32.mxu0 %v8613_v62 }
 0x4cc   : > { %v8103_v8 = vmax.f32 %v7593_v52, 0.0  ;;  %v12899_v48 = vpop.f32.mrb[98].mxu1  ;;  %13116 = vmatmul.mubr.f32.gmra.mrb[222].mxu0 %v8614_v34  ;;  %v13707_v52 = vpop.permute.xlu0 %13706 }
 0x4cd   : > { %v7608_v5 = vadd.f32 %v12899_v48, %v16477_v12  ;;  %v7602_v22 = vpop.f32.mrb[99].mxu1  ;;  %v8616_v41 = vsel %vm2058_vm3, %v8104_v42, %v13679_v31  ;;  %v13708_v31 = vunpack.i.l.bf16 %v13707_v52 }
 0x4ce   : > { %v7603_v1 = vadd.f32 %v16477_v12, %v7602_v22  ;;  %v8615_v59 = vsel %vm2058_vm3, %v8103_v8, %v13678_v33  ;;  %v13709_v22 = vunpack.i.h.bf16 %v13707_v52 }
 0x4cf   : > { %v8106_v32 = vmax.f32 %v7608_v5, 0.0  ;;  %13118 = vmatprep.mubr.f32.mxu0 %v8615_v59 }
 0x4d0   : > { %v8105_v28 = vmax.f32 %v7603_v1, 0.0  ;;  %v12902_v40 = vpop.f32.mrb[100].mxu1  ;;  %13119 = vmatmul.mubr.f32.gmra.mrb[224].mxu0 %v8616_v41  ;;  %v13712_v1 = vpop.permute.xlu1 %13711 }
 0x4d1   : > { %v7618_v14 = vadd.f32 %v12902_v40, %v16477_v12  ;;  %v7612_v17 = vpop.f32.mrb[101].mxu1  ;;  %v8618_v54 = vsel %vm2058_vm3, %v8106_v32, %v13684_v44  ;;  %v13713_v44 = vunpack.i.l.bf16 %v13712_v1 }
 0x4d2   : > { %v7613_v3 = vadd.f32 %v16477_v12, %v7612_v17  ;;  %v8617_v36 = vsel %vm2058_vm3, %v8105_v28, %v13683_v38  ;;  %v13714_v17 = vunpack.i.h.bf16 %v13712_v1 }
 0x4d3   : > { %v8108_v56 = vmax.f32 %v7618_v14, 0.0  ;;  %13121 = vmatprep.mubr.f32.mxu0 %v8617_v36 }
 0x4d4   : > { %v8107_v0 = vmax.f32 %v7613_v3, 0.0  ;;  %v12905_v20 = vpop.f32.mrb[102].mxu1  ;;  %13122 = vmatmul.mubr.f32.gmra.mrb[226].mxu0 %v8618_v54  ;;  %v13717_v3 = vpop.permute.xlu0 %13716 }
 0x4d5   : > { %v7628_v57 = vadd.f32 %v12905_v20, %v16477_v12  ;;  %v7622_v45 = vpop.f32.mrb[103].mxu1  ;;  %v8620_v18 = vsel %vm2058_vm3, %v8108_v56, %v13689_v11  ;;  %v13718_v11 = vunpack.i.l.bf16 %v13717_v3 }
 0x4d6   : > { %v7623_v50 = vadd.f32 %v16477_v12, %v7622_v45  ;;  %v8619_v53 = vsel %vm2058_vm3, %v8107_v0, %v13688_v61  ;;  %v13719_v45 = vunpack.i.h.bf16 %v13717_v3 }
 0x4d7   : > { %v8110_v13 = vmax.f32 %v7628_v57, 0.0  ;;  %13124 = vmatprep.mubr.f32.mxu0 %v8619_v53 }
 0x4d8   : > { %v8109_v2 = vmax.f32 %v7623_v50, 0.0  ;;  %v12908_v24 = vpop.f32.mrb[104].mxu1  ;;  %13125 = vmatmul.mubr.f32.gmra.mrb[228].mxu0 %v8620_v18  ;;  %v13722_v50 = vpop.permute.xlu1 %13721 }
 0x4d9   : > { %v7638_v37 = vadd.f32 %v12908_v24, %v16477_v12  ;;  %v7632_v15 = vpop.f32.mrb[105].mxu1  ;;  %v8622_v4 = vsel %vm2058_vm3, %v8110_v13, %v13694_v7  ;;  %v13723_v7 = vunpack.i.l.bf16 %v13722_v50 }
 0x4da   : > { %v7633_v10 = vadd.f32 %v16477_v12, %v7632_v15  ;;  %v8621_v26 = vsel %vm2058_vm3, %v8109_v2, %v13693_v51  ;;  %v13724_v15 = vunpack.i.h.bf16 %v13722_v50 }
 0x4db   : > { %v8112_v39 = vmax.f32 %v7638_v37, 0.0  ;;  %13127 = vmatprep.mubr.f32.mxu0 %v8621_v26 }
 0x4dc   : > { %v8111_v43 = vmax.f32 %v7633_v10, 0.0  ;;  %v12911_v47 = vpop.f32.mrb[106].mxu1  ;;  %13128 = vmatmul.mubr.f32.gmra.mrb[230].mxu0 %v8622_v4  ;;  %v13727_v10 = vpop.permute.xlu0 %13726 }
 0x4dd   : > { %v7648_v23 = vadd.f32 %v12911_v47, %v16477_v12  ;;  %v7642_v25 = vpop.f32.mrb[107].mxu1  ;;  %v8624_v46 = vsel %vm2058_vm3, %v8112_v39, %v13699_v60  ;;  %v13728_v60 = vunpack.i.l.bf16 %v13727_v10 }
 0x4de   : > { %v7643_v21 = vadd.f32 %v16477_v12, %v7642_v25  ;;  %v8623_v9 = vsel %vm2058_vm3, %v8111_v43, %v13698_v49  ;;  %v13729_v25 = vunpack.i.h.bf16 %v13727_v10 }
 0x4df   : > { %v8114_v19 = vmax.f32 %v7648_v23, 0.0  ;;  %13130 = vmatprep.mubr.f32.mxu0 %v8623_v9 }
 0x4e0   : > { %v8113_v55 = vmax.f32 %v7643_v21, 0.0  ;;  %v12914_v35 = vpop.f32.mrb[108].mxu1  ;;  %13131 = vmatmul.mubr.f32.gmra.mrb[232].mxu0 %v8624_v46  ;;  %v13732_v21 = vpop.permute.xlu1 %13731 }
 0x4e1   : > { %v7658_v62 = vadd.f32 %v12914_v35, %v16477_v12  ;;  %v7652_v42 = vpop.f32.mrb[109].mxu1  ;;  %v8626_v48 = vsel %vm2058_vm3, %v8114_v19, %v13704_v29  ;;  %v13733_v29 = vunpack.i.l.bf16 %v13732_v21 }
 0x4e2   : > { %v7653_v34 = vadd.f32 %v16477_v12, %v7652_v42  ;;  %v8625_v33 = vsel %vm2058_vm3, %v8113_v55, %v13703_v6  ;;  %v13734_v42 = vunpack.i.h.bf16 %v13732_v21 }
 0x4e3   : > { %v8116_v8 = vmax.f32 %v7658_v62, 0.0  ;;  %13133 = vmatprep.mubr.f32.mxu0 %v8625_v33 }
 0x4e4   : > { %v8115_v63 = vmax.f32 %v7653_v34, 0.0  ;;  %v12917_v5 = vpop.f32.mrb[110].mxu1  ;;  %13134 = vmatmul.mubr.f32.gmra.mrb[234].mxu0 %v8626_v48  ;;  %v13737_v34 = vpop.permute.xlu0 %13736 }
 0x4e5   : > { %v7668_v59 = vadd.f32 %v12917_v5, %v16477_v12  ;;  %v7662_v32 = vpop.f32.mrb[111].mxu1  ;;  %v8628_v40 = vsel %vm2058_vm3, %v8116_v8, %v13709_v22  ;;  %v13738_v22 = vunpack.i.l.bf16 %v13737_v34 }
 0x4e6   : > { %v7663_v41 = vadd.f32 %v16477_v12, %v7662_v32  ;;  %v8627_v38 = vsel %vm2058_vm3, %v8115_v63, %v13708_v31  ;;  %v13739_v32 = vunpack.i.h.bf16 %v13737_v34 }
 0x4e7   : > { %v8118_v28 = vmax.f32 %v7668_v59, 0.0  ;;  %13136 = vmatprep.mubr.f32.mxu0 %v8627_v38 }
 0x4e8   : > { %v8117_v30 = vmax.f32 %v7663_v41, 0.0  ;;  %v12920_v14 = vpop.f32.mrb[112].mxu1  ;;  %13137 = vmatmul.mubr.f32.gmra.mrb[236].mxu0 %v8628_v40  ;;  %v13742_v41 = vpop.permute.xlu1 %13741 }
 0x4e9   : > { %v7678_v36 = vadd.f32 %v12920_v14, %v16477_v12  ;;  %v7672_v56 = vpop.f32.mrb[113].mxu1  ;;  %v8630_v20 = vsel %vm2058_vm3, %v8118_v28, %v13714_v17  ;;  %v13743_v17 = vunpack.i.l.bf16 %v13742_v41 }
 0x4ea   : > { %v7673_v54 = vadd.f32 %v16477_v12, %v7672_v56  ;;  %v8629_v61 = vsel %vm2058_vm3, %v8117_v30, %v13713_v44  ;;  %v13744_v56 = vunpack.i.h.bf16 %v13742_v41 }
 0x4eb   : > { %v8120_v0 = vmax.f32 %v7678_v36, 0.0  ;;  %13139 = vmatprep.mubr.f32.mxu0 %v8629_v61 }
 0x4ec   : > { %v8119_v58 = vmax.f32 %v7673_v54, 0.0  ;;  %v12923_v57 = vpop.f32.mrb[114].mxu1  ;;  %13140 = vmatmul.mubr.f32.gmra.mrb[238].mxu0 %v8630_v20  ;;  %v13747_v54 = vpop.permute.xlu0 %13746 }
 0x4ed   : > { %v7688_v53 = vadd.f32 %v12923_v57, %v16477_v12  ;;  %v7682_v13 = vpop.f32.mrb[115].mxu1  ;;  %v8632_v24 = vsel %vm2058_vm3, %v8120_v0, %v13719_v45  ;;  %v13748_v45 = vunpack.i.l.bf16 %v13747_v54 }
 0x4ee   : > { %v7683_v18 = vadd.f32 %v16477_v12, %v7682_v13  ;;  %v8631_v51 = vsel %vm2058_vm3, %v8119_v58, %v13718_v11  ;;  %v13749_v13 = vunpack.i.h.bf16 %v13747_v54 }
 0x4ef   : > { %v8122_v2 = vmax.f32 %v7688_v53, 0.0  ;;  %13142 = vmatprep.mubr.f32.mxu0 %v8631_v51 }
 0x4f0   : > { %v8121_v16 = vmax.f32 %v7683_v18, 0.0  ;;  %v12926_v37 = vpop.f32.mrb[116].mxu1  ;;  %13143 = vmatmul.mubr.f32.gmra.mrb[240].mxu0 %v8632_v24  ;;  %v13752_v18 = vpop.permute.xlu1 %13751 }
 0x4f1   : > { %v7698_v26 = vadd.f32 %v12926_v37, %v16477_v12  ;;  %v7692_v39 = vpop.f32.mrb[117].mxu1  ;;  %v8634_v47 = vsel %vm2058_vm3, %v8122_v2, %v13724_v15  ;;  %v13753_v15 = vunpack.i.l.bf16 %v13752_v18 }
 0x4f2   : > { %v7693_v4 = vadd.f32 %v16477_v12, %v7692_v39  ;;  %v8633_v49 = vsel %vm2058_vm3, %v8121_v16, %v13723_v7  ;;  %v13754_v39 = vunpack.i.h.bf16 %v13752_v18 }
 0x4f3   : > { %v8124_v43 = vmax.f32 %v7698_v26, 0.0  ;;  %13145 = vmatprep.mubr.f32.mxu0 %v8633_v49 }
 0x4f4   : > { %v8123_v27 = vmax.f32 %v7693_v4, 0.0  ;;  %v12929_v23 = vpop.f32.mrb[118].mxu1  ;;  %13146 = vmatmul.mubr.f32.gmra.mrb[242].mxu0 %v8634_v47  ;;  %v13757_v4 = vpop.permute.xlu0 %13756 }
 0x4f5   : > { %v7708_v9 = vadd.f32 %v12929_v23, %v16477_v12  ;;  %v7702_v19 = vpop.f32.mrb[119].mxu1  ;;  %v8636_v35 = vsel %vm2058_vm3, %v8124_v43, %v13729_v25  ;;  %v13758_v25 = vunpack.i.l.bf16 %v13757_v4 }
 0x4f6   : > { %v7703_v46 = vadd.f32 %v16477_v12, %v7702_v19  ;;  %v8635_v6 = vsel %vm2058_vm3, %v8123_v27, %v13728_v60  ;;  %v13759_v19 = vunpack.i.h.bf16 %v13757_v4 }
 0x4f7   : > { %v8126_v55 = vmax.f32 %v7708_v9, 0.0  ;;  %13148 = vmatprep.mubr.f32.mxu0 %v8635_v6 }
 0x4f8   : > { %v8125_v52 = vmax.f32 %v7703_v46, 0.0  ;;  %v12932_v62 = vpop.f32.mrb[120].mxu1  ;;  %13149 = vmatmul.mubr.f32.gmra.mrb[244].mxu0 %v8636_v35  ;;  %v13762_v46 = vpop.permute.xlu1 %13761 }
 0x4f9   : > { %v7718_v33 = vadd.f32 %v12932_v62, %v16477_v12  ;;  %v7712_v8 = vpop.f32.mrb[121].mxu1  ;;  %v8638_v5 = vsel %vm2058_vm3, %v8126_v55, %v13734_v42  ;;  %v13763_v42 = vunpack.i.l.bf16 %v13762_v46 }
 0x4fa   : > { %v7713_v48 = vadd.f32 %v16477_v12, %v7712_v8  ;;  %v8637_v31 = vsel %vm2058_vm3, %v8125_v52, %v13733_v29  ;;  %v13764_v8 = vunpack.i.h.bf16 %v13762_v46 }
 0x4fb   : > { %v8128_v63 = vmax.f32 %v7718_v33, 0.0  ;;  %13151 = vmatprep.mubr.f32.mxu0 %v8637_v31 }
 0x4fc   : > { %v8127_v1 = vmax.f32 %v7713_v48, 0.0  ;;  %v12935_v59 = vpop.f32.mrb[122].mxu1  ;;  %13152 = vmatmul.mubr.f32.gmra.mrb[246].mxu0 %v8638_v5  ;;  %v13767_v48 = vpop.permute.xlu0 %13766 }
 0x4fd   : > { %v7728_v38 = vadd.f32 %v12935_v59, %v16477_v12  ;;  %v7722_v28 = vpop.f32.mrb[123].mxu1  ;;  %v8640_v14 = vsel %vm2058_vm3, %v8128_v63, %v13739_v32  ;;  %v13768_v32 = vunpack.i.l.bf16 %v13767_v48 }
 0x4fe   : > { %v7723_v40 = vadd.f32 %v16477_v12, %v7722_v28  ;;  %v8639_v44 = vsel %vm2058_vm3, %v8127_v1, %v13738_v22  ;;  %v13769_v28 = vunpack.i.h.bf16 %v13767_v48 }
 0x4ff   : > { %v8130_v30 = vmax.f32 %v7728_v38, 0.0  ;;  %13154 = vmatprep.mubr.f32.mxu0 %v8639_v44  ;;  %v16684_v44 = vld [vmem:[%s17415_s12] ss:$0 sm:$0xff] }
 0x500   : > { %v8129_v3 = vmax.f32 %v7723_v40, 0.0  ;;  %v12938_v36 = vpop.f32.mrb[124].mxu1  ;;  %13155 = vmatmul.mubr.f32.gmra.mrb[248].mxu0 %v8640_v14  ;;  %v13772_v40 = vpop.permute.xlu1 %13771 }
 0x501   : > { %v7738_v61 = vadd.f32 %v12938_v36, %v16477_v12  ;;  %v7732_v0 = vpop.f32.mrb[125].mxu1  ;;  %v8642_v57 = vsel %vm2058_vm3, %v8130_v30, %v13744_v56  ;;  %v13773_v56 = vunpack.i.l.bf16 %v13772_v40 }
 0x502   : > { %v7733_v20 = vadd.f32 %v16477_v12, %v7732_v0  ;;  %v8641_v11 = vsel %vm2058_vm3, %v8129_v3, %v13743_v17  ;;  %v13774_v0 = vunpack.i.h.bf16 %v13772_v40 }
 0x503   : > { %v8132_v58 = vmax.f32 %v7738_v61, 0.0  ;;  %13157 = vmatprep.mubr.f32.mxu0 %v8641_v11 }
 0x504   : > { %v8131_v50 = vmax.f32 %v7733_v20, 0.0  ;;  %v12941_v53 = vpop.f32.mrb[126].mxu1  ;;  %13158 = vmatmul.mubr.f32.gmra.mrb[250].mxu0 %v8642_v57  ;;  %v13777_v20 = vpop.permute.xlu0 %13776 }
 0x505   : > { %v7748_v51 = vadd.f32 %v12941_v53, %v16477_v12  ;;  %v7742_v2 = vpop.f32.mrb[127].mxu1  ;;  %v8644_v37 = vsel %vm2058_vm3, %v8132_v58, %v13749_v13  ;;  %v13778_v13 = vunpack.i.l.bf16 %v13777_v20 }
 0x506   : > { %v7743_v24 = vadd.f32 %v16477_v12, %v7742_v2  ;;  %v8643_v7 = vsel %vm2058_vm3, %v8131_v50, %v13748_v45  ;;  %v13779_v2 = vunpack.i.h.bf16 %v13777_v20 }
 0x507   : > { %v8134_v16 = vmax.f32 %v7748_v51, 0.0  ;;  %13160 = vmatprep.mubr.f32.mxu0 %v8643_v7 }
 0x508   : > { %v8133_v10 = vmax.f32 %v7743_v24, 0.0  ;;  %v12944_v26 = vpop.f32.mrb[128].mxu1  ;;  %13161 = vmatmul.mubr.f32.gmra.mrb[252].mxu0 %v8644_v37  ;;  %v13782_v24 = vpop.permute.xlu1 %13781 }
 0x509   : > { %v7758_v49 = vadd.f32 %v12944_v26, %v16477_v12  ;;  %v7752_v43 = vpop.f32.mrb[129].mxu1  ;;  %v8646_v23 = vsel %vm2058_vm3, %v8134_v16, %v13754_v39  ;;  %v13783_v39 = vunpack.i.l.bf16 %v13782_v24 }
 0x50a   : > { %v7753_v47 = vadd.f32 %v16477_v12, %v7752_v43  ;;  %v8645_v60 = vsel %vm2058_vm3, %v8133_v10, %v13753_v15  ;;  %v13784_v43 = vunpack.i.h.bf16 %v13782_v24 }
 0x50b   : > { %v8136_v27 = vmax.f32 %v7758_v49, 0.0  ;;  %13163 = vmatprep.mubr.f32.mxu0 %v8645_v60 }
 0x50c   : > { %v8135_v21 = vmax.f32 %v7753_v47, 0.0  ;;  %v12947_v9 = vpop.f32.mrb[130].mxu1  ;;  %13164 = vmatmul.mubr.f32.gmra.mrb[254].mxu0 %v8646_v23  ;;  %v13787_v47 = vpop.permute.xlu0 %13786 }
 0x50d   : > { %v7768_v6 = vadd.f32 %v12947_v9, %v16477_v12  ;;  %v7762_v55 = vpop.f32.mrb[131].mxu1  ;;  %v8648_v52 = vsel %vm2058_vm3, %v8136_v27, %v13759_v19  ;;  %v13788_v19 = vunpack.i.l.bf16 %v13787_v47 }
 0x50e   : > { %v7763_v35 = vadd.f32 %v16477_v12, %v7762_v55  ;;  %v8647_v29 = vsel %vm2058_vm3, %v8135_v21, %v13758_v25  ;;  %v13789_v55 = vunpack.i.h.bf16 %v13787_v47 }
 0x50f   : > { %v8138_v62 = vmax.f32 %v7768_v6, 0.0  ;;  %13166 = vmatprep.mubr.f32.mxu0 %v8647_v29 }
 0x510   : > { %v8137_v34 = vmax.f32 %v7763_v35, 0.0  ;;  %v12950_v33 = vpop.f32.mrb[132].mxu1  ;;  %13167 = vmatmul.mubr.f32.gmra.mrb[0].mxu0 %v8648_v52  ;;  %v13792_v35 = vpop.permute.xlu1 %13791 }
 0x511   : > { %v7778_v31 = vadd.f32 %v12950_v33, %v16477_v12  ;;  %v7772_v63 = vpop.f32.mrb[133].mxu1  ;;  %v8650_v1 = vsel %vm2058_vm3, %v8138_v62, %v13764_v8  ;;  %v13793_v8 = vunpack.i.l.bf16 %v13792_v35 }
 0x512   : > { %v7773_v5 = vadd.f32 %v16477_v12, %v7772_v63  ;;  %v8649_v22 = vsel %vm2058_vm3, %v8137_v34, %v13763_v42  ;;  %v13794_v63 = vunpack.i.h.bf16 %v13792_v35 }
 0x513   : > { %v8140_v59 = vmax.f32 %v7778_v31, 0.0  ;;  %13169 = vmatprep.mubr.f32.mxu0 %v8649_v22 }
 0x514   : > { %v8139_v41 = vmax.f32 %v7773_v5, 0.0  ;;  %v12953_v38 = vpop.f32.mrb[134].mxu1  ;;  %13170 = vmatmul.mubr.f32.gmra.mrb[2].mxu0 %v8650_v1  ;;  %v13797_v5 = vpop.permute.xlu0 %13796 }
 0x515   : > { %v7788_v30 = vadd.f32 %v16684_v44, %v12953_v38  ;;  %v7782_v12 = vpop.f32.mrb[135].mxu1  ;;  %v8652_v3 = vsel %vm2058_vm3, %v8140_v59, %v13769_v28  ;;  %v13798_v28 = vunpack.i.l.bf16 %v13797_v5 }
 0x516   : > { %v7783_v14 = vadd.f32 %v16684_v44, %v7782_v12  ;;  %v8651_v17 = vsel %vm2058_vm3, %v8139_v41, %v13768_v32  ;;  %v13799_v12 = vunpack.i.h.bf16 %v13797_v5 }
 0x517   : > { %v8142_v36 = vmax.f32 %v7788_v30, 0.0  ;;  %13172 = vmatprep.mubr.f32.mxu0 %v8651_v17 }
 0x518   : > { %v8141_v54 = vmax.f32 %v7783_v14, 0.0  ;;  %v12956_v61 = vpop.f32.mrb[136].mxu1  ;;  %13173 = vmatmul.mubr.f32.gmra.mrb[4].mxu0 %v8652_v3  ;;  %v13802_v14 = vpop.permute.xlu1 %13801 }
 0x519   : > { %v7798_v11 = vadd.f32 %v16684_v44, %v12956_v61  ;;  %v7792_v58 = vpop.f32.mrb[137].mxu1  ;;  %v8654_v50 = vsel %vm2058_vm3, %v8142_v36, %v13774_v0  ;;  %v13803_v0 = vunpack.i.l.bf16 %v13802_v14 }
 0x51a   : > { %v7793_v57 = vadd.f32 %v16684_v44, %v7792_v58  ;;  %v8653_v45 = vsel %vm2058_vm3, %v8141_v54, %v13773_v56  ;;  %v13804_v58 = vunpack.i.h.bf16 %v13802_v14 }
 0x51b   : > { %v8144_v53 = vmax.f32 %v7798_v11, 0.0  ;;  %13175 = vmatprep.mubr.f32.mxu0 %v8653_v45 }
 0x51c   : > { %v8143_v18 = vmax.f32 %v7793_v57, 0.0  ;;  %v12959_v51 = vpop.f32.mrb[138].mxu1  ;;  %13176 = vmatmul.mubr.f32.gmra.mrb[6].mxu0 %v8654_v50  ;;  %v13807_v57 = vpop.permute.xlu0 %13806 }
 0x51d   : > { %v7808_v7 = vadd.f32 %v16684_v44, %v12959_v51  ;;  %v7802_v16 = vpop.f32.mrb[139].mxu1  ;;  %v8656_v10 = vsel %vm2058_vm3, %v8144_v53, %v13779_v2  ;;  %v13808_v2 = vunpack.i.l.bf16 %v13807_v57 }
 0x51e   : > { %v7803_v37 = vadd.f32 %v16684_v44, %v7802_v16  ;;  %v8655_v15 = vsel %vm2058_vm3, %v8143_v18, %v13778_v13  ;;  %v13809_v16 = vunpack.i.h.bf16 %v13807_v57 }
 0x51f   : > { %v8146_v26 = vmax.f32 %v7808_v7, 0.0  ;;  %13178 = vmatprep.mubr.f32.mxu0 %v8655_v15 }
 0x520   : > { %v8145_v4 = vmax.f32 %v7803_v37, 0.0  ;;  %v12962_v49 = vpop.f32.mrb[140].mxu1  ;;  %13179 = vmatmul.mubr.f32.gmra.mrb[8].mxu0 %v8656_v10  ;;  %v13812_v37 = vpop.permute.xlu1 %13811 }
 0x521   : > { %v7818_v60 = vadd.f32 %v16684_v44, %v12962_v49  ;;  %v7812_v27 = vpop.f32.mrb[141].mxu1  ;;  %v8658_v21 = vsel %vm2058_vm3, %v8146_v26, %v13784_v43  ;;  %v13813_v43 = vunpack.i.l.bf16 %v13812_v37 }
 0x522   : > { %v7813_v23 = vadd.f32 %v16684_v44, %v7812_v27  ;;  %v8657_v25 = vsel %vm2058_vm3, %v8145_v4, %v13783_v39  ;;  %v13814_v27 = vunpack.i.h.bf16 %v13812_v37 }
 0x523   : > { %v8148_v9 = vmax.f32 %v7818_v60, 0.0  ;;  %13181 = vmatprep.mubr.f32.mxu0 %v8657_v25 }
 0x524   : > { %v8147_v46 = vmax.f32 %v7813_v23, 0.0  ;;  %v12965_v6 = vpop.f32.mrb[142].mxu1  ;;  %13182 = vmatmul.mubr.f32.gmra.mrb[10].mxu0 %v8658_v21  ;;  %v13817_v23 = vpop.permute.xlu0 %13816 }
 0x525   : > { %v7828_v29 = vadd.f32 %v16684_v44, %v12965_v6  ;;  %v7822_v52 = vpop.f32.mrb[143].mxu1  ;;  %v8660_v34 = vsel %vm2058_vm3, %v8148_v9, %v13789_v55  ;;  %v13818_v55 = vunpack.i.l.bf16 %v13817_v23 }
 0x526   : > { %v7823_v62 = vadd.f32 %v16684_v44, %v7822_v52  ;;  %v8659_v42 = vsel %vm2058_vm3, %v8147_v46, %v13788_v19  ;;  %v13819_v52 = vunpack.i.h.bf16 %v13817_v23 }
 0x527   : > { %v8150_v33 = vmax.f32 %v7828_v29, 0.0  ;;  %13184 = vmatprep.mubr.f32.mxu0 %v8659_v42 }
 0x528   : > { %v8149_v48 = vmax.f32 %v7823_v62, 0.0  ;;  %v12968_v31 = vpop.f32.mrb[144].mxu1  ;;  %13185 = vmatmul.mubr.f32.gmra.mrb[12].mxu0 %v8660_v34  ;;  %v13822_v62 = vpop.permute.xlu1 %13821 }
 0x529   : > { %v7838_v22 = vadd.f32 %v16684_v44, %v12968_v31  ;;  %v7832_v1 = vpop.f32.mrb[145].mxu1  ;;  %v8662_v41 = vsel %vm2058_vm3, %v8150_v33, %v13794_v63  ;;  %v13823_v63 = vunpack.i.l.bf16 %v13822_v62 }
 0x52a   : > { %v7833_v59 = vadd.f32 %v16684_v44, %v7832_v1  ;;  %v8661_v32 = vsel %vm2058_vm3, %v8149_v48, %v13793_v8  ;;  %v13824_v1 = vunpack.i.h.bf16 %v13822_v62 }
 0x52b   : > { %v8152_v38 = vmax.f32 %v7838_v22, 0.0  ;;  %13187 = vmatprep.mubr.f32.mxu0 %v8661_v32 }
 0x52c   : > { %v8151_v40 = vmax.f32 %v7833_v59, 0.0  ;;  %v12971_v30 = vpop.f32.mrb[146].mxu1  ;;  %13188 = vmatmul.mubr.f32.gmra.mrb[14].mxu0 %v8662_v41  ;;  %v13827_v59 = vpop.permute.xlu0 %13826 }
 0x52d   : > { %v7848_v17 = vadd.f32 %v16684_v44, %v12971_v30  ;;  %v7842_v3 = vpop.f32.mrb[147].mxu1  ;;  %v8664_v54 = vsel %vm2058_vm3, %v8152_v38, %v13799_v12  ;;  %v13828_v12 = vunpack.i.l.bf16 %v13827_v59 }
 0x52e   : > { %v7843_v36 = vadd.f32 %v16684_v44, %v7842_v3  ;;  %v8663_v56 = vsel %vm2058_vm3, %v8151_v40, %v13798_v28  ;;  %v13829_v3 = vunpack.i.h.bf16 %v13827_v59 }
 0x52f   : > { %v8154_v61 = vmax.f32 %v7848_v17, 0.0  ;;  %13190 = vmatprep.mubr.f32.mxu0 %v8663_v56 }
 0x530   : > { %v8153_v20 = vmax.f32 %v7843_v36, 0.0  ;;  %v12974_v11 = vpop.f32.mrb[148].mxu1  ;;  %13191 = vmatmul.mubr.f32.gmra.mrb[16].mxu0 %v8664_v54  ;;  %v13832_v36 = vpop.permute.xlu1 %13831 }
 0x531   : > { %v7858_v45 = vadd.f32 %v16684_v44, %v12974_v11  ;;  %v7852_v50 = vpop.f32.mrb[149].mxu1  ;;  %v8666_v18 = vsel %vm2058_vm3, %v8154_v61, %v13804_v58  ;;  %v13833_v58 = vunpack.i.l.bf16 %v13832_v36 }
 0x532   : > { %v7853_v53 = vadd.f32 %v16684_v44, %v7852_v50  ;;  %v8665_v13 = vsel %vm2058_vm3, %v8153_v20, %v13803_v0  ;;  %v13834_v50 = vunpack.i.h.bf16 %v13832_v36 }
 0x533   : > { %v8156_v51 = vmax.f32 %v7858_v45, 0.0  ;;  %13193 = vmatprep.mubr.f32.mxu0 %v8665_v13 }
 0x534   : > { %v8155_v24 = vmax.f32 %v7853_v53, 0.0  ;;  %v12977_v7 = vpop.f32.mrb[150].mxu1  ;;  %13194 = vmatmul.mubr.f32.gmra.mrb[18].mxu0 %v8666_v18  ;;  %v13837_v53 = vpop.permute.xlu0 %13836 }
 0x535   : > { %v7868_v15 = vadd.f32 %v16684_v44, %v12977_v7  ;;  %v7862_v10 = vpop.f32.mrb[151].mxu1  ;;  %v8668_v4 = vsel %vm2058_vm3, %v8156_v51, %v13809_v16  ;;  %v13838_v16 = vunpack.i.l.bf16 %v13837_v53 }
 0x536   : > { %v7863_v26 = vadd.f32 %v16684_v44, %v7862_v10  ;;  %v8667_v39 = vsel %vm2058_vm3, %v8155_v24, %v13808_v2  ;;  %v13839_v10 = vunpack.i.h.bf16 %v13837_v53 }
 0x537   : > { %v8158_v49 = vmax.f32 %v7868_v15, 0.0  ;;  %13196 = vmatprep.mubr.f32.mxu0 %v8667_v39 }
 0x538   : > { %v8157_v47 = vmax.f32 %v7863_v26, 0.0  ;;  %v12980_v60 = vpop.f32.mrb[152].mxu1  ;;  %13197 = vmatmul.mubr.f32.gmra.mrb[20].mxu0 %v8668_v4  ;;  %v13842_v26 = vpop.permute.xlu1 %13841 }
 0x539   : > { %v7878_v25 = vadd.f32 %v16684_v44, %v12980_v60  ;;  %v7872_v21 = vpop.f32.mrb[153].mxu1  ;;  %v8670_v46 = vsel %vm2058_vm3, %v8158_v49, %v13814_v27  ;;  %v13843_v27 = vunpack.i.l.bf16 %v13842_v26 }
 0x53a   : > { %v7873_v9 = vadd.f32 %v16684_v44, %v7872_v21  ;;  %v8669_v19 = vsel %vm2058_vm3, %v8157_v47, %v13813_v43  ;;  %v13844_v21 = vunpack.i.h.bf16 %v13842_v26 }
 0x53b   : > { %v8160_v6 = vmax.f32 %v7878_v25, 0.0  ;;  %13199 = vmatprep.mubr.f32.mxu0 %v8669_v19 }
 0x53c   : > { %v8159_v35 = vmax.f32 %v7873_v9, 0.0  ;;  %v12983_v29 = vpop.f32.mrb[154].mxu1  ;;  %13200 = vmatmul.mubr.f32.gmra.mrb[22].mxu0 %v8670_v46  ;;  %v13847_v9 = vpop.permute.xlu0 %13846 }
 0x53d   : > { %v7888_v42 = vadd.f32 %v16684_v44, %v12983_v29  ;;  %v7882_v34 = vpop.f32.mrb[155].mxu1  ;;  %v8672_v48 = vsel %vm2058_vm3, %v8160_v6, %v13819_v52  ;;  %v13848_v52 = vunpack.i.l.bf16 %v13847_v9 }
 0x53e   : > { %v7883_v33 = vadd.f32 %v16684_v44, %v7882_v34  ;;  %v8671_v8 = vsel %vm2058_vm3, %v8159_v35, %v13818_v55  ;;  %v13849_v34 = vunpack.i.h.bf16 %v13847_v9 }
 0x53f   : > { %v8162_v31 = vmax.f32 %v7888_v42, 0.0  ;;  %13202 = vmatprep.mubr.f32.mxu0 %v8671_v8 }
 0x540   : > { %v8161_v5 = vmax.f32 %v7883_v33, 0.0  ;;  %v12986_v22 = vpop.f32.mrb[156].mxu1  ;;  %13203 = vmatmul.mubr.f32.gmra.mrb[24].mxu0 %v8672_v48  ;;  %v13852_v33 = vpop.permute.xlu1 %13851 }
 0x541   : > { %v7898_v32 = vadd.f32 %v16684_v44, %v12986_v22  ;;  %v7892_v41 = vpop.f32.mrb[157].mxu1  ;;  %v8674_v40 = vsel %vm2058_vm3, %v8162_v31, %v13824_v1  ;;  %v13853_v1 = vunpack.i.l.bf16 %v13852_v33 }
 0x542   : > { %v7893_v38 = vadd.f32 %v16684_v44, %v7892_v41  ;;  %v8673_v28 = vsel %vm2058_vm3, %v8161_v5, %v13823_v63  ;;  %v13854_v41 = vunpack.i.h.bf16 %v13852_v33 }
 0x543   : > { %v8164_v30 = vmax.f32 %v7898_v32, 0.0  ;;  %13205 = vmatprep.mubr.f32.mxu0 %v8673_v28 }
 0x544   : > { %v8163_v14 = vmax.f32 %v7893_v38, 0.0  ;;  %v12989_v17 = vpop.f32.mrb[158].mxu1  ;;  %13206 = vmatmul.mubr.f32.gmra.mrb[26].mxu0 %v8674_v40  ;;  %v13857_v38 = vpop.permute.xlu0 %13856 }
 0x545   : > { %v7908_v56 = vadd.f32 %v16684_v44, %v12989_v17  ;;  %v7902_v54 = vpop.f32.mrb[159].mxu1  ;;  %v8676_v20 = vsel %vm2058_vm3, %v8164_v30, %v13829_v3  ;;  %v13858_v3 = vunpack.i.l.bf16 %v13857_v38 }
 0x546   : > { %v7903_v61 = vadd.f32 %v16684_v44, %v7902_v54  ;;  %v8675_v0 = vsel %vm2058_vm3, %v8163_v14, %v13828_v12  ;;  %v13859_v54 = vunpack.i.h.bf16 %v13857_v38 }
 0x547   : > { %v8166_v11 = vmax.f32 %v7908_v56, 0.0  ;;  %13208 = vmatprep.mubr.f32.mxu0 %v8675_v0 }
 0x548   : > { %v8165_v57 = vmax.f32 %v7903_v61, 0.0  ;;  %v12992_v45 = vpop.f32.mrb[160].mxu1  ;;  %13209 = vmatmul.mubr.f32.gmra.mrb[28].mxu0 %v8676_v20  ;;  %v13862_v61 = vpop.permute.xlu1 %13861 }
 0x549   : > { %v7918_v13 = vadd.f32 %v16684_v44, %v12992_v45  ;;  %v7912_v18 = vpop.f32.mrb[161].mxu1  ;;  %v8678_v24 = vsel %vm2058_vm3, %v8166_v11, %v13834_v50  ;;  %v13863_v50 = vunpack.i.l.bf16 %v13862_v61 }
 0x54a   : > { %v7913_v51 = vadd.f32 %v16684_v44, %v7912_v18  ;;  %v8677_v2 = vsel %vm2058_vm3, %v8165_v57, %v13833_v58  ;;  %v13864_v18 = vunpack.i.h.bf16 %v13862_v61 }
 0x54b   : > { %v8168_v7 = vmax.f32 %v7918_v13, 0.0  ;;  %13211 = vmatprep.mubr.f32.mxu0 %v8677_v2 }
 0x54c   : > { %v8167_v37 = vmax.f32 %v7913_v51, 0.0  ;;  %v12995_v15 = vpop.f32.mrb[162].mxu1  ;;  %13212 = vmatmul.mubr.f32.gmra.mrb[30].mxu0 %v8678_v24  ;;  %v13867_v51 = vpop.permute.xlu0 %13866 }
 0x54d   : > { %v7928_v39 = vadd.f32 %v16684_v44, %v12995_v15  ;;  %v7922_v4 = vpop.f32.mrb[163].mxu1  ;;  %v8680_v47 = vsel %vm2058_vm3, %v8168_v7, %v13839_v10  ;;  %v16767_v7 = vld [vmem:[%s17417_s14] ss:$0 sm:$0xff] }
 0x54e   : > { %v7923_v49 = vadd.f32 %v16684_v44, %v7922_v4  ;;  %v8679_v43 = vsel %vm2058_vm3, %v8167_v37, %v13838_v16 }
 0x54f   : > { %v8170_v60 = vmax.f32 %v7928_v39, 0.0  ;;  %13214 = vmatprep.mubr.f32.mxu0 %v8679_v43  ;;  %v13868_v39 = vunpack.i.l.bf16 %v13867_v51 }
 0x550   : > { %v8169_v23 = vmax.f32 %v7923_v49, 0.0  ;;  %v12998_v25 = vpop.f32.mrb[164].mxu1  ;;  %13215 = vmatmul.mubr.f32.gmra.mrb[32].mxu0 %v8680_v47  ;;  %v13877_v33 = vpop.permute.xlu0 %13876 }
 0x551   : > { %v7938_v19 = vadd.f32 %v16684_v44, %v12998_v25  ;;  %v7932_v46 = vpop.f32.mrb[165].mxu1  ;;  %v8682_v35 = vsel %vm2058_vm3, %v8170_v60, %v13844_v21  ;;  %v13869_v60 = vunpack.i.h.bf16 %v13867_v51 }
 0x552   : > { %v7933_v6 = vadd.f32 %v16684_v44, %v7932_v46  ;;  %v8681_v55 = vsel %vm2058_vm3, %v8169_v23, %v13843_v27  ;;  %v13872_v27 = vpop.permute.xlu1 %13871 }
 0x553   : > { %v8172_v29 = vmax.f32 %v7938_v19, 0.0  ;;  %13217 = vmatprep.mubr.f32.mxu0 %v8681_v55 }
 0x554   : > { %v8171_v62 = vmax.f32 %v7933_v6, 0.0  ;;  %v13001_v42 = vpop.f32.mrb[166].mxu1  ;;  %13218 = vmatmul.mubr.f32.gmra.mrb[34].mxu0 %v8682_v35  ;;  %v13873_v35 = vunpack.i.l.bf16 %v13872_v27 }
 0x555   : > { %v7948_v8 = vadd.f32 %v16684_v44, %v13001_v42  ;;  %v7942_v48 = vpop.f32.mrb[167].mxu1  ;;  %v8684_v5 = vsel %vm2058_vm3, %v8172_v29, %v13849_v34  ;;  %v13874_v34 = vunpack.i.h.bf16 %v13872_v27 }
 0x556   : > { %v7943_v31 = vadd.f32 %v16684_v44, %v7942_v48  ;;  %v8683_v63 = vsel %vm2058_vm3, %v8171_v62, %v13848_v52 }
 0x557   : > { %v8174_v22 = vmax.f32 %v7948_v8, 0.0  ;;  %13220 = vmatprep.mubr.f32.mxu0 %v8683_v63 }
 0x558   : > { %v8173_v59 = vmax.f32 %v7943_v31, 0.0  ;;  %v13004_v32 = vpop.f32.mrb[168].mxu1  ;;  %13221 = vmatmul.mubr.f32.gmra.mrb[36].mxu0 %v8684_v5 }
 0x559   : > { %v7958_v28 = vadd.f32 %v16684_v44, %v13004_v32  ;;  %v7952_v40 = vpop.f32.mrb[169].mxu1  ;;  %v8686_v14 = vsel %vm2058_vm3, %v8174_v22, %v13854_v41  ;;  %v13878_v32 = vunpack.i.l.bf16 %v13877_v33 }
 0x55a   : > { %v7953_v30 = vadd.f32 %v16684_v44, %v7952_v40  ;;  %v8685_v12 = vsel %vm2058_vm3, %v8173_v59, %v13853_v1 }
 0x55b   : > { %v8176_v17 = vmax.f32 %v7958_v28, 0.0  ;;  %13223 = vmatprep.mubr.f32.mxu0 %v8685_v12  ;;  %v13882_v12 = vpop.permute.xlu1 %13881 }
 0x55c   : > { %v8175_v36 = vmax.f32 %v7953_v30, 0.0  ;;  %v13007_v56 = vpop.f32.mrb[170].mxu1  ;;  %13224 = vmatmul.mubr.f32.gmra.mrb[38].mxu0 %v8686_v14  ;;  %v13879_v30 = vunpack.i.h.bf16 %v13877_v33 }
 0x55d   : > { %v7968_v0 = vadd.f32 %v16684_v44, %v13007_v56  ;;  %v7962_v20 = vpop.f32.mrb[171].mxu1  ;;  %v8688_v57 = vsel %vm2058_vm3, %v8176_v17, %v13859_v54 }
 0x55e   : > { %v7963_v11 = vadd.f32 %v16684_v44, %v7962_v20  ;;  %v8687_v58 = vsel %vm2058_vm3, %v8175_v36, %v13858_v3  ;;  %v13883_v20 = vunpack.i.l.bf16 %v13882_v12 }
 0x55f   : > { %v8178_v45 = vmax.f32 %v7968_v0, 0.0  ;;  %13226 = vmatprep.mubr.f32.mxu0 %v8687_v58 }
 0x560   : > { %v8177_v53 = vmax.f32 %v7963_v11, 0.0  ;;  %v13010_v13 = vpop.f32.mrb[172].mxu1  ;;  %13227 = vmatmul.mubr.f32.gmra.mrb[40].mxu0 %v8688_v57 }
 0x561   : > { %v7978_v2 = vadd.f32 %v16684_v44, %v13010_v13  ;;  %v7972_v24 = vpop.f32.mrb[173].mxu1  ;;  %v8690_v15 = vsel %vm2058_vm3, %v8178_v45, %v13864_v18 }
 0x562   : > { %v7973_v16 = vadd.f32 %v16684_v44, %v7972_v24  ;;  %v8689_v37 = vsel %vm2058_vm3, %v8177_v53, %v13863_v50  ;;  %v13884_v50 = vunpack.i.h.bf16 %v13882_v12  ;;  %v13887_v53 = vpop.permute.xlu0 %13886 }
 0x563   : > { %v8180_v10 = vmax.f32 %v7978_v2, 0.0  ;;  %v13072_v26 = vpop.f32.mrb[192].mxu0  ;;  %13229 = vmatprep.mubr.f32.mxu0 %v8689_v37 }
 0x564   : > { %v8179_v4 = vmax.f32 %v7973_v16, 0.0  ;;  %v8806_v49 = vadd.f32 %v13072_v26, %v16767_v7  ;;  %v13013_v43 = vpop.f32.mrb[174].mxu1  ;;  %v8800_v47 = vpop.f32.mrb[193].mxu0  ;;  %13230 = vmatmul.mubr.f32.gmra.mrb[42].mxu0 %v8690_v15 }
 0x565   : > { %v7988_v23 = vadd.f32 %v16684_v44, %v13013_v43  ;;  %v8801_v25 = vadd.f32 %v16767_v7, %v8800_v47  ;;  %v7982_v21 = vpop.f32.mrb[175].mxu1  ;;  %v8692_v46 = vsel %vm2058_vm3, %v8180_v10, %v13869_v60  ;;  %v13888_v10 = vunpack.i.l.bf16 %v13887_v53  ;;  %v13892_v47 = vpop.permute.xlu1 %13891 }
 0x566   : > { %9441 = vst.msk [vmem:[%s16775_s30 + $0x8] sm:$0xff] %vm9439_vm4, %v8806_v49  ;;  %v7983_v9 = vadd.f32 %v16684_v44, %v7982_v21  ;;  %v8691_v19 = vsel %vm2058_vm3, %v8179_v4, %v13868_v39  ;;  %v13889_v43 = vunpack.i.h.bf16 %v13887_v53 }
 0x567   : > { %v8182_v6 = vmax.f32 %v7988_v23, 0.0  ;;  %9440 = vst.msk [vmem:[%s16775_s30] sm:$0xff] %vm9439_vm4, %v8801_v25  ;;  %v13075_v55 = vpop.f32.mrb[194].mxu0  ;;  %13232 = vmatprep.mubr.f32.mxu0 %v8691_v19 }
 0x568   : > { %v8181_v29 = vmax.f32 %v7983_v9, 0.0  ;;  %v8816_v52 = vadd.f32 %v13075_v55, %v16767_v7  ;;  %v13016_v62 = vpop.f32.mrb[176].mxu1  ;;  %v8810_v42 = vpop.f32.mrb[195].mxu0  ;;  %13233 = vmatmul.mubr.f32.gmra.mrb[44].mxu0 %v8692_v46 }
 0x569   : > { %v7998_v8 = vadd.f32 %v16684_v44, %v13016_v62  ;;  %v8811_v48 = vadd.f32 %v16767_v7, %v8810_v42  ;;  %v7992_v31 = vpop.f32.mrb[177].mxu1  ;;  %v8694_v22 = vsel %vm2058_vm3, %v8182_v6, %v13874_v34  ;;  %v13893_v6 = vunpack.i.l.bf16 %v13892_v47  ;;  %v13897_v42 = vpop.permute.xlu0 %13896 }
 0x56a   : > { %9443 = vst.msk [vmem:[%s16775_s30 + $0x18] sm:$0xff] %vm9439_vm4, %v8816_v52  ;;  %v7993_v63 = vadd.f32 %v16684_v44, %v7992_v31  ;;  %v8693_v5 = vsel %vm2058_vm3, %v8181_v29, %v13873_v35  ;;  %v13894_v62 = vunpack.i.h.bf16 %v13892_v47 }
 0x56b   : > { %v8184_v1 = vmax.f32 %v7998_v8, 0.0  ;;  %9442 = vst.msk [vmem:[%s16775_s30 + $0x10] sm:$0xff] %vm9439_vm4, %v8811_v48  ;;  %v13078_v59 = vpop.f32.mrb[196].mxu0  ;;  %13235 = vmatprep.mubr.f32.mxu0 %v8693_v5 }
 0x56c   : > { %v8183_v41 = vmax.f32 %v7993_v63, 0.0  ;;  %v8826_v38 = vadd.f32 %v13078_v59, %v16767_v7  ;;  %v13019_v28 = vpop.f32.mrb[178].mxu1  ;;  %v8820_v40 = vpop.f32.mrb[197].mxu0  ;;  %13236 = vmatmul.mubr.f32.gmra.mrb[46].mxu0 %v8694_v22 }
 0x56d   : > { %v8008_v14 = vadd.f32 %v16684_v44, %v13019_v28  ;;  %v8821_v17 = vadd.f32 %v16767_v7, %v8820_v40  ;;  %v8002_v3 = vpop.f32.mrb[179].mxu1  ;;  %v8696_v54 = vsel %vm2058_vm3, %v8184_v1, %v13879_v30  ;;  %v13898_v1 = vunpack.i.l.bf16 %v13897_v42  ;;  %v13902_v40 = vpop.permute.xlu1 %13901 }
 0x56e   : > { %9445 = vst.msk [vmem:[%s16775_s30 + $0x28] sm:$0xff] %vm9439_vm4, %v8826_v38  ;;  %v8003_v36 = vadd.f32 %v16684_v44, %v8002_v3  ;;  %v8695_v56 = vsel %vm2058_vm3, %v8183_v41, %v13878_v32  ;;  %v13899_v28 = vunpack.i.h.bf16 %v13897_v42 }
 0x56f   : > { %v8186_v61 = vmax.f32 %v8008_v14, 0.0  ;;  %9444 = vst.msk [vmem:[%s16775_s30 + $0x20] sm:$0xff] %vm9439_vm4, %v8821_v17  ;;  %v13081_v0 = vpop.f32.mrb[198].mxu0  ;;  %13238 = vmatprep.mubr.f32.mxu0 %v8695_v56 }
 0x570   : > { %v8185_v11 = vmax.f32 %v8003_v36, 0.0  ;;  %v8836_v58 = vadd.f32 %v13081_v0, %v16767_v7  ;;  %v13022_v57 = vpop.f32.mrb[180].mxu1  ;;  %v8830_v45 = vpop.f32.mrb[199].mxu0  ;;  %13239 = vmatmul.mubr.f32.gmra.mrb[48].mxu0 %v8696_v54 }
 0x571   : > { %v8018_v13 = vadd.f32 %v16684_v44, %v13022_v57  ;;  %v8831_v18 = vadd.f32 %v16767_v7, %v8830_v45  ;;  %v8012_v51 = vpop.f32.mrb[181].mxu1  ;;  %v8698_v16 = vsel %vm2058_vm3, %v8186_v61, %v13884_v50  ;;  %v13903_v61 = vunpack.i.l.bf16 %v13902_v40  ;;  %v13907_v45 = vpop.permute.xlu0 %13906 }
 0x572   : > { %9447 = vst.msk [vmem:[%s16775_s30 + $0x38] sm:$0xff] %vm9439_vm4, %v8836_v58  ;;  %v8013_v2 = vadd.f32 %v16684_v44, %v8012_v51  ;;  %v8697_v24 = vsel %vm2058_vm3, %v8185_v11, %v13883_v20  ;;  %v13904_v57 = vunpack.i.h.bf16 %v13902_v40 }
 0x573   : > { %v8188_v37 = vmax.f32 %v8018_v13, 0.0  ;;  %9446 = vst.msk [vmem:[%s16775_s30 + $0x30] sm:$0xff] %vm9439_vm4, %v8831_v18  ;;  %v13084_v15 = vpop.f32.mrb[200].mxu0  ;;  %13241 = vmatprep.mubr.f32.mxu0 %v8697_v24 }
 0x574   : > { %v8187_v26 = vmax.f32 %v8013_v2, 0.0  ;;  %v8846_v39 = vadd.f32 %v13084_v15, %v16767_v7  ;;  %v13025_v4 = vpop.f32.mrb[182].mxu1  ;;  %v8840_v49 = vpop.f32.mrb[201].mxu0  ;;  %13242 = vmatmul.mubr.f32.gmra.mrb[50].mxu0 %v8698_v16 }
 0x575   : > { %v8028_v60 = vadd.f32 %v16684_v44, %v13025_v4  ;;  %v8841_v27 = vadd.f32 %v16767_v7, %v8840_v49  ;;  %v8022_v23 = vpop.f32.mrb[183].mxu1  ;;  %v8700_v9 = vsel %vm2058_vm3, %v8188_v37, %v13889_v43  ;;  %v13908_v37 = vunpack.i.l.bf16 %v13907_v45  ;;  %v13912_v49 = vpop.permute.xlu1 %13911 }
 0x576   : > { %9449 = vst.msk [vmem:[%s16775_s30 + $0x48] sm:$0xff] %vm9439_vm4, %v8846_v39  ;;  %v8023_v25 = vadd.f32 %v16684_v44, %v8022_v23  ;;  %v8699_v21 = vsel %vm2058_vm3, %v8187_v26, %v13888_v10  ;;  %v13909_v4 = vunpack.i.h.bf16 %v13907_v45 }
 0x577   : > { %v8190_v19 = vmax.f32 %v8028_v60, 0.0  ;;  %9448 = vst.msk [vmem:[%s16775_s30 + $0x40] sm:$0xff] %vm9439_vm4, %v8841_v27  ;;  %v13087_v46 = vpop.f32.mrb[202].mxu0  ;;  %13244 = vmatprep.mubr.f32.mxu0 %v8699_v21 }
 0x578   : > { %v8189_v55 = vmax.f32 %v8023_v25, 0.0  ;;  %v8856_v35 = vadd.f32 %v13087_v46, %v16767_v7  ;;  %v13028_v29 = vpop.f32.mrb[184].mxu1  ;;  %v8850_v52 = vpop.f32.mrb[203].mxu0  ;;  %13245 = vmatmul.mubr.f32.gmra.mrb[52].mxu0 %v8700_v9 }
 0x579   : > { %v8038_v34 = vadd.f32 %v16684_v44, %v13028_v29  ;;  %v8851_v33 = vadd.f32 %v16767_v7, %v8850_v52  ;;  %v8032_v8 = vpop.f32.mrb[185].mxu1  ;;  %v8702_v63 = vsel %vm2058_vm3, %v8190_v19, %v13894_v62  ;;  %v13913_v19 = vunpack.i.l.bf16 %v13912_v49 }
 0x57a   : > { %9451 = vst.msk [vmem:[%s16775_s30 + $0x58] sm:$0xff] %vm9439_vm4, %v8856_v35  ;;  %v8033_v48 = vadd.f32 %v16684_v44, %v8032_v8  ;;  %v8701_v31 = vsel %vm2058_vm3, %v8189_v55, %v13893_v6  ;;  %v13914_v35 = vunpack.i.h.bf16 %v13912_v49 }
 0x57b   : > { %v8192_v5 = vmax.f32 %v8038_v34, 0.0  ;;  %9450 = vst.msk [vmem:[%s16775_s30 + $0x50] sm:$0xff] %vm9439_vm4, %v8851_v33  ;;  %v13090_v22 = vpop.f32.mrb[204].mxu0  ;;  %13247 = vmatprep.mubr.f32.mxu0 %v8701_v31 }
 0x57c   : > { %v8191_v59 = vmax.f32 %v8033_v48, 0.0  ;;  %v8866_v32 = vadd.f32 %v13090_v22, %v16767_v7  ;;  %v13031_v41 = vpop.f32.mrb[186].mxu1  ;;  %v8860_v38 = vpop.f32.mrb[205].mxu0  ;;  %13248 = vmatmul.mubr.f32.gmra.mrb[54].mxu0 %v8702_v63 }
 0x57d   : > { %v8048_v30 = vadd.f32 %v16684_v44, %v13031_v41  ;;  %v8861_v12 = vadd.f32 %v16767_v7, %v8860_v38  ;;  %v8042_v14 = vpop.f32.mrb[187].mxu1  ;;  %v8704_v36 = vsel %vm2058_vm3, %v8192_v5, %v13899_v28 }
 0x57e   : > { %9453 = vst.msk [vmem:[%s16775_s30 + $0x68] sm:$0xff] %vm9439_vm4, %v8866_v32  ;;  %v8043_v17 = vadd.f32 %v16684_v44, %v8042_v14  ;;  %v8703_v3 = vsel %vm2058_vm3, %v8191_v59, %v13898_v1 }
 0x57f   : > { %v8194_v56 = vmax.f32 %v8048_v30, 0.0  ;;  %9452 = vst.msk [vmem:[%s16775_s30 + $0x60] sm:$0xff] %vm9439_vm4, %v8861_v12  ;;  %v13093_v54 = vpop.f32.mrb[206].mxu0  ;;  %13250 = vmatprep.mubr.f32.mxu0 %v8703_v3 }
 0x580   : > { %v8193_v0 = vmax.f32 %v8043_v17, 0.0  ;;  %v8876_v20 = vadd.f32 %v13093_v54, %v16767_v7  ;;  %v13034_v11 = vpop.f32.mrb[188].mxu1  ;;  %v8870_v58 = vpop.f32.mrb[207].mxu0  ;;  %13251 = vmatmul.mubr.f32.gmra.mrb[56].mxu0 %v8704_v36 }
 0x581   : > { %v8058_v50 = vadd.f32 %v16684_v44, %v13034_v11  ;;  %v8871_v53 = vadd.f32 %v16767_v7, %v8870_v58  ;;  %v8052_v13 = vpop.f32.mrb[189].mxu1  ;;  %v8706_v2 = vsel %vm2058_vm3, %v8194_v56, %v13904_v57 }
 0x582   : > { %9455 = vst.msk [vmem:[%s16775_s30 + $0x78] sm:$0xff] %vm9439_vm4, %v8876_v20  ;;  %v8053_v18 = vadd.f32 %v16684_v44, %v8052_v13  ;;  %v8705_v51 = vsel %vm2058_vm3, %v8193_v0, %v13903_v61 }
 0x583   : > { %v8196_v24 = vmax.f32 %v8058_v50, 0.0  ;;  %9454 = vst.msk [vmem:[%s16775_s30 + $0x70] sm:$0xff] %vm9439_vm4, %v8871_v53  ;;  %v13096_v16 = vpop.f32.mrb[208].mxu0  ;;  %13253 = vmatprep.mubr.f32.mxu0 %v8705_v51 }
 0x584   : > { %v8195_v15 = vmax.f32 %v8053_v18, 0.0  ;;  %v8886_v10 = vadd.f32 %v13096_v16, %v16767_v7  ;;  %v13037_v26 = vpop.f32.mrb[190].mxu1  ;;  %v8880_v39 = vpop.f32.mrb[209].mxu0  ;;  %13254 = vmatmul.mubr.f32.gmra.mrb[58].mxu0 %v8706_v2 }
 0x585   : > { %v8068_v43 = vadd.f32 %v16684_v44, %v13037_v26  ;;  %v8881_v47 = vadd.f32 %v16767_v7, %v8880_v39  ;;  %v8062_v60 = vpop.f32.mrb[191].mxu1  ;;  %v8708_v25 = vsel %vm2058_vm3, %v8196_v24, %v13909_v4 }
 0x586   : > { %9457 = vst.msk [vmem:[%s16775_s30 + $0x88] sm:$0xff] %vm9439_vm4, %v8886_v10  ;;  %v8063_v27 = vadd.f32 %v16684_v44, %v8062_v60  ;;  %v8707_v23 = vsel %vm2058_vm3, %v8195_v15, %v13908_v37 }
 0x587   : > { %v8198_v21 = vmax.f32 %v8068_v43, 0.0  ;;  %9456 = vst.msk [vmem:[%s16775_s30 + $0x80] sm:$0xff] %vm9439_vm4, %v8881_v47  ;;  %v13099_v9 = vpop.f32.mrb[210].mxu0  ;;  %13256 = vmatprep.mubr.f32.mxu0 %v8707_v23 }
 0x588   : > { %v8197_v46 = vmax.f32 %v8063_v27, 0.0  ;;  %v8896_v6 = vadd.f32 %v13099_v9, %v16767_v7  ;;  %v8890_v55 = vpop.f32.mrb[211].mxu0  ;;  %13257 = vmatmul.mubr.f32.gmra.mrb[60].mxu0 %v8708_v25 }
 0x589   : > { %v8891_v44 = vadd.f32 %v16767_v7, %v8890_v55  ;;  %v8710_v52 = vsel %vm2058_vm3, %v8198_v21, %v13914_v35 }
 0x58a   : > { %9459 = vst.msk [vmem:[%s16775_s30 + $0x98] sm:$0xff] %vm9439_vm4, %v8896_v6  ;;  %v8709_v29 = vsel %vm2058_vm3, %v8197_v46, %v13913_v19 }
 0x58b   : > { %9458 = vst.msk [vmem:[%s16775_s30 + $0x90] sm:$0xff] %vm9439_vm4, %v8891_v44  ;;  %v13102_v62 = vpop.f32.mrb[212].mxu0  ;;  %13259 = vmatprep.mubr.f32.mxu0 %v8709_v29 }
 0x58c   : > { %v8906_v42 = vadd.f32 %v13102_v62, %v16767_v7  ;;  %v8900_v34 = vpop.f32.mrb[213].mxu0  ;;  %13260 = vmatmul.mubr.f32.gmra.mrb[62].mxu0 %v8710_v52 }
 0x58d   : > { %v8901_v33 = vadd.f32 %v16767_v7, %v8900_v34 }
 0x58e   : > { %9461 = vst.msk [vmem:[%s16775_s30 + $0xa8] sm:$0xff] %vm9439_vm4, %v8906_v42 }
 0x58f   : > { %9460 = vst.msk [vmem:[%s16775_s30 + $0xa0] sm:$0xff] %vm9439_vm4, %v8901_v33  ;;  %v13105_v8 = vpop.f32.mrb[214].mxu0 }
 0x590   : > { %v8916_v48 = vadd.f32 %v13105_v8, %v16767_v7  ;;  %v8910_v31 = vpop.f32.mrb[215].mxu0 }
 0x591   : > { %v8911_v63 = vadd.f32 %v16767_v7, %v8910_v31 }
 0x592   : > { %9463 = vst.msk [vmem:[%s16775_s30 + $0xb8] sm:$0xff] %vm9439_vm4, %v8916_v48 }
 0x593   : > { %9462 = vst.msk [vmem:[%s16775_s30 + $0xb0] sm:$0xff] %vm9439_vm4, %v8911_v63  ;;  %v13108_v5 = vpop.f32.mrb[216].mxu0 }
 0x594   : > { %v8926_v22 = vadd.f32 %v13108_v5, %v16767_v7  ;;  %v8920_v1 = vpop.f32.mrb[217].mxu0 }
 0x595   : > { %v8921_v59 = vadd.f32 %v16767_v7, %v8920_v1 }
 0x596   : > { %9465 = vst.msk [vmem:[%s16775_s30 + $0xc8] sm:$0xff] %vm9439_vm4, %v8926_v22 }
 0x597   : > { %9464 = vst.msk [vmem:[%s16775_s30 + $0xc0] sm:$0xff] %vm9439_vm4, %v8921_v59  ;;  %v13111_v32 = vpop.f32.mrb[218].mxu0 }
 0x598   : > { %v8936_v41 = vadd.f32 %v13111_v32, %v16767_v7  ;;  %v8930_v38 = vpop.f32.mrb[219].mxu0 }
 0x599   : > { %v8931_v28 = vadd.f32 %v16767_v7, %v8930_v38 }
 0x59a   : > { %9467 = vst.msk [vmem:[%s16775_s30 + $0xd8] sm:$0xff] %vm9439_vm4, %v8936_v41 }
 0x59b   : > { %9466 = vst.msk [vmem:[%s16775_s30 + $0xd0] sm:$0xff] %vm9439_vm4, %v8931_v28  ;;  %v13114_v40 = vpop.f32.mrb[220].mxu0 }
 0x59c   : > { %v8946_v30 = vadd.f32 %v13114_v40, %v16767_v7  ;;  %v8940_v12 = vpop.f32.mrb[221].mxu0 }
 0x59d   : > { %v8941_v14 = vadd.f32 %v16767_v7, %v8940_v12 }
 0x59e   : > { %9469 = vst.msk [vmem:[%s16775_s30 + $0xe8] sm:$0xff] %vm9439_vm4, %v8946_v30 }
 0x59f   : > { %9468 = vst.msk [vmem:[%s16775_s30 + $0xe0] sm:$0xff] %vm9439_vm4, %v8941_v14  ;;  %v13117_v17 = vpop.f32.mrb[222].mxu0 }
 0x5a0   : > { %v8956_v3 = vadd.f32 %v13117_v17, %v16767_v7  ;;  %v8950_v36 = vpop.f32.mrb[223].mxu0 }
 0x5a1   : > { %v8951_v56 = vadd.f32 %v16767_v7, %v8950_v36 }
 0x5a2   : > { %9471 = vst.msk [vmem:[%s16775_s30 + $0xf8] sm:$0xff] %vm9439_vm4, %v8956_v3 }
 0x5a3   : > { %9470 = vst.msk [vmem:[%s16775_s30 + $0xf0] sm:$0xff] %vm9439_vm4, %v8951_v56  ;;  %v13120_v54 = vpop.f32.mrb[224].mxu0 }
 0x5a4   : > { %v8966_v61 = vadd.f32 %v13120_v54, %v16767_v7  ;;  %v8960_v0 = vpop.f32.mrb[225].mxu0 }
 0x5a5   : > { %v8961_v20 = vadd.f32 %v16767_v7, %v8960_v0 }
 0x5a6   : > { %9473 = vst.msk [vmem:[%s16775_s30 + $0x108] sm:$0xff] %vm9439_vm4, %v8966_v61 }
 0x5a7   : > { %9472 = vst.msk [vmem:[%s16775_s30 + $0x100] sm:$0xff] %vm9439_vm4, %v8961_v20  ;;  %v13123_v11 = vpop.f32.mrb[226].mxu0 }
 0x5a8   : > { %v8976_v58 = vadd.f32 %v13123_v11, %v16767_v7  ;;  %v8970_v57 = vpop.f32.mrb[227].mxu0 }
 0x5a9   : > { %v8971_v45 = vadd.f32 %v16767_v7, %v8970_v57 }
 0x5aa   : > { %9475 = vst.msk [vmem:[%s16775_s30 + $0x118] sm:$0xff] %vm9439_vm4, %v8976_v58 }
 0x5ab   : > { %9474 = vst.msk [vmem:[%s16775_s30 + $0x110] sm:$0xff] %vm9439_vm4, %v8971_v45  ;;  %v13126_v50 = vpop.f32.mrb[228].mxu0 }
 0x5ac   : > { %v8986_v53 = vadd.f32 %v13126_v50, %v16767_v7  ;;  %v8980_v13 = vpop.f32.mrb[229].mxu0 }
 0x5ad   : > { %v8981_v18 = vadd.f32 %v16767_v7, %v8980_v13 }
 0x5ae   : > { %9477 = vst.msk [vmem:[%s16775_s30 + $0x128] sm:$0xff] %vm9439_vm4, %v8986_v53 }
 0x5af   : > { %9476 = vst.msk [vmem:[%s16775_s30 + $0x120] sm:$0xff] %vm9439_vm4, %v8981_v18  ;;  %v13129_v51 = vpop.f32.mrb[230].mxu0 }
 0x5b0   : > { %v8996_v2 = vadd.f32 %v13129_v51, %v16767_v7  ;;  %v8990_v24 = vpop.f32.mrb[231].mxu0 }
 0x5b1   : > { %v8991_v16 = vadd.f32 %v16767_v7, %v8990_v24 }
 0x5b2   : > { %9479 = vst.msk [vmem:[%s16775_s30 + $0x138] sm:$0xff] %vm9439_vm4, %v8996_v2 }
 0x5b3   : > { %9478 = vst.msk [vmem:[%s16775_s30 + $0x130] sm:$0xff] %vm9439_vm4, %v8991_v16  ;;  %v13132_v37 = vpop.f32.mrb[232].mxu0 }
 0x5b4   : > { %v9006_v15 = vadd.f32 %v13132_v37, %v16767_v7  ;;  %v9000_v10 = vpop.f32.mrb[233].mxu0 }
 0x5b5   : > { %v9001_v26 = vadd.f32 %v16767_v7, %v9000_v10 }
 0x5b6   : > { %9481 = vst.msk [vmem:[%s16775_s30 + $0x148] sm:$0xff] %vm9439_vm4, %v9006_v15 }
 0x5b7   : > { %9480 = vst.msk [vmem:[%s16775_s30 + $0x140] sm:$0xff] %vm9439_vm4, %v9001_v26  ;;  %v13135_v39 = vpop.f32.mrb[234].mxu0 }
 0x5b8   : > { %v9016_v4 = vadd.f32 %v13135_v39, %v16767_v7  ;;  %v9010_v49 = vpop.f32.mrb[235].mxu0 }
 0x5b9   : > { %v9011_v43 = vadd.f32 %v16767_v7, %v9010_v49 }
 0x5ba   : > { %9483 = vst.msk [vmem:[%s16775_s30 + $0x158] sm:$0xff] %vm9439_vm4, %v9016_v4 }
 0x5bb   : > { %9482 = vst.msk [vmem:[%s16775_s30 + $0x150] sm:$0xff] %vm9439_vm4, %v9011_v43  ;;  %v13138_v47 = vpop.f32.mrb[236].mxu0 }
 0x5bc   : > { %v9026_v60 = vadd.f32 %v13138_v47, %v16767_v7  ;;  %v9020_v27 = vpop.f32.mrb[237].mxu0 }
 0x5bd   : > { %v9021_v23 = vadd.f32 %v16767_v7, %v9020_v27 }
 0x5be   : > { %9485 = vst.msk [vmem:[%s16775_s30 + $0x168] sm:$0xff] %vm9439_vm4, %v9026_v60 }
 0x5bf   : > { %9484 = vst.msk [vmem:[%s16775_s30 + $0x160] sm:$0xff] %vm9439_vm4, %v9021_v23  ;;  %v13141_v25 = vpop.f32.mrb[238].mxu0 }
 0x5c0   : > { %v9036_v21 = vadd.f32 %v13141_v25, %v16767_v7  ;;  %v9030_v9 = vpop.f32.mrb[239].mxu0 }
 0x5c1   : > { %v9031_v19 = vadd.f32 %v16767_v7, %v9030_v9 }
 0x5c2   : > { %9487 = vst.msk [vmem:[%s16775_s30 + $0x178] sm:$0xff] %vm9439_vm4, %v9036_v21 }
 0x5c3   : > { %9486 = vst.msk [vmem:[%s16775_s30 + $0x170] sm:$0xff] %vm9439_vm4, %v9031_v19  ;;  %v13144_v46 = vpop.f32.mrb[240].mxu0 }
 0x5c4   : > { %v9046_v6 = vadd.f32 %v13144_v46, %v16767_v7  ;;  %v9040_v55 = vpop.f32.mrb[241].mxu0 }
 0x5c5   : > { %v9041_v35 = vadd.f32 %v16767_v7, %v9040_v55 }
 0x5c6   : > { %9489 = vst.msk [vmem:[%s16775_s30 + $0x188] sm:$0xff] %vm9439_vm4, %v9046_v6 }
 0x5c7   : > { %9488 = vst.msk [vmem:[%s16775_s30 + $0x180] sm:$0xff] %vm9439_vm4, %v9041_v35  ;;  %v13147_v44 = vpop.f32.mrb[242].mxu0 }
 0x5c8   : > { %v9056_v29 = vadd.f32 %v13147_v44, %v16767_v7  ;;  %v9050_v52 = vpop.f32.mrb[243].mxu0 }
 0x5c9   : > { %v9051_v62 = vadd.f32 %v16767_v7, %v9050_v52 }
 0x5ca   : > { %9491 = vst.msk [vmem:[%s16775_s30 + $0x198] sm:$0xff] %vm9439_vm4, %v9056_v29 }
 0x5cb   : > { %9490 = vst.msk [vmem:[%s16775_s30 + $0x190] sm:$0xff] %vm9439_vm4, %v9051_v62  ;;  %v13150_v42 = vpop.f32.mrb[244].mxu0 }
 0x5cc   : > { %v9066_v34 = vadd.f32 %v13150_v42, %v16767_v7  ;;  %v9060_v33 = vpop.f32.mrb[245].mxu0 }
 0x5cd   : > { %v9061_v8 = vadd.f32 %v16767_v7, %v9060_v33 }
 0x5ce   : > { %9493 = vst.msk [vmem:[%s16775_s30 + $0x1a8] sm:$0xff] %vm9439_vm4, %v9066_v34 }
 0x5cf   : > { %9492 = vst.msk [vmem:[%s16775_s30 + $0x1a0] sm:$0xff] %vm9439_vm4, %v9061_v8  ;;  %v13153_v48 = vpop.f32.mrb[246].mxu0 }
 0x5d0   : > { %v9076_v31 = vadd.f32 %v13153_v48, %v16767_v7  ;;  %v9070_v63 = vpop.f32.mrb[247].mxu0 }
 0x5d1   : > { %v9071_v5 = vadd.f32 %v16767_v7, %v9070_v63 }
 0x5d2   : > { %9495 = vst.msk [vmem:[%s16775_s30 + $0x1b8] sm:$0xff] %vm9439_vm4, %v9076_v31 }
 0x5d3   : > { %9494 = vst.msk [vmem:[%s16775_s30 + $0x1b0] sm:$0xff] %vm9439_vm4, %v9071_v5  ;;  %v13156_v22 = vpop.f32.mrb[248].mxu0 }
 0x5d4   : > { %v9086_v1 = vadd.f32 %v13156_v22, %v16767_v7  ;;  %v9080_v59 = vpop.f32.mrb[249].mxu0 }
 0x5d5   : > { %v9081_v32 = vadd.f32 %v16767_v7, %v9080_v59 }
 0x5d6   : > { %9497 = vst.msk [vmem:[%s16775_s30 + $0x1c8] sm:$0xff] %vm9439_vm4, %v9086_v1 }
 0x5d7   : > { %9496 = vst.msk [vmem:[%s16775_s30 + $0x1c0] sm:$0xff] %vm9439_vm4, %v9081_v32  ;;  %v13159_v41 = vpop.f32.mrb[250].mxu0 }
 0x5d8   : > { %v9096_v38 = vadd.f32 %v13159_v41, %v16767_v7  ;;  %v9090_v28 = vpop.f32.mrb[251].mxu0 }
 0x5d9   : > { %v9091_v40 = vadd.f32 %v16767_v7, %v9090_v28 }
 0x5da   : > { %9499 = vst.msk [vmem:[%s16775_s30 + $0x1d8] sm:$0xff] %vm9439_vm4, %v9096_v38 }
 0x5db   : > { %9498 = vst.msk [vmem:[%s16775_s30 + $0x1d0] sm:$0xff] %vm9439_vm4, %v9091_v40  ;;  %v13162_v30 = vpop.f32.mrb[252].mxu0 }
 0x5dc   : > { %v9106_v12 = vadd.f32 %v13162_v30, %v16767_v7  ;;  %v9100_v14 = vpop.f32.mrb[253].mxu0 }
 0x5dd   : > { %v9101_v17 = vadd.f32 %v16767_v7, %v9100_v14 }
 0x5de   : > { %9501 = vst.msk [vmem:[%s16775_s30 + $0x1e8] sm:$0xff] %vm9439_vm4, %v9106_v12 }
 0x5df   : > { %9500 = vst.msk [vmem:[%s16775_s30 + $0x1e0] sm:$0xff] %vm9439_vm4, %v9101_v17  ;;  %v13165_v3 = vpop.f32.mrb[254].mxu0 }
 0x5e0   : > { %v9116_v36 = vadd.f32 %v13165_v3, %v16767_v7  ;;  %v9110_v56 = vpop.f32.mrb[255].mxu0 }
 0x5e1   : > { %v9111_v54 = vadd.f32 %v16767_v7, %v9110_v56 }
 0x5e2   : > { %9503 = vst.msk [vmem:[%s16775_s30 + $0x1f8] sm:$0xff] %vm9439_vm4, %v9116_v36 }
 0x5e3   : > { %9502 = vst.msk [vmem:[%s16775_s30 + $0x1f0] sm:$0xff] %vm9439_vm4, %v9111_v54  ;;  %v13168_v61 = vpop.f32.mrb[0].mxu0 }
 0x5e4   : > { %v9126_v0 = vadd.f32 %v13168_v61, %v16767_v7  ;;  %v9120_v20 = vpop.f32.mrb[1].mxu0 }
 0x5e5   : > { %v9121_v11 = vadd.f32 %v16767_v7, %v9120_v20 }
 0x5e6   : > { %9505 = vst.msk [vmem:[%s16775_s30 + $0x208] sm:$0xff] %vm9439_vm4, %v9126_v0 }
 0x5e7   : > { %9504 = vst.msk [vmem:[%s16775_s30 + $0x200] sm:$0xff] %vm9439_vm4, %v9121_v11  ;;  %v13171_v58 = vpop.f32.mrb[2].mxu0 }
 0x5e8   : > { %v9136_v57 = vadd.f32 %v13171_v58, %v16767_v7  ;;  %v9130_v45 = vpop.f32.mrb[3].mxu0 }
 0x5e9   : > { %v9131_v50 = vadd.f32 %v16767_v7, %v9130_v45 }
 0x5ea   : > { %9507 = vst.msk [vmem:[%s16775_s30 + $0x218] sm:$0xff] %vm9439_vm4, %v9136_v57 }
 0x5eb   : > { %9506 = vst.msk [vmem:[%s16775_s30 + $0x210] sm:$0xff] %vm9439_vm4, %v9131_v50  ;;  %v13174_v53 = vpop.f32.mrb[4].mxu0 }
 0x5ec   : > { %v9146_v13 = vadd.f32 %v13174_v53, %v16767_v7  ;;  %v9140_v18 = vpop.f32.mrb[5].mxu0 }
 0x5ed   : > { %v9141_v51 = vadd.f32 %v16767_v7, %v9140_v18 }
 0x5ee   : > { %9509 = vst.msk [vmem:[%s16775_s30 + $0x228] sm:$0xff] %vm9439_vm4, %v9146_v13 }
 0x5ef   : > { %9508 = vst.msk [vmem:[%s16775_s30 + $0x220] sm:$0xff] %vm9439_vm4, %v9141_v51  ;;  %v13177_v2 = vpop.f32.mrb[6].mxu0 }
 0x5f0   : > { %v9156_v24 = vadd.f32 %v13177_v2, %v16767_v7  ;;  %v9150_v16 = vpop.f32.mrb[7].mxu0 }
 0x5f1   : > { %v9151_v37 = vadd.f32 %v16767_v7, %v9150_v16 }
 0x5f2   : > { %9511 = vst.msk [vmem:[%s16775_s30 + $0x238] sm:$0xff] %vm9439_vm4, %v9156_v24 }
 0x5f3   : > { %9510 = vst.msk [vmem:[%s16775_s30 + $0x230] sm:$0xff] %vm9439_vm4, %v9151_v37  ;;  %v13180_v15 = vpop.f32.mrb[8].mxu0 }
 0x5f4   : > { %v9166_v10 = vadd.f32 %v13180_v15, %v16767_v7  ;;  %v9160_v26 = vpop.f32.mrb[9].mxu0 }
 0x5f5   : > { %v9161_v39 = vadd.f32 %v16767_v7, %v9160_v26 }
 0x5f6   : > { %9513 = vst.msk [vmem:[%s16775_s30 + $0x248] sm:$0xff] %vm9439_vm4, %v9166_v10 }
 0x5f7   : > { %9512 = vst.msk [vmem:[%s16775_s30 + $0x240] sm:$0xff] %vm9439_vm4, %v9161_v39  ;;  %v13183_v4 = vpop.f32.mrb[10].mxu0 }
 0x5f8   : > { %v9176_v49 = vadd.f32 %v13183_v4, %v16767_v7  ;;  %v9170_v43 = vpop.f32.mrb[11].mxu0 }
 0x5f9   : > { %v9171_v47 = vadd.f32 %v16767_v7, %v9170_v43 }
 0x5fa   : > { %9515 = vst.msk [vmem:[%s16775_s30 + $0x258] sm:$0xff] %vm9439_vm4, %v9176_v49 }
 0x5fb   : > { %9514 = vst.msk [vmem:[%s16775_s30 + $0x250] sm:$0xff] %vm9439_vm4, %v9171_v47  ;;  %v13186_v60 = vpop.f32.mrb[12].mxu0 }
 0x5fc   : > { %v9186_v27 = vadd.f32 %v13186_v60, %v16767_v7  ;;  %v9180_v23 = vpop.f32.mrb[13].mxu0 }
 0x5fd   : > { %v9181_v25 = vadd.f32 %v16767_v7, %v9180_v23 }
 0x5fe   : > { %9517 = vst.msk [vmem:[%s16775_s30 + $0x268] sm:$0xff] %vm9439_vm4, %v9186_v27 }
 0x5ff   : > { %9516 = vst.msk [vmem:[%s16775_s30 + $0x260] sm:$0xff] %vm9439_vm4, %v9181_v25  ;;  %v13189_v21 = vpop.f32.mrb[14].mxu0 }
 0x600   : > { %v9196_v9 = vadd.f32 %v13189_v21, %v16767_v7  ;;  %v9190_v19 = vpop.f32.mrb[15].mxu0 }
 0x601   : > { %v9191_v46 = vadd.f32 %v16767_v7, %v9190_v19 }
 0x602   : > { %9519 = vst.msk [vmem:[%s16775_s30 + $0x278] sm:$0xff] %vm9439_vm4, %v9196_v9 }
 0x603   : > { %9518 = vst.msk [vmem:[%s16775_s30 + $0x270] sm:$0xff] %vm9439_vm4, %v9191_v46  ;;  %v13192_v6 = vpop.f32.mrb[16].mxu0 }
 0x604   : > { %v9206_v55 = vadd.f32 %v13192_v6, %v16767_v7  ;;  %v9200_v35 = vpop.f32.mrb[17].mxu0 }
 0x605   : > { %v9201_v44 = vadd.f32 %v16767_v7, %v9200_v35 }
 0x606   : > { %9521 = vst.msk [vmem:[%s16775_s30 + $0x288] sm:$0xff] %vm9439_vm4, %v9206_v55 }
 0x607   : > { %9520 = vst.msk [vmem:[%s16775_s30 + $0x280] sm:$0xff] %vm9439_vm4, %v9201_v44  ;;  %v13195_v29 = vpop.f32.mrb[18].mxu0 }
 0x608   : > { %v9216_v52 = vadd.f32 %v13195_v29, %v16767_v7  ;;  %v9210_v62 = vpop.f32.mrb[19].mxu0 }
 0x609   : > { %v9211_v42 = vadd.f32 %v16767_v7, %v9210_v62 }
 0x60a   : > { %9523 = vst.msk [vmem:[%s16775_s30 + $0x298] sm:$0xff] %vm9439_vm4, %v9216_v52 }
 0x60b   : > { %9522 = vst.msk [vmem:[%s16775_s30 + $0x290] sm:$0xff] %vm9439_vm4, %v9211_v42  ;;  %v13198_v34 = vpop.f32.mrb[20].mxu0 }
 0x60c   : > { %v9226_v33 = vadd.f32 %v13198_v34, %v16767_v7  ;;  %v9220_v8 = vpop.f32.mrb[21].mxu0 }
 0x60d   : > { %v9221_v48 = vadd.f32 %v16767_v7, %v9220_v8 }
 0x60e   : > { %9525 = vst.msk [vmem:[%s16775_s30 + $0x2a8] sm:$0xff] %vm9439_vm4, %v9226_v33 }
 0x60f   : > { %9524 = vst.msk [vmem:[%s16775_s30 + $0x2a0] sm:$0xff] %vm9439_vm4, %v9221_v48  ;;  %v13201_v31 = vpop.f32.mrb[22].mxu0 }
 0x610   : > { %v9236_v63 = vadd.f32 %v13201_v31, %v16767_v7  ;;  %v9230_v5 = vpop.f32.mrb[23].mxu0 }
 0x611   : > { %v9231_v22 = vadd.f32 %v16767_v7, %v9230_v5 }
 0x612   : > { %9527 = vst.msk [vmem:[%s16775_s30 + $0x2b8] sm:$0xff] %vm9439_vm4, %v9236_v63 }
 0x613   : > { %9526 = vst.msk [vmem:[%s16775_s30 + $0x2b0] sm:$0xff] %vm9439_vm4, %v9231_v22  ;;  %v13204_v1 = vpop.f32.mrb[24].mxu0 }
 0x614   : > { %v9246_v59 = vadd.f32 %v13204_v1, %v16767_v7  ;;  %v9240_v32 = vpop.f32.mrb[25].mxu0 }
 0x615   : > { %v9241_v41 = vadd.f32 %v16767_v7, %v9240_v32 }
 0x616   : > { %9529 = vst.msk [vmem:[%s16775_s30 + $0x2c8] sm:$0xff] %vm9439_vm4, %v9246_v59 }
 0x617   : > { %9528 = vst.msk [vmem:[%s16775_s30 + $0x2c0] sm:$0xff] %vm9439_vm4, %v9241_v41  ;;  %v13207_v38 = vpop.f32.mrb[26].mxu0 }
 0x618   : > { %v9256_v28 = vadd.f32 %v13207_v38, %v16767_v7  ;;  %v9250_v40 = vpop.f32.mrb[27].mxu0 }
 0x619   : > { %v9251_v30 = vadd.f32 %v16767_v7, %v9250_v40 }
 0x61a   : > { %9531 = vst.msk [vmem:[%s16775_s30 + $0x2d8] sm:$0xff] %vm9439_vm4, %v9256_v28 }
 0x61b   : > { %9530 = vst.msk [vmem:[%s16775_s30 + $0x2d0] sm:$0xff] %vm9439_vm4, %v9251_v30  ;;  %v13210_v12 = vpop.f32.mrb[28].mxu0 }
 0x61c   : > { %v9266_v14 = vadd.f32 %v13210_v12, %v16767_v7  ;;  %v9260_v17 = vpop.f32.mrb[29].mxu0 }
 0x61d   : > { %v9261_v3 = vadd.f32 %v16767_v7, %v9260_v17 }
 0x61e   : > { %9533 = vst.msk [vmem:[%s16775_s30 + $0x2e8] sm:$0xff] %vm9439_vm4, %v9266_v14 }
 0x61f   : > { %9532 = vst.msk [vmem:[%s16775_s30 + $0x2e0] sm:$0xff] %vm9439_vm4, %v9261_v3  ;;  %v13213_v36 = vpop.f32.mrb[30].mxu0 }
 0x620   : > { %v9276_v56 = vadd.f32 %v13213_v36, %v16767_v7  ;;  %v9270_v54 = vpop.f32.mrb[31].mxu0 }
 0x621   : > { %v9271_v61 = vadd.f32 %v16767_v7, %v9270_v54  ;;  %v13920_v54 = vld [vmem:[%s17417_s14] ss:$0 sm:$0xff] }
 0x622   : > { %9535 = vst.msk [vmem:[%s16775_s30 + $0x2f8] sm:$0xff] %vm9439_vm4, %v9276_v56 }
 0x623   : > { %9534 = vst.msk [vmem:[%s16775_s30 + $0x2f0] sm:$0xff] %vm9439_vm4, %v9271_v61  ;;  %v13216_v0 = vpop.f32.mrb[32].mxu0 }
 0x624   : > { %v9286_v20 = vadd.f32 %v13216_v0, %v16767_v7  ;;  %v9280_v11 = vpop.f32.mrb[33].mxu0 }
 0x625   : > { %v9281_v58 = vadd.f32 %v16767_v7, %v9280_v11 }
 0x626   : > { %9537 = vst.msk [vmem:[%s16775_s30 + $0x308] sm:$0xff] %vm9439_vm4, %v9286_v20 }
 0x627   : > { %9536 = vst.msk [vmem:[%s16775_s30 + $0x300] sm:$0xff] %vm9439_vm4, %v9281_v58  ;;  %v13219_v57 = vpop.f32.mrb[34].mxu0 }
 0x628   : > { %v9296_v45 = vadd.f32 %v13219_v57, %v16767_v7  ;;  %v9290_v50 = vpop.f32.mrb[35].mxu0 }
 0x629   : > { %v9291_v53 = vadd.f32 %v16767_v7, %v9290_v50 }
 0x62a   : > { %9539 = vst.msk [vmem:[%s16775_s30 + $0x318] sm:$0xff] %vm9439_vm4, %v9296_v45 }
 0x62b   : > { %9538 = vst.msk [vmem:[%s16775_s30 + $0x310] sm:$0xff] %vm9439_vm4, %v9291_v53  ;;  %v13222_v13 = vpop.f32.mrb[36].mxu0 }
 0x62c   : > { %v9306_v18 = vadd.f32 %v13222_v13, %v16767_v7  ;;  %v9300_v51 = vpop.f32.mrb[37].mxu0 }
 0x62d   : > { %v9301_v2 = vadd.f32 %v16767_v7, %v9300_v51 }
 0x62e   : > { %9541 = vst.msk [vmem:[%s16775_s30 + $0x328] sm:$0xff] %vm9439_vm4, %v9306_v18 }
 0x62f   : > { %9540 = vst.msk [vmem:[%s16775_s30 + $0x320] sm:$0xff] %vm9439_vm4, %v9301_v2  ;;  %v13225_v24 = vpop.f32.mrb[38].mxu0 }
 0x630   : > { %v9316_v16 = vadd.f32 %v13225_v24, %v16767_v7  ;;  %v9310_v37 = vpop.f32.mrb[39].mxu0 }
 0x631   : > { %v9311_v15 = vadd.f32 %v16767_v7, %v9310_v37 }
 0x632   : > { %9543 = vst.msk [vmem:[%s16775_s30 + $0x338] sm:$0xff] %vm9439_vm4, %v9316_v16 }
 0x633   : > { %9542 = vst.msk [vmem:[%s16775_s30 + $0x330] sm:$0xff] %vm9439_vm4, %v9311_v15  ;;  %v13228_v10 = vpop.f32.mrb[40].mxu0 }
 0x634   : > { %v9326_v26 = vadd.f32 %v13228_v10, %v16767_v7  ;;  %v9320_v39 = vpop.f32.mrb[41].mxu0 }
 0x635   : > { %v9321_v4 = vadd.f32 %v16767_v7, %v9320_v39 }
 0x636   : > { %9545 = vst.msk [vmem:[%s16775_s30 + $0x348] sm:$0xff] %vm9439_vm4, %v9326_v26 }
 0x637   : > { %9544 = vst.msk [vmem:[%s16775_s30 + $0x340] sm:$0xff] %vm9439_vm4, %v9321_v4  ;;  %v13231_v49 = vpop.f32.mrb[42].mxu0 }
 0x638   : > { %v9336_v43 = vadd.f32 %v13231_v49, %v16767_v7  ;;  %v9330_v47 = vpop.f32.mrb[43].mxu0 }
 0x639   : > { %v9331_v60 = vadd.f32 %v16767_v7, %v9330_v47 }
 0x63a   : > { %9547 = vst.msk [vmem:[%s16775_s30 + $0x358] sm:$0xff] %vm9439_vm4, %v9336_v43 }
 0x63b   : > { %9546 = vst.msk [vmem:[%s16775_s30 + $0x350] sm:$0xff] %vm9439_vm4, %v9331_v60  ;;  %v13234_v27 = vpop.f32.mrb[44].mxu0 }
 0x63c   : > { %v9346_v23 = vadd.f32 %v13234_v27, %v16767_v7  ;;  %v9340_v25 = vpop.f32.mrb[45].mxu0 }
 0x63d   : > { %v9341_v21 = vadd.f32 %v16767_v7, %v9340_v25 }
 0x63e   : > { %9549 = vst.msk [vmem:[%s16775_s30 + $0x368] sm:$0xff] %vm9439_vm4, %v9346_v23 }
 0x63f   : > { %9548 = vst.msk [vmem:[%s16775_s30 + $0x360] sm:$0xff] %vm9439_vm4, %v9341_v21  ;;  %v13237_v9 = vpop.f32.mrb[46].mxu0 }
 0x640   : > { %v9356_v19 = vadd.f32 %v13237_v9, %v16767_v7  ;;  %v9350_v46 = vpop.f32.mrb[47].mxu0 }
 0x641   : > { %v9351_v6 = vadd.f32 %v16767_v7, %v9350_v46 }
 0x642   : > { %9551 = vst.msk [vmem:[%s16775_s30 + $0x378] sm:$0xff] %vm9439_vm4, %v9356_v19 }
 0x643   : > { %9550 = vst.msk [vmem:[%s16775_s30 + $0x370] sm:$0xff] %vm9439_vm4, %v9351_v6  ;;  %v13240_v55 = vpop.f32.mrb[48].mxu0 }
 0x644   : > { %v9366_v35 = vadd.f32 %v13240_v55, %v16767_v7  ;;  %v9360_v44 = vpop.f32.mrb[49].mxu0 }
 0x645   : > { %v9361_v29 = vadd.f32 %v16767_v7, %v9360_v44 }
 0x646   : > { %9553 = vst.msk [vmem:[%s16775_s30 + $0x388] sm:$0xff] %vm9439_vm4, %v9366_v35 }
 0x647   : > { %9552 = vst.msk [vmem:[%s16775_s30 + $0x380] sm:$0xff] %vm9439_vm4, %v9361_v29  ;;  %v13243_v52 = vpop.f32.mrb[50].mxu0 }
 0x648   : > { %v9376_v62 = vadd.f32 %v13243_v52, %v16767_v7  ;;  %v9370_v42 = vpop.f32.mrb[51].mxu0 }
 0x649   : > { %v9371_v34 = vadd.f32 %v16767_v7, %v9370_v42 }
 0x64a   : > { %9555 = vst.msk [vmem:[%s16775_s30 + $0x398] sm:$0xff] %vm9439_vm4, %v9376_v62 }
 0x64b   : > { %9554 = vst.msk [vmem:[%s16775_s30 + $0x390] sm:$0xff] %vm9439_vm4, %v9371_v34  ;;  %v13246_v33 = vpop.f32.mrb[52].mxu0 }
 0x64c   : > { %v9386_v8 = vadd.f32 %v13246_v33, %v16767_v7  ;;  %v9380_v48 = vpop.f32.mrb[53].mxu0 }
 0x64d   : > { %v9381_v31 = vadd.f32 %v16767_v7, %v9380_v48 }
 0x64e   : > { %9557 = vst.msk [vmem:[%s16775_s30 + $0x3a8] sm:$0xff] %vm9439_vm4, %v9386_v8 }
 0x64f   : > { %9556 = vst.msk [vmem:[%s16775_s30 + $0x3a0] sm:$0xff] %vm9439_vm4, %v9381_v31  ;;  %v13249_v63 = vpop.f32.mrb[54].mxu0 }
 0x650   : > { %v9396_v5 = vadd.f32 %v13249_v63, %v16767_v7  ;;  %v9390_v22 = vpop.f32.mrb[55].mxu0 }
 0x651   : > { %v9391_v1 = vadd.f32 %v16767_v7, %v9390_v22 }
 0x652   : > { %9559 = vst.msk [vmem:[%s16775_s30 + $0x3b8] sm:$0xff] %vm9439_vm4, %v9396_v5 }
 0x653   : > { %9558 = vst.msk [vmem:[%s16775_s30 + $0x3b0] sm:$0xff] %vm9439_vm4, %v9391_v1  ;;  %v13252_v59 = vpop.f32.mrb[56].mxu0 }
 0x654   : > { %v9406_v32 = vadd.f32 %v13252_v59, %v16767_v7  ;;  %v9400_v41 = vpop.f32.mrb[57].mxu0 }
 0x655   : > { %v9401_v38 = vadd.f32 %v16767_v7, %v9400_v41 }
 0x656   : > { %9561 = vst.msk [vmem:[%s16775_s30 + $0x3c8] sm:$0xff] %vm9439_vm4, %v9406_v32 }
 0x657   : > { %9560 = vst.msk [vmem:[%s16775_s30 + $0x3c0] sm:$0xff] %vm9439_vm4, %v9401_v38  ;;  %v13255_v28 = vpop.f32.mrb[58].mxu0 }
 0x658   : > { %v9416_v40 = vadd.f32 %v13255_v28, %v16767_v7  ;;  %v9410_v30 = vpop.f32.mrb[59].mxu0 }
 0x659   : > { %v9411_v12 = vadd.f32 %v16767_v7, %v9410_v30 }
 0x65a   : > { %9563 = vst.msk [vmem:[%s16775_s30 + $0x3d8] sm:$0xff] %vm9439_vm4, %v9416_v40 }
 0x65b   : > { %9562 = vst.msk [vmem:[%s16775_s30 + $0x3d0] sm:$0xff] %vm9439_vm4, %v9411_v12  ;;  %v13258_v14 = vpop.f32.mrb[60].mxu0 }
 0x65c   : > { %v9426_v17 = vadd.f32 %v13258_v14, %v16767_v7  ;;  %v9420_v3 = vpop.f32.mrb[61].mxu0 }
 0x65d   : > { %v9421_v36 = vadd.f32 %v16767_v7, %v9420_v3  ;;  %9574 = sbr.rel (!%p14115_p4) target bundleno = 1708 (0x6ac), region = 84 }
 0x65e   : > { %9565 = vst.msk [vmem:[%s16775_s30 + $0x3e8] sm:$0xff] %vm9439_vm4, %v9426_v17 }
 0x65f   : > { %9564 = vst.msk [vmem:[%s16775_s30 + $0x3e0] sm:$0xff] %vm9439_vm4, %v9421_v36  ;;  %v13261_v56 = vpop.f32.mrb[62].mxu0 }
 0x660   : > { %v9436_v61 = vadd.f32 %v13920_v54, %v13261_v56  ;;  %v9430_v0 = vpop.f32.mrb[63].mxu0 }
 0x661   : > { %v9431_v20 = vadd.f32 %v13920_v54, %v9430_v0 }
 0x662   : > { %9567 = vst.msk [vmem:[%s16775_s30 + $0x3f8] sm:$0xff] %vm9439_vm4, %v9436_v61 }
 0x663   : > { %9566 = vst.msk [vmem:[%s16775_s30 + $0x3f0] sm:$0xff] %vm9439_vm4, %v9431_v20 }
 0x664   : > { %s17455_s25 = smov (!%p9577_p8, %s9576_s25), 128 }
 0x665   : > { %s10833_s20 = sshll.u32 %s17455_s25, 7 }
 0x666   : > { %p10836_p9 = scmp.eq.s32.totalorder %s10833_s20, 0 }
 0x667   : > { %s17210_s18 = sshrl.u32 (!%p10836_p9), %s17455_s25, 6 }
 0x668   : > { %9585 = sbr.rel (%p10836_p9) target bundleno = 1708 (0x6ac), region = 88  ;;  %p10837_p10 = scmp.le.s32.totalorder (!%p10836_p9), %s17210_s18, 0 }
 0x66f   : > { %9997 = sbr.rel (%p10837_p10) target bundleno = 1687 (0x697), region = 167  ;;  %s17445_s21 = smov (!%p10837_p10), %s17204_s17 }
 0x670   : > { %s17446_s26 = smov (!%p10837_p10), %s16775_s30  ;;  %s17219_s23 = smov (!%p10837_p10), 0  }
 0x671   : > { %s17221_s28 = smov (!%p10837_p10), 0  }
 0x676 LB: >> { %v9773_v7 = vld [vmem:[%s13983_s26] sm:$0xff]  ;;  %v9775_v11 = vld [vmem:[%s13983_s26 + $0x8] sm:$0xff]  ;;  %v9777_v58 = vld [vmem:[%s13983_s26 + $0x10] sm:$0xff]  ;;  %s9901_s29 = sadd.s32 1, %s13987_s23  ;;  %s9767_s28 = sadd.s32 1, %s13991_s28   ;;  %s13991_s28 = sphi %s17221_s28, %s9767_s28   ;;  %s13987_s23 = sphi %s17219_s23, %s17449_s23   ;;  %s13983_s26 = sphi %s17446_s26, %s17448_s26   ;;  %s13979_s21 = sphi %s17445_s21, %s17447_s21  }
 0x677   : >> { %9774 = vst [vmem:[%s13979_s21] sm:$0xff] %v9773_v7  ;;  %9776 = vst [vmem:[%s13979_s21 + $0x8] sm:$0xff] %v9775_v11  ;;  %v9779_v57 = vld [vmem:[%s13983_s26 + $0x18] sm:$0xff]  ;;  %v9781_v45 = vld [vmem:[%s13983_s26 + $0x20] sm:$0xff]  ;;  %p9902_p11 = scmp.ge.s32.totalorder %s9901_s29, %s17210_s18  ;;  %p9766_p12 = scmp.ge.s32.totalorder %s9767_s28, %s17210_s18 }
 0x678   : >> { %9778 = vst [vmem:[%s13979_s21 + $0x10] sm:$0xff] %v9777_v58  ;;  %v9783_v50 = vld [vmem:[%s13983_s26 + $0x28] sm:$0xff]  ;;  %9780 = vst [vmem:[%s13979_s21 + $0x18] sm:$0xff] %v9779_v57  ;;  %v9785_v53 = vld [vmem:[%s13983_s26 + $0x30] sm:$0xff] }
 0x679   : >> { %9782 = vst [vmem:[%s13979_s21 + $0x20] sm:$0xff] %v9781_v45  ;;  %9784 = vst [vmem:[%s13979_s21 + $0x28] sm:$0xff] %v9783_v50  ;;  %v9787_v13 = vld [vmem:[%s13983_s26 + $0x38] sm:$0xff]  ;;  %v9789_v18 = vld [vmem:[%s13983_s26 + $0x40] sm:$0xff]  ;;  %s17457_s29 = smov (%p9902_p11, %s9901_s29), 0 }
 0x67a   : >> { %9786 = vst [vmem:[%s13979_s21 + $0x30] sm:$0xff] %v9785_v53  ;;  %9788 = vst [vmem:[%s13979_s21 + $0x38] sm:$0xff] %v9787_v13  ;;  %v9791_v51 = vld [vmem:[%s13983_s26 + $0x48] sm:$0xff]  ;;  %v9793_v2 = vld [vmem:[%s13983_s26 + $0x50] sm:$0xff]  ;;  %s10838_s16 = sshll.u32 %s17457_s29, 9  ;;  %s17449_s23 = smov %s17457_s29 }
 0x67b   : >> { %9790 = vst [vmem:[%s13979_s21 + $0x40] sm:$0xff] %v9789_v18  ;;  %v9795_v24 = vld [vmem:[%s13983_s26 + $0x58] sm:$0xff]  ;;  %9792 = vst [vmem:[%s13979_s21 + $0x48] sm:$0xff] %v9791_v51  ;;  %v9797_v16 = vld [vmem:[%s13983_s26 + $0x60] sm:$0xff]  ;;  %s17277_s24 = scalar_lea.vmem %s16775_s30, %s10838_s16 [#allocation2]   ;;  %s17280_s27 = scalar_lea.vmem %s17204_s17, %s10838_s16  }
 0x67c   : >> { %9794 = vst [vmem:[%s13979_s21 + $0x50] sm:$0xff] %v9793_v2  ;;  %9796 = vst [vmem:[%s13979_s21 + $0x58] sm:$0xff] %v9795_v24  ;;  %v9799_v37 = vld [vmem:[%s13983_s26 + $0x68] sm:$0xff]  ;;  %v9801_v15 = vld [vmem:[%s13983_s26 + $0x70] sm:$0xff] }
 0x67d   : >> { %9798 = vst [vmem:[%s13979_s21 + $0x60] sm:$0xff] %v9797_v16  ;;  %9800 = vst [vmem:[%s13979_s21 + $0x68] sm:$0xff] %v9799_v37  ;;  %v9803_v10 = vld [vmem:[%s13983_s26 + $0x78] sm:$0xff]  ;;  %v9805_v26 = vld [vmem:[%s13983_s26 + $0x80] sm:$0xff] }
 0x67e   : >> { %9802 = vst [vmem:[%s13979_s21 + $0x70] sm:$0xff] %v9801_v15  ;;  %v9807_v39 = vld [vmem:[%s13983_s26 + $0x88] sm:$0xff]  ;;  %9804 = vst [vmem:[%s13979_s21 + $0x78] sm:$0xff] %v9803_v10  ;;  %v9809_v4 = vld [vmem:[%s13983_s26 + $0x90] sm:$0xff] }
 0x67f   : >> { %9806 = vst [vmem:[%s13979_s21 + $0x80] sm:$0xff] %v9805_v26  ;;  %9808 = vst [vmem:[%s13979_s21 + $0x88] sm:$0xff] %v9807_v39  ;;  %v9811_v49 = vld [vmem:[%s13983_s26 + $0x98] sm:$0xff]  ;;  %v9813_v43 = vld [vmem:[%s13983_s26 + $0xa0] sm:$0xff] }
 0x680   : >> { %9810 = vst [vmem:[%s13979_s21 + $0x90] sm:$0xff] %v9809_v4  ;;  %9812 = vst [vmem:[%s13979_s21 + $0x98] sm:$0xff] %v9811_v49  ;;  %v9815_v47 = vld [vmem:[%s13983_s26 + $0xa8] sm:$0xff]  ;;  %v9817_v60 = vld [vmem:[%s13983_s26 + $0xb0] sm:$0xff] }
 0x681   : >> { %9814 = vst [vmem:[%s13979_s21 + $0xa0] sm:$0xff] %v9813_v43  ;;  %v9819_v27 = vld [vmem:[%s13983_s26 + $0xb8] sm:$0xff]  ;;  %9816 = vst [vmem:[%s13979_s21 + $0xa8] sm:$0xff] %v9815_v47  ;;  %v9821_v23 = vld [vmem:[%s13983_s26 + $0xc0] sm:$0xff] }
 0x682   : >> { %9818 = vst [vmem:[%s13979_s21 + $0xb0] sm:$0xff] %v9817_v60  ;;  %9820 = vst [vmem:[%s13979_s21 + $0xb8] sm:$0xff] %v9819_v27  ;;  %v9823_v25 = vld [vmem:[%s13983_s26 + $0xc8] sm:$0xff]  ;;  %v9825_v21 = vld [vmem:[%s13983_s26 + $0xd0] sm:$0xff] }
 0x683   : >> { %9822 = vst [vmem:[%s13979_s21 + $0xc0] sm:$0xff] %v9821_v23  ;;  %9824 = vst [vmem:[%s13979_s21 + $0xc8] sm:$0xff] %v9823_v25  ;;  %v9827_v9 = vld [vmem:[%s13983_s26 + $0xd8] sm:$0xff]  ;;  %v9829_v19 = vld [vmem:[%s13983_s26 + $0xe0] sm:$0xff] }
 0x684   : >> { %9826 = vst [vmem:[%s13979_s21 + $0xd0] sm:$0xff] %v9825_v21  ;;  %v9831_v46 = vld [vmem:[%s13983_s26 + $0xe8] sm:$0xff]  ;;  %9828 = vst [vmem:[%s13979_s21 + $0xd8] sm:$0xff] %v9827_v9  ;;  %v9833_v6 = vld [vmem:[%s13983_s26 + $0xf0] sm:$0xff] }
 0x685   : >> { %9830 = vst [vmem:[%s13979_s21 + $0xe0] sm:$0xff] %v9829_v19  ;;  %9832 = vst [vmem:[%s13979_s21 + $0xe8] sm:$0xff] %v9831_v46  ;;  %v9835_v55 = vld [vmem:[%s13983_s26 + $0xf8] sm:$0xff]  ;;  %v9837_v35 = vld [vmem:[%s13983_s26 + $0x100] sm:$0xff] }
 0x686   : >> { %9834 = vst [vmem:[%s13979_s21 + $0xf0] sm:$0xff] %v9833_v6  ;;  %9836 = vst [vmem:[%s13979_s21 + $0xf8] sm:$0xff] %v9835_v55  ;;  %v9839_v44 = vld [vmem:[%s13983_s26 + $0x108] sm:$0xff]  ;;  %v9841_v29 = vld [vmem:[%s13983_s26 + $0x110] sm:$0xff] }
 0x687   : >> { %9838 = vst [vmem:[%s13979_s21 + $0x100] sm:$0xff] %v9837_v35  ;;  %v9843_v52 = vld [vmem:[%s13983_s26 + $0x118] sm:$0xff]  ;;  %9840 = vst [vmem:[%s13979_s21 + $0x108] sm:$0xff] %v9839_v44  ;;  %v9845_v62 = vld [vmem:[%s13983_s26 + $0x120] sm:$0xff] }
 0x688   : >> { %9842 = vst [vmem:[%s13979_s21 + $0x110] sm:$0xff] %v9841_v29  ;;  %9844 = vst [vmem:[%s13979_s21 + $0x118] sm:$0xff] %v9843_v52  ;;  %v9847_v42 = vld [vmem:[%s13983_s26 + $0x128] sm:$0xff]  ;;  %v9849_v34 = vld [vmem:[%s13983_s26 + $0x130] sm:$0xff] }
 0x689   : >> { %9846 = vst [vmem:[%s13979_s21 + $0x120] sm:$0xff] %v9845_v62  ;;  %9848 = vst [vmem:[%s13979_s21 + $0x128] sm:$0xff] %v9847_v42  ;;  %v9851_v33 = vld [vmem:[%s13983_s26 + $0x138] sm:$0xff]  ;;  %v9853_v8 = vld [vmem:[%s13983_s26 + $0x140] sm:$0xff] }
 0x68a   : >> { %9850 = vst [vmem:[%s13979_s21 + $0x130] sm:$0xff] %v9849_v34  ;;  %v9855_v48 = vld [vmem:[%s13983_s26 + $0x148] sm:$0xff]  ;;  %9852 = vst [vmem:[%s13979_s21 + $0x138] sm:$0xff] %v9851_v33  ;;  %v9857_v31 = vld [vmem:[%s13983_s26 + $0x150] sm:$0xff] }
 0x68b   : >> { %9854 = vst [vmem:[%s13979_s21 + $0x140] sm:$0xff] %v9853_v8  ;;  %9856 = vst [vmem:[%s13979_s21 + $0x148] sm:$0xff] %v9855_v48  ;;  %v9859_v63 = vld [vmem:[%s13983_s26 + $0x158] sm:$0xff]  ;;  %v9861_v5 = vld [vmem:[%s13983_s26 + $0x160] sm:$0xff] }
 0x68c   : >> { %9858 = vst [vmem:[%s13979_s21 + $0x150] sm:$0xff] %v9857_v31  ;;  %9860 = vst [vmem:[%s13979_s21 + $0x158] sm:$0xff] %v9859_v63  ;;  %v9863_v22 = vld [vmem:[%s13983_s26 + $0x168] sm:$0xff]  ;;  %v9865_v1 = vld [vmem:[%s13983_s26 + $0x170] sm:$0xff] }
 0x68d   : >> { %9862 = vst [vmem:[%s13979_s21 + $0x160] sm:$0xff] %v9861_v5  ;;  %v9867_v59 = vld [vmem:[%s13983_s26 + $0x178] sm:$0xff]  ;;  %9864 = vst [vmem:[%s13979_s21 + $0x168] sm:$0xff] %v9863_v22  ;;  %v9869_v32 = vld [vmem:[%s13983_s26 + $0x180] sm:$0xff] }
 0x68e   : >> { %9866 = vst [vmem:[%s13979_s21 + $0x170] sm:$0xff] %v9865_v1  ;;  %9868 = vst [vmem:[%s13979_s21 + $0x178] sm:$0xff] %v9867_v59  ;;  %v9871_v41 = vld [vmem:[%s13983_s26 + $0x188] sm:$0xff]  ;;  %v9873_v38 = vld [vmem:[%s13983_s26 + $0x190] sm:$0xff] }
 0x68f   : >> { %9870 = vst [vmem:[%s13979_s21 + $0x180] sm:$0xff] %v9869_v32  ;;  %9872 = vst [vmem:[%s13979_s21 + $0x188] sm:$0xff] %v9871_v41  ;;  %v9875_v28 = vld [vmem:[%s13983_s26 + $0x198] sm:$0xff]  ;;  %v9877_v40 = vld [vmem:[%s13983_s26 + $0x1a0] sm:$0xff] }
 0x690   : >> { %9874 = vst [vmem:[%s13979_s21 + $0x190] sm:$0xff] %v9873_v38  ;;  %v9879_v30 = vld [vmem:[%s13983_s26 + $0x1a8] sm:$0xff]  ;;  %9876 = vst [vmem:[%s13979_s21 + $0x198] sm:$0xff] %v9875_v28  ;;  %v9881_v12 = vld [vmem:[%s13983_s26 + $0x1b0] sm:$0xff]  ;;  %9769 = sbr.rel (!%p9766_p12) target bundleno = 1654 (0x676), region = 173 }
 0x691   : >> { %9878 = vst [vmem:[%s13979_s21 + $0x1a0] sm:$0xff] %v9877_v40  ;;  %9880 = vst [vmem:[%s13979_s21 + $0x1a8] sm:$0xff] %v9879_v30  ;;  %v9883_v14 = vld [vmem:[%s13983_s26 + $0x1b8] sm:$0xff]  ;;  %v9885_v17 = vld [vmem:[%s13983_s26 + $0x1c0] sm:$0xff] }
 0x692   : >> { %9882 = vst [vmem:[%s13979_s21 + $0x1b0] sm:$0xff] %v9881_v12  ;;  %9884 = vst [vmem:[%s13979_s21 + $0x1b8] sm:$0xff] %v9883_v14  ;;  %v9887_v3 = vld [vmem:[%s13983_s26 + $0x1c8] sm:$0xff]  ;;  %v9889_v36 = vld [vmem:[%s13983_s26 + $0x1d0] sm:$0xff] }
 0x693   : >> { %9886 = vst [vmem:[%s13979_s21 + $0x1c0] sm:$0xff] %v9885_v17  ;;  %v9891_v56 = vld [vmem:[%s13983_s26 + $0x1d8] sm:$0xff]  ;;  %9888 = vst [vmem:[%s13979_s21 + $0x1c8] sm:$0xff] %v9887_v3  ;;  %v9893_v54 = vld [vmem:[%s13983_s26 + $0x1e0] sm:$0xff] }
 0x694   : >> { %9890 = vst [vmem:[%s13979_s21 + $0x1d0] sm:$0xff] %v9889_v36  ;;  %9892 = vst [vmem:[%s13979_s21 + $0x1d8] sm:$0xff] %v9891_v56  ;;  %v9895_v61 = vld [vmem:[%s13983_s26 + $0x1e8] sm:$0xff]  ;;  %v9897_v0 = vld [vmem:[%s13983_s26 + $0x1f0] sm:$0xff] }
 0x695   : >> { %9894 = vst [vmem:[%s13979_s21 + $0x1e0] sm:$0xff] %v9893_v54  ;;  %9896 = vst [vmem:[%s13979_s21 + $0x1e8] sm:$0xff] %v9895_v61  ;;  %v9899_v20 = vld [vmem:[%s13983_s26 + $0x1f8] sm:$0xff]  ;;  %s17448_s26 = smov %s17277_s24 }
 0x696   : >> { %9898 = vst [vmem:[%s13979_s21 + $0x1f0] sm:$0xff] %v9897_v0  ;;  %9900 = vst [vmem:[%s13979_s21 + $0x1f8] sm:$0xff] %v9899_v20  ;;  %s17447_s21 = smov %s17280_s27 }
 0x697 PF: > { %s17385_s20 = sand.u32 63, %s17455_s25   ;;  %s10849_s16 = sshll.u32 %s17210_s18, 9 }
 0x698   : > { %s9912_s0 = scalar_lea.vmem %s16775_s30, %s10849_s16 [#allocation2]   ;;  %s9914_s1 = scalar_lea.vmem %s17204_s17, %s10849_s16  }
 0x699   : > { %p10843_p13 = scmp.le.s32.totalorder %s17385_s20, 0 }
 0x69a   : > { %s13993_s27 = smov (!%p10843_p13), %s9914_s1   ;;  %s13997_s24 = smov (!%p10843_p13), %s9912_s0  }
 0x69b   : > { %10011 = sbr.rel (%p10843_p13) target bundleno = 1708 (0x6ac), region = 178  ;;  %s14001_s2 = smov (!%p10843_p13), 0  }
 0x69c   : > { %s14005_s29 = smov (!%p10843_p13), 0  }
 0x6a2 LB: >> { %v9924_v7 = vld [vmem:[%s13999_s24] sm:$0xff]  ;;  %s9926_s25 = sadd.s32 1, %s14003_s2  ;;  %s9918_s29 = sadd.s32 1, %s14007_s29   ;;  %s14007_s29 = sphi %s14005_s29, %s9918_s29   ;;  %s14003_s2 = sphi %s14001_s2, %s14002_s2   ;;  %s13999_s24 = sphi %s13997_s24, %s9931_s24   ;;  %s13995_s27 = sphi %s13993_s27, %s9932_s27  }
 0x6a3   : >> { %9925 = vst [vmem:[%s13995_s27] sm:$0xff] %v9924_v7  ;;  %p9927_p0 = scmp.ge.s32.totalorder %s9926_s25, %s17385_s20  ;;  %p9917_p1 = scmp.ge.s32.totalorder %s9918_s29, %s17385_s20 }
 0x6a5   : >> { %s17459_s25 = smov (%p9927_p0, %s9926_s25), 0  ;;  %9920 = sbr.rel (!%p9917_p1) target bundleno = 1698 (0x6a2), region = 184 }
 0x6a6   : >> { %s10844_s30 = sshll.u32 %s17459_s25, 3  ;;  %s14002_s2 = smov %s17459_s25  }
 0x6a7   : >> { %s9931_s24 = scalar_lea.vmem %s9912_s0, %s10844_s30 [#allocation2]   ;;  %s9932_s27 = scalar_lea.vmem %s9914_s1, %s10844_s30  }
 0x6ac PF: > { %s17450_s2 = sld [smem:[#allocation3_spill]]  ;;  %p22_p2 = scmp.ge.s32.totalorder %s14105_s22, 5  }
 0x6ad   : > { %s17451_s18 = smov %s13971_s19  ;;  %s17453_s20 = smov %s14105_s22 }
 0x6ae   :  { %24 = sbr.rel (!%p22_p2) target bundleno = 6 (0x6), region = 195 }
 0x6b2   : > { %s17452_s19 = smov %s17450_s2 }

</bundles_post_ra>
